<compile_context>
chip_gen: v7x
topology: tpu7x:2x2x1
jax: 0.10.0
libtpu: 0.0.40
codegen_flags: <defaults>
</compile_context>

<pallas_src>
import numpy as np

import jax
import jax.numpy as jnp
from jax.experimental import pallas as pl
from jax.experimental.pallas import tpu as pltpu


_PAD_BASE = 32   # lane offset of the staged image inside the padded scratch
_TAPS9 = [(dh, dw) for dh in (-1, 0, 1) for dw in (-1, 0, 1)]


# --------------------------------------------------------------------------
# In-kernel helpers (activations are (C, S*S): channels on sublanes,
# flattened row-major spatial on lanes).
# --------------------------------------------------------------------------
def _stage(pad_ref, x):
    cin, P = x.shape
    pad_ref[:cin, pl.ds(_PAD_BASE, P)] = x


def _conv3x3_relu(pad_ref, x, S, w_ref, b_ref, m_ref):
    """SAME-padded 3x3 conv + bias + ReLU.

    x:     (cin, S*S) value
    w_ref: (9, cout, cin) per-tap transposed weights
    b_ref: (cout, 1) bias
    m_ref: (9, 1, S*S) float validity masks (zero padding at image borders)
    """
    cin, P = x.shape
    _stage(pad_ref, x)
    acc = None
    for t, (dh, dw) in enumerate(_TAPS9):
        off = dh * S + dw
        tap = pad_ref[:cin, pl.ds(_PAD_BASE + off, P)] * m_ref[t]
        d = jnp.dot(w_ref[t], tap, preferred_element_type=jnp.float32)
        acc = d if acc is None else acc + d
    return jnp.maximum(acc + b_ref[...], 0.0)


def _maxpool2x2(pad_ref, x, S, g_ref):
    """2x2 stride-2 max pool: 4 shifted reads + 0/1 anchor-selection matmul."""
    cin, P = x.shape
    _stage(pad_ref, x)
    t1 = pad_ref[:cin, pl.ds(_PAD_BASE + 1, P)]
    t2 = pad_ref[:cin, pl.ds(_PAD_BASE + S, P)]
    t3 = pad_ref[:cin, pl.ds(_PAD_BASE + S + 1, P)]
    m = jnp.maximum(jnp.maximum(x, t1), jnp.maximum(t2, t3))
    return jnp.dot(m, g_ref[...], preferred_element_type=jnp.float32)


def _conv_transpose2x2(parts, w_refs, b_ref, p_ref):
    """ConvTranspose2d(k=2, s=2).  `parts`/`w_refs` carry the decoder channel
    concat as split operands (no materialized concat)."""
    out = None
    for t in range(4):
        a = None
        for x, w_ref in zip(parts, w_refs):
            d = jnp.dot(w_ref[t], x, preferred_element_type=jnp.float32)
            a = d if a is None else a + d
        s = jnp.dot(a, p_ref[t], preferred_element_type=jnp.float32)
        out = s if out is None else out + s
    return out + b_ref[...]


# --------------------------------------------------------------------------
# The fused UNet kernel (one grid step == one image; spatial sizes 16/8/4/2).
# --------------------------------------------------------------------------
def _unet_kernel(
    x_ref,
    m16_ref, m8_ref, m4_ref, m2_ref,
    e1w1, e1b1, e1w2, e1b2,
    e2w1, e2b1, e2w2, e2b2,
    e3w1, e3b1, e3w2, e3b2,
    bnw1, bnb1, bnw2, bnb2,
    g1_ref, g2_ref, g3_ref,
    u3w, u3b, u3p,
    u2wa, u2wb, u2b, u2p,
    u1wa, u1wb, u1b, u1p,
    ow_a, ow_b, o_b,
    o_ref,
    pad_ref,
):
    pad_ref[...] = jnp.zeros_like(pad_ref)        # zero-padded staging scratch
    x = x_ref[0]                                  # (C, 256)

    # ------------------------------ encoder ------------------------------
    e1 = _conv3x3_relu(pad_ref, x, 16, e1w1, e1b1, m16_ref)
    e1 = _conv3x3_relu(pad_ref, e1, 16, e1w2, e1b2, m16_ref)   # (C/2, 256)
    p1 = _maxpool2x2(pad_ref, e1, 16, g1_ref)                  # (C/2, 64)

    e2 = _conv3x3_relu(pad_ref, p1, 8, e2w1, e2b1, m8_ref)
    e2 = _conv3x3_relu(pad_ref, e2, 8, e2w2, e2b2, m8_ref)     # (C/4, 64)
    p2 = _maxpool2x2(pad_ref, e2, 8, g2_ref)                   # (C/4, 16)

    e3 = _conv3x3_relu(pad_ref, p2, 4, e3w1, e3b1, m4_ref)
    e3 = _conv3x3_relu(pad_ref, e3, 4, e3w2, e3b2, m4_ref)     # (C/8, 16)
    p3 = _maxpool2x2(pad_ref, e3, 4, g3_ref)                   # (C/8, 4)

    bn = _conv3x3_relu(pad_ref, p3, 2, bnw1, bnb1, m2_ref)
    bn = _conv3x3_relu(pad_ref, bn, 2, bnw2, bnb2, m2_ref)     # (C/8, 4)

    # ---------------- decoder (concats folded into split weights) --------
    u3 = _conv_transpose2x2([bn], [u3w], u3b, u3p)             # (C/8, 16)
    u2 = _conv_transpose2x2([u3, e3], [u2wa, u2wb], u2b, u2p)  # (C/4, 64)
    u1 = _conv_transpose2x2([u2, e2], [u1wa, u1wb], u1b, u1p)  # (C/2, 256)

    out = (jnp.dot(ow_a[...], u1, preferred_element_type=jnp.float32)
           + jnp.dot(ow_b[...], e1, preferred_element_type=jnp.float32)
           + o_b[...])                                         # (C, 256)
    o_ref[0] = out


# --------------------------------------------------------------------------
# Host-side constant builders (weight re-layout, masks, select/scatter mats)
# --------------------------------------------------------------------------
def _conv_taps(w):   # (3,3,cin,cout) -> (9, cout, cin)
    return jnp.transpose(w, (0, 1, 3, 2)).reshape(9, w.shape[3], w.shape[2])


def _convT_taps(w):  # (2,2,cin,cout) -> (4, cout, cin)
    return jnp.transpose(w, (0, 1, 3, 2)).reshape(4, w.shape[3], w.shape[2])


def _col(b):
    return b.reshape(-1, 1)


def _tap_masks(S):
    """(9, 1, S*S) float32 validity masks for the 9 conv taps."""
    P = S * S
    m = np.zeros((9, 1, P), np.float32)
    for t, (dh, dw) in enumerate(_TAPS9):
        for h in range(S):
            for w in range(S):
                if 0 <= h + dh < S and 0 <= w + dw < S:
                    m[t, 0, h * S + w] = 1.0
    return jnp.asarray(m)


def _pool_select(S):
    """(S*S, (S/2)^2) 0/1 matrix selecting even-(h,w) window anchors."""
    So = S // 2
    g = np.zeros((S * S, So * So), np.float32)
    for ho in range(So):
        for wo in range(So):
            g[(2 * ho) * S + 2 * wo, ho * So + wo] = 1.0
    return jnp.asarray(g)


def _upsample_scatter(S):
    """(4, S*S, (2S)^2) 0/1 scatter: tap (kh,kw), (h,w) -> (2h+kh, 2w+kw)."""
    m = np.zeros((4, S * S, 4 * S * S), np.float32)
    for kh in range(2):
        for kw in range(2):
            t = kh * 2 + kw
            for h in range(S):
                for w in range(S):
                    m[t, h * S + w, (2 * h + kh) * (2 * S) + (2 * w + kw)] = 1.0
    return jnp.asarray(m)


# --------------------------------------------------------------------------
# UNet forward (mirrors the PyTorch module); NCHW in / NCHW out.
# --------------------------------------------------------------------------
@jax.jit
def unet_forward(params, x_nchw):
    N, C, H, W = x_nchw.shape
    assert (H, W) == (16, 16) and C % 8 == 0
    c2, c4, c8 = C // 2, C // 4, C // 8

    def block(p):
        return (_conv_taps(p["w1"]), _col(p["b1"]),
                _conv_taps(p["w2"]), _col(p["b2"]))

    u3w = _convT_taps(params["up3"]["w"])      # (4, c8, c8)
    u2w = _convT_taps(params["up2"]["w"])      # (4, c4, c4)
    u1w = _convT_taps(params["up1"]["w"])      # (4, c2, c2)
    ow = params["out"]["w"].T                  # (cout, cin) = (C, C)

    consts = (
        _tap_masks(16), _tap_masks(8), _tap_masks(4), _tap_masks(2),
        *block(params["enc1"]),
        *block(params["enc2"]),
        *block(params["enc3"]),
        *block(params["bottleneck"]),
        _pool_select(16), _pool_select(8), _pool_select(4),
        u3w, _col(params["up3"]["b"]), _upsample_scatter(2),
        u2w[:, :, :c8], u2w[:, :, c8:], _col(params["up2"]["b"]), _upsample_scatter(4),
        u1w[:, :, :c4], u1w[:, :, c4:], _col(params["up1"]["b"]), _upsample_scatter(8),
        ow[:, :c2], ow[:, c2:], _col(params["out"]["b"]),
    )

    x2 = x_nchw.reshape(N, C, H * W)           # NCHW -> (N, C, H*W), pure reshape

    in_specs = [pl.BlockSpec((1, C, H * W), lambda n: (n, 0, 0))]
    for a in consts:
        in_specs.append(pl.BlockSpec(a.shape, lambda n, _nd=a.ndim: (0,) * _nd))

    pad_lanes = ((_PAD_BASE + H * W + H + 1) + 127) // 128 * 128

    out = pl.pallas_call(
        _unet_kernel,
        out_shape=jax.ShapeDtypeStruct((N, C, H * W), jnp.float32),
        grid=(N,),
        in_specs=in_specs,
        out_specs=pl.BlockSpec((1, C, H * W), lambda n: (n, 0, 0)),
        scratch_shapes=[pltpu.VMEM((C, pad_lanes), jnp.float32)],
        compiler_params=pltpu.CompilerParams(
            dimension_semantics=("parallel",),
            vmem_limit_bytes=32 * 1024 * 1024),
    )(x2, *consts)
    return out.reshape(N, C, H, W)


# --------------------------------------------------------------------------
# Deterministic parameter init (synthetic weights, HWIO layout)
# --------------------------------------------------------------------------
def _conv_block_params(key, cin, cout):
    k1, k2, k3, k4 = jax.random.split(key, 4)
    s1 = (9 * cin) ** -0.5
    s2 = (9 * cout) ** -0.5
    return {"w1": jax.random.normal(k1, (3, 3, cin, cout), jnp.float32) * s1,
            "b1": jax.random.normal(k2, (cout,), jnp.float32) * s1,
            "w2": jax.random.normal(k3, (3, 3, cout, cout), jnp.float32) * s2,
            "b2": jax.random.normal(k4, (cout,), jnp.float32) * s2}


def _conv_transpose_params(key, c):
    k1, k2 = jax.random.split(key)
    s = (4 * c) ** -0.5
    return {"w": jax.random.normal(k1, (2, 2, c, c), jnp.float32) * s,
            "b": jax.random.normal(k2, (c,), jnp.float32) * s}


def init_params(key, C):
    ks = jax.random.split(key, 9)
    return {
        "enc1": _conv_block_params(ks[0], C, C // 2),
        "enc2": _conv_block_params(ks[1], C // 2, C // 4),
        "enc3": _conv_block_params(ks[2], C // 4, C // 8),
        "bottleneck": _conv_block_params(ks[3], C // 8, C // 8),
        "up3": _conv_transpose_params(ks[4], C // 8),
        "up2": _conv_transpose_params(ks[5], C // 4),
        "up1": _conv_transpose_params(ks[6], C // 2),
        "out": {"w": jax.random.normal(ks[7], (C, C), jnp.float32) * C ** -0.5,
                "b": jax.random.normal(ks[8], (C,), jnp.float32) * C ** -0.5},
    }


# --------------------------------------------------------------------------
# Pure-JAX reference (validation only)
# --------------------------------------------------------------------------
def _ref_conv3x3_relu(x, w, b):
    y = jax.lax.conv_general_dilated(
        x, w, (1, 1), "SAME",
        dimension_numbers=("NHWC", "HWIO", "NHWC"),
        precision=jax.lax.Precision.HIGHEST)
    return jnp.maximum(y + b.reshape(1, 1, 1, -1), 0.0)


def _ref_pool(x):
    N, H, W, C = x.shape
    return jnp.max(x.reshape(N, H // 2, 2, W // 2, 2, C), axis=(2, 4))


def _ref_convT(x, w, b):
    y = jnp.einsum("nhwc,ijcd->nhiwjd", x, w,
                   precision=jax.lax.Precision.HIGHEST)
    N, H, _, W, _, Co = y.shape
    return y.reshape(N, 2 * H, 2 * W, Co) + b.reshape(1, 1, 1, -1)


def ref_forward(params, x_nchw):
    x = jnp.transpose(x_nchw, (0, 2, 3, 1))

    def cb(x, p):
        x = _ref_conv3x3_relu(x, p["w1"], p["b1"])
        return _ref_conv3x3_relu(x, p["w2"], p["b2"])

    e1 = cb(x, params["enc1"])
    e2 = cb(_ref_pool(e1), params["enc2"])
    e3 = cb(_ref_pool(e2), params["enc3"])
    b = cb(_ref_pool(e3), params["bottleneck"])
    d3 = jnp.concatenate([_ref_convT(b, params["up3"]["w"], params["up3"]["b"]), e3], -1)
    d2 = jnp.concatenate([_ref_convT(d3, params["up2"]["w"], params["up2"]["b"]), e2], -1)
    d1 = jnp.concatenate([_ref_convT(d2, params["up1"]["w"], params["up1"]["b"]), e1], -1)
    out = jnp.einsum("nhwc,cd->nhwd", d1, params["out"]["w"],
                     precision=jax.lax.Precision.HIGHEST) \
        + params["out"]["b"].reshape(1, 1, 1, -1)
    return jnp.transpose(out, (0, 3, 1, 2))


# --------------------------------------------------------------------------
if __name__ == "__main__":
    N, C, H, W = 2, 16, 16, 16                 # in_channels divisible by 8
    key = jax.random.PRNGKey(0)
    pkey, xkey = jax.random.split(key)
    params = init_params(pkey, C)
    x = jax.random.normal(xkey, (N, C, H, W), jnp.float32)   # NCHW, as in PyTorch

    out = jax.block_until_ready(unet_forward(params, x))
    assert out.shape == (N, C, H, W), out.shape
    assert bool(jnp.all(jnp.isfinite(out)))

    ref = ref_forward(params, x)
    max_err = float(jnp.max(jnp.abs(out - ref)))
    assert max_err < 5e-2, f"mismatch vs reference: max abs err = {max_err}"

    print("KERNEL_OK")
</pallas_src>

<mosaic_0001>
module attributes {stable_mosaic.version = 11 : i64} {
  func.func @_unet_kernel(%arg0: i32, %arg1: memref<1x16x256xf32, #tpu.memory_space<vmem>>, %arg2: memref<9x1x256xf32, #tpu.memory_space<vmem>>, %arg3: memref<9x1x64xf32, #tpu.memory_space<vmem>>, %arg4: memref<9x1x16xf32, #tpu.memory_space<vmem>>, %arg5: memref<9x1x4xf32, #tpu.memory_space<vmem>>, %arg6: memref<9x8x16xf32, #tpu.memory_space<vmem>>, %arg7: memref<8x1xf32, #tpu.memory_space<vmem>>, %arg8: memref<9x8x8xf32, #tpu.memory_space<vmem>>, %arg9: memref<8x1xf32, #tpu.memory_space<vmem>>, %arg10: memref<9x4x8xf32, #tpu.memory_space<vmem>>, %arg11: memref<4x1xf32, #tpu.memory_space<vmem>>, %arg12: memref<9x4x4xf32, #tpu.memory_space<vmem>>, %arg13: memref<4x1xf32, #tpu.memory_space<vmem>>, %arg14: memref<9x2x4xf32, #tpu.memory_space<vmem>>, %arg15: memref<2x1xf32, #tpu.memory_space<vmem>>, %arg16: memref<9x2x2xf32, #tpu.memory_space<vmem>>, %arg17: memref<2x1xf32, #tpu.memory_space<vmem>>, %arg18: memref<9x2x2xf32, #tpu.memory_space<vmem>>, %arg19: memref<2x1xf32, #tpu.memory_space<vmem>>, %arg20: memref<9x2x2xf32, #tpu.memory_space<vmem>>, %arg21: memref<2x1xf32, #tpu.memory_space<vmem>>, %arg22: memref<256x64xf32, #tpu.memory_space<vmem>>, %arg23: memref<64x16xf32, #tpu.memory_space<vmem>>, %arg24: memref<16x4xf32, #tpu.memory_space<vmem>>, %arg25: memref<4x2x2xf32, #tpu.memory_space<vmem>>, %arg26: memref<2x1xf32, #tpu.memory_space<vmem>>, %arg27: memref<4x4x16xf32, #tpu.memory_space<vmem>>, %arg28: memref<4x4x2xf32, #tpu.memory_space<vmem>>, %arg29: memref<4x4x2xf32, #tpu.memory_space<vmem>>, %arg30: memref<4x1xf32, #tpu.memory_space<vmem>>, %arg31: memref<4x16x64xf32, #tpu.memory_space<vmem>>, %arg32: memref<4x8x4xf32, #tpu.memory_space<vmem>>, %arg33: memref<4x8x4xf32, #tpu.memory_space<vmem>>, %arg34: memref<8x1xf32, #tpu.memory_space<vmem>>, %arg35: memref<4x64x256xf32, #tpu.memory_space<vmem>>, %arg36: memref<16x8xf32, #tpu.memory_space<vmem>>, %arg37: memref<16x8xf32, #tpu.memory_space<vmem>>, %arg38: memref<16x1xf32, #tpu.memory_space<vmem>>, %arg39: memref<1x16x256xf32, #tpu.memory_space<vmem>>, %arg40: memref<16x384xf32, #tpu.memory_space<vmem>>) attributes {dimension_semantics = [#tpu.dimension_semantics<parallel>], iteration_bounds = array<i64: 2>, scalar_prefetch = 0 : i64, scratch_operands = 1 : i64, tpu.core_type = #tpu.core_type<tc>, window_params = [{transform_indices = @transform_0, window_bounds = array<i64: 1, 16, 256>}, {pipeline_mode = #tpu.pipeline_mode<synchronous>, transform_indices = @transform_1, window_bounds = array<i64: 9, 1, 256>}, {pipeline_mode = #tpu.pipeline_mode<synchronous>, transform_indices = @transform_2, window_bounds = array<i64: 9, 1, 64>}, {pipeline_mode = #tpu.pipeline_mode<synchronous>, transform_indices = @transform_3, window_bounds = array<i64: 9, 1, 16>}, {pipeline_mode = #tpu.pipeline_mode<synchronous>, transform_indices = @transform_4, window_bounds = array<i64: 9, 1, 4>}, {pipeline_mode = #tpu.pipeline_mode<synchronous>, transform_indices = @transform_5, window_bounds = array<i64: 9, 8, 16>}, {pipeline_mode = #tpu.pipeline_mode<synchronous>, transform_indices = @transform_6, window_bounds = array<i64: 8, 1>}, {pipeline_mode = #tpu.pipeline_mode<synchronous>, transform_indices = @transform_7, window_bounds = array<i64: 9, 8, 8>}, {pipeline_mode = #tpu.pipeline_mode<synchronous>, transform_indices = @transform_8, window_bounds = array<i64: 8, 1>}, {pipeline_mode = #tpu.pipeline_mode<synchronous>, transform_indices = @transform_9, window_bounds = array<i64: 9, 4, 8>}, {pipeline_mode = #tpu.pipeline_mode<synchronous>, transform_indices = @transform_10, window_bounds = array<i64: 4, 1>}, {pipeline_mode = #tpu.pipeline_mode<synchronous>, transform_indices = @transform_11, window_bounds = array<i64: 9, 4, 4>}, {pipeline_mode = #tpu.pipeline_mode<synchronous>, transform_indices = @transform_12, window_bounds = array<i64: 4, 1>}, {pipeline_mode = #tpu.pipeline_mode<synchronous>, transform_indices = @transform_13, window_bounds = array<i64: 9, 2, 4>}, {pipeline_mode = #tpu.pipeline_mode<synchronous>, transform_indices = @transform_14, window_bounds = array<i64: 2, 1>}, {pipeline_mode = #tpu.pipeline_mode<synchronous>, transform_indices = @transform_15, window_bounds = array<i64: 9, 2, 2>}, {pipeline_mode = #tpu.pipeline_mode<synchronous>, transform_indices = @transform_16, window_bounds = array<i64: 2, 1>}, {pipeline_mode = #tpu.pipeline_mode<synchronous>, transform_indices = @transform_17, window_bounds = array<i64: 9, 2, 2>}, {pipeline_mode = #tpu.pipeline_mode<synchronous>, transform_indices = @transform_18, window_bounds = array<i64: 2, 1>}, {pipeline_mode = #tpu.pipeline_mode<synchronous>, transform_indices = @transform_19, window_bounds = array<i64: 9, 2, 2>}, {pipeline_mode = #tpu.pipeline_mode<synchronous>, transform_indices = @transform_20, window_bounds = array<i64: 2, 1>}, {pipeline_mode = #tpu.pipeline_mode<synchronous>, transform_indices = @transform_21, window_bounds = array<i64: 256, 64>}, {pipeline_mode = #tpu.pipeline_mode<synchronous>, transform_indices = @transform_22, window_bounds = array<i64: 64, 16>}, {pipeline_mode = #tpu.pipeline_mode<synchronous>, transform_indices = @transform_23, window_bounds = array<i64: 16, 4>}, {pipeline_mode = #tpu.pipeline_mode<synchronous>, transform_indices = @transform_24, window_bounds = array<i64: 4, 2, 2>}, {pipeline_mode = #tpu.pipeline_mode<synchronous>, transform_indices = @transform_25, window_bounds = array<i64: 2, 1>}, {pipeline_mode = #tpu.pipeline_mode<synchronous>, transform_indices = @transform_26, window_bounds = array<i64: 4, 4, 16>}, {pipeline_mode = #tpu.pipeline_mode<synchronous>, transform_indices = @transform_27, window_bounds = array<i64: 4, 4, 2>}, {pipeline_mode = #tpu.pipeline_mode<synchronous>, transform_indices = @transform_28, window_bounds = array<i64: 4, 4, 2>}, {pipeline_mode = #tpu.pipeline_mode<synchronous>, transform_indices = @transform_29, window_bounds = array<i64: 4, 1>}, {pipeline_mode = #tpu.pipeline_mode<synchronous>, transform_indices = @transform_30, window_bounds = array<i64: 4, 16, 64>}, {pipeline_mode = #tpu.pipeline_mode<synchronous>, transform_indices = @transform_31, window_bounds = array<i64: 4, 8, 4>}, {pipeline_mode = #tpu.pipeline_mode<synchronous>, transform_indices = @transform_32, window_bounds = array<i64: 4, 8, 4>}, {pipeline_mode = #tpu.pipeline_mode<synchronous>, transform_indices = @transform_33, window_bounds = array<i64: 8, 1>}, {pipeline_mode = #tpu.pipeline_mode<synchronous>, transform_indices = @transform_34, window_bounds = array<i64: 4, 64, 256>}, {pipeline_mode = #tpu.pipeline_mode<synchronous>, transform_indices = @transform_35, window_bounds = array<i64: 16, 8>}, {pipeline_mode = #tpu.pipeline_mode<synchronous>, transform_indices = @transform_36, window_bounds = array<i64: 16, 8>}, {pipeline_mode = #tpu.pipeline_mode<synchronous>, transform_indices = @transform_37, window_bounds = array<i64: 16, 1>}, {transform_indices = @transform_38, window_bounds = array<i64: 1, 16, 256>}]} {
    %cst = arith.constant 0.000000e+00 : f32
    %0 = vector.broadcast %cst : f32 to vector<16x384xf32>
    %c0 = arith.constant 0 : index
    %c0_0 = arith.constant 0 : index
    %1 = vector.load %arg40[%c0, %c0_0] : memref<16x384xf32, #tpu.memory_space<vmem>>, vector<16x384xf32>
    tpu.vector_store %arg40[%c0, %c0_0], %0 {strides = array<i32>} : memref<16x384xf32, #tpu.memory_space<vmem>>, vector<16x384xf32>,
    %c0_1 = arith.constant 0 : index
    %c0_2 = arith.constant 0 : index
    %c0_3 = arith.constant 0 : index
    %2 = vector.load %arg1[%c0_1, %c0_2, %c0_3] : memref<1x16x256xf32, #tpu.memory_space<vmem>>, vector<1x16x256xf32>
    %3 = vector.shape_cast %2 : vector<1x16x256xf32> to vector<16x256xf32>
    %c0_4 = arith.constant 0 : index
    %c32 = arith.constant 32 : index
    %4 = vector.load %arg40[%c0_4, %c32] : memref<16x384xf32, #tpu.memory_space<vmem>>, vector<16x256xf32>
    tpu.vector_store %arg40[%c0_4, %c32], %3 {strides = array<i32>} : memref<16x384xf32, #tpu.memory_space<vmem>>, vector<16x256xf32>,
    %c0_5 = arith.constant 0 : index
    %c15 = arith.constant 15 : index
    %5 = vector.load %arg40[%c0_5, %c15] : memref<16x384xf32, #tpu.memory_space<vmem>>, vector<16x256xf32>
    %c0_6 = arith.constant 0 : index
    %c0_7 = arith.constant 0 : index
    %c0_8 = arith.constant 0 : index
    %6 = vector.load %arg2[%c0_6, %c0_7, %c0_8] : memref<9x1x256xf32, #tpu.memory_space<vmem>>, vector<1x1x256xf32>
    %7 = vector.shape_cast %6 : vector<1x1x256xf32> to vector<1x256xf32>
    %8 = vector.broadcast %7 : vector<1x256xf32> to vector<16x256xf32>
    %9 = arith.mulf %5, %8 : vector<16x256xf32>
    %c0_9 = arith.constant 0 : index
    %c0_10 = arith.constant 0 : index
    %c0_11 = arith.constant 0 : index
    %10 = vector.load %arg6[%c0_9, %c0_10, %c0_11] : memref<9x8x16xf32, #tpu.memory_space<vmem>>, vector<1x8x16xf32>
    %11 = vector.shape_cast %10 : vector<1x8x16xf32> to vector<8x16xf32>
    %cst_12 = arith.constant dense<0.000000e+00> : vector<8x256xf32>
    %12 = tpu.matmul %11, %9, %cst_12 {dimension_numbers = #tpu.dot_dimension_numbers<[1], [0], [0], [1], [0, 0, 1, 1], [], []>} : vector<8x16xf32>, vector<16x256xf32>, vector<8x256xf32> -> vector<8x256xf32>
    %c0_13 = arith.constant 0 : index
    %c16 = arith.constant 16 : index
    %13 = vector.load %arg40[%c0_13, %c16] : memref<16x384xf32, #tpu.memory_space<vmem>>, vector<16x256xf32>
    %c1 = arith.constant 1 : index
    %c0_14 = arith.constant 0 : index
    %c0_15 = arith.constant 0 : index
    %14 = vector.load %arg2[%c1, %c0_14, %c0_15] : memref<9x1x256xf32, #tpu.memory_space<vmem>>, vector<1x1x256xf32>
    %15 = vector.shape_cast %14 : vector<1x1x256xf32> to vector<1x256xf32>
    %16 = vector.broadcast %15 : vector<1x256xf32> to vector<16x256xf32>
    %17 = arith.mulf %13, %16 : vector<16x256xf32>
    %c1_16 = arith.constant 1 : index
    %c0_17 = arith.constant 0 : index
    %c0_18 = arith.constant 0 : index
    %18 = vector.load %arg6[%c1_16, %c0_17, %c0_18] : memref<9x8x16xf32, #tpu.memory_space<vmem>>, vector<1x8x16xf32>
    %19 = vector.shape_cast %18 : vector<1x8x16xf32> to vector<8x16xf32>
    %cst_19 = arith.constant dense<0.000000e+00> : vector<8x256xf32>
    %20 = tpu.matmul %19, %17, %cst_19 {dimension_numbers = #tpu.dot_dimension_numbers<[1], [0], [0], [1], [0, 0, 1, 1], [], []>} : vector<8x16xf32>, vector<16x256xf32>, vector<8x256xf32> -> vector<8x256xf32>
    %21 = arith.addf %12, %20 : vector<8x256xf32>
    %c0_20 = arith.constant 0 : index
    %c17 = arith.constant 17 : index
    %22 = vector.load %arg40[%c0_20, %c17] : memref<16x384xf32, #tpu.memory_space<vmem>>, vector<16x256xf32>
    %c2 = arith.constant 2 : index
    %c0_21 = arith.constant 0 : index
    %c0_22 = arith.constant 0 : index
    %23 = vector.load %arg2[%c2, %c0_21, %c0_22] : memref<9x1x256xf32, #tpu.memory_space<vmem>>, vector<1x1x256xf32>
    %24 = vector.shape_cast %23 : vector<1x1x256xf32> to vector<1x256xf32>
    %25 = vector.broadcast %24 : vector<1x256xf32> to vector<16x256xf32>
    %26 = arith.mulf %22, %25 : vector<16x256xf32>
    %c2_23 = arith.constant 2 : index
    %c0_24 = arith.constant 0 : index
    %c0_25 = arith.constant 0 : index
    %27 = vector.load %arg6[%c2_23, %c0_24, %c0_25] : memref<9x8x16xf32, #tpu.memory_space<vmem>>, vector<1x8x16xf32>
    %28 = vector.shape_cast %27 : vector<1x8x16xf32> to vector<8x16xf32>
    %cst_26 = arith.constant dense<0.000000e+00> : vector<8x256xf32>
    %29 = tpu.matmul %28, %26, %cst_26 {dimension_numbers = #tpu.dot_dimension_numbers<[1], [0], [0], [1], [0, 0, 1, 1], [], []>} : vector<8x16xf32>, vector<16x256xf32>, vector<8x256xf32> -> vector<8x256xf32>
    %30 = arith.addf %21, %29 : vector<8x256xf32>
    %c0_27 = arith.constant 0 : index
    %c31 = arith.constant 31 : index
    %31 = vector.load %arg40[%c0_27, %c31] : memref<16x384xf32, #tpu.memory_space<vmem>>, vector<16x256xf32>
    %c3 = arith.constant 3 : index
    %c0_28 = arith.constant 0 : index
    %c0_29 = arith.constant 0 : index
    %32 = vector.load %arg2[%c3, %c0_28, %c0_29] : memref<9x1x256xf32, #tpu.memory_space<vmem>>, vector<1x1x256xf32>
    %33 = vector.shape_cast %32 : vector<1x1x256xf32> to vector<1x256xf32>
    %34 = vector.broadcast %33 : vector<1x256xf32> to vector<16x256xf32>
    %35 = arith.mulf %31, %34 : vector<16x256xf32>
    %c3_30 = arith.constant 3 : index
    %c0_31 = arith.constant 0 : index
    %c0_32 = arith.constant 0 : index
    %36 = vector.load %arg6[%c3_30, %c0_31, %c0_32] : memref<9x8x16xf32, #tpu.memory_space<vmem>>, vector<1x8x16xf32>
    %37 = vector.shape_cast %36 : vector<1x8x16xf32> to vector<8x16xf32>
    %cst_33 = arith.constant dense<0.000000e+00> : vector<8x256xf32>
    %38 = tpu.matmul %37, %35, %cst_33 {dimension_numbers = #tpu.dot_dimension_numbers<[1], [0], [0], [1], [0, 0, 1, 1], [], []>} : vector<8x16xf32>, vector<16x256xf32>, vector<8x256xf32> -> vector<8x256xf32>
    %39 = arith.addf %30, %38 : vector<8x256xf32>
    %c0_34 = arith.constant 0 : index
    %c32_35 = arith.constant 32 : index
    %40 = vector.load %arg40[%c0_34, %c32_35] : memref<16x384xf32, #tpu.memory_space<vmem>>, vector<16x256xf32>
    %c4 = arith.constant 4 : index
    %c0_36 = arith.constant 0 : index
    %c0_37 = arith.constant 0 : index
    %41 = vector.load %arg2[%c4, %c0_36, %c0_37] : memref<9x1x256xf32, #tpu.memory_space<vmem>>, vector<1x1x256xf32>
    %42 = vector.shape_cast %41 : vector<1x1x256xf32> to vector<1x256xf32>
    %43 = vector.broadcast %42 : vector<1x256xf32> to vector<16x256xf32>
    %44 = arith.mulf %40, %43 : vector<16x256xf32>
    %c4_38 = arith.constant 4 : index
    %c0_39 = arith.constant 0 : index
    %c0_40 = arith.constant 0 : index
    %45 = vector.load %arg6[%c4_38, %c0_39, %c0_40] : memref<9x8x16xf32, #tpu.memory_space<vmem>>, vector<1x8x16xf32>
    %46 = vector.shape_cast %45 : vector<1x8x16xf32> to vector<8x16xf32>
    %cst_41 = arith.constant dense<0.000000e+00> : vector<8x256xf32>
    %47 = tpu.matmul %46, %44, %cst_41 {dimension_numbers = #tpu.dot_dimension_numbers<[1], [0], [0], [1], [0, 0, 1, 1], [], []>} : vector<8x16xf32>, vector<16x256xf32>, vector<8x256xf32> -> vector<8x256xf32>
    %48 = arith.addf %39, %47 : vector<8x256xf32>
    %c0_42 = arith.constant 0 : index
    %c33 = arith.constant 33 : index
    %49 = vector.load %arg40[%c0_42, %c33] : memref<16x384xf32, #tpu.memory_space<vmem>>, vector<16x256xf32>
    %c5 = arith.constant 5 : index
    %c0_43 = arith.constant 0 : index
    %c0_44 = arith.constant 0 : index
    %50 = vector.load %arg2[%c5, %c0_43, %c0_44] : memref<9x1x256xf32, #tpu.memory_space<vmem>>, vector<1x1x256xf32>
    %51 = vector.shape_cast %50 : vector<1x1x256xf32> to vector<1x256xf32>
    %52 = vector.broadcast %51 : vector<1x256xf32> to vector<16x256xf32>
    %53 = arith.mulf %49, %52 : vector<16x256xf32>
    %c5_45 = arith.constant 5 : index
    %c0_46 = arith.constant 0 : index
    %c0_47 = arith.constant 0 : index
    %54 = vector.load %arg6[%c5_45, %c0_46, %c0_47] : memref<9x8x16xf32, #tpu.memory_space<vmem>>, vector<1x8x16xf32>
    %55 = vector.shape_cast %54 : vector<1x8x16xf32> to vector<8x16xf32>
    %cst_48 = arith.constant dense<0.000000e+00> : vector<8x256xf32>
    %56 = tpu.matmul %55, %53, %cst_48 {dimension_numbers = #tpu.dot_dimension_numbers<[1], [0], [0], [1], [0, 0, 1, 1], [], []>} : vector<8x16xf32>, vector<16x256xf32>, vector<8x256xf32> -> vector<8x256xf32>
    %57 = arith.addf %48, %56 : vector<8x256xf32>
    %c0_49 = arith.constant 0 : index
    %c47 = arith.constant 47 : index
    %58 = vector.load %arg40[%c0_49, %c47] : memref<16x384xf32, #tpu.memory_space<vmem>>, vector<16x256xf32>
    %c6 = arith.constant 6 : index
    %c0_50 = arith.constant 0 : index
    %c0_51 = arith.constant 0 : index
    %59 = vector.load %arg2[%c6, %c0_50, %c0_51] : memref<9x1x256xf32, #tpu.memory_space<vmem>>, vector<1x1x256xf32>
    %60 = vector.shape_cast %59 : vector<1x1x256xf32> to vector<1x256xf32>
    %61 = vector.broadcast %60 : vector<1x256xf32> to vector<16x256xf32>
    %62 = arith.mulf %58, %61 : vector<16x256xf32>
    %c6_52 = arith.constant 6 : index
    %c0_53 = arith.constant 0 : index
    %c0_54 = arith.constant 0 : index
    %63 = vector.load %arg6[%c6_52, %c0_53, %c0_54] : memref<9x8x16xf32, #tpu.memory_space<vmem>>, vector<1x8x16xf32>
    %64 = vector.shape_cast %63 : vector<1x8x16xf32> to vector<8x16xf32>
    %cst_55 = arith.constant dense<0.000000e+00> : vector<8x256xf32>
    %65 = tpu.matmul %64, %62, %cst_55 {dimension_numbers = #tpu.dot_dimension_numbers<[1], [0], [0], [1], [0, 0, 1, 1], [], []>} : vector<8x16xf32>, vector<16x256xf32>, vector<8x256xf32> -> vector<8x256xf32>
    %66 = arith.addf %57, %65 : vector<8x256xf32>
    %c0_56 = arith.constant 0 : index
    %c48 = arith.constant 48 : index
    %67 = vector.load %arg40[%c0_56, %c48] : memref<16x384xf32, #tpu.memory_space<vmem>>, vector<16x256xf32>
    %c7 = arith.constant 7 : index
    %c0_57 = arith.constant 0 : index
    %c0_58 = arith.constant 0 : index
    %68 = vector.load %arg2[%c7, %c0_57, %c0_58] : memref<9x1x256xf32, #tpu.memory_space<vmem>>, vector<1x1x256xf32>
    %69 = vector.shape_cast %68 : vector<1x1x256xf32> to vector<1x256xf32>
    %70 = vector.broadcast %69 : vector<1x256xf32> to vector<16x256xf32>
    %71 = arith.mulf %67, %70 : vector<16x256xf32>
    %c7_59 = arith.constant 7 : index
    %c0_60 = arith.constant 0 : index
    %c0_61 = arith.constant 0 : index
    %72 = vector.load %arg6[%c7_59, %c0_60, %c0_61] : memref<9x8x16xf32, #tpu.memory_space<vmem>>, vector<1x8x16xf32>
    %73 = vector.shape_cast %72 : vector<1x8x16xf32> to vector<8x16xf32>
    %cst_62 = arith.constant dense<0.000000e+00> : vector<8x256xf32>
    %74 = tpu.matmul %73, %71, %cst_62 {dimension_numbers = #tpu.dot_dimension_numbers<[1], [0], [0], [1], [0, 0, 1, 1], [], []>} : vector<8x16xf32>, vector<16x256xf32>, vector<8x256xf32> -> vector<8x256xf32>
    %75 = arith.addf %66, %74 : vector<8x256xf32>
    %c0_63 = arith.constant 0 : index
    %c49 = arith.constant 49 : index
    %76 = vector.load %arg40[%c0_63, %c49] : memref<16x384xf32, #tpu.memory_space<vmem>>, vector<16x256xf32>
    %c8 = arith.constant 8 : index
    %c0_64 = arith.constant 0 : index
    %c0_65 = arith.constant 0 : index
    %77 = vector.load %arg2[%c8, %c0_64, %c0_65] : memref<9x1x256xf32, #tpu.memory_space<vmem>>, vector<1x1x256xf32>
    %78 = vector.shape_cast %77 : vector<1x1x256xf32> to vector<1x256xf32>
    %79 = vector.broadcast %78 : vector<1x256xf32> to vector<16x256xf32>
    %80 = arith.mulf %76, %79 : vector<16x256xf32>
    %c8_66 = arith.constant 8 : index
    %c0_67 = arith.constant 0 : index
    %c0_68 = arith.constant 0 : index
    %81 = vector.load %arg6[%c8_66, %c0_67, %c0_68] : memref<9x8x16xf32, #tpu.memory_space<vmem>>, vector<1x8x16xf32>
    %82 = vector.shape_cast %81 : vector<1x8x16xf32> to vector<8x16xf32>
    %cst_69 = arith.constant dense<0.000000e+00> : vector<8x256xf32>
    %83 = tpu.matmul %82, %80, %cst_69 {dimension_numbers = #tpu.dot_dimension_numbers<[1], [0], [0], [1], [0, 0, 1, 1], [], []>} : vector<8x16xf32>, vector<16x256xf32>, vector<8x256xf32> -> vector<8x256xf32>
    %84 = arith.addf %75, %83 : vector<8x256xf32>
    %c0_70 = arith.constant 0 : index
    %c0_71 = arith.constant 0 : index
    %85 = vector.load %arg7[%c0_70, %c0_71] : memref<8x1xf32, #tpu.memory_space<vmem>>, vector<8x1xf32>
    %86 = vector.broadcast %85 : vector<8x1xf32> to vector<8x256xf32>
    %87 = arith.addf %84, %86 : vector<8x256xf32>
    %cst_72 = arith.constant 0.000000e+00 : f32
    %88 = vector.broadcast %cst_72 : f32 to vector<8x256xf32>
    %89 = arith.maximumf %87, %88 : vector<8x256xf32>
    %c0_73 = arith.constant 0 : index
    %c32_74 = arith.constant 32 : index
    %90 = vector.load %arg40[%c0_73, %c32_74] : memref<16x384xf32, #tpu.memory_space<vmem>>, vector<8x256xf32>
    tpu.vector_store %arg40[%c0_73, %c32_74], %89 {strides = array<i32>} : memref<16x384xf32, #tpu.memory_space<vmem>>, vector<8x256xf32>,
    %c0_75 = arith.constant 0 : index
    %c15_76 = arith.constant 15 : index
    %91 = vector.load %arg40[%c0_75, %c15_76] : memref<16x384xf32, #tpu.memory_space<vmem>>, vector<8x256xf32>
    %c0_77 = arith.constant 0 : index
    %c0_78 = arith.constant 0 : index
    %c0_79 = arith.constant 0 : index
    %92 = vector.load %arg2[%c0_77, %c0_78, %c0_79] : memref<9x1x256xf32, #tpu.memory_space<vmem>>, vector<1x1x256xf32>
    %93 = vector.shape_cast %92 : vector<1x1x256xf32> to vector<1x256xf32>
    %94 = vector.broadcast %93 : vector<1x256xf32> to vector<8x256xf32>
    %95 = arith.mulf %91, %94 : vector<8x256xf32>
    %c0_80 = arith.constant 0 : index
    %c0_81 = arith.constant 0 : index
    %c0_82 = arith.constant 0 : index
    %96 = vector.load %arg8[%c0_80, %c0_81, %c0_82] : memref<9x8x8xf32, #tpu.memory_space<vmem>>, vector<1x8x8xf32>
    %97 = vector.shape_cast %96 : vector<1x8x8xf32> to vector<8x8xf32>
    %cst_83 = arith.constant dense<0.000000e+00> : vector<8x256xf32>
    %98 = tpu.matmul %97, %95, %cst_83 {dimension_numbers = #tpu.dot_dimension_numbers<[1], [0], [0], [1], [0, 0, 1, 1], [], []>} : vector<8x8xf32>, vector<8x256xf32>, vector<8x256xf32> -> vector<8x256xf32>
    %c0_84 = arith.constant 0 : index
    %c16_85 = arith.constant 16 : index
    %99 = vector.load %arg40[%c0_84, %c16_85] : memref<16x384xf32, #tpu.memory_space<vmem>>, vector<8x256xf32>
    %c1_86 = arith.constant 1 : index
    %c0_87 = arith.constant 0 : index
    %c0_88 = arith.constant 0 : index
    %100 = vector.load %arg2[%c1_86, %c0_87, %c0_88] : memref<9x1x256xf32, #tpu.memory_space<vmem>>, vector<1x1x256xf32>
    %101 = vector.shape_cast %100 : vector<1x1x256xf32> to vector<1x256xf32>
    %102 = vector.broadcast %101 : vector<1x256xf32> to vector<8x256xf32>
    %103 = arith.mulf %99, %102 : vector<8x256xf32>
    %c1_89 = arith.constant 1 : index
    %c0_90 = arith.constant 0 : index
    %c0_91 = arith.constant 0 : index
    %104 = vector.load %arg8[%c1_89, %c0_90, %c0_91] : memref<9x8x8xf32, #tpu.memory_space<vmem>>, vector<1x8x8xf32>
    %105 = vector.shape_cast %104 : vector<1x8x8xf32> to vector<8x8xf32>
    %cst_92 = arith.constant dense<0.000000e+00> : vector<8x256xf32>
    %106 = tpu.matmul %105, %103, %cst_92 {dimension_numbers = #tpu.dot_dimension_numbers<[1], [0], [0], [1], [0, 0, 1, 1], [], []>} : vector<8x8xf32>, vector<8x256xf32>, vector<8x256xf32> -> vector<8x256xf32>
    %107 = arith.addf %98, %106 : vector<8x256xf32>
    %c0_93 = arith.constant 0 : index
    %c17_94 = arith.constant 17 : index
    %108 = vector.load %arg40[%c0_93, %c17_94] : memref<16x384xf32, #tpu.memory_space<vmem>>, vector<8x256xf32>
    %c2_95 = arith.constant 2 : index
    %c0_96 = arith.constant 0 : index
    %c0_97 = arith.constant 0 : index
    %109 = vector.load %arg2[%c2_95, %c0_96, %c0_97] : memref<9x1x256xf32, #tpu.memory_space<vmem>>, vector<1x1x256xf32>
    %110 = vector.shape_cast %109 : vector<1x1x256xf32> to vector<1x256xf32>
    %111 = vector.broadcast %110 : vector<1x256xf32> to vector<8x256xf32>
    %112 = arith.mulf %108, %111 : vector<8x256xf32>
    %c2_98 = arith.constant 2 : index
    %c0_99 = arith.constant 0 : index
    %c0_100 = arith.constant 0 : index
    %113 = vector.load %arg8[%c2_98, %c0_99, %c0_100] : memref<9x8x8xf32, #tpu.memory_space<vmem>>, vector<1x8x8xf32>
    %114 = vector.shape_cast %113 : vector<1x8x8xf32> to vector<8x8xf32>
    %cst_101 = arith.constant dense<0.000000e+00> : vector<8x256xf32>
    %115 = tpu.matmul %114, %112, %cst_101 {dimension_numbers = #tpu.dot_dimension_numbers<[1], [0], [0], [1], [0, 0, 1, 1], [], []>} : vector<8x8xf32>, vector<8x256xf32>, vector<8x256xf32> -> vector<8x256xf32>
    %116 = arith.addf %107, %115 : vector<8x256xf32>
    %c0_102 = arith.constant 0 : index
    %c31_103 = arith.constant 31 : index
    %117 = vector.load %arg40[%c0_102, %c31_103] : memref<16x384xf32, #tpu.memory_space<vmem>>, vector<8x256xf32>
    %c3_104 = arith.constant 3 : index
    %c0_105 = arith.constant 0 : index
    %c0_106 = arith.constant 0 : index
    %118 = vector.load %arg2[%c3_104, %c0_105, %c0_106] : memref<9x1x256xf32, #tpu.memory_space<vmem>>, vector<1x1x256xf32>
    %119 = vector.shape_cast %118 : vector<1x1x256xf32> to vector<1x256xf32>
    %120 = vector.broadcast %119 : vector<1x256xf32> to vector<8x256xf32>
    %121 = arith.mulf %117, %120 : vector<8x256xf32>
    %c3_107 = arith.constant 3 : index
    %c0_108 = arith.constant 0 : index
    %c0_109 = arith.constant 0 : index
    %122 = vector.load %arg8[%c3_107, %c0_108, %c0_109] : memref<9x8x8xf32, #tpu.memory_space<vmem>>, vector<1x8x8xf32>
    %123 = vector.shape_cast %122 : vector<1x8x8xf32> to vector<8x8xf32>
    %cst_110 = arith.constant dense<0.000000e+00> : vector<8x256xf32>
    %124 = tpu.matmul %123, %121, %cst_110 {dimension_numbers = #tpu.dot_dimension_numbers<[1], [0], [0], [1], [0, 0, 1, 1], [], []>} : vector<8x8xf32>, vector<8x256xf32>, vector<8x256xf32> -> vector<8x256xf32>
    %125 = arith.addf %116, %124 : vector<8x256xf32>
    %c0_111 = arith.constant 0 : index
    %c32_112 = arith.constant 32 : index
    %126 = vector.load %arg40[%c0_111, %c32_112] : memref<16x384xf32, #tpu.memory_space<vmem>>, vector<8x256xf32>
    %c4_113 = arith.constant 4 : index
    %c0_114 = arith.constant 0 : index
    %c0_115 = arith.constant 0 : index
    %127 = vector.load %arg2[%c4_113, %c0_114, %c0_115] : memref<9x1x256xf32, #tpu.memory_space<vmem>>, vector<1x1x256xf32>
    %128 = vector.shape_cast %127 : vector<1x1x256xf32> to vector<1x256xf32>
    %129 = vector.broadcast %128 : vector<1x256xf32> to vector<8x256xf32>
    %130 = arith.mulf %126, %129 : vector<8x256xf32>
    %c4_116 = arith.constant 4 : index
    %c0_117 = arith.constant 0 : index
    %c0_118 = arith.constant 0 : index
    %131 = vector.load %arg8[%c4_116, %c0_117, %c0_118] : memref<9x8x8xf32, #tpu.memory_space<vmem>>, vector<1x8x8xf32>
    %132 = vector.shape_cast %131 : vector<1x8x8xf32> to vector<8x8xf32>
    %cst_119 = arith.constant dense<0.000000e+00> : vector<8x256xf32>
    %133 = tpu.matmul %132, %130, %cst_119 {dimension_numbers = #tpu.dot_dimension_numbers<[1], [0], [0], [1], [0, 0, 1, 1], [], []>} : vector<8x8xf32>, vector<8x256xf32>, vector<8x256xf32> -> vector<8x256xf32>
    %134 = arith.addf %125, %133 : vector<8x256xf32>
    %c0_120 = arith.constant 0 : index
    %c33_121 = arith.constant 33 : index
    %135 = vector.load %arg40[%c0_120, %c33_121] : memref<16x384xf32, #tpu.memory_space<vmem>>, vector<8x256xf32>
    %c5_122 = arith.constant 5 : index
    %c0_123 = arith.constant 0 : index
    %c0_124 = arith.constant 0 : index
    %136 = vector.load %arg2[%c5_122, %c0_123, %c0_124] : memref<9x1x256xf32, #tpu.memory_space<vmem>>, vector<1x1x256xf32>
    %137 = vector.shape_cast %136 : vector<1x1x256xf32> to vector<1x256xf32>
    %138 = vector.broadcast %137 : vector<1x256xf32> to vector<8x256xf32>
    %139 = arith.mulf %135, %138 : vector<8x256xf32>
    %c5_125 = arith.constant 5 : index
    %c0_126 = arith.constant 0 : index
    %c0_127 = arith.constant 0 : index
    %140 = vector.load %arg8[%c5_125, %c0_126, %c0_127] : memref<9x8x8xf32, #tpu.memory_space<vmem>>, vector<1x8x8xf32>
    %141 = vector.shape_cast %140 : vector<1x8x8xf32> to vector<8x8xf32>
    %cst_128 = arith.constant dense<0.000000e+00> : vector<8x256xf32>
    %142 = tpu.matmul %141, %139, %cst_128 {dimension_numbers = #tpu.dot_dimension_numbers<[1], [0], [0], [1], [0, 0, 1, 1], [], []>} : vector<8x8xf32>, vector<8x256xf32>, vector<8x256xf32> -> vector<8x256xf32>
    %143 = arith.addf %134, %142 : vector<8x256xf32>
    %c0_129 = arith.constant 0 : index
    %c47_130 = arith.constant 47 : index
    %144 = vector.load %arg40[%c0_129, %c47_130] : memref<16x384xf32, #tpu.memory_space<vmem>>, vector<8x256xf32>
    %c6_131 = arith.constant 6 : index
    %c0_132 = arith.constant 0 : index
    %c0_133 = arith.constant 0 : index
    %145 = vector.load %arg2[%c6_131, %c0_132, %c0_133] : memref<9x1x256xf32, #tpu.memory_space<vmem>>, vector<1x1x256xf32>
    %146 = vector.shape_cast %145 : vector<1x1x256xf32> to vector<1x256xf32>
    %147 = vector.broadcast %146 : vector<1x256xf32> to vector<8x256xf32>
    %148 = arith.mulf %144, %147 : vector<8x256xf32>
    %c6_134 = arith.constant 6 : index
    %c0_135 = arith.constant 0 : index
    %c0_136 = arith.constant 0 : index
    %149 = vector.load %arg8[%c6_134, %c0_135, %c0_136] : memref<9x8x8xf32, #tpu.memory_space<vmem>>, vector<1x8x8xf32>
    %150 = vector.shape_cast %149 : vector<1x8x8xf32> to vector<8x8xf32>
    %cst_137 = arith.constant dense<0.000000e+00> : vector<8x256xf32>
    %151 = tpu.matmul %150, %148, %cst_137 {dimension_numbers = #tpu.dot_dimension_numbers<[1], [0], [0], [1], [0, 0, 1, 1], [], []>} : vector<8x8xf32>, vector<8x256xf32>, vector<8x256xf32> -> vector<8x256xf32>
    %152 = arith.addf %143, %151 : vector<8x256xf32>
    %c0_138 = arith.constant 0 : index
    %c48_139 = arith.constant 48 : index
    %153 = vector.load %arg40[%c0_138, %c48_139] : memref<16x384xf32, #tpu.memory_space<vmem>>, vector<8x256xf32>
    %c7_140 = arith.constant 7 : index
    %c0_141 = arith.constant 0 : index
    %c0_142 = arith.constant 0 : index
    %154 = vector.load %arg2[%c7_140, %c0_141, %c0_142] : memref<9x1x256xf32, #tpu.memory_space<vmem>>, vector<1x1x256xf32>
    %155 = vector.shape_cast %154 : vector<1x1x256xf32> to vector<1x256xf32>
    %156 = vector.broadcast %155 : vector<1x256xf32> to vector<8x256xf32>
    %157 = arith.mulf %153, %156 : vector<8x256xf32>
    %c7_143 = arith.constant 7 : index
    %c0_144 = arith.constant 0 : index
    %c0_145 = arith.constant 0 : index
    %158 = vector.load %arg8[%c7_143, %c0_144, %c0_145] : memref<9x8x8xf32, #tpu.memory_space<vmem>>, vector<1x8x8xf32>
    %159 = vector.shape_cast %158 : vector<1x8x8xf32> to vector<8x8xf32>
    %cst_146 = arith.constant dense<0.000000e+00> : vector<8x256xf32>
    %160 = tpu.matmul %159, %157, %cst_146 {dimension_numbers = #tpu.dot_dimension_numbers<[1], [0], [0], [1], [0, 0, 1, 1], [], []>} : vector<8x8xf32>, vector<8x256xf32>, vector<8x256xf32> -> vector<8x256xf32>
    %161 = arith.addf %152, %160 : vector<8x256xf32>
    %c0_147 = arith.constant 0 : index
    %c49_148 = arith.constant 49 : index
    %162 = vector.load %arg40[%c0_147, %c49_148] : memref<16x384xf32, #tpu.memory_space<vmem>>, vector<8x256xf32>
    %c8_149 = arith.constant 8 : index
    %c0_150 = arith.constant 0 : index
    %c0_151 = arith.constant 0 : index
    %163 = vector.load %arg2[%c8_149, %c0_150, %c0_151] : memref<9x1x256xf32, #tpu.memory_space<vmem>>, vector<1x1x256xf32>
    %164 = vector.shape_cast %163 : vector<1x1x256xf32> to vector<1x256xf32>
    %165 = vector.broadcast %164 : vector<1x256xf32> to vector<8x256xf32>
    %166 = arith.mulf %162, %165 : vector<8x256xf32>
    %c8_152 = arith.constant 8 : index
    %c0_153 = arith.constant 0 : index
    %c0_154 = arith.constant 0 : index
    %167 = vector.load %arg8[%c8_152, %c0_153, %c0_154] : memref<9x8x8xf32, #tpu.memory_space<vmem>>, vector<1x8x8xf32>
    %168 = vector.shape_cast %167 : vector<1x8x8xf32> to vector<8x8xf32>
    %cst_155 = arith.constant dense<0.000000e+00> : vector<8x256xf32>
    %169 = tpu.matmul %168, %166, %cst_155 {dimension_numbers = #tpu.dot_dimension_numbers<[1], [0], [0], [1], [0, 0, 1, 1], [], []>} : vector<8x8xf32>, vector<8x256xf32>, vector<8x256xf32> -> vector<8x256xf32>
    %170 = arith.addf %161, %169 : vector<8x256xf32>
    %c0_156 = arith.constant 0 : index
    %c0_157 = arith.constant 0 : index
    %171 = vector.load %arg9[%c0_156, %c0_157] : memref<8x1xf32, #tpu.memory_space<vmem>>, vector<8x1xf32>
    %172 = vector.broadcast %171 : vector<8x1xf32> to vector<8x256xf32>
    %173 = arith.addf %170, %172 : vector<8x256xf32>
    %cst_158 = arith.constant 0.000000e+00 : f32
    %174 = vector.broadcast %cst_158 : f32 to vector<8x256xf32>
    %175 = arith.maximumf %173, %174 : vector<8x256xf32>
    %c0_159 = arith.constant 0 : index
    %c32_160 = arith.constant 32 : index
    %176 = vector.load %arg40[%c0_159, %c32_160] : memref<16x384xf32, #tpu.memory_space<vmem>>, vector<8x256xf32>
    tpu.vector_store %arg40[%c0_159, %c32_160], %175 {strides = array<i32>} : memref<16x384xf32, #tpu.memory_space<vmem>>, vector<8x256xf32>,
    %c0_161 = arith.constant 0 : index
    %c33_162 = arith.constant 33 : index
    %177 = vector.load %arg40[%c0_161, %c33_162] : memref<16x384xf32, #tpu.memory_space<vmem>>, vector<8x256xf32>
    %c0_163 = arith.constant 0 : index
    %c48_164 = arith.constant 48 : index
    %178 = vector.load %arg40[%c0_163, %c48_164] : memref<16x384xf32, #tpu.memory_space<vmem>>, vector<8x256xf32>
    %c0_165 = arith.constant 0 : index
    %c49_166 = arith.constant 49 : index
    %179 = vector.load %arg40[%c0_165, %c49_166] : memref<16x384xf32, #tpu.memory_space<vmem>>, vector<8x256xf32>
    %180 = arith.maximumf %175, %177 : vector<8x256xf32>
    %181 = arith.maximumf %178, %179 : vector<8x256xf32>
    %182 = arith.maximumf %180, %181 : vector<8x256xf32>
    %c0_167 = arith.constant 0 : index
    %c0_168 = arith.constant 0 : index
    %183 = vector.load %arg22[%c0_167, %c0_168] : memref<256x64xf32, #tpu.memory_space<vmem>>, vector<256x64xf32>
    %cst_169 = arith.constant dense<0.000000e+00> : vector<8x64xf32>
    %184 = tpu.matmul %182, %183, %cst_169 {dimension_numbers = #tpu.dot_dimension_numbers<[1], [0], [0], [1], [0, 0, 1, 1], [], []>} : vector<8x256xf32>, vector<256x64xf32>, vector<8x64xf32> -> vector<8x64xf32>
    %c0_170 = arith.constant 0 : index
    %c32_171 = arith.constant 32 : index
    %185 = vector.load %arg40[%c0_170, %c32_171] : memref<16x384xf32, #tpu.memory_space<vmem>>, vector<8x64xf32>
    tpu.vector_store %arg40[%c0_170, %c32_171], %184 {strides = array<i32>} : memref<16x384xf32, #tpu.memory_space<vmem>>, vector<8x64xf32>,
    %c0_172 = arith.constant 0 : index
    %c23 = arith.constant 23 : index
    %186 = vector.load %arg40[%c0_172, %c23] : memref<16x384xf32, #tpu.memory_space<vmem>>, vector<8x64xf32>
    %c0_173 = arith.constant 0 : index
    %c0_174 = arith.constant 0 : index
    %c0_175 = arith.constant 0 : index
    %187 = vector.load %arg3[%c0_173, %c0_174, %c0_175] : memref<9x1x64xf32, #tpu.memory_space<vmem>>, vector<1x1x64xf32>
    %188 = vector.shape_cast %187 : vector<1x1x64xf32> to vector<1x64xf32>
    %189 = vector.broadcast %188 : vector<1x64xf32> to vector<8x64xf32>
    %190 = arith.mulf %186, %189 : vector<8x64xf32>
    %c0_176 = arith.constant 0 : index
    %c0_177 = arith.constant 0 : index
    %c0_178 = arith.constant 0 : index
    %191 = vector.load %arg10[%c0_176, %c0_177, %c0_178] : memref<9x4x8xf32, #tpu.memory_space<vmem>>, vector<1x4x8xf32>
    %192 = vector.shape_cast %191 : vector<1x4x8xf32> to vector<4x8xf32>
    %cst_179 = arith.constant dense<0.000000e+00> : vector<4x64xf32>
    %193 = tpu.matmul %192, %190, %cst_179 {dimension_numbers = #tpu.dot_dimension_numbers<[1], [0], [0], [1], [0, 0, 1, 1], [], []>} : vector<4x8xf32>, vector<8x64xf32>, vector<4x64xf32> -> vector<4x64xf32>
    %c0_180 = arith.constant 0 : index
    %c24 = arith.constant 24 : index
    %194 = vector.load %arg40[%c0_180, %c24] : memref<16x384xf32, #tpu.memory_space<vmem>>, vector<8x64xf32>
    %c1_181 = arith.constant 1 : index
    %c0_182 = arith.constant 0 : index
    %c0_183 = arith.constant 0 : index
    %195 = vector.load %arg3[%c1_181, %c0_182, %c0_183] : memref<9x1x64xf32, #tpu.memory_space<vmem>>, vector<1x1x64xf32>
    %196 = vector.shape_cast %195 : vector<1x1x64xf32> to vector<1x64xf32>
    %197 = vector.broadcast %196 : vector<1x64xf32> to vector<8x64xf32>
    %198 = arith.mulf %194, %197 : vector<8x64xf32>
    %c1_184 = arith.constant 1 : index
    %c0_185 = arith.constant 0 : index
    %c0_186 = arith.constant 0 : index
    %199 = vector.load %arg10[%c1_184, %c0_185, %c0_186] : memref<9x4x8xf32, #tpu.memory_space<vmem>>, vector<1x4x8xf32>
    %200 = vector.shape_cast %199 : vector<1x4x8xf32> to vector<4x8xf32>
    %cst_187 = arith.constant dense<0.000000e+00> : vector<4x64xf32>
    %201 = tpu.matmul %200, %198, %cst_187 {dimension_numbers = #tpu.dot_dimension_numbers<[1], [0], [0], [1], [0, 0, 1, 1], [], []>} : vector<4x8xf32>, vector<8x64xf32>, vector<4x64xf32> -> vector<4x64xf32>
    %202 = arith.addf %193, %201 : vector<4x64xf32>
    %c0_188 = arith.constant 0 : index
    %c25 = arith.constant 25 : index
    %203 = vector.load %arg40[%c0_188, %c25] : memref<16x384xf32, #tpu.memory_space<vmem>>, vector<8x64xf32>
    %c2_189 = arith.constant 2 : index
    %c0_190 = arith.constant 0 : index
    %c0_191 = arith.constant 0 : index
    %204 = vector.load %arg3[%c2_189, %c0_190, %c0_191] : memref<9x1x64xf32, #tpu.memory_space<vmem>>, vector<1x1x64xf32>
    %205 = vector.shape_cast %204 : vector<1x1x64xf32> to vector<1x64xf32>
    %206 = vector.broadcast %205 : vector<1x64xf32> to vector<8x64xf32>
    %207 = arith.mulf %203, %206 : vector<8x64xf32>
    %c2_192 = arith.constant 2 : index
    %c0_193 = arith.constant 0 : index
    %c0_194 = arith.constant 0 : index
    %208 = vector.load %arg10[%c2_192, %c0_193, %c0_194] : memref<9x4x8xf32, #tpu.memory_space<vmem>>, vector<1x4x8xf32>
    %209 = vector.shape_cast %208 : vector<1x4x8xf32> to vector<4x8xf32>
    %cst_195 = arith.constant dense<0.000000e+00> : vector<4x64xf32>
    %210 = tpu.matmul %209, %207, %cst_195 {dimension_numbers = #tpu.dot_dimension_numbers<[1], [0], [0], [1], [0, 0, 1, 1], [], []>} : vector<4x8xf32>, vector<8x64xf32>, vector<4x64xf32> -> vector<4x64xf32>
    %211 = arith.addf %202, %210 : vector<4x64xf32>
    %c0_196 = arith.constant 0 : index
    %c31_197 = arith.constant 31 : index
    %212 = vector.load %arg40[%c0_196, %c31_197] : memref<16x384xf32, #tpu.memory_space<vmem>>, vector<8x64xf32>
    %c3_198 = arith.constant 3 : index
    %c0_199 = arith.constant 0 : index
    %c0_200 = arith.constant 0 : index
    %213 = vector.load %arg3[%c3_198, %c0_199, %c0_200] : memref<9x1x64xf32, #tpu.memory_space<vmem>>, vector<1x1x64xf32>
    %214 = vector.shape_cast %213 : vector<1x1x64xf32> to vector<1x64xf32>
    %215 = vector.broadcast %214 : vector<1x64xf32> to vector<8x64xf32>
    %216 = arith.mulf %212, %215 : vector<8x64xf32>
    %c3_201 = arith.constant 3 : index
    %c0_202 = arith.constant 0 : index
    %c0_203 = arith.constant 0 : index
    %217 = vector.load %arg10[%c3_201, %c0_202, %c0_203] : memref<9x4x8xf32, #tpu.memory_space<vmem>>, vector<1x4x8xf32>
    %218 = vector.shape_cast %217 : vector<1x4x8xf32> to vector<4x8xf32>
    %cst_204 = arith.constant dense<0.000000e+00> : vector<4x64xf32>
    %219 = tpu.matmul %218, %216, %cst_204 {dimension_numbers = #tpu.dot_dimension_numbers<[1], [0], [0], [1], [0, 0, 1, 1], [], []>} : vector<4x8xf32>, vector<8x64xf32>, vector<4x64xf32> -> vector<4x64xf32>
    %220 = arith.addf %211, %219 : vector<4x64xf32>
    %c0_205 = arith.constant 0 : index
    %c32_206 = arith.constant 32 : index
    %221 = vector.load %arg40[%c0_205, %c32_206] : memref<16x384xf32, #tpu.memory_space<vmem>>, vector<8x64xf32>
    %c4_207 = arith.constant 4 : index
    %c0_208 = arith.constant 0 : index
    %c0_209 = arith.constant 0 : index
    %222 = vector.load %arg3[%c4_207, %c0_208, %c0_209] : memref<9x1x64xf32, #tpu.memory_space<vmem>>, vector<1x1x64xf32>
    %223 = vector.shape_cast %222 : vector<1x1x64xf32> to vector<1x64xf32>
    %224 = vector.broadcast %223 : vector<1x64xf32> to vector<8x64xf32>
    %225 = arith.mulf %221, %224 : vector<8x64xf32>
    %c4_210 = arith.constant 4 : index
    %c0_211 = arith.constant 0 : index
    %c0_212 = arith.constant 0 : index
    %226 = vector.load %arg10[%c4_210, %c0_211, %c0_212] : memref<9x4x8xf32, #tpu.memory_space<vmem>>, vector<1x4x8xf32>
    %227 = vector.shape_cast %226 : vector<1x4x8xf32> to vector<4x8xf32>
    %cst_213 = arith.constant dense<0.000000e+00> : vector<4x64xf32>
    %228 = tpu.matmul %227, %225, %cst_213 {dimension_numbers = #tpu.dot_dimension_numbers<[1], [0], [0], [1], [0, 0, 1, 1], [], []>} : vector<4x8xf32>, vector<8x64xf32>, vector<4x64xf32> -> vector<4x64xf32>
    %229 = arith.addf %220, %228 : vector<4x64xf32>
    %c0_214 = arith.constant 0 : index
    %c33_215 = arith.constant 33 : index
    %230 = vector.load %arg40[%c0_214, %c33_215] : memref<16x384xf32, #tpu.memory_space<vmem>>, vector<8x64xf32>
    %c5_216 = arith.constant 5 : index
    %c0_217 = arith.constant 0 : index
    %c0_218 = arith.constant 0 : index
    %231 = vector.load %arg3[%c5_216, %c0_217, %c0_218] : memref<9x1x64xf32, #tpu.memory_space<vmem>>, vector<1x1x64xf32>
    %232 = vector.shape_cast %231 : vector<1x1x64xf32> to vector<1x64xf32>
    %233 = vector.broadcast %232 : vector<1x64xf32> to vector<8x64xf32>
    %234 = arith.mulf %230, %233 : vector<8x64xf32>
    %c5_219 = arith.constant 5 : index
    %c0_220 = arith.constant 0 : index
    %c0_221 = arith.constant 0 : index
    %235 = vector.load %arg10[%c5_219, %c0_220, %c0_221] : memref<9x4x8xf32, #tpu.memory_space<vmem>>, vector<1x4x8xf32>
    %236 = vector.shape_cast %235 : vector<1x4x8xf32> to vector<4x8xf32>
    %cst_222 = arith.constant dense<0.000000e+00> : vector<4x64xf32>
    %237 = tpu.matmul %236, %234, %cst_222 {dimension_numbers = #tpu.dot_dimension_numbers<[1], [0], [0], [1], [0, 0, 1, 1], [], []>} : vector<4x8xf32>, vector<8x64xf32>, vector<4x64xf32> -> vector<4x64xf32>
    %238 = arith.addf %229, %237 : vector<4x64xf32>
    %c0_223 = arith.constant 0 : index
    %c39 = arith.constant 39 : index
    %239 = vector.load %arg40[%c0_223, %c39] : memref<16x384xf32, #tpu.memory_space<vmem>>, vector<8x64xf32>
    %c6_224 = arith.constant 6 : index
    %c0_225 = arith.constant 0 : index
    %c0_226 = arith.constant 0 : index
    %240 = vector.load %arg3[%c6_224, %c0_225, %c0_226] : memref<9x1x64xf32, #tpu.memory_space<vmem>>, vector<1x1x64xf32>
    %241 = vector.shape_cast %240 : vector<1x1x64xf32> to vector<1x64xf32>
    %242 = vector.broadcast %241 : vector<1x64xf32> to vector<8x64xf32>
    %243 = arith.mulf %239, %242 : vector<8x64xf32>
    %c6_227 = arith.constant 6 : index
    %c0_228 = arith.constant 0 : index
    %c0_229 = arith.constant 0 : index
    %244 = vector.load %arg10[%c6_227, %c0_228, %c0_229] : memref<9x4x8xf32, #tpu.memory_space<vmem>>, vector<1x4x8xf32>
    %245 = vector.shape_cast %244 : vector<1x4x8xf32> to vector<4x8xf32>
    %cst_230 = arith.constant dense<0.000000e+00> : vector<4x64xf32>
    %246 = tpu.matmul %245, %243, %cst_230 {dimension_numbers = #tpu.dot_dimension_numbers<[1], [0], [0], [1], [0, 0, 1, 1], [], []>} : vector<4x8xf32>, vector<8x64xf32>, vector<4x64xf32> -> vector<4x64xf32>
    %247 = arith.addf %238, %246 : vector<4x64xf32>
    %c0_231 = arith.constant 0 : index
    %c40 = arith.constant 40 : index
    %248 = vector.load %arg40[%c0_231, %c40] : memref<16x384xf32, #tpu.memory_space<vmem>>, vector<8x64xf32>
    %c7_232 = arith.constant 7 : index
    %c0_233 = arith.constant 0 : index
    %c0_234 = arith.constant 0 : index
    %249 = vector.load %arg3[%c7_232, %c0_233, %c0_234] : memref<9x1x64xf32, #tpu.memory_space<vmem>>, vector<1x1x64xf32>
    %250 = vector.shape_cast %249 : vector<1x1x64xf32> to vector<1x64xf32>
    %251 = vector.broadcast %250 : vector<1x64xf32> to vector<8x64xf32>
    %252 = arith.mulf %248, %251 : vector<8x64xf32>
    %c7_235 = arith.constant 7 : index
    %c0_236 = arith.constant 0 : index
    %c0_237 = arith.constant 0 : index
    %253 = vector.load %arg10[%c7_235, %c0_236, %c0_237] : memref<9x4x8xf32, #tpu.memory_space<vmem>>, vector<1x4x8xf32>
    %254 = vector.shape_cast %253 : vector<1x4x8xf32> to vector<4x8xf32>
    %cst_238 = arith.constant dense<0.000000e+00> : vector<4x64xf32>
    %255 = tpu.matmul %254, %252, %cst_238 {dimension_numbers = #tpu.dot_dimension_numbers<[1], [0], [0], [1], [0, 0, 1, 1], [], []>} : vector<4x8xf32>, vector<8x64xf32>, vector<4x64xf32> -> vector<4x64xf32>
    %256 = arith.addf %247, %255 : vector<4x64xf32>
    %c0_239 = arith.constant 0 : index
    %c41 = arith.constant 41 : index
    %257 = vector.load %arg40[%c0_239, %c41] : memref<16x384xf32, #tpu.memory_space<vmem>>, vector<8x64xf32>
    %c8_240 = arith.constant 8 : index
    %c0_241 = arith.constant 0 : index
    %c0_242 = arith.constant 0 : index
    %258 = vector.load %arg3[%c8_240, %c0_241, %c0_242] : memref<9x1x64xf32, #tpu.memory_space<vmem>>, vector<1x1x64xf32>
    %259 = vector.shape_cast %258 : vector<1x1x64xf32> to vector<1x64xf32>
    %260 = vector.broadcast %259 : vector<1x64xf32> to vector<8x64xf32>
    %261 = arith.mulf %257, %260 : vector<8x64xf32>
    %c8_243 = arith.constant 8 : index
    %c0_244 = arith.constant 0 : index
    %c0_245 = arith.constant 0 : index
    %262 = vector.load %arg10[%c8_243, %c0_244, %c0_245] : memref<9x4x8xf32, #tpu.memory_space<vmem>>, vector<1x4x8xf32>
    %263 = vector.shape_cast %262 : vector<1x4x8xf32> to vector<4x8xf32>
    %cst_246 = arith.constant dense<0.000000e+00> : vector<4x64xf32>
    %264 = tpu.matmul %263, %261, %cst_246 {dimension_numbers = #tpu.dot_dimension_numbers<[1], [0], [0], [1], [0, 0, 1, 1], [], []>} : vector<4x8xf32>, vector<8x64xf32>, vector<4x64xf32> -> vector<4x64xf32>
    %265 = arith.addf %256, %264 : vector<4x64xf32>
    %c0_247 = arith.constant 0 : index
    %c0_248 = arith.constant 0 : index
    %266 = vector.load %arg11[%c0_247, %c0_248] : memref<4x1xf32, #tpu.memory_space<vmem>>, vector<4x1xf32>
    %267 = vector.broadcast %266 : vector<4x1xf32> to vector<4x64xf32>
    %268 = arith.addf %265, %267 : vector<4x64xf32>
    %cst_249 = arith.constant 0.000000e+00 : f32
    %269 = vector.broadcast %cst_249 : f32 to vector<4x64xf32>
    %270 = arith.maximumf %268, %269 : vector<4x64xf32>
    %c0_250 = arith.constant 0 : index
    %c32_251 = arith.constant 32 : index
    %271 = vector.load %arg40[%c0_250, %c32_251] : memref<16x384xf32, #tpu.memory_space<vmem>>, vector<4x64xf32>
    tpu.vector_store %arg40[%c0_250, %c32_251], %270 {strides = array<i32>} : memref<16x384xf32, #tpu.memory_space<vmem>>, vector<4x64xf32>,
    %c0_252 = arith.constant 0 : index
    %c23_253 = arith.constant 23 : index
    %272 = vector.load %arg40[%c0_252, %c23_253] : memref<16x384xf32, #tpu.memory_space<vmem>>, vector<4x64xf32>
    %c0_254 = arith.constant 0 : index
    %c0_255 = arith.constant 0 : index
    %c0_256 = arith.constant 0 : index
    %273 = vector.load %arg3[%c0_254, %c0_255, %c0_256] : memref<9x1x64xf32, #tpu.memory_space<vmem>>, vector<1x1x64xf32>
    %274 = vector.shape_cast %273 : vector<1x1x64xf32> to vector<1x64xf32>
    %275 = vector.broadcast %274 : vector<1x64xf32> to vector<4x64xf32>
    %276 = arith.mulf %272, %275 : vector<4x64xf32>
    %c0_257 = arith.constant 0 : index
    %c0_258 = arith.constant 0 : index
    %c0_259 = arith.constant 0 : index
    %277 = vector.load %arg12[%c0_257, %c0_258, %c0_259] : memref<9x4x4xf32, #tpu.memory_space<vmem>>, vector<1x4x4xf32>
    %278 = vector.shape_cast %277 : vector<1x4x4xf32> to vector<4x4xf32>
    %cst_260 = arith.constant dense<0.000000e+00> : vector<4x64xf32>
    %279 = tpu.matmul %278, %276, %cst_260 {dimension_numbers = #tpu.dot_dimension_numbers<[1], [0], [0], [1], [0, 0, 1, 1], [], []>} : vector<4x4xf32>, vector<4x64xf32>, vector<4x64xf32> -> vector<4x64xf32>
    %c0_261 = arith.constant 0 : index
    %c24_262 = arith.constant 24 : index
    %280 = vector.load %arg40[%c0_261, %c24_262] : memref<16x384xf32, #tpu.memory_space<vmem>>, vector<4x64xf32>
    %c1_263 = arith.constant 1 : index
    %c0_264 = arith.constant 0 : index
    %c0_265 = arith.constant 0 : index
    %281 = vector.load %arg3[%c1_263, %c0_264, %c0_265] : memref<9x1x64xf32, #tpu.memory_space<vmem>>, vector<1x1x64xf32>
    %282 = vector.shape_cast %281 : vector<1x1x64xf32> to vector<1x64xf32>
    %283 = vector.broadcast %282 : vector<1x64xf32> to vector<4x64xf32>
    %284 = arith.mulf %280, %283 : vector<4x64xf32>
    %c1_266 = arith.constant 1 : index
    %c0_267 = arith.constant 0 : index
    %c0_268 = arith.constant 0 : index
    %285 = vector.load %arg12[%c1_266, %c0_267, %c0_268] : memref<9x4x4xf32, #tpu.memory_space<vmem>>, vector<1x4x4xf32>
    %286 = vector.shape_cast %285 : vector<1x4x4xf32> to vector<4x4xf32>
    %cst_269 = arith.constant dense<0.000000e+00> : vector<4x64xf32>
    %287 = tpu.matmul %286, %284, %cst_269 {dimension_numbers = #tpu.dot_dimension_numbers<[1], [0], [0], [1], [0, 0, 1, 1], [], []>} : vector<4x4xf32>, vector<4x64xf32>, vector<4x64xf32> -> vector<4x64xf32>
    %288 = arith.addf %279, %287 : vector<4x64xf32>
    %c0_270 = arith.constant 0 : index
    %c25_271 = arith.constant 25 : index
    %289 = vector.load %arg40[%c0_270, %c25_271] : memref<16x384xf32, #tpu.memory_space<vmem>>, vector<4x64xf32>
    %c2_272 = arith.constant 2 : index
    %c0_273 = arith.constant 0 : index
    %c0_274 = arith.constant 0 : index
    %290 = vector.load %arg3[%c2_272, %c0_273, %c0_274] : memref<9x1x64xf32, #tpu.memory_space<vmem>>, vector<1x1x64xf32>
    %291 = vector.shape_cast %290 : vector<1x1x64xf32> to vector<1x64xf32>
    %292 = vector.broadcast %291 : vector<1x64xf32> to vector<4x64xf32>
    %293 = arith.mulf %289, %292 : vector<4x64xf32>
    %c2_275 = arith.constant 2 : index
    %c0_276 = arith.constant 0 : index
    %c0_277 = arith.constant 0 : index
    %294 = vector.load %arg12[%c2_275, %c0_276, %c0_277] : memref<9x4x4xf32, #tpu.memory_space<vmem>>, vector<1x4x4xf32>
    %295 = vector.shape_cast %294 : vector<1x4x4xf32> to vector<4x4xf32>
    %cst_278 = arith.constant dense<0.000000e+00> : vector<4x64xf32>
    %296 = tpu.matmul %295, %293, %cst_278 {dimension_numbers = #tpu.dot_dimension_numbers<[1], [0], [0], [1], [0, 0, 1, 1], [], []>} : vector<4x4xf32>, vector<4x64xf32>, vector<4x64xf32> -> vector<4x64xf32>
    %297 = arith.addf %288, %296 : vector<4x64xf32>
    %c0_279 = arith.constant 0 : index
    %c31_280 = arith.constant 31 : index
    %298 = vector.load %arg40[%c0_279, %c31_280] : memref<16x384xf32, #tpu.memory_space<vmem>>, vector<4x64xf32>
    %c3_281 = arith.constant 3 : index
    %c0_282 = arith.constant 0 : index
    %c0_283 = arith.constant 0 : index
    %299 = vector.load %arg3[%c3_281, %c0_282, %c0_283] : memref<9x1x64xf32, #tpu.memory_space<vmem>>, vector<1x1x64xf32>
    %300 = vector.shape_cast %299 : vector<1x1x64xf32> to vector<1x64xf32>
    %301 = vector.broadcast %300 : vector<1x64xf32> to vector<4x64xf32>
    %302 = arith.mulf %298, %301 : vector<4x64xf32>
    %c3_284 = arith.constant 3 : index
    %c0_285 = arith.constant 0 : index
    %c0_286 = arith.constant 0 : index
    %303 = vector.load %arg12[%c3_284, %c0_285, %c0_286] : memref<9x4x4xf32, #tpu.memory_space<vmem>>, vector<1x4x4xf32>
    %304 = vector.shape_cast %303 : vector<1x4x4xf32> to vector<4x4xf32>
    %cst_287 = arith.constant dense<0.000000e+00> : vector<4x64xf32>
    %305 = tpu.matmul %304, %302, %cst_287 {dimension_numbers = #tpu.dot_dimension_numbers<[1], [0], [0], [1], [0, 0, 1, 1], [], []>} : vector<4x4xf32>, vector<4x64xf32>, vector<4x64xf32> -> vector<4x64xf32>
    %306 = arith.addf %297, %305 : vector<4x64xf32>
    %c0_288 = arith.constant 0 : index
    %c32_289 = arith.constant 32 : index
    %307 = vector.load %arg40[%c0_288, %c32_289] : memref<16x384xf32, #tpu.memory_space<vmem>>, vector<4x64xf32>
    %c4_290 = arith.constant 4 : index
    %c0_291 = arith.constant 0 : index
    %c0_292 = arith.constant 0 : index
    %308 = vector.load %arg3[%c4_290, %c0_291, %c0_292] : memref<9x1x64xf32, #tpu.memory_space<vmem>>, vector<1x1x64xf32>
    %309 = vector.shape_cast %308 : vector<1x1x64xf32> to vector<1x64xf32>
    %310 = vector.broadcast %309 : vector<1x64xf32> to vector<4x64xf32>
    %311 = arith.mulf %307, %310 : vector<4x64xf32>
    %c4_293 = arith.constant 4 : index
    %c0_294 = arith.constant 0 : index
    %c0_295 = arith.constant 0 : index
    %312 = vector.load %arg12[%c4_293, %c0_294, %c0_295] : memref<9x4x4xf32, #tpu.memory_space<vmem>>, vector<1x4x4xf32>
    %313 = vector.shape_cast %312 : vector<1x4x4xf32> to vector<4x4xf32>
    %cst_296 = arith.constant dense<0.000000e+00> : vector<4x64xf32>
    %314 = tpu.matmul %313, %311, %cst_296 {dimension_numbers = #tpu.dot_dimension_numbers<[1], [0], [0], [1], [0, 0, 1, 1], [], []>} : vector<4x4xf32>, vector<4x64xf32>, vector<4x64xf32> -> vector<4x64xf32>
    %315 = arith.addf %306, %314 : vector<4x64xf32>
    %c0_297 = arith.constant 0 : index
    %c33_298 = arith.constant 33 : index
    %316 = vector.load %arg40[%c0_297, %c33_298] : memref<16x384xf32, #tpu.memory_space<vmem>>, vector<4x64xf32>
    %c5_299 = arith.constant 5 : index
    %c0_300 = arith.constant 0 : index
    %c0_301 = arith.constant 0 : index
    %317 = vector.load %arg3[%c5_299, %c0_300, %c0_301] : memref<9x1x64xf32, #tpu.memory_space<vmem>>, vector<1x1x64xf32>
    %318 = vector.shape_cast %317 : vector<1x1x64xf32> to vector<1x64xf32>
    %319 = vector.broadcast %318 : vector<1x64xf32> to vector<4x64xf32>
    %320 = arith.mulf %316, %319 : vector<4x64xf32>
    %c5_302 = arith.constant 5 : index
    %c0_303 = arith.constant 0 : index
    %c0_304 = arith.constant 0 : index
    %321 = vector.load %arg12[%c5_302, %c0_303, %c0_304] : memref<9x4x4xf32, #tpu.memory_space<vmem>>, vector<1x4x4xf32>
    %322 = vector.shape_cast %321 : vector<1x4x4xf32> to vector<4x4xf32>
    %cst_305 = arith.constant dense<0.000000e+00> : vector<4x64xf32>
    %323 = tpu.matmul %322, %320, %cst_305 {dimension_numbers = #tpu.dot_dimension_numbers<[1], [0], [0], [1], [0, 0, 1, 1], [], []>} : vector<4x4xf32>, vector<4x64xf32>, vector<4x64xf32> -> vector<4x64xf32>
    %324 = arith.addf %315, %323 : vector<4x64xf32>
    %c0_306 = arith.constant 0 : index
    %c39_307 = arith.constant 39 : index
    %325 = vector.load %arg40[%c0_306, %c39_307] : memref<16x384xf32, #tpu.memory_space<vmem>>, vector<4x64xf32>
    %c6_308 = arith.constant 6 : index
    %c0_309 = arith.constant 0 : index
    %c0_310 = arith.constant 0 : index
    %326 = vector.load %arg3[%c6_308, %c0_309, %c0_310] : memref<9x1x64xf32, #tpu.memory_space<vmem>>, vector<1x1x64xf32>
    %327 = vector.shape_cast %326 : vector<1x1x64xf32> to vector<1x64xf32>
    %328 = vector.broadcast %327 : vector<1x64xf32> to vector<4x64xf32>
    %329 = arith.mulf %325, %328 : vector<4x64xf32>
    %c6_311 = arith.constant 6 : index
    %c0_312 = arith.constant 0 : index
    %c0_313 = arith.constant 0 : index
    %330 = vector.load %arg12[%c6_311, %c0_312, %c0_313] : memref<9x4x4xf32, #tpu.memory_space<vmem>>, vector<1x4x4xf32>
    %331 = vector.shape_cast %330 : vector<1x4x4xf32> to vector<4x4xf32>
    %cst_314 = arith.constant dense<0.000000e+00> : vector<4x64xf32>
    %332 = tpu.matmul %331, %329, %cst_314 {dimension_numbers = #tpu.dot_dimension_numbers<[1], [0], [0], [1], [0, 0, 1, 1], [], []>} : vector<4x4xf32>, vector<4x64xf32>, vector<4x64xf32> -> vector<4x64xf32>
    %333 = arith.addf %324, %332 : vector<4x64xf32>
    %c0_315 = arith.constant 0 : index
    %c40_316 = arith.constant 40 : index
    %334 = vector.load %arg40[%c0_315, %c40_316] : memref<16x384xf32, #tpu.memory_space<vmem>>, vector<4x64xf32>
    %c7_317 = arith.constant 7 : index
    %c0_318 = arith.constant 0 : index
    %c0_319 = arith.constant 0 : index
    %335 = vector.load %arg3[%c7_317, %c0_318, %c0_319] : memref<9x1x64xf32, #tpu.memory_space<vmem>>, vector<1x1x64xf32>
    %336 = vector.shape_cast %335 : vector<1x1x64xf32> to vector<1x64xf32>
    %337 = vector.broadcast %336 : vector<1x64xf32> to vector<4x64xf32>
    %338 = arith.mulf %334, %337 : vector<4x64xf32>
    %c7_320 = arith.constant 7 : index
    %c0_321 = arith.constant 0 : index
    %c0_322 = arith.constant 0 : index
    %339 = vector.load %arg12[%c7_320, %c0_321, %c0_322] : memref<9x4x4xf32, #tpu.memory_space<vmem>>, vector<1x4x4xf32>
    %340 = vector.shape_cast %339 : vector<1x4x4xf32> to vector<4x4xf32>
    %cst_323 = arith.constant dense<0.000000e+00> : vector<4x64xf32>
    %341 = tpu.matmul %340, %338, %cst_323 {dimension_numbers = #tpu.dot_dimension_numbers<[1], [0], [0], [1], [0, 0, 1, 1], [], []>} : vector<4x4xf32>, vector<4x64xf32>, vector<4x64xf32> -> vector<4x64xf32>
    %342 = arith.addf %333, %341 : vector<4x64xf32>
    %c0_324 = arith.constant 0 : index
    %c41_325 = arith.constant 41 : index
    %343 = vector.load %arg40[%c0_324, %c41_325] : memref<16x384xf32, #tpu.memory_space<vmem>>, vector<4x64xf32>
    %c8_326 = arith.constant 8 : index
    %c0_327 = arith.constant 0 : index
    %c0_328 = arith.constant 0 : index
    %344 = vector.load %arg3[%c8_326, %c0_327, %c0_328] : memref<9x1x64xf32, #tpu.memory_space<vmem>>, vector<1x1x64xf32>
    %345 = vector.shape_cast %344 : vector<1x1x64xf32> to vector<1x64xf32>
    %346 = vector.broadcast %345 : vector<1x64xf32> to vector<4x64xf32>
    %347 = arith.mulf %343, %346 : vector<4x64xf32>
    %c8_329 = arith.constant 8 : index
    %c0_330 = arith.constant 0 : index
    %c0_331 = arith.constant 0 : index
    %348 = vector.load %arg12[%c8_329, %c0_330, %c0_331] : memref<9x4x4xf32, #tpu.memory_space<vmem>>, vector<1x4x4xf32>
    %349 = vector.shape_cast %348 : vector<1x4x4xf32> to vector<4x4xf32>
    %cst_332 = arith.constant dense<0.000000e+00> : vector<4x64xf32>
    %350 = tpu.matmul %349, %347, %cst_332 {dimension_numbers = #tpu.dot_dimension_numbers<[1], [0], [0], [1], [0, 0, 1, 1], [], []>} : vector<4x4xf32>, vector<4x64xf32>, vector<4x64xf32> -> vector<4x64xf32>
    %351 = arith.addf %342, %350 : vector<4x64xf32>
    %c0_333 = arith.constant 0 : index
    %c0_334 = arith.constant 0 : index
    %352 = vector.load %arg13[%c0_333, %c0_334] : memref<4x1xf32, #tpu.memory_space<vmem>>, vector<4x1xf32>
    %353 = vector.broadcast %352 : vector<4x1xf32> to vector<4x64xf32>
    %354 = arith.addf %351, %353 : vector<4x64xf32>
    %cst_335 = arith.constant 0.000000e+00 : f32
    %355 = vector.broadcast %cst_335 : f32 to vector<4x64xf32>
    %356 = arith.maximumf %354, %355 : vector<4x64xf32>
    %c0_336 = arith.constant 0 : index
    %c32_337 = arith.constant 32 : index
    %357 = vector.load %arg40[%c0_336, %c32_337] : memref<16x384xf32, #tpu.memory_space<vmem>>, vector<4x64xf32>
    tpu.vector_store %arg40[%c0_336, %c32_337], %356 {strides = array<i32>} : memref<16x384xf32, #tpu.memory_space<vmem>>, vector<4x64xf32>,
    %c0_338 = arith.constant 0 : index
    %c33_339 = arith.constant 33 : index
    %358 = vector.load %arg40[%c0_338, %c33_339] : memref<16x384xf32, #tpu.memory_space<vmem>>, vector<4x64xf32>
    %c0_340 = arith.constant 0 : index
    %c40_341 = arith.constant 40 : index
    %359 = vector.load %arg40[%c0_340, %c40_341] : memref<16x384xf32, #tpu.memory_space<vmem>>, vector<4x64xf32>
    %c0_342 = arith.constant 0 : index
    %c41_343 = arith.constant 41 : index
    %360 = vector.load %arg40[%c0_342, %c41_343] : memref<16x384xf32, #tpu.memory_space<vmem>>, vector<4x64xf32>
    %361 = arith.maximumf %356, %358 : vector<4x64xf32>
    %362 = arith.maximumf %359, %360 : vector<4x64xf32>
    %363 = arith.maximumf %361, %362 : vector<4x64xf32>
    %c0_344 = arith.constant 0 : index
    %c0_345 = arith.constant 0 : index
    %364 = vector.load %arg23[%c0_344, %c0_345] : memref<64x16xf32, #tpu.memory_space<vmem>>, vector<64x16xf32>
    %cst_346 = arith.constant dense<0.000000e+00> : vector<4x16xf32>
    %365 = tpu.matmul %363, %364, %cst_346 {dimension_numbers = #tpu.dot_dimension_numbers<[1], [0], [0], [1], [0, 0, 1, 1], [], []>} : vector<4x64xf32>, vector<64x16xf32>, vector<4x16xf32> -> vector<4x16xf32>
    %c0_347 = arith.constant 0 : index
    %c32_348 = arith.constant 32 : index
    %366 = vector.load %arg40[%c0_347, %c32_348] : memref<16x384xf32, #tpu.memory_space<vmem>>, vector<4x16xf32>
    tpu.vector_store %arg40[%c0_347, %c32_348], %365 {strides = array<i32>} : memref<16x384xf32, #tpu.memory_space<vmem>>, vector<4x16xf32>,
    %c0_349 = arith.constant 0 : index
    %c27 = arith.constant 27 : index
    %367 = vector.load %arg40[%c0_349, %c27] : memref<16x384xf32, #tpu.memory_space<vmem>>, vector<4x16xf32>
    %c0_350 = arith.constant 0 : index
    %c0_351 = arith.constant 0 : index
    %c0_352 = arith.constant 0 : index
    %368 = vector.load %arg4[%c0_350, %c0_351, %c0_352] : memref<9x1x16xf32, #tpu.memory_space<vmem>>, vector<1x1x16xf32>
    %369 = vector.shape_cast %368 : vector<1x1x16xf32> to vector<1x16xf32>
    %370 = vector.broadcast %369 : vector<1x16xf32> to vector<4x16xf32>
    %371 = arith.mulf %367, %370 : vector<4x16xf32>
    %c0_353 = arith.constant 0 : index
    %c0_354 = arith.constant 0 : index
    %c0_355 = arith.constant 0 : index
    %372 = vector.load %arg14[%c0_353, %c0_354, %c0_355] : memref<9x2x4xf32, #tpu.memory_space<vmem>>, vector<1x2x4xf32>
    %373 = vector.shape_cast %372 : vector<1x2x4xf32> to vector<2x4xf32>
    %cst_356 = arith.constant dense<0.000000e+00> : vector<2x16xf32>
    %374 = tpu.matmul %373, %371, %cst_356 {dimension_numbers = #tpu.dot_dimension_numbers<[1], [0], [0], [1], [0, 0, 1, 1], [], []>} : vector<2x4xf32>, vector<4x16xf32>, vector<2x16xf32> -> vector<2x16xf32>
    %c0_357 = arith.constant 0 : index
    %c28 = arith.constant 28 : index
    %375 = vector.load %arg40[%c0_357, %c28] : memref<16x384xf32, #tpu.memory_space<vmem>>, vector<4x16xf32>
    %c1_358 = arith.constant 1 : index
    %c0_359 = arith.constant 0 : index
    %c0_360 = arith.constant 0 : index
    %376 = vector.load %arg4[%c1_358, %c0_359, %c0_360] : memref<9x1x16xf32, #tpu.memory_space<vmem>>, vector<1x1x16xf32>
    %377 = vector.shape_cast %376 : vector<1x1x16xf32> to vector<1x16xf32>
    %378 = vector.broadcast %377 : vector<1x16xf32> to vector<4x16xf32>
    %379 = arith.mulf %375, %378 : vector<4x16xf32>
    %c1_361 = arith.constant 1 : index
    %c0_362 = arith.constant 0 : index
    %c0_363 = arith.constant 0 : index
    %380 = vector.load %arg14[%c1_361, %c0_362, %c0_363] : memref<9x2x4xf32, #tpu.memory_space<vmem>>, vector<1x2x4xf32>
    %381 = vector.shape_cast %380 : vector<1x2x4xf32> to vector<2x4xf32>
    %cst_364 = arith.constant dense<0.000000e+00> : vector<2x16xf32>
    %382 = tpu.matmul %381, %379, %cst_364 {dimension_numbers = #tpu.dot_dimension_numbers<[1], [0], [0], [1], [0, 0, 1, 1], [], []>} : vector<2x4xf32>, vector<4x16xf32>, vector<2x16xf32> -> vector<2x16xf32>
    %383 = arith.addf %374, %382 : vector<2x16xf32>
    %c0_365 = arith.constant 0 : index
    %c29 = arith.constant 29 : index
    %384 = vector.load %arg40[%c0_365, %c29] : memref<16x384xf32, #tpu.memory_space<vmem>>, vector<4x16xf32>
    %c2_366 = arith.constant 2 : index
    %c0_367 = arith.constant 0 : index
    %c0_368 = arith.constant 0 : index
    %385 = vector.load %arg4[%c2_366, %c0_367, %c0_368] : memref<9x1x16xf32, #tpu.memory_space<vmem>>, vector<1x1x16xf32>
    %386 = vector.shape_cast %385 : vector<1x1x16xf32> to vector<1x16xf32>
    %387 = vector.broadcast %386 : vector<1x16xf32> to vector<4x16xf32>
    %388 = arith.mulf %384, %387 : vector<4x16xf32>
    %c2_369 = arith.constant 2 : index
    %c0_370 = arith.constant 0 : index
    %c0_371 = arith.constant 0 : index
    %389 = vector.load %arg14[%c2_369, %c0_370, %c0_371] : memref<9x2x4xf32, #tpu.memory_space<vmem>>, vector<1x2x4xf32>
    %390 = vector.shape_cast %389 : vector<1x2x4xf32> to vector<2x4xf32>
    %cst_372 = arith.constant dense<0.000000e+00> : vector<2x16xf32>
    %391 = tpu.matmul %390, %388, %cst_372 {dimension_numbers = #tpu.dot_dimension_numbers<[1], [0], [0], [1], [0, 0, 1, 1], [], []>} : vector<2x4xf32>, vector<4x16xf32>, vector<2x16xf32> -> vector<2x16xf32>
    %392 = arith.addf %383, %391 : vector<2x16xf32>
    %c0_373 = arith.constant 0 : index
    %c31_374 = arith.constant 31 : index
    %393 = vector.load %arg40[%c0_373, %c31_374] : memref<16x384xf32, #tpu.memory_space<vmem>>, vector<4x16xf32>
    %c3_375 = arith.constant 3 : index
    %c0_376 = arith.constant 0 : index
    %c0_377 = arith.constant 0 : index
    %394 = vector.load %arg4[%c3_375, %c0_376, %c0_377] : memref<9x1x16xf32, #tpu.memory_space<vmem>>, vector<1x1x16xf32>
    %395 = vector.shape_cast %394 : vector<1x1x16xf32> to vector<1x16xf32>
    %396 = vector.broadcast %395 : vector<1x16xf32> to vector<4x16xf32>
    %397 = arith.mulf %393, %396 : vector<4x16xf32>
    %c3_378 = arith.constant 3 : index
    %c0_379 = arith.constant 0 : index
    %c0_380 = arith.constant 0 : index
    %398 = vector.load %arg14[%c3_378, %c0_379, %c0_380] : memref<9x2x4xf32, #tpu.memory_space<vmem>>, vector<1x2x4xf32>
    %399 = vector.shape_cast %398 : vector<1x2x4xf32> to vector<2x4xf32>
    %cst_381 = arith.constant dense<0.000000e+00> : vector<2x16xf32>
    %400 = tpu.matmul %399, %397, %cst_381 {dimension_numbers = #tpu.dot_dimension_numbers<[1], [0], [0], [1], [0, 0, 1, 1], [], []>} : vector<2x4xf32>, vector<4x16xf32>, vector<2x16xf32> -> vector<2x16xf32>
    %401 = arith.addf %392, %400 : vector<2x16xf32>
    %c0_382 = arith.constant 0 : index
    %c32_383 = arith.constant 32 : index
    %402 = vector.load %arg40[%c0_382, %c32_383] : memref<16x384xf32, #tpu.memory_space<vmem>>, vector<4x16xf32>
    %c4_384 = arith.constant 4 : index
    %c0_385 = arith.constant 0 : index
    %c0_386 = arith.constant 0 : index
    %403 = vector.load %arg4[%c4_384, %c0_385, %c0_386] : memref<9x1x16xf32, #tpu.memory_space<vmem>>, vector<1x1x16xf32>
    %404 = vector.shape_cast %403 : vector<1x1x16xf32> to vector<1x16xf32>
    %405 = vector.broadcast %404 : vector<1x16xf32> to vector<4x16xf32>
    %406 = arith.mulf %402, %405 : vector<4x16xf32>
    %c4_387 = arith.constant 4 : index
    %c0_388 = arith.constant 0 : index
    %c0_389 = arith.constant 0 : index
    %407 = vector.load %arg14[%c4_387, %c0_388, %c0_389] : memref<9x2x4xf32, #tpu.memory_space<vmem>>, vector<1x2x4xf32>
    %408 = vector.shape_cast %407 : vector<1x2x4xf32> to vector<2x4xf32>
    %cst_390 = arith.constant dense<0.000000e+00> : vector<2x16xf32>
    %409 = tpu.matmul %408, %406, %cst_390 {dimension_numbers = #tpu.dot_dimension_numbers<[1], [0], [0], [1], [0, 0, 1, 1], [], []>} : vector<2x4xf32>, vector<4x16xf32>, vector<2x16xf32> -> vector<2x16xf32>
    %410 = arith.addf %401, %409 : vector<2x16xf32>
    %c0_391 = arith.constant 0 : index
    %c33_392 = arith.constant 33 : index
    %411 = vector.load %arg40[%c0_391, %c33_392] : memref<16x384xf32, #tpu.memory_space<vmem>>, vector<4x16xf32>
    %c5_393 = arith.constant 5 : index
    %c0_394 = arith.constant 0 : index
    %c0_395 = arith.constant 0 : index
    %412 = vector.load %arg4[%c5_393, %c0_394, %c0_395] : memref<9x1x16xf32, #tpu.memory_space<vmem>>, vector<1x1x16xf32>
    %413 = vector.shape_cast %412 : vector<1x1x16xf32> to vector<1x16xf32>
    %414 = vector.broadcast %413 : vector<1x16xf32> to vector<4x16xf32>
    %415 = arith.mulf %411, %414 : vector<4x16xf32>
    %c5_396 = arith.constant 5 : index
    %c0_397 = arith.constant 0 : index
    %c0_398 = arith.constant 0 : index
    %416 = vector.load %arg14[%c5_396, %c0_397, %c0_398] : memref<9x2x4xf32, #tpu.memory_space<vmem>>, vector<1x2x4xf32>
    %417 = vector.shape_cast %416 : vector<1x2x4xf32> to vector<2x4xf32>
    %cst_399 = arith.constant dense<0.000000e+00> : vector<2x16xf32>
    %418 = tpu.matmul %417, %415, %cst_399 {dimension_numbers = #tpu.dot_dimension_numbers<[1], [0], [0], [1], [0, 0, 1, 1], [], []>} : vector<2x4xf32>, vector<4x16xf32>, vector<2x16xf32> -> vector<2x16xf32>
    %419 = arith.addf %410, %418 : vector<2x16xf32>
    %c0_400 = arith.constant 0 : index
    %c35 = arith.constant 35 : index
    %420 = vector.load %arg40[%c0_400, %c35] : memref<16x384xf32, #tpu.memory_space<vmem>>, vector<4x16xf32>
    %c6_401 = arith.constant 6 : index
    %c0_402 = arith.constant 0 : index
    %c0_403 = arith.constant 0 : index
    %421 = vector.load %arg4[%c6_401, %c0_402, %c0_403] : memref<9x1x16xf32, #tpu.memory_space<vmem>>, vector<1x1x16xf32>
    %422 = vector.shape_cast %421 : vector<1x1x16xf32> to vector<1x16xf32>
    %423 = vector.broadcast %422 : vector<1x16xf32> to vector<4x16xf32>
    %424 = arith.mulf %420, %423 : vector<4x16xf32>
    %c6_404 = arith.constant 6 : index
    %c0_405 = arith.constant 0 : index
    %c0_406 = arith.constant 0 : index
    %425 = vector.load %arg14[%c6_404, %c0_405, %c0_406] : memref<9x2x4xf32, #tpu.memory_space<vmem>>, vector<1x2x4xf32>
    %426 = vector.shape_cast %425 : vector<1x2x4xf32> to vector<2x4xf32>
    %cst_407 = arith.constant dense<0.000000e+00> : vector<2x16xf32>
    %427 = tpu.matmul %426, %424, %cst_407 {dimension_numbers = #tpu.dot_dimension_numbers<[1], [0], [0], [1], [0, 0, 1, 1], [], []>} : vector<2x4xf32>, vector<4x16xf32>, vector<2x16xf32> -> vector<2x16xf32>
    %428 = arith.addf %419, %427 : vector<2x16xf32>
    %c0_408 = arith.constant 0 : index
    %c36 = arith.constant 36 : index
    %429 = vector.load %arg40[%c0_408, %c36] : memref<16x384xf32, #tpu.memory_space<vmem>>, vector<4x16xf32>
    %c7_409 = arith.constant 7 : index
    %c0_410 = arith.constant 0 : index
    %c0_411 = arith.constant 0 : index
    %430 = vector.load %arg4[%c7_409, %c0_410, %c0_411] : memref<9x1x16xf32, #tpu.memory_space<vmem>>, vector<1x1x16xf32>
    %431 = vector.shape_cast %430 : vector<1x1x16xf32> to vector<1x16xf32>
    %432 = vector.broadcast %431 : vector<1x16xf32> to vector<4x16xf32>
    %433 = arith.mulf %429, %432 : vector<4x16xf32>
    %c7_412 = arith.constant 7 : index
    %c0_413 = arith.constant 0 : index
    %c0_414 = arith.constant 0 : index
    %434 = vector.load %arg14[%c7_412, %c0_413, %c0_414] : memref<9x2x4xf32, #tpu.memory_space<vmem>>, vector<1x2x4xf32>
    %435 = vector.shape_cast %434 : vector<1x2x4xf32> to vector<2x4xf32>
    %cst_415 = arith.constant dense<0.000000e+00> : vector<2x16xf32>
    %436 = tpu.matmul %435, %433, %cst_415 {dimension_numbers = #tpu.dot_dimension_numbers<[1], [0], [0], [1], [0, 0, 1, 1], [], []>} : vector<2x4xf32>, vector<4x16xf32>, vector<2x16xf32> -> vector<2x16xf32>
    %437 = arith.addf %428, %436 : vector<2x16xf32>
    %c0_416 = arith.constant 0 : index
    %c37 = arith.constant 37 : index
    %438 = vector.load %arg40[%c0_416, %c37] : memref<16x384xf32, #tpu.memory_space<vmem>>, vector<4x16xf32>
    %c8_417 = arith.constant 8 : index
    %c0_418 = arith.constant 0 : index
    %c0_419 = arith.constant 0 : index
    %439 = vector.load %arg4[%c8_417, %c0_418, %c0_419] : memref<9x1x16xf32, #tpu.memory_space<vmem>>, vector<1x1x16xf32>
    %440 = vector.shape_cast %439 : vector<1x1x16xf32> to vector<1x16xf32>
    %441 = vector.broadcast %440 : vector<1x16xf32> to vector<4x16xf32>
    %442 = arith.mulf %438, %441 : vector<4x16xf32>
    %c8_420 = arith.constant 8 : index
    %c0_421 = arith.constant 0 : index
    %c0_422 = arith.constant 0 : index
    %443 = vector.load %arg14[%c8_420, %c0_421, %c0_422] : memref<9x2x4xf32, #tpu.memory_space<vmem>>, vector<1x2x4xf32>
    %444 = vector.shape_cast %443 : vector<1x2x4xf32> to vector<2x4xf32>
    %cst_423 = arith.constant dense<0.000000e+00> : vector<2x16xf32>
    %445 = tpu.matmul %444, %442, %cst_423 {dimension_numbers = #tpu.dot_dimension_numbers<[1], [0], [0], [1], [0, 0, 1, 1], [], []>} : vector<2x4xf32>, vector<4x16xf32>, vector<2x16xf32> -> vector<2x16xf32>
    %446 = arith.addf %437, %445 : vector<2x16xf32>
    %c0_424 = arith.constant 0 : index
    %c0_425 = arith.constant 0 : index
    %447 = vector.load %arg15[%c0_424, %c0_425] : memref<2x1xf32, #tpu.memory_space<vmem>>, vector<2x1xf32>
    %448 = vector.broadcast %447 : vector<2x1xf32> to vector<2x16xf32>
    %449 = arith.addf %446, %448 : vector<2x16xf32>
    %cst_426 = arith.constant 0.000000e+00 : f32
    %450 = vector.broadcast %cst_426 : f32 to vector<2x16xf32>
    %451 = arith.maximumf %449, %450 : vector<2x16xf32>
    %c0_427 = arith.constant 0 : index
    %c32_428 = arith.constant 32 : index
    %452 = vector.load %arg40[%c0_427, %c32_428] : memref<16x384xf32, #tpu.memory_space<vmem>>, vector<2x16xf32>
    tpu.vector_store %arg40[%c0_427, %c32_428], %451 {strides = array<i32>} : memref<16x384xf32, #tpu.memory_space<vmem>>, vector<2x16xf32>,
    %c0_429 = arith.constant 0 : index
    %c27_430 = arith.constant 27 : index
    %453 = vector.load %arg40[%c0_429, %c27_430] : memref<16x384xf32, #tpu.memory_space<vmem>>, vector<2x16xf32>
    %c0_431 = arith.constant 0 : index
    %c0_432 = arith.constant 0 : index
    %c0_433 = arith.constant 0 : index
    %454 = vector.load %arg4[%c0_431, %c0_432, %c0_433] : memref<9x1x16xf32, #tpu.memory_space<vmem>>, vector<1x1x16xf32>
    %455 = vector.shape_cast %454 : vector<1x1x16xf32> to vector<1x16xf32>
    %456 = vector.broadcast %455 : vector<1x16xf32> to vector<2x16xf32>
    %457 = arith.mulf %453, %456 : vector<2x16xf32>
    %c0_434 = arith.constant 0 : index
    %c0_435 = arith.constant 0 : index
    %c0_436 = arith.constant 0 : index
    %458 = vector.load %arg16[%c0_434, %c0_435, %c0_436] : memref<9x2x2xf32, #tpu.memory_space<vmem>>, vector<1x2x2xf32>
    %459 = vector.shape_cast %458 : vector<1x2x2xf32> to vector<2x2xf32>
    %cst_437 = arith.constant dense<0.000000e+00> : vector<2x16xf32>
    %460 = tpu.matmul %459, %457, %cst_437 {dimension_numbers = #tpu.dot_dimension_numbers<[1], [0], [0], [1], [0, 0, 1, 1], [], []>} : vector<2x2xf32>, vector<2x16xf32>, vector<2x16xf32> -> vector<2x16xf32>
    %c0_438 = arith.constant 0 : index
    %c28_439 = arith.constant 28 : index
    %461 = vector.load %arg40[%c0_438, %c28_439] : memref<16x384xf32, #tpu.memory_space<vmem>>, vector<2x16xf32>
    %c1_440 = arith.constant 1 : index
    %c0_441 = arith.constant 0 : index
    %c0_442 = arith.constant 0 : index
    %462 = vector.load %arg4[%c1_440, %c0_441, %c0_442] : memref<9x1x16xf32, #tpu.memory_space<vmem>>, vector<1x1x16xf32>
    %463 = vector.shape_cast %462 : vector<1x1x16xf32> to vector<1x16xf32>
    %464 = vector.broadcast %463 : vector<1x16xf32> to vector<2x16xf32>
    %465 = arith.mulf %461, %464 : vector<2x16xf32>
    %c1_443 = arith.constant 1 : index
    %c0_444 = arith.constant 0 : index
    %c0_445 = arith.constant 0 : index
    %466 = vector.load %arg16[%c1_443, %c0_444, %c0_445] : memref<9x2x2xf32, #tpu.memory_space<vmem>>, vector<1x2x2xf32>
    %467 = vector.shape_cast %466 : vector<1x2x2xf32> to vector<2x2xf32>
    %cst_446 = arith.constant dense<0.000000e+00> : vector<2x16xf32>
    %468 = tpu.matmul %467, %465, %cst_446 {dimension_numbers = #tpu.dot_dimension_numbers<[1], [0], [0], [1], [0, 0, 1, 1], [], []>} : vector<2x2xf32>, vector<2x16xf32>, vector<2x16xf32> -> vector<2x16xf32>
    %469 = arith.addf %460, %468 : vector<2x16xf32>
    %c0_447 = arith.constant 0 : index
    %c29_448 = arith.constant 29 : index
    %470 = vector.load %arg40[%c0_447, %c29_448] : memref<16x384xf32, #tpu.memory_space<vmem>>, vector<2x16xf32>
    %c2_449 = arith.constant 2 : index
    %c0_450 = arith.constant 0 : index
    %c0_451 = arith.constant 0 : index
    %471 = vector.load %arg4[%c2_449, %c0_450, %c0_451] : memref<9x1x16xf32, #tpu.memory_space<vmem>>, vector<1x1x16xf32>
    %472 = vector.shape_cast %471 : vector<1x1x16xf32> to vector<1x16xf32>
    %473 = vector.broadcast %472 : vector<1x16xf32> to vector<2x16xf32>
    %474 = arith.mulf %470, %473 : vector<2x16xf32>
    %c2_452 = arith.constant 2 : index
    %c0_453 = arith.constant 0 : index
    %c0_454 = arith.constant 0 : index
    %475 = vector.load %arg16[%c2_452, %c0_453, %c0_454] : memref<9x2x2xf32, #tpu.memory_space<vmem>>, vector<1x2x2xf32>
    %476 = vector.shape_cast %475 : vector<1x2x2xf32> to vector<2x2xf32>
    %cst_455 = arith.constant dense<0.000000e+00> : vector<2x16xf32>
    %477 = tpu.matmul %476, %474, %cst_455 {dimension_numbers = #tpu.dot_dimension_numbers<[1], [0], [0], [1], [0, 0, 1, 1], [], []>} : vector<2x2xf32>, vector<2x16xf32>, vector<2x16xf32> -> vector<2x16xf32>
    %478 = arith.addf %469, %477 : vector<2x16xf32>
    %c0_456 = arith.constant 0 : index
    %c31_457 = arith.constant 31 : index
    %479 = vector.load %arg40[%c0_456, %c31_457] : memref<16x384xf32, #tpu.memory_space<vmem>>, vector<2x16xf32>
    %c3_458 = arith.constant 3 : index
    %c0_459 = arith.constant 0 : index
    %c0_460 = arith.constant 0 : index
    %480 = vector.load %arg4[%c3_458, %c0_459, %c0_460] : memref<9x1x16xf32, #tpu.memory_space<vmem>>, vector<1x1x16xf32>
    %481 = vector.shape_cast %480 : vector<1x1x16xf32> to vector<1x16xf32>
    %482 = vector.broadcast %481 : vector<1x16xf32> to vector<2x16xf32>
    %483 = arith.mulf %479, %482 : vector<2x16xf32>
    %c3_461 = arith.constant 3 : index
    %c0_462 = arith.constant 0 : index
    %c0_463 = arith.constant 0 : index
    %484 = vector.load %arg16[%c3_461, %c0_462, %c0_463] : memref<9x2x2xf32, #tpu.memory_space<vmem>>, vector<1x2x2xf32>
    %485 = vector.shape_cast %484 : vector<1x2x2xf32> to vector<2x2xf32>
    %cst_464 = arith.constant dense<0.000000e+00> : vector<2x16xf32>
    %486 = tpu.matmul %485, %483, %cst_464 {dimension_numbers = #tpu.dot_dimension_numbers<[1], [0], [0], [1], [0, 0, 1, 1], [], []>} : vector<2x2xf32>, vector<2x16xf32>, vector<2x16xf32> -> vector<2x16xf32>
    %487 = arith.addf %478, %486 : vector<2x16xf32>
    %c0_465 = arith.constant 0 : index
    %c32_466 = arith.constant 32 : index
    %488 = vector.load %arg40[%c0_465, %c32_466] : memref<16x384xf32, #tpu.memory_space<vmem>>, vector<2x16xf32>
    %c4_467 = arith.constant 4 : index
    %c0_468 = arith.constant 0 : index
    %c0_469 = arith.constant 0 : index
    %489 = vector.load %arg4[%c4_467, %c0_468, %c0_469] : memref<9x1x16xf32, #tpu.memory_space<vmem>>, vector<1x1x16xf32>
    %490 = vector.shape_cast %489 : vector<1x1x16xf32> to vector<1x16xf32>
    %491 = vector.broadcast %490 : vector<1x16xf32> to vector<2x16xf32>
    %492 = arith.mulf %488, %491 : vector<2x16xf32>
    %c4_470 = arith.constant 4 : index
    %c0_471 = arith.constant 0 : index
    %c0_472 = arith.constant 0 : index
    %493 = vector.load %arg16[%c4_470, %c0_471, %c0_472] : memref<9x2x2xf32, #tpu.memory_space<vmem>>, vector<1x2x2xf32>
    %494 = vector.shape_cast %493 : vector<1x2x2xf32> to vector<2x2xf32>
    %cst_473 = arith.constant dense<0.000000e+00> : vector<2x16xf32>
    %495 = tpu.matmul %494, %492, %cst_473 {dimension_numbers = #tpu.dot_dimension_numbers<[1], [0], [0], [1], [0, 0, 1, 1], [], []>} : vector<2x2xf32>, vector<2x16xf32>, vector<2x16xf32> -> vector<2x16xf32>
    %496 = arith.addf %487, %495 : vector<2x16xf32>
    %c0_474 = arith.constant 0 : index
    %c33_475 = arith.constant 33 : index
    %497 = vector.load %arg40[%c0_474, %c33_475] : memref<16x384xf32, #tpu.memory_space<vmem>>, vector<2x16xf32>
    %c5_476 = arith.constant 5 : index
    %c0_477 = arith.constant 0 : index
    %c0_478 = arith.constant 0 : index
    %498 = vector.load %arg4[%c5_476, %c0_477, %c0_478] : memref<9x1x16xf32, #tpu.memory_space<vmem>>, vector<1x1x16xf32>
    %499 = vector.shape_cast %498 : vector<1x1x16xf32> to vector<1x16xf32>
    %500 = vector.broadcast %499 : vector<1x16xf32> to vector<2x16xf32>
    %501 = arith.mulf %497, %500 : vector<2x16xf32>
    %c5_479 = arith.constant 5 : index
    %c0_480 = arith.constant 0 : index
    %c0_481 = arith.constant 0 : index
    %502 = vector.load %arg16[%c5_479, %c0_480, %c0_481] : memref<9x2x2xf32, #tpu.memory_space<vmem>>, vector<1x2x2xf32>
    %503 = vector.shape_cast %502 : vector<1x2x2xf32> to vector<2x2xf32>
    %cst_482 = arith.constant dense<0.000000e+00> : vector<2x16xf32>
    %504 = tpu.matmul %503, %501, %cst_482 {dimension_numbers = #tpu.dot_dimension_numbers<[1], [0], [0], [1], [0, 0, 1, 1], [], []>} : vector<2x2xf32>, vector<2x16xf32>, vector<2x16xf32> -> vector<2x16xf32>
    %505 = arith.addf %496, %504 : vector<2x16xf32>
    %c0_483 = arith.constant 0 : index
    %c35_484 = arith.constant 35 : index
    %506 = vector.load %arg40[%c0_483, %c35_484] : memref<16x384xf32, #tpu.memory_space<vmem>>, vector<2x16xf32>
    %c6_485 = arith.constant 6 : index
    %c0_486 = arith.constant 0 : index
    %c0_487 = arith.constant 0 : index
    %507 = vector.load %arg4[%c6_485, %c0_486, %c0_487] : memref<9x1x16xf32, #tpu.memory_space<vmem>>, vector<1x1x16xf32>
    %508 = vector.shape_cast %507 : vector<1x1x16xf32> to vector<1x16xf32>
    %509 = vector.broadcast %508 : vector<1x16xf32> to vector<2x16xf32>
    %510 = arith.mulf %506, %509 : vector<2x16xf32>
    %c6_488 = arith.constant 6 : index
    %c0_489 = arith.constant 0 : index
    %c0_490 = arith.constant 0 : index
    %511 = vector.load %arg16[%c6_488, %c0_489, %c0_490] : memref<9x2x2xf32, #tpu.memory_space<vmem>>, vector<1x2x2xf32>
    %512 = vector.shape_cast %511 : vector<1x2x2xf32> to vector<2x2xf32>
    %cst_491 = arith.constant dense<0.000000e+00> : vector<2x16xf32>
    %513 = tpu.matmul %512, %510, %cst_491 {dimension_numbers = #tpu.dot_dimension_numbers<[1], [0], [0], [1], [0, 0, 1, 1], [], []>} : vector<2x2xf32>, vector<2x16xf32>, vector<2x16xf32> -> vector<2x16xf32>
    %514 = arith.addf %505, %513 : vector<2x16xf32>
    %c0_492 = arith.constant 0 : index
    %c36_493 = arith.constant 36 : index
    %515 = vector.load %arg40[%c0_492, %c36_493] : memref<16x384xf32, #tpu.memory_space<vmem>>, vector<2x16xf32>
    %c7_494 = arith.constant 7 : index
    %c0_495 = arith.constant 0 : index
    %c0_496 = arith.constant 0 : index
    %516 = vector.load %arg4[%c7_494, %c0_495, %c0_496] : memref<9x1x16xf32, #tpu.memory_space<vmem>>, vector<1x1x16xf32>
    %517 = vector.shape_cast %516 : vector<1x1x16xf32> to vector<1x16xf32>
    %518 = vector.broadcast %517 : vector<1x16xf32> to vector<2x16xf32>
    %519 = arith.mulf %515, %518 : vector<2x16xf32>
    %c7_497 = arith.constant 7 : index
    %c0_498 = arith.constant 0 : index
    %c0_499 = arith.constant 0 : index
    %520 = vector.load %arg16[%c7_497, %c0_498, %c0_499] : memref<9x2x2xf32, #tpu.memory_space<vmem>>, vector<1x2x2xf32>
    %521 = vector.shape_cast %520 : vector<1x2x2xf32> to vector<2x2xf32>
    %cst_500 = arith.constant dense<0.000000e+00> : vector<2x16xf32>
    %522 = tpu.matmul %521, %519, %cst_500 {dimension_numbers = #tpu.dot_dimension_numbers<[1], [0], [0], [1], [0, 0, 1, 1], [], []>} : vector<2x2xf32>, vector<2x16xf32>, vector<2x16xf32> -> vector<2x16xf32>
    %523 = arith.addf %514, %522 : vector<2x16xf32>
    %c0_501 = arith.constant 0 : index
    %c37_502 = arith.constant 37 : index
    %524 = vector.load %arg40[%c0_501, %c37_502] : memref<16x384xf32, #tpu.memory_space<vmem>>, vector<2x16xf32>
    %c8_503 = arith.constant 8 : index
    %c0_504 = arith.constant 0 : index
    %c0_505 = arith.constant 0 : index
    %525 = vector.load %arg4[%c8_503, %c0_504, %c0_505] : memref<9x1x16xf32, #tpu.memory_space<vmem>>, vector<1x1x16xf32>
    %526 = vector.shape_cast %525 : vector<1x1x16xf32> to vector<1x16xf32>
    %527 = vector.broadcast %526 : vector<1x16xf32> to vector<2x16xf32>
    %528 = arith.mulf %524, %527 : vector<2x16xf32>
    %c8_506 = arith.constant 8 : index
    %c0_507 = arith.constant 0 : index
    %c0_508 = arith.constant 0 : index
    %529 = vector.load %arg16[%c8_506, %c0_507, %c0_508] : memref<9x2x2xf32, #tpu.memory_space<vmem>>, vector<1x2x2xf32>
    %530 = vector.shape_cast %529 : vector<1x2x2xf32> to vector<2x2xf32>
    %cst_509 = arith.constant dense<0.000000e+00> : vector<2x16xf32>
    %531 = tpu.matmul %530, %528, %cst_509 {dimension_numbers = #tpu.dot_dimension_numbers<[1], [0], [0], [1], [0, 0, 1, 1], [], []>} : vector<2x2xf32>, vector<2x16xf32>, vector<2x16xf32> -> vector<2x16xf32>
    %532 = arith.addf %523, %531 : vector<2x16xf32>
    %c0_510 = arith.constant 0 : index
    %c0_511 = arith.constant 0 : index
    %533 = vector.load %arg17[%c0_510, %c0_511] : memref<2x1xf32, #tpu.memory_space<vmem>>, vector<2x1xf32>
    %534 = vector.broadcast %533 : vector<2x1xf32> to vector<2x16xf32>
    %535 = arith.addf %532, %534 : vector<2x16xf32>
    %cst_512 = arith.constant 0.000000e+00 : f32
    %536 = vector.broadcast %cst_512 : f32 to vector<2x16xf32>
    %537 = arith.maximumf %535, %536 : vector<2x16xf32>
    %c0_513 = arith.constant 0 : index
    %c32_514 = arith.constant 32 : index
    %538 = vector.load %arg40[%c0_513, %c32_514] : memref<16x384xf32, #tpu.memory_space<vmem>>, vector<2x16xf32>
    tpu.vector_store %arg40[%c0_513, %c32_514], %537 {strides = array<i32>} : memref<16x384xf32, #tpu.memory_space<vmem>>, vector<2x16xf32>,
    %c0_515 = arith.constant 0 : index
    %c33_516 = arith.constant 33 : index
    %539 = vector.load %arg40[%c0_515, %c33_516] : memref<16x384xf32, #tpu.memory_space<vmem>>, vector<2x16xf32>
    %c0_517 = arith.constant 0 : index
    %c36_518 = arith.constant 36 : index
    %540 = vector.load %arg40[%c0_517, %c36_518] : memref<16x384xf32, #tpu.memory_space<vmem>>, vector<2x16xf32>
    %c0_519 = arith.constant 0 : index
    %c37_520 = arith.constant 37 : index
    %541 = vector.load %arg40[%c0_519, %c37_520] : memref<16x384xf32, #tpu.memory_space<vmem>>, vector<2x16xf32>
    %542 = arith.maximumf %537, %539 : vector<2x16xf32>
    %543 = arith.maximumf %540, %541 : vector<2x16xf32>
    %544 = arith.maximumf %542, %543 : vector<2x16xf32>
    %c0_521 = arith.constant 0 : index
    %c0_522 = arith.constant 0 : index
    %545 = vector.load %arg24[%c0_521, %c0_522] : memref<16x4xf32, #tpu.memory_space<vmem>>, vector<16x4xf32>
    %cst_523 = arith.constant dense<0.000000e+00> : vector<2x4xf32>
    %546 = tpu.matmul %544, %545, %cst_523 {dimension_numbers = #tpu.dot_dimension_numbers<[1], [0], [0], [1], [0, 0, 1, 1], [], []>} : vector<2x16xf32>, vector<16x4xf32>, vector<2x4xf32> -> vector<2x4xf32>
    %c0_524 = arith.constant 0 : index
    %c32_525 = arith.constant 32 : index
    %547 = vector.load %arg40[%c0_524, %c32_525] : memref<16x384xf32, #tpu.memory_space<vmem>>, vector<2x4xf32>
    tpu.vector_store %arg40[%c0_524, %c32_525], %546 {strides = array<i32>} : memref<16x384xf32, #tpu.memory_space<vmem>>, vector<2x4xf32>,
    %c0_526 = arith.constant 0 : index
    %c29_527 = arith.constant 29 : index
    %548 = vector.load %arg40[%c0_526, %c29_527] : memref<16x384xf32, #tpu.memory_space<vmem>>, vector<2x4xf32>
    %c0_528 = arith.constant 0 : index
    %c0_529 = arith.constant 0 : index
    %c0_530 = arith.constant 0 : index
    %549 = vector.load %arg5[%c0_528, %c0_529, %c0_530] : memref<9x1x4xf32, #tpu.memory_space<vmem>>, vector<1x1x4xf32>
    %550 = vector.shape_cast %549 : vector<1x1x4xf32> to vector<1x4xf32>
    %551 = vector.broadcast %550 : vector<1x4xf32> to vector<2x4xf32>
    %552 = arith.mulf %548, %551 : vector<2x4xf32>
    %c0_531 = arith.constant 0 : index
    %c0_532 = arith.constant 0 : index
    %c0_533 = arith.constant 0 : index
    %553 = vector.load %arg18[%c0_531, %c0_532, %c0_533] : memref<9x2x2xf32, #tpu.memory_space<vmem>>, vector<1x2x2xf32>
    %554 = vector.shape_cast %553 : vector<1x2x2xf32> to vector<2x2xf32>
    %cst_534 = arith.constant dense<0.000000e+00> : vector<2x4xf32>
    %555 = tpu.matmul %554, %552, %cst_534 {dimension_numbers = #tpu.dot_dimension_numbers<[1], [0], [0], [1], [0, 0, 1, 1], [], []>} : vector<2x2xf32>, vector<2x4xf32>, vector<2x4xf32> -> vector<2x4xf32>
    %c0_535 = arith.constant 0 : index
    %c30 = arith.constant 30 : index
    %556 = vector.load %arg40[%c0_535, %c30] : memref<16x384xf32, #tpu.memory_space<vmem>>, vector<2x4xf32>
    %c1_536 = arith.constant 1 : index
    %c0_537 = arith.constant 0 : index
    %c0_538 = arith.constant 0 : index
    %557 = vector.load %arg5[%c1_536, %c0_537, %c0_538] : memref<9x1x4xf32, #tpu.memory_space<vmem>>, vector<1x1x4xf32>
    %558 = vector.shape_cast %557 : vector<1x1x4xf32> to vector<1x4xf32>
    %559 = vector.broadcast %558 : vector<1x4xf32> to vector<2x4xf32>
    %560 = arith.mulf %556, %559 : vector<2x4xf32>
    %c1_539 = arith.constant 1 : index
    %c0_540 = arith.constant 0 : index
    %c0_541 = arith.constant 0 : index
    %561 = vector.load %arg18[%c1_539, %c0_540, %c0_541] : memref<9x2x2xf32, #tpu.memory_space<vmem>>, vector<1x2x2xf32>
    %562 = vector.shape_cast %561 : vector<1x2x2xf32> to vector<2x2xf32>
    %cst_542 = arith.constant dense<0.000000e+00> : vector<2x4xf32>
    %563 = tpu.matmul %562, %560, %cst_542 {dimension_numbers = #tpu.dot_dimension_numbers<[1], [0], [0], [1], [0, 0, 1, 1], [], []>} : vector<2x2xf32>, vector<2x4xf32>, vector<2x4xf32> -> vector<2x4xf32>
    %564 = arith.addf %555, %563 : vector<2x4xf32>
    %c0_543 = arith.constant 0 : index
    %c31_544 = arith.constant 31 : index
    %565 = vector.load %arg40[%c0_543, %c31_544] : memref<16x384xf32, #tpu.memory_space<vmem>>, vector<2x4xf32>
    %c2_545 = arith.constant 2 : index
    %c0_546 = arith.constant 0 : index
    %c0_547 = arith.constant 0 : index
    %566 = vector.load %arg5[%c2_545, %c0_546, %c0_547] : memref<9x1x4xf32, #tpu.memory_space<vmem>>, vector<1x1x4xf32>
    %567 = vector.shape_cast %566 : vector<1x1x4xf32> to vector<1x4xf32>
    %568 = vector.broadcast %567 : vector<1x4xf32> to vector<2x4xf32>
    %569 = arith.mulf %565, %568 : vector<2x4xf32>
    %c2_548 = arith.constant 2 : index
    %c0_549 = arith.constant 0 : index
    %c0_550 = arith.constant 0 : index
    %570 = vector.load %arg18[%c2_548, %c0_549, %c0_550] : memref<9x2x2xf32, #tpu.memory_space<vmem>>, vector<1x2x2xf32>
    %571 = vector.shape_cast %570 : vector<1x2x2xf32> to vector<2x2xf32>
    %cst_551 = arith.constant dense<0.000000e+00> : vector<2x4xf32>
    %572 = tpu.matmul %571, %569, %cst_551 {dimension_numbers = #tpu.dot_dimension_numbers<[1], [0], [0], [1], [0, 0, 1, 1], [], []>} : vector<2x2xf32>, vector<2x4xf32>, vector<2x4xf32> -> vector<2x4xf32>
    %573 = arith.addf %564, %572 : vector<2x4xf32>
    %c0_552 = arith.constant 0 : index
    %c31_553 = arith.constant 31 : index
    %574 = vector.load %arg40[%c0_552, %c31_553] : memref<16x384xf32, #tpu.memory_space<vmem>>, vector<2x4xf32>
    %c3_554 = arith.constant 3 : index
    %c0_555 = arith.constant 0 : index
    %c0_556 = arith.constant 0 : index
    %575 = vector.load %arg5[%c3_554, %c0_555, %c0_556] : memref<9x1x4xf32, #tpu.memory_space<vmem>>, vector<1x1x4xf32>
    %576 = vector.shape_cast %575 : vector<1x1x4xf32> to vector<1x4xf32>
    %577 = vector.broadcast %576 : vector<1x4xf32> to vector<2x4xf32>
    %578 = arith.mulf %574, %577 : vector<2x4xf32>
    %c3_557 = arith.constant 3 : index
    %c0_558 = arith.constant 0 : index
    %c0_559 = arith.constant 0 : index
    %579 = vector.load %arg18[%c3_557, %c0_558, %c0_559] : memref<9x2x2xf32, #tpu.memory_space<vmem>>, vector<1x2x2xf32>
    %580 = vector.shape_cast %579 : vector<1x2x2xf32> to vector<2x2xf32>
    %cst_560 = arith.constant dense<0.000000e+00> : vector<2x4xf32>
    %581 = tpu.matmul %580, %578, %cst_560 {dimension_numbers = #tpu.dot_dimension_numbers<[1], [0], [0], [1], [0, 0, 1, 1], [], []>} : vector<2x2xf32>, vector<2x4xf32>, vector<2x4xf32> -> vector<2x4xf32>
    %582 = arith.addf %573, %581 : vector<2x4xf32>
    %c0_561 = arith.constant 0 : index
    %c32_562 = arith.constant 32 : index
    %583 = vector.load %arg40[%c0_561, %c32_562] : memref<16x384xf32, #tpu.memory_space<vmem>>, vector<2x4xf32>
    %c4_563 = arith.constant 4 : index
    %c0_564 = arith.constant 0 : index
    %c0_565 = arith.constant 0 : index
    %584 = vector.load %arg5[%c4_563, %c0_564, %c0_565] : memref<9x1x4xf32, #tpu.memory_space<vmem>>, vector<1x1x4xf32>
    %585 = vector.shape_cast %584 : vector<1x1x4xf32> to vector<1x4xf32>
    %586 = vector.broadcast %585 : vector<1x4xf32> to vector<2x4xf32>
    %587 = arith.mulf %583, %586 : vector<2x4xf32>
    %c4_566 = arith.constant 4 : index
    %c0_567 = arith.constant 0 : index
    %c0_568 = arith.constant 0 : index
    %588 = vector.load %arg18[%c4_566, %c0_567, %c0_568] : memref<9x2x2xf32, #tpu.memory_space<vmem>>, vector<1x2x2xf32>
    %589 = vector.shape_cast %588 : vector<1x2x2xf32> to vector<2x2xf32>
    %cst_569 = arith.constant dense<0.000000e+00> : vector<2x4xf32>
    %590 = tpu.matmul %589, %587, %cst_569 {dimension_numbers = #tpu.dot_dimension_numbers<[1], [0], [0], [1], [0, 0, 1, 1], [], []>} : vector<2x2xf32>, vector<2x4xf32>, vector<2x4xf32> -> vector<2x4xf32>
    %591 = arith.addf %582, %590 : vector<2x4xf32>
    %c0_570 = arith.constant 0 : index
    %c33_571 = arith.constant 33 : index
    %592 = vector.load %arg40[%c0_570, %c33_571] : memref<16x384xf32, #tpu.memory_space<vmem>>, vector<2x4xf32>
    %c5_572 = arith.constant 5 : index
    %c0_573 = arith.constant 0 : index
    %c0_574 = arith.constant 0 : index
    %593 = vector.load %arg5[%c5_572, %c0_573, %c0_574] : memref<9x1x4xf32, #tpu.memory_space<vmem>>, vector<1x1x4xf32>
    %594 = vector.shape_cast %593 : vector<1x1x4xf32> to vector<1x4xf32>
    %595 = vector.broadcast %594 : vector<1x4xf32> to vector<2x4xf32>
    %596 = arith.mulf %592, %595 : vector<2x4xf32>
    %c5_575 = arith.constant 5 : index
    %c0_576 = arith.constant 0 : index
    %c0_577 = arith.constant 0 : index
    %597 = vector.load %arg18[%c5_575, %c0_576, %c0_577] : memref<9x2x2xf32, #tpu.memory_space<vmem>>, vector<1x2x2xf32>
    %598 = vector.shape_cast %597 : vector<1x2x2xf32> to vector<2x2xf32>
    %cst_578 = arith.constant dense<0.000000e+00> : vector<2x4xf32>
    %599 = tpu.matmul %598, %596, %cst_578 {dimension_numbers = #tpu.dot_dimension_numbers<[1], [0], [0], [1], [0, 0, 1, 1], [], []>} : vector<2x2xf32>, vector<2x4xf32>, vector<2x4xf32> -> vector<2x4xf32>
    %600 = arith.addf %591, %599 : vector<2x4xf32>
    %c0_579 = arith.constant 0 : index
    %c33_580 = arith.constant 33 : index
    %601 = vector.load %arg40[%c0_579, %c33_580] : memref<16x384xf32, #tpu.memory_space<vmem>>, vector<2x4xf32>
    %c6_581 = arith.constant 6 : index
    %c0_582 = arith.constant 0 : index
    %c0_583 = arith.constant 0 : index
    %602 = vector.load %arg5[%c6_581, %c0_582, %c0_583] : memref<9x1x4xf32, #tpu.memory_space<vmem>>, vector<1x1x4xf32>
    %603 = vector.shape_cast %602 : vector<1x1x4xf32> to vector<1x4xf32>
    %604 = vector.broadcast %603 : vector<1x4xf32> to vector<2x4xf32>
    %605 = arith.mulf %601, %604 : vector<2x4xf32>
    %c6_584 = arith.constant 6 : index
    %c0_585 = arith.constant 0 : index
    %c0_586 = arith.constant 0 : index
    %606 = vector.load %arg18[%c6_584, %c0_585, %c0_586] : memref<9x2x2xf32, #tpu.memory_space<vmem>>, vector<1x2x2xf32>
    %607 = vector.shape_cast %606 : vector<1x2x2xf32> to vector<2x2xf32>
    %cst_587 = arith.constant dense<0.000000e+00> : vector<2x4xf32>
    %608 = tpu.matmul %607, %605, %cst_587 {dimension_numbers = #tpu.dot_dimension_numbers<[1], [0], [0], [1], [0, 0, 1, 1], [], []>} : vector<2x2xf32>, vector<2x4xf32>, vector<2x4xf32> -> vector<2x4xf32>
    %609 = arith.addf %600, %608 : vector<2x4xf32>
    %c0_588 = arith.constant 0 : index
    %c34 = arith.constant 34 : index
    %610 = vector.load %arg40[%c0_588, %c34] : memref<16x384xf32, #tpu.memory_space<vmem>>, vector<2x4xf32>
    %c7_589 = arith.constant 7 : index
    %c0_590 = arith.constant 0 : index
    %c0_591 = arith.constant 0 : index
    %611 = vector.load %arg5[%c7_589, %c0_590, %c0_591] : memref<9x1x4xf32, #tpu.memory_space<vmem>>, vector<1x1x4xf32>
    %612 = vector.shape_cast %611 : vector<1x1x4xf32> to vector<1x4xf32>
    %613 = vector.broadcast %612 : vector<1x4xf32> to vector<2x4xf32>
    %614 = arith.mulf %610, %613 : vector<2x4xf32>
    %c7_592 = arith.constant 7 : index
    %c0_593 = arith.constant 0 : index
    %c0_594 = arith.constant 0 : index
    %615 = vector.load %arg18[%c7_592, %c0_593, %c0_594] : memref<9x2x2xf32, #tpu.memory_space<vmem>>, vector<1x2x2xf32>
    %616 = vector.shape_cast %615 : vector<1x2x2xf32> to vector<2x2xf32>
    %cst_595 = arith.constant dense<0.000000e+00> : vector<2x4xf32>
    %617 = tpu.matmul %616, %614, %cst_595 {dimension_numbers = #tpu.dot_dimension_numbers<[1], [0], [0], [1], [0, 0, 1, 1], [], []>} : vector<2x2xf32>, vector<2x4xf32>, vector<2x4xf32> -> vector<2x4xf32>
    %618 = arith.addf %609, %617 : vector<2x4xf32>
    %c0_596 = arith.constant 0 : index
    %c35_597 = arith.constant 35 : index
    %619 = vector.load %arg40[%c0_596, %c35_597] : memref<16x384xf32, #tpu.memory_space<vmem>>, vector<2x4xf32>
    %c8_598 = arith.constant 8 : index
    %c0_599 = arith.constant 0 : index
    %c0_600 = arith.constant 0 : index
    %620 = vector.load %arg5[%c8_598, %c0_599, %c0_600] : memref<9x1x4xf32, #tpu.memory_space<vmem>>, vector<1x1x4xf32>
    %621 = vector.shape_cast %620 : vector<1x1x4xf32> to vector<1x4xf32>
    %622 = vector.broadcast %621 : vector<1x4xf32> to vector<2x4xf32>
    %623 = arith.mulf %619, %622 : vector<2x4xf32>
    %c8_601 = arith.constant 8 : index
    %c0_602 = arith.constant 0 : index
    %c0_603 = arith.constant 0 : index
    %624 = vector.load %arg18[%c8_601, %c0_602, %c0_603] : memref<9x2x2xf32, #tpu.memory_space<vmem>>, vector<1x2x2xf32>
    %625 = vector.shape_cast %624 : vector<1x2x2xf32> to vector<2x2xf32>
    %cst_604 = arith.constant dense<0.000000e+00> : vector<2x4xf32>
    %626 = tpu.matmul %625, %623, %cst_604 {dimension_numbers = #tpu.dot_dimension_numbers<[1], [0], [0], [1], [0, 0, 1, 1], [], []>} : vector<2x2xf32>, vector<2x4xf32>, vector<2x4xf32> -> vector<2x4xf32>
    %627 = arith.addf %618, %626 : vector<2x4xf32>
    %c0_605 = arith.constant 0 : index
    %c0_606 = arith.constant 0 : index
    %628 = vector.load %arg19[%c0_605, %c0_606] : memref<2x1xf32, #tpu.memory_space<vmem>>, vector<2x1xf32>
    %629 = vector.broadcast %628 : vector<2x1xf32> to vector<2x4xf32>
    %630 = arith.addf %627, %629 : vector<2x4xf32>
    %cst_607 = arith.constant 0.000000e+00 : f32
    %631 = vector.broadcast %cst_607 : f32 to vector<2x4xf32>
    %632 = arith.maximumf %630, %631 : vector<2x4xf32>
    %c0_608 = arith.constant 0 : index
    %c32_609 = arith.constant 32 : index
    %633 = vector.load %arg40[%c0_608, %c32_609] : memref<16x384xf32, #tpu.memory_space<vmem>>, vector<2x4xf32>
    tpu.vector_store %arg40[%c0_608, %c32_609], %632 {strides = array<i32>} : memref<16x384xf32, #tpu.memory_space<vmem>>, vector<2x4xf32>,
    %c0_610 = arith.constant 0 : index
    %c29_611 = arith.constant 29 : index
    %634 = vector.load %arg40[%c0_610, %c29_611] : memref<16x384xf32, #tpu.memory_space<vmem>>, vector<2x4xf32>
    %c0_612 = arith.constant 0 : index
    %c0_613 = arith.constant 0 : index
    %c0_614 = arith.constant 0 : index
    %635 = vector.load %arg5[%c0_612, %c0_613, %c0_614] : memref<9x1x4xf32, #tpu.memory_space<vmem>>, vector<1x1x4xf32>
    %636 = vector.shape_cast %635 : vector<1x1x4xf32> to vector<1x4xf32>
    %637 = vector.broadcast %636 : vector<1x4xf32> to vector<2x4xf32>
    %638 = arith.mulf %634, %637 : vector<2x4xf32>
    %c0_615 = arith.constant 0 : index
    %c0_616 = arith.constant 0 : index
    %c0_617 = arith.constant 0 : index
    %639 = vector.load %arg20[%c0_615, %c0_616, %c0_617] : memref<9x2x2xf32, #tpu.memory_space<vmem>>, vector<1x2x2xf32>
    %640 = vector.shape_cast %639 : vector<1x2x2xf32> to vector<2x2xf32>
    %cst_618 = arith.constant dense<0.000000e+00> : vector<2x4xf32>
    %641 = tpu.matmul %640, %638, %cst_618 {dimension_numbers = #tpu.dot_dimension_numbers<[1], [0], [0], [1], [0, 0, 1, 1], [], []>} : vector<2x2xf32>, vector<2x4xf32>, vector<2x4xf32> -> vector<2x4xf32>
    %c0_619 = arith.constant 0 : index
    %c30_620 = arith.constant 30 : index
    %642 = vector.load %arg40[%c0_619, %c30_620] : memref<16x384xf32, #tpu.memory_space<vmem>>, vector<2x4xf32>
    %c1_621 = arith.constant 1 : index
    %c0_622 = arith.constant 0 : index
    %c0_623 = arith.constant 0 : index
    %643 = vector.load %arg5[%c1_621, %c0_622, %c0_623] : memref<9x1x4xf32, #tpu.memory_space<vmem>>, vector<1x1x4xf32>
    %644 = vector.shape_cast %643 : vector<1x1x4xf32> to vector<1x4xf32>
    %645 = vector.broadcast %644 : vector<1x4xf32> to vector<2x4xf32>
    %646 = arith.mulf %642, %645 : vector<2x4xf32>
    %c1_624 = arith.constant 1 : index
    %c0_625 = arith.constant 0 : index
    %c0_626 = arith.constant 0 : index
    %647 = vector.load %arg20[%c1_624, %c0_625, %c0_626] : memref<9x2x2xf32, #tpu.memory_space<vmem>>, vector<1x2x2xf32>
    %648 = vector.shape_cast %647 : vector<1x2x2xf32> to vector<2x2xf32>
    %cst_627 = arith.constant dense<0.000000e+00> : vector<2x4xf32>
    %649 = tpu.matmul %648, %646, %cst_627 {dimension_numbers = #tpu.dot_dimension_numbers<[1], [0], [0], [1], [0, 0, 1, 1], [], []>} : vector<2x2xf32>, vector<2x4xf32>, vector<2x4xf32> -> vector<2x4xf32>
    %650 = arith.addf %641, %649 : vector<2x4xf32>
    %c0_628 = arith.constant 0 : index
    %c31_629 = arith.constant 31 : index
    %651 = vector.load %arg40[%c0_628, %c31_629] : memref<16x384xf32, #tpu.memory_space<vmem>>, vector<2x4xf32>
    %c2_630 = arith.constant 2 : index
    %c0_631 = arith.constant 0 : index
    %c0_632 = arith.constant 0 : index
    %652 = vector.load %arg5[%c2_630, %c0_631, %c0_632] : memref<9x1x4xf32, #tpu.memory_space<vmem>>, vector<1x1x4xf32>
    %653 = vector.shape_cast %652 : vector<1x1x4xf32> to vector<1x4xf32>
    %654 = vector.broadcast %653 : vector<1x4xf32> to vector<2x4xf32>
    %655 = arith.mulf %651, %654 : vector<2x4xf32>
    %c2_633 = arith.constant 2 : index
    %c0_634 = arith.constant 0 : index
    %c0_635 = arith.constant 0 : index
    %656 = vector.load %arg20[%c2_633, %c0_634, %c0_635] : memref<9x2x2xf32, #tpu.memory_space<vmem>>, vector<1x2x2xf32>
    %657 = vector.shape_cast %656 : vector<1x2x2xf32> to vector<2x2xf32>
    %cst_636 = arith.constant dense<0.000000e+00> : vector<2x4xf32>
    %658 = tpu.matmul %657, %655, %cst_636 {dimension_numbers = #tpu.dot_dimension_numbers<[1], [0], [0], [1], [0, 0, 1, 1], [], []>} : vector<2x2xf32>, vector<2x4xf32>, vector<2x4xf32> -> vector<2x4xf32>
    %659 = arith.addf %650, %658 : vector<2x4xf32>
    %c0_637 = arith.constant 0 : index
    %c31_638 = arith.constant 31 : index
    %660 = vector.load %arg40[%c0_637, %c31_638] : memref<16x384xf32, #tpu.memory_space<vmem>>, vector<2x4xf32>
    %c3_639 = arith.constant 3 : index
    %c0_640 = arith.constant 0 : index
    %c0_641 = arith.constant 0 : index
    %661 = vector.load %arg5[%c3_639, %c0_640, %c0_641] : memref<9x1x4xf32, #tpu.memory_space<vmem>>, vector<1x1x4xf32>
    %662 = vector.shape_cast %661 : vector<1x1x4xf32> to vector<1x4xf32>
    %663 = vector.broadcast %662 : vector<1x4xf32> to vector<2x4xf32>
    %664 = arith.mulf %660, %663 : vector<2x4xf32>
    %c3_642 = arith.constant 3 : index
    %c0_643 = arith.constant 0 : index
    %c0_644 = arith.constant 0 : index
    %665 = vector.load %arg20[%c3_642, %c0_643, %c0_644] : memref<9x2x2xf32, #tpu.memory_space<vmem>>, vector<1x2x2xf32>
    %666 = vector.shape_cast %665 : vector<1x2x2xf32> to vector<2x2xf32>
    %cst_645 = arith.constant dense<0.000000e+00> : vector<2x4xf32>
    %667 = tpu.matmul %666, %664, %cst_645 {dimension_numbers = #tpu.dot_dimension_numbers<[1], [0], [0], [1], [0, 0, 1, 1], [], []>} : vector<2x2xf32>, vector<2x4xf32>, vector<2x4xf32> -> vector<2x4xf32>
    %668 = arith.addf %659, %667 : vector<2x4xf32>
    %c0_646 = arith.constant 0 : index
    %c32_647 = arith.constant 32 : index
    %669 = vector.load %arg40[%c0_646, %c32_647] : memref<16x384xf32, #tpu.memory_space<vmem>>, vector<2x4xf32>
    %c4_648 = arith.constant 4 : index
    %c0_649 = arith.constant 0 : index
    %c0_650 = arith.constant 0 : index
    %670 = vector.load %arg5[%c4_648, %c0_649, %c0_650] : memref<9x1x4xf32, #tpu.memory_space<vmem>>, vector<1x1x4xf32>
    %671 = vector.shape_cast %670 : vector<1x1x4xf32> to vector<1x4xf32>
    %672 = vector.broadcast %671 : vector<1x4xf32> to vector<2x4xf32>
    %673 = arith.mulf %669, %672 : vector<2x4xf32>
    %c4_651 = arith.constant 4 : index
    %c0_652 = arith.constant 0 : index
    %c0_653 = arith.constant 0 : index
    %674 = vector.load %arg20[%c4_651, %c0_652, %c0_653] : memref<9x2x2xf32, #tpu.memory_space<vmem>>, vector<1x2x2xf32>
    %675 = vector.shape_cast %674 : vector<1x2x2xf32> to vector<2x2xf32>
    %cst_654 = arith.constant dense<0.000000e+00> : vector<2x4xf32>
    %676 = tpu.matmul %675, %673, %cst_654 {dimension_numbers = #tpu.dot_dimension_numbers<[1], [0], [0], [1], [0, 0, 1, 1], [], []>} : vector<2x2xf32>, vector<2x4xf32>, vector<2x4xf32> -> vector<2x4xf32>
    %677 = arith.addf %668, %676 : vector<2x4xf32>
    %c0_655 = arith.constant 0 : index
    %c33_656 = arith.constant 33 : index
    %678 = vector.load %arg40[%c0_655, %c33_656] : memref<16x384xf32, #tpu.memory_space<vmem>>, vector<2x4xf32>
    %c5_657 = arith.constant 5 : index
    %c0_658 = arith.constant 0 : index
    %c0_659 = arith.constant 0 : index
    %679 = vector.load %arg5[%c5_657, %c0_658, %c0_659] : memref<9x1x4xf32, #tpu.memory_space<vmem>>, vector<1x1x4xf32>
    %680 = vector.shape_cast %679 : vector<1x1x4xf32> to vector<1x4xf32>
    %681 = vector.broadcast %680 : vector<1x4xf32> to vector<2x4xf32>
    %682 = arith.mulf %678, %681 : vector<2x4xf32>
    %c5_660 = arith.constant 5 : index
    %c0_661 = arith.constant 0 : index
    %c0_662 = arith.constant 0 : index
    %683 = vector.load %arg20[%c5_660, %c0_661, %c0_662] : memref<9x2x2xf32, #tpu.memory_space<vmem>>, vector<1x2x2xf32>
    %684 = vector.shape_cast %683 : vector<1x2x2xf32> to vector<2x2xf32>
    %cst_663 = arith.constant dense<0.000000e+00> : vector<2x4xf32>
    %685 = tpu.matmul %684, %682, %cst_663 {dimension_numbers = #tpu.dot_dimension_numbers<[1], [0], [0], [1], [0, 0, 1, 1], [], []>} : vector<2x2xf32>, vector<2x4xf32>, vector<2x4xf32> -> vector<2x4xf32>
    %686 = arith.addf %677, %685 : vector<2x4xf32>
    %c0_664 = arith.constant 0 : index
    %c33_665 = arith.constant 33 : index
    %687 = vector.load %arg40[%c0_664, %c33_665] : memref<16x384xf32, #tpu.memory_space<vmem>>, vector<2x4xf32>
    %c6_666 = arith.constant 6 : index
    %c0_667 = arith.constant 0 : index
    %c0_668 = arith.constant 0 : index
    %688 = vector.load %arg5[%c6_666, %c0_667, %c0_668] : memref<9x1x4xf32, #tpu.memory_space<vmem>>, vector<1x1x4xf32>
    %689 = vector.shape_cast %688 : vector<1x1x4xf32> to vector<1x4xf32>
    %690 = vector.broadcast %689 : vector<1x4xf32> to vector<2x4xf32>
    %691 = arith.mulf %687, %690 : vector<2x4xf32>
    %c6_669 = arith.constant 6 : index
    %c0_670 = arith.constant 0 : index
    %c0_671 = arith.constant 0 : index
    %692 = vector.load %arg20[%c6_669, %c0_670, %c0_671] : memref<9x2x2xf32, #tpu.memory_space<vmem>>, vector<1x2x2xf32>
    %693 = vector.shape_cast %692 : vector<1x2x2xf32> to vector<2x2xf32>
    %cst_672 = arith.constant dense<0.000000e+00> : vector<2x4xf32>
    %694 = tpu.matmul %693, %691, %cst_672 {dimension_numbers = #tpu.dot_dimension_numbers<[1], [0], [0], [1], [0, 0, 1, 1], [], []>} : vector<2x2xf32>, vector<2x4xf32>, vector<2x4xf32> -> vector<2x4xf32>
    %695 = arith.addf %686, %694 : vector<2x4xf32>
    %c0_673 = arith.constant 0 : index
    %c34_674 = arith.constant 34 : index
    %696 = vector.load %arg40[%c0_673, %c34_674] : memref<16x384xf32, #tpu.memory_space<vmem>>, vector<2x4xf32>
    %c7_675 = arith.constant 7 : index
    %c0_676 = arith.constant 0 : index
    %c0_677 = arith.constant 0 : index
    %697 = vector.load %arg5[%c7_675, %c0_676, %c0_677] : memref<9x1x4xf32, #tpu.memory_space<vmem>>, vector<1x1x4xf32>
    %698 = vector.shape_cast %697 : vector<1x1x4xf32> to vector<1x4xf32>
    %699 = vector.broadcast %698 : vector<1x4xf32> to vector<2x4xf32>
    %700 = arith.mulf %696, %699 : vector<2x4xf32>
    %c7_678 = arith.constant 7 : index
    %c0_679 = arith.constant 0 : index
    %c0_680 = arith.constant 0 : index
    %701 = vector.load %arg20[%c7_678, %c0_679, %c0_680] : memref<9x2x2xf32, #tpu.memory_space<vmem>>, vector<1x2x2xf32>
    %702 = vector.shape_cast %701 : vector<1x2x2xf32> to vector<2x2xf32>
    %cst_681 = arith.constant dense<0.000000e+00> : vector<2x4xf32>
    %703 = tpu.matmul %702, %700, %cst_681 {dimension_numbers = #tpu.dot_dimension_numbers<[1], [0], [0], [1], [0, 0, 1, 1], [], []>} : vector<2x2xf32>, vector<2x4xf32>, vector<2x4xf32> -> vector<2x4xf32>
    %704 = arith.addf %695, %703 : vector<2x4xf32>
    %c0_682 = arith.constant 0 : index
    %c35_683 = arith.constant 35 : index
    %705 = vector.load %arg40[%c0_682, %c35_683] : memref<16x384xf32, #tpu.memory_space<vmem>>, vector<2x4xf32>
    %c8_684 = arith.constant 8 : index
    %c0_685 = arith.constant 0 : index
    %c0_686 = arith.constant 0 : index
    %706 = vector.load %arg5[%c8_684, %c0_685, %c0_686] : memref<9x1x4xf32, #tpu.memory_space<vmem>>, vector<1x1x4xf32>
    %707 = vector.shape_cast %706 : vector<1x1x4xf32> to vector<1x4xf32>
    %708 = vector.broadcast %707 : vector<1x4xf32> to vector<2x4xf32>
    %709 = arith.mulf %705, %708 : vector<2x4xf32>
    %c8_687 = arith.constant 8 : index
    %c0_688 = arith.constant 0 : index
    %c0_689 = arith.constant 0 : index
    %710 = vector.load %arg20[%c8_687, %c0_688, %c0_689] : memref<9x2x2xf32, #tpu.memory_space<vmem>>, vector<1x2x2xf32>
    %711 = vector.shape_cast %710 : vector<1x2x2xf32> to vector<2x2xf32>
    %cst_690 = arith.constant dense<0.000000e+00> : vector<2x4xf32>
    %712 = tpu.matmul %711, %709, %cst_690 {dimension_numbers = #tpu.dot_dimension_numbers<[1], [0], [0], [1], [0, 0, 1, 1], [], []>} : vector<2x2xf32>, vector<2x4xf32>, vector<2x4xf32> -> vector<2x4xf32>
    %713 = arith.addf %704, %712 : vector<2x4xf32>
    %c0_691 = arith.constant 0 : index
    %c0_692 = arith.constant 0 : index
    %714 = vector.load %arg21[%c0_691, %c0_692] : memref<2x1xf32, #tpu.memory_space<vmem>>, vector<2x1xf32>
    %715 = vector.broadcast %714 : vector<2x1xf32> to vector<2x4xf32>
    %716 = arith.addf %713, %715 : vector<2x4xf32>
    %cst_693 = arith.constant 0.000000e+00 : f32
    %717 = vector.broadcast %cst_693 : f32 to vector<2x4xf32>
    %718 = arith.maximumf %716, %717 : vector<2x4xf32>
    %c0_694 = arith.constant 0 : index
    %c0_695 = arith.constant 0 : index
    %c0_696 = arith.constant 0 : index
    %719 = vector.load %arg25[%c0_694, %c0_695, %c0_696] : memref<4x2x2xf32, #tpu.memory_space<vmem>>, vector<1x2x2xf32>
    %720 = vector.shape_cast %719 : vector<1x2x2xf32> to vector<2x2xf32>
    %cst_697 = arith.constant dense<0.000000e+00> : vector<2x4xf32>
    %721 = tpu.matmul %720, %718, %cst_697 {dimension_numbers = #tpu.dot_dimension_numbers<[1], [0], [0], [1], [0, 0, 1, 1], [], []>} : vector<2x2xf32>, vector<2x4xf32>, vector<2x4xf32> -> vector<2x4xf32>
    %c0_698 = arith.constant 0 : index
    %c0_699 = arith.constant 0 : index
    %c0_700 = arith.constant 0 : index
    %722 = vector.load %arg27[%c0_698, %c0_699, %c0_700] : memref<4x4x16xf32, #tpu.memory_space<vmem>>, vector<1x4x16xf32>
    %723 = vector.shape_cast %722 : vector<1x4x16xf32> to vector<4x16xf32>
    %cst_701 = arith.constant dense<0.000000e+00> : vector<2x16xf32>
    %724 = tpu.matmul %721, %723, %cst_701 {dimension_numbers = #tpu.dot_dimension_numbers<[1], [0], [0], [1], [0, 0, 1, 1], [], []>} : vector<2x4xf32>, vector<4x16xf32>, vector<2x16xf32> -> vector<2x16xf32>
    %c1_702 = arith.constant 1 : index
    %c0_703 = arith.constant 0 : index
    %c0_704 = arith.constant 0 : index
    %725 = vector.load %arg25[%c1_702, %c0_703, %c0_704] : memref<4x2x2xf32, #tpu.memory_space<vmem>>, vector<1x2x2xf32>
    %726 = vector.shape_cast %725 : vector<1x2x2xf32> to vector<2x2xf32>
    %cst_705 = arith.constant dense<0.000000e+00> : vector<2x4xf32>
    %727 = tpu.matmul %726, %718, %cst_705 {dimension_numbers = #tpu.dot_dimension_numbers<[1], [0], [0], [1], [0, 0, 1, 1], [], []>} : vector<2x2xf32>, vector<2x4xf32>, vector<2x4xf32> -> vector<2x4xf32>
    %c1_706 = arith.constant 1 : index
    %c0_707 = arith.constant 0 : index
    %c0_708 = arith.constant 0 : index
    %728 = vector.load %arg27[%c1_706, %c0_707, %c0_708] : memref<4x4x16xf32, #tpu.memory_space<vmem>>, vector<1x4x16xf32>
    %729 = vector.shape_cast %728 : vector<1x4x16xf32> to vector<4x16xf32>
    %cst_709 = arith.constant dense<0.000000e+00> : vector<2x16xf32>
    %730 = tpu.matmul %727, %729, %cst_709 {dimension_numbers = #tpu.dot_dimension_numbers<[1], [0], [0], [1], [0, 0, 1, 1], [], []>} : vector<2x4xf32>, vector<4x16xf32>, vector<2x16xf32> -> vector<2x16xf32>
    %731 = arith.addf %724, %730 : vector<2x16xf32>
    %c2_710 = arith.constant 2 : index
    %c0_711 = arith.constant 0 : index
    %c0_712 = arith.constant 0 : index
    %732 = vector.load %arg25[%c2_710, %c0_711, %c0_712] : memref<4x2x2xf32, #tpu.memory_space<vmem>>, vector<1x2x2xf32>
    %733 = vector.shape_cast %732 : vector<1x2x2xf32> to vector<2x2xf32>
    %cst_713 = arith.constant dense<0.000000e+00> : vector<2x4xf32>
    %734 = tpu.matmul %733, %718, %cst_713 {dimension_numbers = #tpu.dot_dimension_numbers<[1], [0], [0], [1], [0, 0, 1, 1], [], []>} : vector<2x2xf32>, vector<2x4xf32>, vector<2x4xf32> -> vector<2x4xf32>
    %c2_714 = arith.constant 2 : index
    %c0_715 = arith.constant 0 : index
    %c0_716 = arith.constant 0 : index
    %735 = vector.load %arg27[%c2_714, %c0_715, %c0_716] : memref<4x4x16xf32, #tpu.memory_space<vmem>>, vector<1x4x16xf32>
    %736 = vector.shape_cast %735 : vector<1x4x16xf32> to vector<4x16xf32>
    %cst_717 = arith.constant dense<0.000000e+00> : vector<2x16xf32>
    %737 = tpu.matmul %734, %736, %cst_717 {dimension_numbers = #tpu.dot_dimension_numbers<[1], [0], [0], [1], [0, 0, 1, 1], [], []>} : vector<2x4xf32>, vector<4x16xf32>, vector<2x16xf32> -> vector<2x16xf32>
    %738 = arith.addf %731, %737 : vector<2x16xf32>
    %c3_718 = arith.constant 3 : index
    %c0_719 = arith.constant 0 : index
    %c0_720 = arith.constant 0 : index
    %739 = vector.load %arg25[%c3_718, %c0_719, %c0_720] : memref<4x2x2xf32, #tpu.memory_space<vmem>>, vector<1x2x2xf32>
    %740 = vector.shape_cast %739 : vector<1x2x2xf32> to vector<2x2xf32>
    %cst_721 = arith.constant dense<0.000000e+00> : vector<2x4xf32>
    %741 = tpu.matmul %740, %718, %cst_721 {dimension_numbers = #tpu.dot_dimension_numbers<[1], [0], [0], [1], [0, 0, 1, 1], [], []>} : vector<2x2xf32>, vector<2x4xf32>, vector<2x4xf32> -> vector<2x4xf32>
    %c3_722 = arith.constant 3 : index
    %c0_723 = arith.constant 0 : index
    %c0_724 = arith.constant 0 : index
    %742 = vector.load %arg27[%c3_722, %c0_723, %c0_724] : memref<4x4x16xf32, #tpu.memory_space<vmem>>, vector<1x4x16xf32>
    %743 = vector.shape_cast %742 : vector<1x4x16xf32> to vector<4x16xf32>
    %cst_725 = arith.constant dense<0.000000e+00> : vector<2x16xf32>
    %744 = tpu.matmul %741, %743, %cst_725 {dimension_numbers = #tpu.dot_dimension_numbers<[1], [0], [0], [1], [0, 0, 1, 1], [], []>} : vector<2x4xf32>, vector<4x16xf32>, vector<2x16xf32> -> vector<2x16xf32>
    %745 = arith.addf %738, %744 : vector<2x16xf32>
    %c0_726 = arith.constant 0 : index
    %c0_727 = arith.constant 0 : index
    %746 = vector.load %arg26[%c0_726, %c0_727] : memref<2x1xf32, #tpu.memory_space<vmem>>, vector<2x1xf32>
    %747 = vector.broadcast %746 : vector<2x1xf32> to vector<2x16xf32>
    %748 = arith.addf %745, %747 : vector<2x16xf32>
    %c0_728 = arith.constant 0 : index
    %c0_729 = arith.constant 0 : index
    %c0_730 = arith.constant 0 : index
    %749 = vector.load %arg28[%c0_728, %c0_729, %c0_730] : memref<4x4x2xf32, #tpu.memory_space<vmem>>, vector<1x4x2xf32>
    %750 = vector.shape_cast %749 : vector<1x4x2xf32> to vector<4x2xf32>
    %cst_731 = arith.constant dense<0.000000e+00> : vector<4x16xf32>
    %751 = tpu.matmul %750, %748, %cst_731 {dimension_numbers = #tpu.dot_dimension_numbers<[1], [0], [0], [1], [0, 0, 1, 1], [], []>} : vector<4x2xf32>, vector<2x16xf32>, vector<4x16xf32> -> vector<4x16xf32>
    %c0_732 = arith.constant 0 : index
    %c0_733 = arith.constant 0 : index
    %c0_734 = arith.constant 0 : index
    %752 = vector.load %arg29[%c0_732, %c0_733, %c0_734] : memref<4x4x2xf32, #tpu.memory_space<vmem>>, vector<1x4x2xf32>
    %753 = vector.shape_cast %752 : vector<1x4x2xf32> to vector<4x2xf32>
    %cst_735 = arith.constant dense<0.000000e+00> : vector<4x16xf32>
    %754 = tpu.matmul %753, %537, %cst_735 {dimension_numbers = #tpu.dot_dimension_numbers<[1], [0], [0], [1], [0, 0, 1, 1], [], []>} : vector<4x2xf32>, vector<2x16xf32>, vector<4x16xf32> -> vector<4x16xf32>
    %755 = arith.addf %751, %754 : vector<4x16xf32>
    %c0_736 = arith.constant 0 : index
    %c0_737 = arith.constant 0 : index
    %c0_738 = arith.constant 0 : index
    %756 = vector.load %arg31[%c0_736, %c0_737, %c0_738] : memref<4x16x64xf32, #tpu.memory_space<vmem>>, vector<1x16x64xf32>
    %757 = vector.shape_cast %756 : vector<1x16x64xf32> to vector<16x64xf32>
    %cst_739 = arith.constant dense<0.000000e+00> : vector<4x64xf32>
    %758 = tpu.matmul %755, %757, %cst_739 {dimension_numbers = #tpu.dot_dimension_numbers<[1], [0], [0], [1], [0, 0, 1, 1], [], []>} : vector<4x16xf32>, vector<16x64xf32>, vector<4x64xf32> -> vector<4x64xf32>
    %c1_740 = arith.constant 1 : index
    %c0_741 = arith.constant 0 : index
    %c0_742 = arith.constant 0 : index
    %759 = vector.load %arg28[%c1_740, %c0_741, %c0_742] : memref<4x4x2xf32, #tpu.memory_space<vmem>>, vector<1x4x2xf32>
    %760 = vector.shape_cast %759 : vector<1x4x2xf32> to vector<4x2xf32>
    %cst_743 = arith.constant dense<0.000000e+00> : vector<4x16xf32>
    %761 = tpu.matmul %760, %748, %cst_743 {dimension_numbers = #tpu.dot_dimension_numbers<[1], [0], [0], [1], [0, 0, 1, 1], [], []>} : vector<4x2xf32>, vector<2x16xf32>, vector<4x16xf32> -> vector<4x16xf32>
    %c1_744 = arith.constant 1 : index
    %c0_745 = arith.constant 0 : index
    %c0_746 = arith.constant 0 : index
    %762 = vector.load %arg29[%c1_744, %c0_745, %c0_746] : memref<4x4x2xf32, #tpu.memory_space<vmem>>, vector<1x4x2xf32>
    %763 = vector.shape_cast %762 : vector<1x4x2xf32> to vector<4x2xf32>
    %cst_747 = arith.constant dense<0.000000e+00> : vector<4x16xf32>
    %764 = tpu.matmul %763, %537, %cst_747 {dimension_numbers = #tpu.dot_dimension_numbers<[1], [0], [0], [1], [0, 0, 1, 1], [], []>} : vector<4x2xf32>, vector<2x16xf32>, vector<4x16xf32> -> vector<4x16xf32>
    %765 = arith.addf %761, %764 : vector<4x16xf32>
    %c1_748 = arith.constant 1 : index
    %c0_749 = arith.constant 0 : index
    %c0_750 = arith.constant 0 : index
    %766 = vector.load %arg31[%c1_748, %c0_749, %c0_750] : memref<4x16x64xf32, #tpu.memory_space<vmem>>, vector<1x16x64xf32>
    %767 = vector.shape_cast %766 : vector<1x16x64xf32> to vector<16x64xf32>
    %cst_751 = arith.constant dense<0.000000e+00> : vector<4x64xf32>
    %768 = tpu.matmul %765, %767, %cst_751 {dimension_numbers = #tpu.dot_dimension_numbers<[1], [0], [0], [1], [0, 0, 1, 1], [], []>} : vector<4x16xf32>, vector<16x64xf32>, vector<4x64xf32> -> vector<4x64xf32>
    %769 = arith.addf %758, %768 : vector<4x64xf32>
    %c2_752 = arith.constant 2 : index
    %c0_753 = arith.constant 0 : index
    %c0_754 = arith.constant 0 : index
    %770 = vector.load %arg28[%c2_752, %c0_753, %c0_754] : memref<4x4x2xf32, #tpu.memory_space<vmem>>, vector<1x4x2xf32>
    %771 = vector.shape_cast %770 : vector<1x4x2xf32> to vector<4x2xf32>
    %cst_755 = arith.constant dense<0.000000e+00> : vector<4x16xf32>
    %772 = tpu.matmul %771, %748, %cst_755 {dimension_numbers = #tpu.dot_dimension_numbers<[1], [0], [0], [1], [0, 0, 1, 1], [], []>} : vector<4x2xf32>, vector<2x16xf32>, vector<4x16xf32> -> vector<4x16xf32>
    %c2_756 = arith.constant 2 : index
    %c0_757 = arith.constant 0 : index
    %c0_758 = arith.constant 0 : index
    %773 = vector.load %arg29[%c2_756, %c0_757, %c0_758] : memref<4x4x2xf32, #tpu.memory_space<vmem>>, vector<1x4x2xf32>
    %774 = vector.shape_cast %773 : vector<1x4x2xf32> to vector<4x2xf32>
    %cst_759 = arith.constant dense<0.000000e+00> : vector<4x16xf32>
    %775 = tpu.matmul %774, %537, %cst_759 {dimension_numbers = #tpu.dot_dimension_numbers<[1], [0], [0], [1], [0, 0, 1, 1], [], []>} : vector<4x2xf32>, vector<2x16xf32>, vector<4x16xf32> -> vector<4x16xf32>
    %776 = arith.addf %772, %775 : vector<4x16xf32>
    %c2_760 = arith.constant 2 : index
    %c0_761 = arith.constant 0 : index
    %c0_762 = arith.constant 0 : index
    %777 = vector.load %arg31[%c2_760, %c0_761, %c0_762] : memref<4x16x64xf32, #tpu.memory_space<vmem>>, vector<1x16x64xf32>
    %778 = vector.shape_cast %777 : vector<1x16x64xf32> to vector<16x64xf32>
    %cst_763 = arith.constant dense<0.000000e+00> : vector<4x64xf32>
    %779 = tpu.matmul %776, %778, %cst_763 {dimension_numbers = #tpu.dot_dimension_numbers<[1], [0], [0], [1], [0, 0, 1, 1], [], []>} : vector<4x16xf32>, vector<16x64xf32>, vector<4x64xf32> -> vector<4x64xf32>
    %780 = arith.addf %769, %779 : vector<4x64xf32>
    %c3_764 = arith.constant 3 : index
    %c0_765 = arith.constant 0 : index
    %c0_766 = arith.constant 0 : index
    %781 = vector.load %arg28[%c3_764, %c0_765, %c0_766] : memref<4x4x2xf32, #tpu.memory_space<vmem>>, vector<1x4x2xf32>
    %782 = vector.shape_cast %781 : vector<1x4x2xf32> to vector<4x2xf32>
    %cst_767 = arith.constant dense<0.000000e+00> : vector<4x16xf32>
    %783 = tpu.matmul %782, %748, %cst_767 {dimension_numbers = #tpu.dot_dimension_numbers<[1], [0], [0], [1], [0, 0, 1, 1], [], []>} : vector<4x2xf32>, vector<2x16xf32>, vector<4x16xf32> -> vector<4x16xf32>
    %c3_768 = arith.constant 3 : index
    %c0_769 = arith.constant 0 : index
    %c0_770 = arith.constant 0 : index
    %784 = vector.load %arg29[%c3_768, %c0_769, %c0_770] : memref<4x4x2xf32, #tpu.memory_space<vmem>>, vector<1x4x2xf32>
    %785 = vector.shape_cast %784 : vector<1x4x2xf32> to vector<4x2xf32>
    %cst_771 = arith.constant dense<0.000000e+00> : vector<4x16xf32>
    %786 = tpu.matmul %785, %537, %cst_771 {dimension_numbers = #tpu.dot_dimension_numbers<[1], [0], [0], [1], [0, 0, 1, 1], [], []>} : vector<4x2xf32>, vector<2x16xf32>, vector<4x16xf32> -> vector<4x16xf32>
    %787 = arith.addf %783, %786 : vector<4x16xf32>
    %c3_772 = arith.constant 3 : index
    %c0_773 = arith.constant 0 : index
    %c0_774 = arith.constant 0 : index
    %788 = vector.load %arg31[%c3_772, %c0_773, %c0_774] : memref<4x16x64xf32, #tpu.memory_space<vmem>>, vector<1x16x64xf32>
    %789 = vector.shape_cast %788 : vector<1x16x64xf32> to vector<16x64xf32>
    %cst_775 = arith.constant dense<0.000000e+00> : vector<4x64xf32>
    %790 = tpu.matmul %787, %789, %cst_775 {dimension_numbers = #tpu.dot_dimension_numbers<[1], [0], [0], [1], [0, 0, 1, 1], [], []>} : vector<4x16xf32>, vector<16x64xf32>, vector<4x64xf32> -> vector<4x64xf32>
    %791 = arith.addf %780, %790 : vector<4x64xf32>
    %c0_776 = arith.constant 0 : index
    %c0_777 = arith.constant 0 : index
    %792 = vector.load %arg30[%c0_776, %c0_777] : memref<4x1xf32, #tpu.memory_space<vmem>>, vector<4x1xf32>
    %793 = vector.broadcast %792 : vector<4x1xf32> to vector<4x64xf32>
    %794 = arith.addf %791, %793 : vector<4x64xf32>
    %c0_778 = arith.constant 0 : index
    %c0_779 = arith.constant 0 : index
    %c0_780 = arith.constant 0 : index
    %795 = vector.load %arg32[%c0_778, %c0_779, %c0_780] : memref<4x8x4xf32, #tpu.memory_space<vmem>>, vector<1x8x4xf32>
    %796 = vector.shape_cast %795 : vector<1x8x4xf32> to vector<8x4xf32>
    %cst_781 = arith.constant dense<0.000000e+00> : vector<8x64xf32>
    %797 = tpu.matmul %796, %794, %cst_781 {dimension_numbers = #tpu.dot_dimension_numbers<[1], [0], [0], [1], [0, 0, 1, 1], [], []>} : vector<8x4xf32>, vector<4x64xf32>, vector<8x64xf32> -> vector<8x64xf32>
    %c0_782 = arith.constant 0 : index
    %c0_783 = arith.constant 0 : index
    %c0_784 = arith.constant 0 : index
    %798 = vector.load %arg33[%c0_782, %c0_783, %c0_784] : memref<4x8x4xf32, #tpu.memory_space<vmem>>, vector<1x8x4xf32>
    %799 = vector.shape_cast %798 : vector<1x8x4xf32> to vector<8x4xf32>
    %cst_785 = arith.constant dense<0.000000e+00> : vector<8x64xf32>
    %800 = tpu.matmul %799, %356, %cst_785 {dimension_numbers = #tpu.dot_dimension_numbers<[1], [0], [0], [1], [0, 0, 1, 1], [], []>} : vector<8x4xf32>, vector<4x64xf32>, vector<8x64xf32> -> vector<8x64xf32>
    %801 = arith.addf %797, %800 : vector<8x64xf32>
    %c0_786 = arith.constant 0 : index
    %c0_787 = arith.constant 0 : index
    %c0_788 = arith.constant 0 : index
    %802 = vector.load %arg35[%c0_786, %c0_787, %c0_788] : memref<4x64x256xf32, #tpu.memory_space<vmem>>, vector<1x64x256xf32>
    %803 = vector.shape_cast %802 : vector<1x64x256xf32> to vector<64x256xf32>
    %cst_789 = arith.constant dense<0.000000e+00> : vector<8x256xf32>
    %804 = tpu.matmul %801, %803, %cst_789 {dimension_numbers = #tpu.dot_dimension_numbers<[1], [0], [0], [1], [0, 0, 1, 1], [], []>} : vector<8x64xf32>, vector<64x256xf32>, vector<8x256xf32> -> vector<8x256xf32>
    %c1_790 = arith.constant 1 : index
    %c0_791 = arith.constant 0 : index
    %c0_792 = arith.constant 0 : index
    %805 = vector.load %arg32[%c1_790, %c0_791, %c0_792] : memref<4x8x4xf32, #tpu.memory_space<vmem>>, vector<1x8x4xf32>
    %806 = vector.shape_cast %805 : vector<1x8x4xf32> to vector<8x4xf32>
    %cst_793 = arith.constant dense<0.000000e+00> : vector<8x64xf32>
    %807 = tpu.matmul %806, %794, %cst_793 {dimension_numbers = #tpu.dot_dimension_numbers<[1], [0], [0], [1], [0, 0, 1, 1], [], []>} : vector<8x4xf32>, vector<4x64xf32>, vector<8x64xf32> -> vector<8x64xf32>
    %c1_794 = arith.constant 1 : index
    %c0_795 = arith.constant 0 : index
    %c0_796 = arith.constant 0 : index
    %808 = vector.load %arg33[%c1_794, %c0_795, %c0_796] : memref<4x8x4xf32, #tpu.memory_space<vmem>>, vector<1x8x4xf32>
    %809 = vector.shape_cast %808 : vector<1x8x4xf32> to vector<8x4xf32>
    %cst_797 = arith.constant dense<0.000000e+00> : vector<8x64xf32>
    %810 = tpu.matmul %809, %356, %cst_797 {dimension_numbers = #tpu.dot_dimension_numbers<[1], [0], [0], [1], [0, 0, 1, 1], [], []>} : vector<8x4xf32>, vector<4x64xf32>, vector<8x64xf32> -> vector<8x64xf32>
    %811 = arith.addf %807, %810 : vector<8x64xf32>
    %c1_798 = arith.constant 1 : index
    %c0_799 = arith.constant 0 : index
    %c0_800 = arith.constant 0 : index
    %812 = vector.load %arg35[%c1_798, %c0_799, %c0_800] : memref<4x64x256xf32, #tpu.memory_space<vmem>>, vector<1x64x256xf32>
    %813 = vector.shape_cast %812 : vector<1x64x256xf32> to vector<64x256xf32>
    %cst_801 = arith.constant dense<0.000000e+00> : vector<8x256xf32>
    %814 = tpu.matmul %811, %813, %cst_801 {dimension_numbers = #tpu.dot_dimension_numbers<[1], [0], [0], [1], [0, 0, 1, 1], [], []>} : vector<8x64xf32>, vector<64x256xf32>, vector<8x256xf32> -> vector<8x256xf32>
    %815 = arith.addf %804, %814 : vector<8x256xf32>
    %c2_802 = arith.constant 2 : index
    %c0_803 = arith.constant 0 : index
    %c0_804 = arith.constant 0 : index
    %816 = vector.load %arg32[%c2_802, %c0_803, %c0_804] : memref<4x8x4xf32, #tpu.memory_space<vmem>>, vector<1x8x4xf32>
    %817 = vector.shape_cast %816 : vector<1x8x4xf32> to vector<8x4xf32>
    %cst_805 = arith.constant dense<0.000000e+00> : vector<8x64xf32>
    %818 = tpu.matmul %817, %794, %cst_805 {dimension_numbers = #tpu.dot_dimension_numbers<[1], [0], [0], [1], [0, 0, 1, 1], [], []>} : vector<8x4xf32>, vector<4x64xf32>, vector<8x64xf32> -> vector<8x64xf32>
    %c2_806 = arith.constant 2 : index
    %c0_807 = arith.constant 0 : index
    %c0_808 = arith.constant 0 : index
    %819 = vector.load %arg33[%c2_806, %c0_807, %c0_808] : memref<4x8x4xf32, #tpu.memory_space<vmem>>, vector<1x8x4xf32>
    %820 = vector.shape_cast %819 : vector<1x8x4xf32> to vector<8x4xf32>
    %cst_809 = arith.constant dense<0.000000e+00> : vector<8x64xf32>
    %821 = tpu.matmul %820, %356, %cst_809 {dimension_numbers = #tpu.dot_dimension_numbers<[1], [0], [0], [1], [0, 0, 1, 1], [], []>} : vector<8x4xf32>, vector<4x64xf32>, vector<8x64xf32> -> vector<8x64xf32>
    %822 = arith.addf %818, %821 : vector<8x64xf32>
    %c2_810 = arith.constant 2 : index
    %c0_811 = arith.constant 0 : index
    %c0_812 = arith.constant 0 : index
    %823 = vector.load %arg35[%c2_810, %c0_811, %c0_812] : memref<4x64x256xf32, #tpu.memory_space<vmem>>, vector<1x64x256xf32>
    %824 = vector.shape_cast %823 : vector<1x64x256xf32> to vector<64x256xf32>
    %cst_813 = arith.constant dense<0.000000e+00> : vector<8x256xf32>
    %825 = tpu.matmul %822, %824, %cst_813 {dimension_numbers = #tpu.dot_dimension_numbers<[1], [0], [0], [1], [0, 0, 1, 1], [], []>} : vector<8x64xf32>, vector<64x256xf32>, vector<8x256xf32> -> vector<8x256xf32>
    %826 = arith.addf %815, %825 : vector<8x256xf32>
    %c3_814 = arith.constant 3 : index
    %c0_815 = arith.constant 0 : index
    %c0_816 = arith.constant 0 : index
    %827 = vector.load %arg32[%c3_814, %c0_815, %c0_816] : memref<4x8x4xf32, #tpu.memory_space<vmem>>, vector<1x8x4xf32>
    %828 = vector.shape_cast %827 : vector<1x8x4xf32> to vector<8x4xf32>
    %cst_817 = arith.constant dense<0.000000e+00> : vector<8x64xf32>
    %829 = tpu.matmul %828, %794, %cst_817 {dimension_numbers = #tpu.dot_dimension_numbers<[1], [0], [0], [1], [0, 0, 1, 1], [], []>} : vector<8x4xf32>, vector<4x64xf32>, vector<8x64xf32> -> vector<8x64xf32>
    %c3_818 = arith.constant 3 : index
    %c0_819 = arith.constant 0 : index
    %c0_820 = arith.constant 0 : index
    %830 = vector.load %arg33[%c3_818, %c0_819, %c0_820] : memref<4x8x4xf32, #tpu.memory_space<vmem>>, vector<1x8x4xf32>
    %831 = vector.shape_cast %830 : vector<1x8x4xf32> to vector<8x4xf32>
    %cst_821 = arith.constant dense<0.000000e+00> : vector<8x64xf32>
    %832 = tpu.matmul %831, %356, %cst_821 {dimension_numbers = #tpu.dot_dimension_numbers<[1], [0], [0], [1], [0, 0, 1, 1], [], []>} : vector<8x4xf32>, vector<4x64xf32>, vector<8x64xf32> -> vector<8x64xf32>
    %833 = arith.addf %829, %832 : vector<8x64xf32>
    %c3_822 = arith.constant 3 : index
    %c0_823 = arith.constant 0 : index
    %c0_824 = arith.constant 0 : index
    %834 = vector.load %arg35[%c3_822, %c0_823, %c0_824] : memref<4x64x256xf32, #tpu.memory_space<vmem>>, vector<1x64x256xf32>
    %835 = vector.shape_cast %834 : vector<1x64x256xf32> to vector<64x256xf32>
    %cst_825 = arith.constant dense<0.000000e+00> : vector<8x256xf32>
    %836 = tpu.matmul %833, %835, %cst_825 {dimension_numbers = #tpu.dot_dimension_numbers<[1], [0], [0], [1], [0, 0, 1, 1], [], []>} : vector<8x64xf32>, vector<64x256xf32>, vector<8x256xf32> -> vector<8x256xf32>
    %837 = arith.addf %826, %836 : vector<8x256xf32>
    %c0_826 = arith.constant 0 : index
    %c0_827 = arith.constant 0 : index
    %838 = vector.load %arg34[%c0_826, %c0_827] : memref<8x1xf32, #tpu.memory_space<vmem>>, vector<8x1xf32>
    %839 = vector.broadcast %838 : vector<8x1xf32> to vector<8x256xf32>
    %840 = arith.addf %837, %839 : vector<8x256xf32>
    %c0_828 = arith.constant 0 : index
    %c0_829 = arith.constant 0 : index
    %841 = vector.load %arg36[%c0_828, %c0_829] : memref<16x8xf32, #tpu.memory_space<vmem>>, vector<16x8xf32>
    %cst_830 = arith.constant dense<0.000000e+00> : vector<16x256xf32>
    %842 = tpu.matmul %841, %840, %cst_830 {dimension_numbers = #tpu.dot_dimension_numbers<[1], [0], [0], [1], [0, 0, 1, 1], [], []>} : vector<16x8xf32>, vector<8x256xf32>, vector<16x256xf32> -> vector<16x256xf32>
    %c0_831 = arith.constant 0 : index
    %c0_832 = arith.constant 0 : index
    %843 = vector.load %arg37[%c0_831, %c0_832] : memref<16x8xf32, #tpu.memory_space<vmem>>, vector<16x8xf32>
    %cst_833 = arith.constant dense<0.000000e+00> : vector<16x256xf32>
    %844 = tpu.matmul %843, %175, %cst_833 {dimension_numbers = #tpu.dot_dimension_numbers<[1], [0], [0], [1], [0, 0, 1, 1], [], []>} : vector<16x8xf32>, vector<8x256xf32>, vector<16x256xf32> -> vector<16x256xf32>
    %845 = arith.addf %842, %844 : vector<16x256xf32>
    %c0_834 = arith.constant 0 : index
    %c0_835 = arith.constant 0 : index
    %846 = vector.load %arg38[%c0_834, %c0_835] : memref<16x1xf32, #tpu.memory_space<vmem>>, vector<16x1xf32>
    %847 = vector.broadcast %846 : vector<16x1xf32> to vector<16x256xf32>
    %848 = arith.addf %845, %847 : vector<16x256xf32>
    %c0_836 = arith.constant 0 : index
    %c0_837 = arith.constant 0 : index
    %c0_838 = arith.constant 0 : index
    %849 = vector.load %arg39[%c0_836, %c0_837, %c0_838] : memref<1x16x256xf32, #tpu.memory_space<vmem>>, vector<1x16x256xf32>
    %850 = vector.shape_cast %849 : vector<1x16x256xf32> to vector<16x256xf32>
    %851 = vector.shape_cast %848 : vector<16x256xf32> to vector<1x16x256xf32>
    tpu.vector_store %arg39[%c0_836, %c0_837, %c0_838], %851 {strides = array<i32>} : memref<1x16x256xf32, #tpu.memory_space<vmem>>, vector<1x16x256xf32>,
    return
  }
  func.func @transform_0(%arg0: i32) -> (i32, i32, i32) {
    %c0_i32 = arith.constant 0 : i32
    %c0_i32_0 = arith.constant 0 : i32
    %c0_i32_1 = arith.constant 0 : i32
    return %arg0, %c0_i32, %c0_i32_0 : i32, i32, i32
  }
  func.func @transform_1(%arg0: i32) -> (i32, i32, i32) {
    %c0_i32 = arith.constant 0 : i32
    %c0_i32_0 = arith.constant 0 : i32
    %c0_i32_1 = arith.constant 0 : i32
    %c0_i32_2 = arith.constant 0 : i32
    return %c0_i32, %c0_i32_0, %c0_i32_1 : i32, i32, i32
  }
  func.func @transform_2(%arg0: i32) -> (i32, i32, i32) {
    %c0_i32 = arith.constant 0 : i32
    %c0_i32_0 = arith.constant 0 : i32
    %c0_i32_1 = arith.constant 0 : i32
    %c0_i32_2 = arith.constant 0 : i32
    return %c0_i32, %c0_i32_0, %c0_i32_1 : i32, i32, i32
  }
  func.func @transform_3(%arg0: i32) -> (i32, i32, i32) {
    %c0_i32 = arith.constant 0 : i32
    %c0_i32_0 = arith.constant 0 : i32
    %c0_i32_1 = arith.constant 0 : i32
    %c0_i32_2 = arith.constant 0 : i32
    return %c0_i32, %c0_i32_0, %c0_i32_1 : i32, i32, i32
  }
  func.func @transform_4(%arg0: i32) -> (i32, i32, i32) {
    %c0_i32 = arith.constant 0 : i32
    %c0_i32_0 = arith.constant 0 : i32
    %c0_i32_1 = arith.constant 0 : i32
    %c0_i32_2 = arith.constant 0 : i32
    return %c0_i32, %c0_i32_0, %c0_i32_1 : i32, i32, i32
  }
  func.func @transform_5(%arg0: i32) -> (i32, i32, i32) {
    %c0_i32 = arith.constant 0 : i32
    %c0_i32_0 = arith.constant 0 : i32
    %c0_i32_1 = arith.constant 0 : i32
    %c0_i32_2 = arith.constant 0 : i32
    return %c0_i32, %c0_i32_0, %c0_i32_1 : i32, i32, i32
  }
  func.func @transform_6(%arg0: i32) -> (i32, i32) {
    %c0_i32 = arith.constant 0 : i32
    %c0_i32_0 = arith.constant 0 : i32
    %c0_i32_1 = arith.constant 0 : i32
    return %c0_i32, %c0_i32_0 : i32, i32
  }
  func.func @transform_7(%arg0: i32) -> (i32, i32, i32) {
    %c0_i32 = arith.constant 0 : i32
    %c0_i32_0 = arith.constant 0 : i32
    %c0_i32_1 = arith.constant 0 : i32
    %c0_i32_2 = arith.constant 0 : i32
    return %c0_i32, %c0_i32_0, %c0_i32_1 : i32, i32, i32
  }
  func.func @transform_8(%arg0: i32) -> (i32, i32) {
    %c0_i32 = arith.constant 0 : i32
    %c0_i32_0 = arith.constant 0 : i32
    %c0_i32_1 = arith.constant 0 : i32
    return %c0_i32, %c0_i32_0 : i32, i32
  }
  func.func @transform_9(%arg0: i32) -> (i32, i32, i32) {
    %c0_i32 = arith.constant 0 : i32
    %c0_i32_0 = arith.constant 0 : i32
    %c0_i32_1 = arith.constant 0 : i32
    %c0_i32_2 = arith.constant 0 : i32
    return %c0_i32, %c0_i32_0, %c0_i32_1 : i32, i32, i32
  }
  func.func @transform_10(%arg0: i32) -> (i32, i32) {
    %c0_i32 = arith.constant 0 : i32
    %c0_i32_0 = arith.constant 0 : i32
    %c0_i32_1 = arith.constant 0 : i32
    return %c0_i32, %c0_i32_0 : i32, i32
  }
  func.func @transform_11(%arg0: i32) -> (i32, i32, i32) {
    %c0_i32 = arith.constant 0 : i32
    %c0_i32_0 = arith.constant 0 : i32
    %c0_i32_1 = arith.constant 0 : i32
    %c0_i32_2 = arith.constant 0 : i32
    return %c0_i32, %c0_i32_0, %c0_i32_1 : i32, i32, i32
  }
  func.func @transform_12(%arg0: i32) -> (i32, i32) {
    %c0_i32 = arith.constant 0 : i32
    %c0_i32_0 = arith.constant 0 : i32
    %c0_i32_1 = arith.constant 0 : i32
    return %c0_i32, %c0_i32_0 : i32, i32
  }
  func.func @transform_13(%arg0: i32) -> (i32, i32, i32) {
    %c0_i32 = arith.constant 0 : i32
    %c0_i32_0 = arith.constant 0 : i32
    %c0_i32_1 = arith.constant 0 : i32
    %c0_i32_2 = arith.constant 0 : i32
    return %c0_i32, %c0_i32_0, %c0_i32_1 : i32, i32, i32
  }
  func.func @transform_14(%arg0: i32) -> (i32, i32) {
    %c0_i32 = arith.constant 0 : i32
    %c0_i32_0 = arith.constant 0 : i32
    %c0_i32_1 = arith.constant 0 : i32
    return %c0_i32, %c0_i32_0 : i32, i32
  }
  func.func @transform_15(%arg0: i32) -> (i32, i32, i32) {
    %c0_i32 = arith.constant 0 : i32
    %c0_i32_0 = arith.constant 0 : i32
    %c0_i32_1 = arith.constant 0 : i32
    %c0_i32_2 = arith.constant 0 : i32
    return %c0_i32, %c0_i32_0, %c0_i32_1 : i32, i32, i32
  }
  func.func @transform_16(%arg0: i32) -> (i32, i32) {
    %c0_i32 = arith.constant 0 : i32
    %c0_i32_0 = arith.constant 0 : i32
    %c0_i32_1 = arith.constant 0 : i32
    return %c0_i32, %c0_i32_0 : i32, i32
  }
  func.func @transform_17(%arg0: i32) -> (i32, i32, i32) {
    %c0_i32 = arith.constant 0 : i32
    %c0_i32_0 = arith.constant 0 : i32
    %c0_i32_1 = arith.constant 0 : i32
    %c0_i32_2 = arith.constant 0 : i32
    return %c0_i32, %c0_i32_0, %c0_i32_1 : i32, i32, i32
  }
  func.func @transform_18(%arg0: i32) -> (i32, i32) {
    %c0_i32 = arith.constant 0 : i32
    %c0_i32_0 = arith.constant 0 : i32
    %c0_i32_1 = arith.constant 0 : i32
    return %c0_i32, %c0_i32_0 : i32, i32
  }
  func.func @transform_19(%arg0: i32) -> (i32, i32, i32) {
    %c0_i32 = arith.constant 0 : i32
    %c0_i32_0 = arith.constant 0 : i32
    %c0_i32_1 = arith.constant 0 : i32
    %c0_i32_2 = arith.constant 0 : i32
    return %c0_i32, %c0_i32_0, %c0_i32_1 : i32, i32, i32
  }
  func.func @transform_20(%arg0: i32) -> (i32, i32) {
    %c0_i32 = arith.constant 0 : i32
    %c0_i32_0 = arith.constant 0 : i32
    %c0_i32_1 = arith.constant 0 : i32
    return %c0_i32, %c0_i32_0 : i32, i32
  }
  func.func @transform_21(%arg0: i32) -> (i32, i32) {
    %c0_i32 = arith.constant 0 : i32
    %c0_i32_0 = arith.constant 0 : i32
    %c0_i32_1 = arith.constant 0 : i32
    return %c0_i32, %c0_i32_0 : i32, i32
  }
  func.func @transform_22(%arg0: i32) -> (i32, i32) {
    %c0_i32 = arith.constant 0 : i32
    %c0_i32_0 = arith.constant 0 : i32
    %c0_i32_1 = arith.constant 0 : i32
    return %c0_i32, %c0_i32_0 : i32, i32
  }
  func.func @transform_23(%arg0: i32) -> (i32, i32) {
    %c0_i32 = arith.constant 0 : i32
    %c0_i32_0 = arith.constant 0 : i32
    %c0_i32_1 = arith.constant 0 : i32
    return %c0_i32, %c0_i32_0 : i32, i32
  }
  func.func @transform_24(%arg0: i32) -> (i32, i32, i32) {
    %c0_i32 = arith.constant 0 : i32
    %c0_i32_0 = arith.constant 0 : i32
    %c0_i32_1 = arith.constant 0 : i32
    %c0_i32_2 = arith.constant 0 : i32
    return %c0_i32, %c0_i32_0, %c0_i32_1 : i32, i32, i32
  }
  func.func @transform_25(%arg0: i32) -> (i32, i32) {
    %c0_i32 = arith.constant 0 : i32
    %c0_i32_0 = arith.constant 0 : i32
    %c0_i32_1 = arith.constant 0 : i32
    return %c0_i32, %c0_i32_0 : i32, i32
  }
  func.func @transform_26(%arg0: i32) -> (i32, i32, i32) {
    %c0_i32 = arith.constant 0 : i32
    %c0_i32_0 = arith.constant 0 : i32
    %c0_i32_1 = arith.constant 0 : i32
    %c0_i32_2 = arith.constant 0 : i32
    return %c0_i32, %c0_i32_0, %c0_i32_1 : i32, i32, i32
  }
  func.func @transform_27(%arg0: i32) -> (i32, i32, i32) {
    %c0_i32 = arith.constant 0 : i32
    %c0_i32_0 = arith.constant 0 : i32
    %c0_i32_1 = arith.constant 0 : i32
    %c0_i32_2 = arith.constant 0 : i32
    return %c0_i32, %c0_i32_0, %c0_i32_1 : i32, i32, i32
  }
  func.func @transform_28(%arg0: i32) -> (i32, i32, i32) {
    %c0_i32 = arith.constant 0 : i32
    %c0_i32_0 = arith.constant 0 : i32
    %c0_i32_1 = arith.constant 0 : i32
    %c0_i32_2 = arith.constant 0 : i32
    return %c0_i32, %c0_i32_0, %c0_i32_1 : i32, i32, i32
  }
  func.func @transform_29(%arg0: i32) -> (i32, i32) {
    %c0_i32 = arith.constant 0 : i32
    %c0_i32_0 = arith.constant 0 : i32
    %c0_i32_1 = arith.constant 0 : i32
    return %c0_i32, %c0_i32_0 : i32, i32
  }
  func.func @transform_30(%arg0: i32) -> (i32, i32, i32) {
    %c0_i32 = arith.constant 0 : i32
    %c0_i32_0 = arith.constant 0 : i32
    %c0_i32_1 = arith.constant 0 : i32
    %c0_i32_2 = arith.constant 0 : i32
    return %c0_i32, %c0_i32_0, %c0_i32_1 : i32, i32, i32
  }
  func.func @transform_31(%arg0: i32) -> (i32, i32, i32) {
    %c0_i32 = arith.constant 0 : i32
    %c0_i32_0 = arith.constant 0 : i32
    %c0_i32_1 = arith.constant 0 : i32
    %c0_i32_2 = arith.constant 0 : i32
    return %c0_i32, %c0_i32_0, %c0_i32_1 : i32, i32, i32
  }
  func.func @transform_32(%arg0: i32) -> (i32, i32, i32) {
    %c0_i32 = arith.constant 0 : i32
    %c0_i32_0 = arith.constant 0 : i32
    %c0_i32_1 = arith.constant 0 : i32
    %c0_i32_2 = arith.constant 0 : i32
    return %c0_i32, %c0_i32_0, %c0_i32_1 : i32, i32, i32
  }
  func.func @transform_33(%arg0: i32) -> (i32, i32) {
    %c0_i32 = arith.constant 0 : i32
    %c0_i32_0 = arith.constant 0 : i32
    %c0_i32_1 = arith.constant 0 : i32
    return %c0_i32, %c0_i32_0 : i32, i32
  }
  func.func @transform_34(%arg0: i32) -> (i32, i32, i32) {
    %c0_i32 = arith.constant 0 : i32
    %c0_i32_0 = arith.constant 0 : i32
    %c0_i32_1 = arith.constant 0 : i32
    %c0_i32_2 = arith.constant 0 : i32
    return %c0_i32, %c0_i32_0, %c0_i32_1 : i32, i32, i32
  }
  func.func @transform_35(%arg0: i32) -> (i32, i32) {
    %c0_i32 = arith.constant 0 : i32
    %c0_i32_0 = arith.constant 0 : i32
    %c0_i32_1 = arith.constant 0 : i32
    return %c0_i32, %c0_i32_0 : i32, i32
  }
  func.func @transform_36(%arg0: i32) -> (i32, i32) {
    %c0_i32 = arith.constant 0 : i32
    %c0_i32_0 = arith.constant 0 : i32
    %c0_i32_1 = arith.constant 0 : i32
    return %c0_i32, %c0_i32_0 : i32, i32
  }
  func.func @transform_37(%arg0: i32) -> (i32, i32) {
    %c0_i32 = arith.constant 0 : i32
    %c0_i32_0 = arith.constant 0 : i32
    %c0_i32_1 = arith.constant 0 : i32
    return %c0_i32, %c0_i32_0 : i32, i32
  }
  func.func @transform_38(%arg0: i32) -> (i32, i32, i32) {
    %c0_i32 = arith.constant 0 : i32
    %c0_i32_0 = arith.constant 0 : i32
    %c0_i32_1 = arith.constant 0 : i32
    return %arg0, %c0_i32, %c0_i32_0 : i32, i32, i32
  }
}

</mosaic_0001>

<bundles_post_ra>
// kernel: unet_forward.1
= control target key start
LH: loop header
LB: loop body
LE: loop exit
PB: predicated region body
PF: predicated region fallthrough
CT: control target
= control target key end

     0   :  { %s13438_s6 = smov 1   ;;  %s13439_s10 = smov 2   ;;  %s15150_s0 = inlined_call_operand.smem [shape: u32[39], index: -1, kind: input, shape index: {}] }
   0x1   :  { %s13546_s5 = sld [smem:[%s15150_s0]]   ;;  %s13440_s14 = smov 3  }
   0x2   :  { %s13551_s9 = sld [smem:[%s15150_s0 + %s13438_s6]]   ;;  %s13441_s18 = smov 4  }
   0x3   :  { %s13556_s13 = sld [smem:[%s15150_s0 + %s13439_s10]]   ;;  %s13442_s22 = smov 5  }
   0x4   :  { %s13561_s17 = sld [smem:[%s15150_s0 + %s13440_s14]]   ;;  %s13443_s26 = smov 6  }
   0x5   :  { %s13566_s21 = sld [smem:[%s15150_s0 + %s13441_s18]]   ;;  %s13444_s30 = smov 7  }
   0x6   :  { %s13571_s25 = sld [smem:[%s15150_s0 + %s13442_s22]]   ;;  %s13445_s4 = smov 8  }
   0x7   :  { %15223 = sst [smem:[#allocation14_spill]] %s13546_s5  ;;  %s13446_s10 = smov 9  }
   0x8   :  { %s13576_s29 = sld [smem:[%s15150_s0 + %s13443_s26]]   ;;  %s13447_s15 = smov 10  }
   0x9   :  { %s13581_s3 = sld [smem:[%s15150_s0 + %s13444_s30]]   ;;  %s13448_s20 = smov 11  }
   0xa   :  { %15224 = sst [smem:[#allocation15_spill]] %s13561_s17  ;;  %s13449_s26 = smov 12  }
   0xb   :  { %s13586_s8 = sld [smem:[%s15150_s0 + %s13445_s4]]   ;;  %s13450_s1 = smov 13  }
   0xc   :  { %s13591_s14 = sld [smem:[%s15150_s0 + %s13446_s10]]   ;;  %s13451_s7 = smov 14  }
   0xd   :  { %s13596_s19 = sld [smem:[%s15150_s0 + %s13447_s15]]   ;;  %s13452_s15 = smov 15  }
   0xe   :  { %s13601_s24 = sld [smem:[%s15150_s0 + %s13448_s20]]   ;;  %s13453_s22 = smov 16  }
   0xf   :  { %15225 = sst [smem:[#allocation16_spill]] %s13581_s3  ;;  %s13454_s28 = smov 17  }
  0x10   :  { %s13606_s30 = sld [smem:[%s15150_s0 + %s13449_s26]]  }
  0x11   :  { %15226 = sst [smem:[#allocation17_spill]] %s13586_s8 }
  0x12   :  { %s13611_s6 = sld [smem:[%s15150_s0 + %s13450_s1]]  }
  0x13   :  { %s13616_s12 = sld [smem:[%s15150_s0 + %s13451_s7]]   ;;  %s13455_s7 = smov 18  }
  0x14   :  { %15227 = sst [smem:[#allocation18_spill]] %s13601_s24 }
  0x15   :  { %s13621_s20 = sld [smem:[%s15150_s0 + %s13452_s15]]   ;;  %s13456_s15 = smov 19  }
  0x16   :  { %s13626_s27 = sld [smem:[%s15150_s0 + %s13453_s22]]   ;;  %s13457_s22 = smov 20  }
  0x17   :  { %s13631_s4 = sld [smem:[%s15150_s0 + %s13454_s28]]   ;;  %s13458_s28 = smov 21  }
  0x18   :  { %15228 = sst [smem:[#allocation19_spill]] %s13611_s6 }
  0x19   :  { %15229 = sst [smem:[#allocation20_spill]] %s13616_s12 }
  0x1a   :  { %s13636_s6 = sld [smem:[%s15150_s0 + %s13455_s7]]   ;;  %s13459_s7 = smov 22  }
  0x1b   :  { %15230 = sst [smem:[#allocation21_spill]] %s13621_s20 }
  0x1c   :  { %15231 = sst [smem:[#allocation22_spill]] %s13626_s27 }
  0x1d   :  { %15232 = sst [smem:[#allocation23_spill]] %s13631_s4 }
  0x1e   :  { %s13641_s20 = sld [smem:[%s15150_s0 + %s13456_s15]]   ;;  %s13460_s15 = smov 23  }
  0x1f   :  { %s13646_s27 = sld [smem:[%s15150_s0 + %s13457_s22]]   ;;  %s13461_s22 = smov 24  }
  0x20   :  { %15233 = sst [smem:[#allocation24_spill]] %s13636_s6 }
  0x21   :  { %s13651_s4 = sld [smem:[%s15150_s0 + %s13458_s28]]   ;;  %s13462_s28 = smov 25  }
  0x22   :  { %s13656_s6 = sld [smem:[%s15150_s0 + %s13459_s7]]   ;;  %s13463_s7 = smov 26  }
  0x23   :  { %s13671_s12 = sld [smem:[%s15150_s0 + %s13462_s28]]   ;;  %s13466_s28 = smov 29  }
  0x24   :  { %15234 = sst [smem:[#allocation25_spill]] %s13641_s20 }
  0x25   :  { %15235 = sst [smem:[#allocation26_spill]] %s13646_s27 }
  0x26   :  { %s13661_s20 = sld [smem:[%s15150_s0 + %s13460_s15]]   ;;  %s13464_s15 = smov 27  }
  0x27   :  { %15236 = sst [smem:[#allocation27_spill]] %s13651_s4 }
  0x28   :  { %15237 = sst [smem:[#allocation28_spill]] %s13656_s6 }
  0x29   :  { %s13666_s27 = sld [smem:[%s15150_s0 + %s13461_s22]]   ;;  %s13465_s22 = smov 28  }
  0x2a   :  { %15239 = sst [smem:[#allocation30_spill]] %s13671_s12 }
  0x2b   :  { %s13676_s6 = sld [smem:[%s15150_s0 + %s13463_s7]]   ;;  %s13467_s7 = smov 30  }
  0x2c   :  { %s13681_s24 = sld [smem:[%s15150_s0 + %s13464_s15]]   ;;  %s13468_s15 = smov 31  }
  0x2d   :  { %s13691_s12 = sld [smem:[%s15150_s0 + %s13466_s28]]   ;;  %s13470_s28 = smov 33  }
  0x2f   :  { %15238 = sst [smem:[#allocation29_spill]] %s13666_s27 }
  0x30   :  { %s13686_s27 = sld [smem:[%s15150_s0 + %s13465_s22]]   ;;  %s13469_s22 = smov 32  }
  0x31   :  { %15240 = sst [smem:[#allocation31_spill]] %s13676_s6 }
  0x32   :  { %15241 = sst [smem:[#allocation32_spill]] %s13681_s24 }
  0x33   :  { %15243 = sst [smem:[#allocation34_spill]] %s13691_s12 }
  0x34   :  { %s13696_s6 = sld [smem:[%s15150_s0 + %s13467_s7]]   ;;  %s13471_s7 = smov 34  }
  0x35   :  { %s13701_s24 = sld [smem:[%s15150_s0 + %s13468_s15]]   ;;  %s13472_s15 = smov 35  }
  0x36   :  { %15242 = sst [smem:[#allocation33_spill]] %s13686_s27 }
  0x37   :  { %s13706_s27 = sld [smem:[%s15150_s0 + %s13469_s22]]   ;;  %s13473_s22 = smov 36  }
  0x38   :  { %s13711_s12 = sld [smem:[%s15150_s0 + %s13470_s28]]   ;;  %s13474_s28 = smov 37  }
  0x3a   :  { %15244 = sst [smem:[#allocation35_spill]] %s13696_s6 }
  0x3b   :  { %15245 = sst [smem:[#allocation36_spill]] %s13701_s24 }
  0x3c   :  { %s13716_s6 = sld [smem:[%s15150_s0 + %s13471_s7]]   ;;  %s13475_s7 = smov 38  }
  0x3d   :  { %15246 = sst [smem:[#allocation37_spill]] %s13706_s27 }
  0x3e   :  { %15247 = sst [smem:[#allocation38_spill]] %s13711_s12 }
  0x3f   :  { %s13721_s24 = sld [smem:[%s15150_s0 + %s13472_s15]]  }
  0x40   :  { %s13726_s27 = sld [smem:[%s15150_s0 + %s13473_s22]]  }
  0x41   :  { %s13731_s12 = sld [smem:[%s15150_s0 + %s13474_s28]]  }
  0x42   :  { %15248 = sst [smem:[#allocation39_spill]] %s13716_s6 }
  0x43   :  { %s13736_s6 = sld [smem:[%s15150_s0 + %s13475_s7]]  }
  0x44   :  { %82 = vsyncpa [#allocation4], 0 }
  0x45   :  { %83 = vsyncpa [#allocation6], 0 }
  0x46   :  { %84 = vsyncpa [#allocation9], 0  ;;  %s13738_s15 = smov 0  }
  0x47 LB: > { %s15249_s4 = sld [smem:[#allocation27_spill]]  ;;  %s15250_s3 = sld [smem:[#allocation16_spill]]  ;;  %s13436_s15 = sphi %s13738_s15, %s90_s15  }
  0x48   : > { %s15251_s17 = sld [smem:[#allocation15_spill]]  ;;  %s13744_s16 = sadd.s32 4294967295, %s13436_s15  }
  0x49   : > { %p11698_p0 = scmp.ge.s32.totalorder %s13436_s15, 1  ;;  %p924_p1 = scmp.lt.s32.totalorder %s13436_s15, 3 }
  0x4a   : > { %p15165_p2 = scmp.eq.s32.totalorder %s13744_s16, 0  ;;  %s13476_s18 = smov [#allocation5]  }
  0x4b   : > { %p13749_p3 = pnand %p11698_p0, %p924_p1  ;;  %s952_s22 = sshll.u32 %s13476_s18, 4  ;;  %s13753_s22 = int_to_ptr.vmem [resolvable:$true] %s952_s22 }
  0x4c   : > { %s13477_s23 = smov [#allocation8]   ;;  %s13478_s1 = smov [#allocation3]  }
  0x4d   : > { %s15252_s0 = scalar_select %p13749_p3, 1, 0 }
  0x4e   : > { %p12992_p4 = pneg %p13749_p3  ;;  %s990_s26 = sshll.u32 %s13477_s23, 4  ;;  %s13757_s26 = int_to_ptr.vmem [resolvable:$true] %s990_s26 }
  0x4f   : > { %s13765_s2 = sshll.u32 %s13478_s1, 4  ;;  %s13278_s7 = scalar_lea.hbm %s15251_s17, 144  ;;  %s940_s2 = int_to_ptr.vmem [resolvable:$true] %s13765_s2 }
  0x50   : > { %p13761_p5 = pnand %p15165_p2, %p12992_p4  ;;  %p13279_p6 = scmp.ne.s32.totalorder %s15251_s17, %s13278_s7 }
  0x51   : > { %p13285_p10 = scmp.lt.u32.totalorder %s13278_s7, %s15251_s17 }
  0x52   : > { %p13771_p7 = pneg %p13761_p5 }
  0x54   : > { %p13281_p8 = pnand %p13771_p7, %p13279_p6 }
  0x56   : > { %p13282_p9 = pneg %p13281_p8 }
  0x58   : > { %p13287_p11 = pnand %p13285_p10, %p13282_p9 }
  0x5a   : > { %13290 = shalt.err (!%p13287_p11)
}
  0x5b   : > { %s13291_s11 = scalar_lea.vmem %s13753_s22, 144  ;;  %s13298_s18 = scalar_lea.vmem %s13753_s22, 160 }
  0x5c   : > { %p13292_p12 = scmp.ne.s32.totalorder %s13753_s22, %s13291_s11  ;;  %p13299_p1 = scmp.lt.s32.totalorder %s13753_s22, %s13753_s22 }
  0x5d   : > { %p13300_p4 = scmp.lt.s32.totalorder %s13298_s18, %s13291_s11 }
  0x5e   : > { %p13294_p13 = pnand %p13292_p12, %p13771_p7 }
  0x5f   : > { %p13301_p2 = por %p13300_p4, %p13299_p1 }
  0x60   : > { %p13295_p0 = pneg %p13294_p13 }
  0x62   : > { %p13302_p6 = pnand %p13301_p2, %p13295_p0 }
  0x64   : > { %13305 = shalt.err (!%p13302_p6)
}
  0x65   : > { %s15167_s23 = smov 16   ;;  %s15169_s1 = smov 1  }
  0x66   : > { %12998 = dma.hbm_to_vmem [thread:$0]  (!%p13761_p5), %s15251_s17, 144, %s13753_s22, [#allocation6], %s15167_s23, %s15167_s23, %s15169_s1  }
  0x67   : > { %s13306_s7 = scalar_lea.hbm %s13591_s14, 576 }
  0x68   : > { %p13307_p8 = scmp.ne.s32.totalorder %s13591_s14, %s13306_s7  ;;  %p13313_p10 = scmp.lt.u32.totalorder %s13306_s7, %s13591_s14 }
  0x6a   : > { %p13309_p9 = pnand %p13307_p8, %p13771_p7 }
  0x6c   : > { %p13310_p2 = pneg %p13309_p9 }
  0x6e   : > { %p13315_p11 = pnand %p13313_p10, %p13310_p2 }
  0x70   : > { %13318 = shalt.err (!%p13315_p11)
}
  0x71   : > { %s13319_s11 = scalar_lea.vmem %s13757_s26, 576  ;;  %p13327_p1 = scmp.lt.s32.totalorder %s13757_s26, %s13757_s26 }
  0x72   : > { %p13320_p12 = scmp.ne.s32.totalorder %s13757_s26, %s13319_s11  ;;  %p13328_p4 = scmp.lt.s32.totalorder %s13319_s11, %s13319_s11 }
  0x74   : > { %p13322_p13 = pnand %p13320_p12, %p13771_p7  ;;  %p13329_p6 = por %p13328_p4, %p13327_p1 }
  0x76   : > { %p13323_p0 = pneg %p13322_p13 }
  0x78   : > { %p13330_p3 = pnand %p13329_p6, %p13323_p0 }
  0x7a   : > { %13333 = shalt.err (!%p13330_p3)
}
  0x7b   : > { %s13481_s22 = smov 64   ;;  %s13482_s18 = smov 4  }
  0x7c   : > { %13004 = dma.hbm_to_vmem [thread:$0]  (!%p13761_p5), %s13591_s14, 576, %s13757_s26, [#allocation9], %s13481_s22, %s13481_s22, %s13482_s18  }
  0x7d   : > { %s13483_s7 = smov [#allocation7]   ;;  %s13334_s1 = scalar_lea.hbm %s13556_s13, 144 }
  0x7e   : > { %s965_s23 = sshll.u32 %s13483_s7, 4  ;;  %p13335_p8 = scmp.ne.s32.totalorder %s13556_s13, %s13334_s1  ;;  %s966_s23 = int_to_ptr.vmem [resolvable:$true] %s965_s23 }
  0x7f   : > { %p13341_p2 = scmp.lt.u32.totalorder %s13334_s1, %s13556_s13 }
  0x80   : > { %p13337_p9 = pnand %p13335_p8, %p13771_p7 }
  0x82   : > { %p13338_p3 = pneg %p13337_p9 }
  0x84   : > { %p13343_p10 = pnand %p13341_p2, %p13338_p3 }
  0x86   : > { %13346 = shalt.err (!%p13343_p10)
}
  0x87   : > { %s13347_s11 = scalar_lea.vmem %s940_s2, 144  ;;  %s13354_s17 = scalar_lea.vmem %s940_s2, 160 }
  0x88   : > { %p13348_p11 = scmp.ne.s32.totalorder %s940_s2, %s13347_s11  ;;  %p13355_p0 = scmp.lt.s32.totalorder %s940_s2, %s940_s2 }
  0x89   : > { %p13356_p1 = scmp.lt.s32.totalorder %s13354_s17, %s13347_s11 }
  0x8a   : > { %p13350_p12 = pnand %p13348_p11, %p13771_p7 }
  0x8b   : > { %p13357_p4 = por %p13356_p1, %p13355_p0 }
  0x8c   : > { %p13351_p13 = pneg %p13350_p12 }
  0x8e   : > { %p13358_p6 = pnand %p13357_p4, %p13351_p13 }
  0x90   : > { %13361 = shalt.err (!%p13358_p6)
}
  0x91   : > { %s15255_s26 = smov 1   ;;  %s15256_s22 = smov 16  }
  0x92   : > { %12995 = dma.hbm_to_vmem [thread:$0]  (!%p13761_p5), %s13556_s13, 144, %s940_s2, [#allocation4], %s15256_s22, %s15256_s22, %s15255_s26  }
  0x93   : > { %s13362_s1 = scalar_lea.hbm %s13566_s21, 144 }
  0x94   : > { %p13363_p8 = scmp.ne.s32.totalorder %s13566_s21, %s13362_s1  ;;  %p13369_p2 = scmp.lt.u32.totalorder %s13362_s1, %s13566_s21 }
  0x96   : > { %p13365_p9 = pnand %p13363_p8, %p13771_p7 }
  0x98   : > { %p13366_p3 = pneg %p13365_p9 }
  0x9a   : > { %p13371_p10 = pnand %p13369_p2, %p13366_p3 }
  0x9c   : > { %13374 = shalt.err (!%p13371_p10)
}
  0x9d   : > { %s13375_s17 = scalar_lea.vmem %s966_s23, 144  ;;  %s13382_s18 = scalar_lea.vmem %s966_s23, 160 }
  0x9e   : > { %p13376_p11 = scmp.ne.s32.totalorder %s966_s23, %s13375_s17  ;;  %p13383_p0 = scmp.lt.s32.totalorder %s966_s23, %s966_s23 }
  0x9f   : > { %p13384_p1 = scmp.lt.s32.totalorder %s13382_s18, %s13375_s17 }
  0xa0   : > { %p13378_p12 = pnand %p13376_p11, %p13771_p7 }
  0xa1   : > { %p13385_p4 = por %p13384_p1, %p13383_p0 }
  0xa2   : > { %p13379_p13 = pneg %p13378_p12 }
  0xa4   : > { %p13386_p6 = pnand %p13385_p4, %p13379_p13 }
  0xa6   : > { %13389 = shalt.err (!%p13386_p6)
}
  0xa7   : > { %13001 = dma.hbm_to_vmem [thread:$0]  (!%p13761_p5), %s13566_s21, 144, %s966_s23, [#allocation6], %s15256_s22, %s15256_s22, %s15255_s26  }
  0xa8   : > { %s13484_s2 = smov [#allocation10]   ;;  %s13390_s11 = scalar_lea.hbm %s13661_s20, 256 }
  0xa9   : > { %s1042_s7 = sshll.u32 %s13484_s2, 4  ;;  %p13391_p8 = scmp.ne.s32.totalorder %s13661_s20, %s13390_s11  ;;  %s1043_s7 = int_to_ptr.vmem [resolvable:$true] %s1042_s7 }
  0xaa   : > { %p13397_p2 = scmp.lt.u32.totalorder %s13390_s11, %s13661_s20 }
  0xab   : > { %p13393_p9 = pnand %p13391_p8, %p13771_p7 }
  0xad   : > { %p13394_p3 = pneg %p13393_p9 }
  0xaf   : > { %p13399_p10 = pnand %p13397_p2, %p13394_p3 }
  0xb1   : > { %13402 = shalt.err (!%p13399_p10)
}
  0xb2   : > { %s13403_s1 = scalar_lea.vmem %s1043_s7, 256  ;;  %p13411_p0 = scmp.lt.s32.totalorder %s1043_s7, %s1043_s7 }
  0xb3   : > { %p13404_p11 = scmp.ne.s32.totalorder %s1043_s7, %s13403_s1  ;;  %p13412_p1 = scmp.lt.s32.totalorder %s13403_s1, %s13403_s1 }
  0xb5   : > { %p13406_p12 = pnand %p13404_p11, %p13771_p7  ;;  %p13413_p4 = por %p13412_p1, %p13411_p0 }
  0xb7   : > { %p13407_p13 = pneg %p13406_p12 }
  0xb9   : > { %p13414_p6 = pnand %p13413_p4, %p13407_p13 }
  0xbb   : > { %13417 = shalt.err (!%p13414_p6)
}
  0xbc   : > { %s13485_s23 = smov 128   ;;  %s13486_s26 = smov 8  }
  0xbd   : > { %13007 = dma.hbm_to_vmem [thread:$0]  (!%p13761_p5), %s13661_s20, 256, %s1043_s7, [#allocation9], %s13485_s23, %s13485_s23, %s13486_s26  }
  0xbe   : > { %p15257_p8 = scmp.ne.s32.totalorder %s15252_s0, 0 }
  0xbf   : > { %p15258_p9 = scmp.eq.s32.totalorder (!%p15257_p8), %s13744_s16, 0 }
  0xc0   : > { %1108 = sbr.rel (%p15257_p8) target bundleno = 8412 (0x20dc), region = 172 }
  0xc7   : > { %13423 = dma.done.wait (%p15258_p9), [#allocation4], 144   ;;  %p15259_p7 = pmov %p15258_p9 }
  0xc9   : > { %13425 = vsyncadd (%p15259_p7), [#allocation4], 4294967152  ;;  %p15260_p3 = pmov %p15259_p7 }
  0xcb   : > { %13427 = dma.done.wait (%p15260_p3), [#allocation6], 288   ;;  %p15261_p2 = pmov %p15260_p3 }
  0xcd   : > { %13429 = vsyncadd (%p15261_p2), [#allocation6], 4294967008  ;;  %p15262_p10 = pmov %p15261_p2 }
  0xce   : > { %p15263_p5 = pmov %p15261_p2 }
  0xcf   : > { %13431 = dma.done.wait (%p15262_p10), [#allocation9], 832  }
  0xd0   : > { %13433 = vsyncadd (%p15263_p5), [#allocation9], 4294966464  ;;  %s15264_s5 = sld [smem:[#allocation14_spill]]  ;;  %p1218_p11 = scmp.lt.s32.totalorder %s13744_s16, 1  ;;  %v1274_v0 = vlaneseq  ;;  %v13487_v1 = vmov 0.0   ;;  %vm1259_vm0 = vcmask 1047808  }
  0xd1   : > { %1231 = vst [vmem:[#allocation2 + $0x18] sm:$0xff] %v13487_v1  ;;  %1228 = vst [vmem:[#allocation2] sm:$0xff] %v13487_v1  ;;  %1420 = vmatprep.mubr.f32.mxu0 %v13487_v1  ;;  %2596 = vmatprep.mubr.f32.mxu1 %v13487_v1  ;;  %s15198_s10 = smov 32   ;;  %v11715_v9 = vld [vmem:[%s13551_s9 + $0x2] sm:$0x3]  ;;  %s13489_s22 = smov 16  }
  0xd2   : > { %1230 = vst [vmem:[#allocation2 + $0x10] sm:$0xff] %v13487_v1  ;;  %1233 = vst [vmem:[#allocation2 + $0x28] sm:$0xff] %v13487_v1  ;;  %s15325_s16 = smov (!%p1218_p11, %s13744_s16), 1  ;;  %v1275_v2 = vshrl.u32 %v1274_v0, 7  ;;  %v1272_v12 = vld [vmem:[%s13551_s9] sm:$0x3] }
  0xd3   : > { %s15172_s0 = sshll.u32 %s15325_s16, 5  ;;  %v11719_v15 = vld [vmem:[%s13551_s9 + $0x4] sm:$0x3]  ;;  %s13490_s17 = smov 15   ;;  %v11722_v18 = vld [vmem:[%s13551_s9 + $0x6] sm:$0x3] }
  0xd4   : > { %v13874_v5 = vsub.s32 1, %v1275_v2  ;;  %v13876_v6 = vsub.s32 0, %v1275_v2  ;;  %s13491_s18 = smov 17   ;;  %v11725_v21 = vld [vmem:[%s13551_s9 + $0x8] sm:$0x3]  ;;  %s15193_s2 = smov 31  }
  0xd5   : > { %v11728_v24 = vld [vmem:[%s13551_s9 + $0xa] sm:$0x3]  ;;  %v11731_v27 = vld [vmem:[%s13551_s9 + $0xc] sm:$0x3]  ;;  %s15190_s7 = smov 33   ;;  %s13494_s11 = smov 47  }
  0xd6   : > { %s1222_s28 = scalar_lea.vmem %s15264_s5, %s15172_s0  ;;  %v1308_v10 = vrot.slane %v11715_v9, %v13874_v5  ;;  %v1304_v11 = vrot.slane %v11715_v9, %v13876_v6  ;;  %v1281_v13 = vrot.slane %v1272_v12, %v13874_v5  ;;  %v1277_v14 = vrot.slane %v1272_v12, %v13876_v6  ;;  %v11734_v30 = vld [vmem:[%s13551_s9 + $0xe] sm:$0x3]  ;;  %s13495_s1 = smov 48   ;;  %v11737_v55 = vld [vmem:[%s13551_s9 + $0x10] sm:$0x3] }
  0xd7   : > { %v1236_v3 = vld [vmem:[%s1222_s28 + $0x10] sm:$0xff]  ;;  %v1234_v4 = vld [vmem:[%s1222_s28] sm:$0xff]  ;;  %v1237_v7 = vld [vmem:[%s1222_s28 + $0x18] sm:$0xff]  ;;  %v1538_v16 = vrot.slane %v11719_v15, %v13874_v5  ;;  %v1534_v17 = vrot.slane %v11719_v15, %v13876_v6  ;;  %v1669_v19 = vrot.slane %v11722_v18, %v13874_v5  ;;  %v1665_v20 = vrot.slane %v11722_v18, %v13876_v6  ;;  %s13496_s23 = smov 112   ;;  %s13497_s26 = smov 49  }
  0xd8   : > { %1246 = vrot.lane.b32.xlu1 %v1236_v3, %s15198_s10  ;;  %1242 = vrot.lane.b32.xlu0 %v1234_v4, %s15198_s10  ;;  %v1235_v8 = vld [vmem:[%s1222_s28 + $0x8] sm:$0xff]  ;;  %v1800_v22 = vrot.slane %v11725_v21, %v13874_v5  ;;  %v1796_v23 = vrot.slane %v11725_v21, %v13876_v6  ;;  %v1930_v25 = vrot.slane %v11728_v24, %v13874_v5  ;;  %vm1250_vm1 = vcmask 261120   ;;  %s15173_s28 = smov 113   ;;  %s15175_s0 = smov 111  }
  0xd9   : > { %v1926_v26 = vrot.slane %v11728_v24, %v13876_v6  ;;  %v2061_v28 = vrot.slane %v11731_v27, %v13874_v5  ;;  %v2057_v29 = vrot.slane %v11731_v27, %v13876_v6  ;;  %v2192_v31 = vrot.slane %v11734_v30, %v13874_v5  ;;  %s15271_s8 = sld [smem:[#allocation17_spill]]  ;;  %s15293_s5 = smov 29  }
  0xda   : > { %v2188_v32 = vrot.slane %v11734_v30, %v13876_v6  ;;  %vm1313_vm2 = vcmask 130048   ;;  %vm1286_vm3 = vcmask 121856   ;;  %v2319_v59 = vrot.slane %v11737_v55, %v13876_v6 }
  0xdb   : > { %vm1543_vm4 = vcmask 138240   ;;  %v2323_v62 = vrot.slane %v11737_v55, %v13874_v5  ;;  %vm1674_vm5 = vcmask 252928   ;;  %vm1935_vm6 = vcmask 269312  }
  0xdc   : > { %1248 = vrot.lane.b32.xlu1 %v1237_v7, %s15198_s10  ;;  %1244 = vrot.lane.b32.xlu0 %v1235_v8, %s15198_s10  ;;  %vm2066_vm7 = vcmask 384000   ;;  %vm2197_vm8 = vcmask 392192   ;;  %vm1344_vm9 = vcmask 916480   ;;  %vm2328_vm10 = vcmask 400384  }
  0xdd   : > { %vm1445_vm11 = vcmask 924672   ;;  %vm1574_vm12 = vcmask 908288   ;;  %vm1705_vm13 = vcmask 793600   ;;  %vm15185_vm14 = vcmask 785408  }
  0xde   : > { %vm15186_vm15 = vcmask 777216  }
  0xe0   : > { %1311 = vrot.lane.b32.xlu1 %v1308_v10, %s13489_s22  ;;  %1309 = vrot.lane.b32.xlu0 %v1304_v11, %s13489_s22 }
  0xe4   : > { %1284 = vrot.lane.b32.xlu1 %v1281_v13, %s13490_s17  ;;  %1282 = vrot.lane.b32.xlu0 %v1277_v14, %s13490_s17 }
  0xe8   : > { %1541 = vrot.lane.b32.xlu1 %v1538_v16, %s13491_s18  ;;  %1539 = vrot.lane.b32.xlu0 %v1534_v17, %s13491_s18 }
  0xec   : > { %1672 = vrot.lane.b32.xlu1 %v1669_v19, %s15193_s2  ;;  %1670 = vrot.lane.b32.xlu0 %v1665_v20, %s15193_s2 }
  0xf0   : > { %1803 = vrot.lane.b32.xlu1 %v1800_v22, %s15198_s10  ;;  %1801 = vrot.lane.b32.xlu0 %v1796_v23, %s15198_s10 }
  0xf4   : > { %1933 = vrot.lane.b32.xlu1 %v1930_v25, %s15190_s7  ;;  %1931 = vrot.lane.b32.xlu0 %v1926_v26, %s15190_s7 }
  0xf8   : > { %2064 = vrot.lane.b32.xlu1 %v2061_v28, %s13494_s11  ;;  %2062 = vrot.lane.b32.xlu0 %v2057_v29, %s13494_s11 }
  0xfc   : > { %2195 = vrot.lane.b32.xlu1 %v2192_v31, %s13495_s1  ;;  %2193 = vrot.lane.b32.xlu0 %v2188_v32, %s13495_s1 }
 0x14a   : > { %v1247_v33 = vpop.permute.xlu1 %1246  ;;  %v1243_v34 = vpop.permute.xlu0 %1242 }
 0x14b   : > { %1263 = vst.msk [vmem:[#allocation2 + $0x18] sm:$0xff] %vm1259_vm0, %v1247_v33  ;;  %1260 = vst.msk [vmem:[#allocation2] sm:$0xff] %vm1259_vm0, %v1243_v34 }
 0x14e   : > { %v1249_v35 = vpop.permute.xlu1 %1248  ;;  %v1245_v36 = vpop.permute.xlu0 %1244 }
 0x14f   : > { %v13923_v37 = vsel %vm1250_vm1, %v1247_v33, %v1249_v35  ;;  %1265 = vst.msk [vmem:[#allocation2 + $0x28] sm:$0xff] %vm1250_vm1, %v1249_v35  ;;  %1262 = vst.msk [vmem:[#allocation2 + $0x10] sm:$0xff] %vm1250_vm1, %v1245_v36  ;;  %v13935_v46 = vsel %vm1250_vm1, %v1243_v34, %v1245_v36 }
 0x152   : > { %v1312_v38 = vpop.permute.xlu1 %1311  ;;  %v1310_v39 = vpop.permute.xlu0 %1309  ;;  %v13927_v40 = vld [vmem:[#allocation2] sm:$0xff]  ;;  %v13929_v41 = vld [vmem:[#allocation2 + $0x18] sm:$0xff] }
 0x153   : > { %v1318_v42 = vmul.f32 %v1310_v39, %v13927_v40  ;;  %v1321_v43 = vmul.f32 %v1310_v39, %v13929_v41  ;;  %v1314_v44 = vsel %vm1313_vm2, %v1310_v39, %v1312_v38 }
 0x154   : > { %v1322_v53 = vmul.f32 %v1314_v44, %v13923_v37  ;;  %v1319_v54 = vmul.f32 %v1314_v44, %v13935_v46 }
 0x155   : > { %v13126_v45 = vpack.i.bf16 %v1321_v43, %v1318_v42 }
 0x156   : > { %v13937_v47 = vld [vmem:[#allocation2 + $0x10] sm:$0xff]  ;;  %v13939_v48 = vld [vmem:[#allocation2 + $0x28] sm:$0xff]  ;;  %v1285_v49 = vpop.permute.xlu1 %1284  ;;  %v1283_v50 = vpop.permute.xlu0 %1282 }
 0x157   : > { %v1320_v51 = vmul.f32 %v1312_v38, %v13937_v47  ;;  %v1323_v52 = vmul.f32 %v1312_v38, %v13939_v48  ;;  %13127 = vrot.lane.b32.xlu0 %v13126_v45, %s13496_s23  ;;  %v1287_v58 = vsel %vm1286_vm3, %v1283_v50, %v1285_v49  ;;  %v1293_v63 = vmul.f32 %v1285_v49, %v13937_v47 }
 0x158   : > { %v1292_v0 = vmul.f32 %v1287_v58, %v13935_v46  ;;  %v1296_v2 = vmul.f32 %v1285_v49, %v13939_v48  ;;  %v1295_v3 = vmul.f32 %v1287_v58, %v13923_v37  ;;  %v1291_v7 = vmul.f32 %v1283_v50, %v13927_v40 }
 0x159   : > { %v13136_v56 = vpack.i.bf16 %v1323_v52, %v1322_v53  ;;  %v13131_v57 = vpack.i.bf16 %v1320_v51, %v1319_v54  ;;  %v1294_v8 = vmul.f32 %v1283_v50, %v13929_v41 }
 0x15a   : > { %v1542_v60 = vpop.permute.xlu1 %1541  ;;  %v1540_v61 = vpop.permute.xlu0 %1539  ;;  %v13141_v9 = vpack.i.bf16 %v1293_v63, %v1292_v0  ;;  %v13146_v13 = vpack.i.bf16 %v1296_v2, %v1295_v3 }
 0x15b   : > { %13137 = vrot.lane.b32.xlu1 %v13136_v56, %s13496_s23  ;;  %13132 = vrot.lane.b32.xlu0 %v13131_v57, %s13496_s23  ;;  %v1544_v4 = vsel %vm1543_vm4, %v1540_v61, %v1542_v60  ;;  %v1550_v10 = vmul.f32 %v1542_v60, %v13937_v47  ;;  %v1553_v15 = vmul.f32 %v1542_v60, %v13939_v48 }
 0x15c   : > { %v1549_v14 = vmul.f32 %v1544_v4, %v13935_v46  ;;  %v13151_v16 = vpack.i.bf16 %v1294_v8, %v1291_v7  ;;  %v1552_v17 = vmul.f32 %v1544_v4, %v13923_v37  ;;  %v1548_v18 = vmul.f32 %v1540_v61, %v13927_v40 }
 0x15d   : > { %v1551_v19 = vmul.f32 %v1540_v61, %v13929_v41 }
 0x15e   : > { %v1673_v11 = vpop.permute.xlu1 %1672  ;;  %v1671_v12 = vpop.permute.xlu0 %1670  ;;  %v13156_v21 = vpack.i.bf16 %v1550_v10, %v1549_v14  ;;  %v13161_v25 = vpack.i.bf16 %v1553_v15, %v1552_v17 }
 0x15f   : > { %2324 = vrot.lane.b32.xlu1 %v2319_v59, %s13497_s26  ;;  %2326 = vrot.lane.b32.xlu0 %v2323_v62, %s13497_s26  ;;  %v1675_v20 = vsel %vm1674_vm5, %v1671_v12, %v1673_v11  ;;  %v1681_v24 = vmul.f32 %v1673_v11, %v13937_v47  ;;  %v1684_v27 = vmul.f32 %v1673_v11, %v13939_v48 }
 0x160   : > { %v1680_v26 = vmul.f32 %v1675_v20, %v13935_v46  ;;  %v13166_v28 = vpack.i.bf16 %v1551_v19, %v1548_v18  ;;  %v1683_v29 = vmul.f32 %v1675_v20, %v13923_v37  ;;  %v1679_v31 = vmul.f32 %v1671_v12, %v13927_v40 }
 0x161   : > { %v1682_v32 = vmul.f32 %v1671_v12, %v13929_v41 }
 0x162   : > { %v1804_v22 = vpop.permute.xlu1 %1803  ;;  %v1802_v23 = vpop.permute.xlu0 %1801  ;;  %v13171_v33 = vpack.i.bf16 %v1681_v24, %v1680_v26  ;;  %v13176_v38 = vpack.i.bf16 %v1684_v27, %v1683_v29 }
 0x163   : > { %13142 = vrot.lane.b32.xlu1 %v13141_v9, %s15173_s28  ;;  %13147 = vrot.lane.b32.xlu0 %v13146_v13, %s15173_s28  ;;  %v1805_v30 = vsel %vm1250_vm1, %v1802_v23, %v1804_v22  ;;  %v1811_v34 = vmul.f32 %v1804_v22, %v13937_v47  ;;  %v1814_v42 = vmul.f32 %v1804_v22, %v13939_v48 }
 0x164   : > { %v1810_v39 = vmul.f32 %v1805_v30, %v13935_v46  ;;  %v13181_v43 = vpack.i.bf16 %v1682_v32, %v1679_v31  ;;  %v1813_v44 = vmul.f32 %v1805_v30, %v13923_v37  ;;  %v1809_v45 = vmul.f32 %v1802_v23, %v13927_v40 }
 0x165   : > { %v1812_v49 = vmul.f32 %v1802_v23, %v13929_v41 }
 0x166   : > { %v1934_v35 = vpop.permute.xlu1 %1933  ;;  %v1932_v36 = vpop.permute.xlu0 %1931  ;;  %v13186_v51 = vpack.i.bf16 %v1811_v34, %v1810_v39  ;;  %v13191_v55 = vpack.i.bf16 %v1814_v42, %v1813_v44 }
 0x167   : > { %13152 = vrot.lane.b32.xlu1 %v13151_v16, %s15173_s28  ;;  %13157 = vrot.lane.b32.xlu0 %v13156_v21, %s15175_s0  ;;  %s15177_s28 = smov 97   ;;  %v1936_v50 = vsel %vm1935_vm6, %v1932_v36, %v1934_v35  ;;  %v1942_v54 = vmul.f32 %v1934_v35, %v13937_v47  ;;  %v1945_v57 = vmul.f32 %v1934_v35, %v13939_v48 }
 0x168   : > { %v1941_v56 = vmul.f32 %v1936_v50, %v13935_v46  ;;  %v13196_v58 = vpack.i.bf16 %v1812_v49, %v1809_v45  ;;  %v1944_v59 = vmul.f32 %v1936_v50, %v13923_v37  ;;  %v1940_v61 = vmul.f32 %v1932_v36, %v13927_v40 }
 0x169   : > { %v1943_v62 = vmul.f32 %v1932_v36, %v13929_v41 }
 0x16a   : > { %v2065_v52 = vpop.permute.xlu1 %2064  ;;  %v2063_v53 = vpop.permute.xlu0 %2062  ;;  %v13201_v63 = vpack.i.bf16 %v1942_v54, %v1941_v56  ;;  %v13206_v2 = vpack.i.bf16 %v1945_v57, %v1944_v59 }
 0x16b   : > { %13162 = vrot.lane.b32.xlu1 %v13161_v25, %s15175_s0  ;;  %13167 = vrot.lane.b32.xlu0 %v13166_v28, %s15175_s0  ;;  %s15179_s0 = smov 96   ;;  %v2067_v60 = vsel %vm2066_vm7, %v2063_v53, %v2065_v52  ;;  %v2073_v0 = vmul.f32 %v2065_v52, %v13937_v47  ;;  %v2076_v8 = vmul.f32 %v2065_v52, %v13939_v48 }
 0x16c   : > { %v2072_v3 = vmul.f32 %v2067_v60, %v13935_v46  ;;  %v13211_v9 = vpack.i.bf16 %v1943_v62, %v1940_v61  ;;  %v2075_v10 = vmul.f32 %v2067_v60, %v13923_v37  ;;  %v2071_v11 = vmul.f32 %v2063_v53, %v13927_v40 }
 0x16d   : > { %v2074_v12 = vmul.f32 %v2063_v53, %v13929_v41 }
 0x16e   : > { %v2196_v4 = vpop.permute.xlu1 %2195  ;;  %v2194_v7 = vpop.permute.xlu0 %2193  ;;  %v13216_v14 = vpack.i.bf16 %v2073_v0, %v2072_v3  ;;  %v13221_v16 = vpack.i.bf16 %v2076_v8, %v2075_v10 }
 0x16f   : > { %13172 = vrot.lane.b32.xlu1 %v13171_v33, %s15177_s28  ;;  %13177 = vrot.lane.b32.xlu0 %v13176_v38, %s15177_s28  ;;  %v2198_v13 = vsel %vm2197_vm8, %v2194_v7, %v2196_v4  ;;  %v2204_v15 = vmul.f32 %v2196_v4, %v13937_v47  ;;  %v2207_v18 = vmul.f32 %v2196_v4, %v13939_v48 }
 0x170   : > { %v2203_v17 = vmul.f32 %v2198_v13, %v13935_v46  ;;  %v13226_v19 = vpack.i.bf16 %v2074_v12, %v2071_v11  ;;  %v2206_v20 = vmul.f32 %v2198_v13, %v13923_v37  ;;  %v2202_v21 = vmul.f32 %v2194_v7, %v13927_v40 }
 0x171   : > { %v2205_v22 = vmul.f32 %v2194_v7, %v13929_v41  ;;  %v2444_v7 = vld [vmem:[%s13576_s29] sm:$0xff] }
 0x172   : > { %v13231_v23 = vpack.i.bf16 %v2204_v15, %v2203_v17  ;;  %v13236_v24 = vpack.i.bf16 %v2207_v18, %v2206_v20 }
 0x173   : > { %13182 = vrot.lane.b32.xlu1 %v13181_v43, %s15177_s28  ;;  %13187 = vrot.lane.b32.xlu0 %v13186_v51, %s15179_s0  ;;  %s15181_s28 = smov 95   ;;  %v13241_v25 = vpack.i.bf16 %v2205_v22, %v2202_v21 }
 0x177   : > { %13192 = vrot.lane.b32.xlu1 %v13191_v55, %s15179_s0  ;;  %13197 = vrot.lane.b32.xlu0 %v13196_v58, %s15179_s0  ;;  %s13503_s0 = smov 81  }
 0x17b   : > { %13202 = vrot.lane.b32.xlu1 %v13201_v63, %s15181_s28  ;;  %13207 = vrot.lane.b32.xlu0 %v13206_v2, %s15181_s28 }
 0x17f   : > { %13212 = vrot.lane.b32.xlu1 %v13211_v9, %s15181_s28  ;;  %13217 = vrot.lane.b32.xlu0 %v13216_v14, %s13503_s0  ;;  %s15183_s28 = smov 80  }
 0x183   : > { %13222 = vrot.lane.b32.xlu1 %v13221_v16, %s13503_s0  ;;  %13227 = vrot.lane.b32.xlu0 %v13226_v19, %s13503_s0  ;;  %v1297_v19 = vld [vmem:[%s13571_s25] sm:$0xff] }
 0x187   : > { %13232 = vrot.lane.b32.xlu1 %v13231_v23, %s15183_s28  ;;  %13237 = vrot.lane.b32.xlu0 %v13236_v24, %s15183_s28 }
 0x18b   : > { %13242 = vrot.lane.b32.xlu1 %v13241_v25, %s15183_s28  ;;  %s13505_s28 = smov 79  }
 0x1c9   : > { %v13128_v26 = vpop.permute.xlu0 %13127 }
 0x1ca   : > { %v13130_v28 = vunpack.i.h.bf16 %v13128_v26  ;;  %v13129_v32 = vunpack.i.l.bf16 %v13128_v26 }
 0x1cd   : > { %v13138_v27 = vpop.permute.xlu1 %13137  ;;  %v13133_v31 = vpop.permute.xlu0 %13132 }
 0x1ce   : > { %v13140_v29 = vunpack.i.h.bf16 %v13138_v27  ;;  %v13139_v30 = vunpack.i.l.bf16 %v13138_v27  ;;  %v13135_v33 = vunpack.i.h.bf16 %v13133_v31  ;;  %v13134_v34 = vunpack.i.l.bf16 %v13133_v31 }
 0x1d0   : > { %v1348_v35 = vsel %vm1344_vm9, %v13139_v30, %v13140_v29  ;;  %v1347_v36 = vsel %vm1344_vm9, %v13130_v28, %v13139_v30  ;;  %v1346_v39 = vsel %vm1344_vm9, %v13134_v34, %v13135_v33  ;;  %v1345_v42 = vsel %vm1344_vm9, %v13129_v32, %v13134_v34 }
 0x1d1   : > { %v2325_v38 = vpop.permute.xlu1 %2324  ;;  %v2327_v43 = vpop.permute.xlu0 %2326  ;;  %v12755_v44 = vpack.c.bf16 %v1348_v35, %v1346_v39  ;;  %v12757_v45 = vpack.c.bf16 %v1347_v36, %v1345_v42  ;;  %v11720_v42 = vld [vmem:[%s13571_s25 + $0x10] sm:$0xff] }
 0x1d2   : > { %v2329_v49 = vsel %vm2328_vm10, %v2325_v38, %v2327_v43  ;;  %v2335_v50 = vmul.f32 %v2327_v43, %v13937_v47  ;;  %v2338_v51 = vmul.f32 %v2327_v43, %v13939_v48  ;;  %v2333_v54 = vmul.f32 %v2325_v38, %v13927_v40  ;;  %v11716_v47 = vld [vmem:[%s13571_s25 + $0x8] sm:$0xff] }
 0x1d3   : > { %12756 = vmatprep.subr.bf16.mxu0 %v12755_v44  ;;  %v2334_v52 = vmul.f32 %v2329_v49, %v13935_v46  ;;  %v2337_v53 = vmul.f32 %v2329_v49, %v13923_v37  ;;  %v2336_v55 = vmul.f32 %v2325_v38, %v13929_v41  ;;  %v13506_v46 = vmov 0  }
 0x1d4   : > { %12758 = vmatpush1.bf16.msra.mxu0 %v12757_v45  ;;  %13261 = vset.pattern.permute.xlu1 %v13506_v46 }
 0x1d5   : > { %v13143_v56 = vpop.permute.xlu1 %13142  ;;  %v13148_v59 = vpop.permute.xlu0 %13147  ;;  %v13246_v60 = vpack.i.bf16 %v2335_v50, %v2334_v52  ;;  %v13251_v61 = vpack.i.bf16 %v2338_v51, %v2337_v53  ;;  %v13256_v3 = vpack.i.bf16 %v2336_v55, %v2333_v54  ;;  %13277 = vset.pattern.permute.xlu0 %v13506_v46  ;;  %v11723_v46 = vld [vmem:[%s13571_s25 + $0x18] sm:$0xff] }
 0x1d6   : > { %v13145_v57 = vunpack.i.h.bf16 %v13143_v56  ;;  %v13144_v58 = vunpack.i.l.bf16 %v13143_v56  ;;  %v13150_v62 = vunpack.i.h.bf16 %v13148_v59  ;;  %v13149_v48 = vunpack.i.l.bf16 %v13148_v59 }
 0x1d7   : > { %13247 = vrot.lane.b32.xlu0 %v13246_v60, %s13505_s28  ;;  %13252 = vrot.lane.b32.xlu1 %v13251_v61, %s13505_s28 }
 0x1d8   : > { %v1447_v37 = vsel %vm1445_vm11, %v13144_v58, %v13145_v57  ;;  %11717 = vmatmul.mubr.msk.f32.vlgmr.msra.gmra.mrb[0].mxu0 %vm1313_vm2, %v11716_v47  ;;  %v1449_v41 = vsel %vm1445_vm11, %v13149_v48, %v13150_v62 }
 0x1d9   : > { %v13153_v40 = vpop.permute.xlu1 %13152  ;;  %v13158_v63 = vpop.permute.xlu0 %13157  ;;  %v12759_v4 = vpack.c.bf16 %v1449_v41, %v1447_v37  ;;  %1521 = vmatprep.mubr.f32.mxu0 %v13487_v1 }
 0x1da   : > { %v13155_v0 = vunpack.i.h.bf16 %v13153_v40  ;;  %v13154_v2 = vunpack.i.l.bf16 %v13153_v40  ;;  %v13160_v8 = vunpack.i.h.bf16 %v13158_v63  ;;  %v13159_v9 = vunpack.i.l.bf16 %v13158_v63 }
 0x1db   : > { %13257 = vrot.lane.b32.xlu0 %v13256_v3, %s13505_s28  ;;  %12760 = vmatprep.subr.bf16.mxu0 %v12759_v4 }
 0x1dc   : > { %v1448_v10 = vsel %vm1445_vm11, %v13155_v0, %v13149_v48  ;;  %v1446_v11 = vsel %vm1445_vm11, %v13154_v2, %v13144_v58  ;;  %2447 = vperm.xlu1 %13261, %v2444_v7   ;;  %v1576_v20 = vsel %vm1574_vm12, %v13159_v9, %v13160_v8 }
 0x1dd   : > { %v13163_v12 = vpop.permute.xlu1 %13162  ;;  %v12761_v13 = vpack.c.bf16 %v1448_v10, %v1446_v11  ;;  %v13168_v14 = vpop.permute.xlu0 %13167 }
 0x1de   : > { %v13165_v15 = vunpack.i.h.bf16 %v13163_v12  ;;  %v13164_v16 = vunpack.i.l.bf16 %v13163_v12  ;;  %v13170_v17 = vunpack.i.h.bf16 %v13168_v14  ;;  %v13169_v18 = vunpack.i.l.bf16 %v13168_v14 }
 0x1df   : > { %12762 = vmatpush1.bf16.msra.mxu0 %v12761_v13 }
 0x1e0   : > { %v1578_v21 = vsel %vm1574_vm12, %v13164_v16, %v13165_v15  ;;  %v1575_v22 = vsel %vm1574_vm12, %v13169_v18, %v13159_v9  ;;  %v1577_v23 = vsel %vm1574_vm12, %v13170_v17, %v13164_v16  ;;  %v11726_v18 = vld [vmem:[%s13571_s25 + $0x20] sm:$0xff] }
 0x1e1   : > { %v13173_v24 = vpop.permute.xlu1 %13172  ;;  %v12763_v25 = vpack.c.bf16 %v1578_v21, %v1576_v20  ;;  %v13178_v26 = vpop.permute.xlu0 %13177  ;;  %v12765_v29 = vpack.c.bf16 %v1577_v23, %v1575_v22 }
 0x1e2   : > { %v13175_v27 = vunpack.i.h.bf16 %v13173_v24  ;;  %v13174_v28 = vunpack.i.l.bf16 %v13173_v24  ;;  %11718 = vmatmul.mubr.msk.f32.vlgmr.msra.gmra.mrb[0].mxu0 %vm1313_vm2, %v1297_v19  ;;  %v13180_v30 = vunpack.i.h.bf16 %v13178_v26  ;;  %v13179_v31 = vunpack.i.l.bf16 %v13178_v26 }
 0x1e3   : > { %12764 = vmatprep.subr.bf16.mxu0 %v12763_v25  ;;  %1650 = vmatprep.mubr.f32.mxu0 %v13487_v1 }
 0x1e4   : > { %12766 = vmatpush1.bf16.msra.mxu0 %v12765_v29  ;;  %v1707_v32 = vsel %vm1705_vm13, %v13174_v28, %v13175_v27  ;;  %v1709_v34 = vsel %vm1705_vm13, %v13179_v31, %v13180_v30 }
 0x1e5   : > { %v13183_v33 = vpop.permute.xlu1 %13182  ;;  %v13188_v35 = vpop.permute.xlu0 %13187  ;;  %v12767_v39 = vpack.c.bf16 %v1709_v34, %v1707_v32  ;;  %v11729_v34 = vld [vmem:[%s13571_s25 + $0x28] sm:$0xff] }
 0x1e6   : > { %v13185_v36 = vunpack.i.h.bf16 %v13183_v33  ;;  %v13184_v38 = vunpack.i.l.bf16 %v13183_v33  ;;  %v13190_v43 = vunpack.i.h.bf16 %v13188_v35  ;;  %v13189_v44 = vunpack.i.l.bf16 %v13188_v35 }
 0x1e7   : > { %12768 = vmatprep.subr.bf16.mxu0 %v12767_v39 }
 0x1e8   : > { %v1708_v45 = vsel %vm1705_vm13, %v13185_v36, %v13179_v31  ;;  %v1706_v49 = vsel %vm1705_vm13, %v13184_v38, %v13174_v28  ;;  %v1837_v57 = vsel %vm15185_vm14, %v13189_v44, %v13190_v43 }
 0x1e9   : > { %v13193_v50 = vpop.permute.xlu1 %13192  ;;  %v12769_v51 = vpack.c.bf16 %v1708_v45, %v1706_v49  ;;  %v13198_v52 = vpop.permute.xlu0 %13197  ;;  %v11732_v49 = vld [vmem:[%s13571_s25 + $0x30] sm:$0xff] }
 0x1ea   : > { %v13195_v53 = vunpack.i.h.bf16 %v13193_v50  ;;  %v13194_v54 = vunpack.i.l.bf16 %v13193_v50  ;;  %11721 = vmatmul.mubr.msk.f32.vlgmr.msra.gmra.mrb[0].mxu0 %vm1313_vm2, %v11720_v42  ;;  %v13200_v55 = vunpack.i.h.bf16 %v13198_v52  ;;  %v13199_v56 = vunpack.i.l.bf16 %v13198_v52 }
 0x1eb   : > { %12770 = vmatpush1.bf16.msra.mxu0 %v12769_v51  ;;  %1781 = vmatprep.mubr.f32.mxu0 %v13487_v1  ;;  %v11735_v51 = vld [vmem:[%s13571_s25 + $0x38] sm:$0xff] }
 0x1ec   : > { %v1839_v58 = vsel %vm15185_vm14, %v13194_v54, %v13195_v53  ;;  %v1836_v61 = vsel %vm15185_vm14, %v13199_v56, %v13189_v44  ;;  %v1838_v47 = vsel %vm15185_vm14, %v13200_v55, %v13194_v54  ;;  %vm15187_vm14 = vcmask 662528  }
 0x1ed   : > { %v13203_v59 = vpop.permute.xlu1 %13202  ;;  %v12771_v60 = vpack.c.bf16 %v1839_v58, %v1837_v57  ;;  %v13208_v62 = vpop.permute.xlu0 %13207  ;;  %v12773_v2 = vpack.c.bf16 %v1838_v47, %v1836_v61 }
 0x1ee   : > { %v13205_v48 = vunpack.i.h.bf16 %v13203_v59  ;;  %v13204_v37 = vunpack.i.l.bf16 %v13203_v59  ;;  %v13210_v40 = vunpack.i.h.bf16 %v13208_v62  ;;  %v13209_v41 = vunpack.i.l.bf16 %v13208_v62 }
 0x1ef   : > { %12772 = vmatprep.subr.bf16.mxu0 %v12771_v60 }
 0x1f0   : > { %v1968_v63 = vsel %vm15186_vm15, %v13204_v37, %v13205_v48  ;;  %v1970_v3 = vsel %vm15186_vm15, %v13209_v41, %v13210_v40 }
 0x1f1   : > { %v13213_v0 = vpop.permute.xlu1 %13212  ;;  %v13218_v4 = vpop.permute.xlu0 %13217  ;;  %v12775_v9 = vpack.c.bf16 %v1970_v3, %v1968_v63 }
 0x1f2   : > { %v13215_v7 = vunpack.i.h.bf16 %v13213_v0  ;;  %v13214_v8 = vunpack.i.l.bf16 %v13213_v0  ;;  %11724 = vmatmul.mubr.msk.f32.vlgmr.msra.gmra.mrb[0].mxu0 %vm1313_vm2, %v11723_v46  ;;  %v13220_v10 = vunpack.i.h.bf16 %v13218_v4  ;;  %v13219_v11 = vunpack.i.l.bf16 %v13218_v4  ;;  %v11740_v4 = vld [vmem:[%s13551_s9 + $0x2] sm:$0x3] }
 0x1f3   : > { %12774 = vmatpush1.bf16.msra.mxu0 %v12773_v2  ;;  %1911 = vmatprep.mubr.f32.mxu0 %v13487_v1 }
 0x1f4   : > { %12776 = vmatprep.subr.bf16.mxu0 %v12775_v9  ;;  %v1969_v13 = vsel %vm15186_vm15, %v13215_v7, %v13209_v41  ;;  %v1967_v14 = vsel %vm15186_vm15, %v13214_v8, %v13204_v37  ;;  %v2099_v19 = vsel %vm15187_vm14, %v13219_v11, %v13220_v10  ;;  %vm2228_vm15 = vcmask 654336   ;;  %v11738_v41 = vld [vmem:[%s13571_s25 + $0x40] sm:$0xff] }
 0x1f5   : > { %v13223_v12 = vpop.permute.xlu1 %13222  ;;  %v13228_v15 = vpop.permute.xlu0 %13227  ;;  %v12777_v22 = vpack.c.bf16 %v1969_v13, %v1967_v14  ;;  %v2497_v9 = vrot.slane %v11740_v4, %v13876_v6  ;;  %v2501_v10 = vrot.slane %v11740_v4, %v13874_v5  ;;  %v11744_v14 = vld [vmem:[%s13551_s9 + $0x4] sm:$0x3] }
 0x1f6   : > { %v13225_v16 = vunpack.i.h.bf16 %v13223_v12  ;;  %v13224_v17 = vunpack.i.l.bf16 %v13223_v12  ;;  %v13230_v24 = vunpack.i.h.bf16 %v13228_v15  ;;  %v13229_v25 = vunpack.i.l.bf16 %v13228_v15 }
 0x1f7   : > { %v2695_v15 = vrot.slane %v11744_v14, %v13876_v6 }
 0x1f8   : > { %v2101_v20 = vsel %vm15187_vm14, %v13224_v17, %v13225_v16  ;;  %v2098_v31 = vsel %vm15187_vm14, %v13229_v25, %v13219_v11  ;;  %v2100_v32 = vsel %vm15187_vm14, %v13230_v24, %v13224_v17  ;;  %vm2359_vm14 = vcmask 646144   ;;  %v2470_v11 = vld [vmem:[%s13551_s9] sm:$0x3]  ;;  %v11747_v17 = vld [vmem:[%s13551_s9 + $0x6] sm:$0x3] }
 0x1f9   : > { %v13233_v21 = vpop.permute.xlu1 %13232  ;;  %v12779_v23 = vpack.c.bf16 %v2101_v20, %v2099_v19  ;;  %v13238_v26 = vpop.permute.xlu0 %13237  ;;  %v12781_v38 = vpack.c.bf16 %v2100_v32, %v2098_v31  ;;  %v2475_v12 = vrot.slane %v2470_v11, %v13876_v6  ;;  %v2479_v13 = vrot.slane %v2470_v11, %v13874_v5  ;;  %v11750_v20 = vld [vmem:[%s13551_s9 + $0x8] sm:$0x3] }
 0x1fa   : > { %11727 = vmatmul.mubr.msk.f32.vlgmr.msra.gmra.mrb[0].mxu0 %vm1313_vm2, %v11726_v18  ;;  %v13240_v27 = vunpack.i.h.bf16 %v13238_v26  ;;  %v13239_v28 = vunpack.i.l.bf16 %v13238_v26  ;;  %v13235_v29 = vunpack.i.h.bf16 %v13233_v21  ;;  %v13234_v30 = vunpack.i.l.bf16 %v13233_v21  ;;  %v11756_v26 = vld [vmem:[%s13551_s9 + $0xc] sm:$0x3] }
 0x1fb   : > { %12778 = vmatpush1.bf16.msra.mxu0 %v12777_v22  ;;  %2042 = vmatprep.mubr.f32.mxu0 %v13487_v1  ;;  %v2699_v16 = vrot.slane %v11744_v14, %v13874_v5  ;;  %v2807_v18 = vrot.slane %v11747_v17, %v13876_v6  ;;  %v2811_v19 = vrot.slane %v11747_v17, %v13874_v5 }
 0x1fc   : > { %12780 = vmatprep.subr.bf16.mxu0 %v12779_v23  ;;  %v2230_v35 = vsel %vm2228_vm15, %v13234_v30, %v13235_v29  ;;  %v2232_v36 = vsel %vm2228_vm15, %v13239_v28, %v13240_v27  ;;  %v2919_v21 = vrot.slane %v11750_v20, %v13876_v6  ;;  %v2923_v22 = vrot.slane %v11750_v20, %v13874_v5  ;;  %v11753_v23 = vld [vmem:[%s13551_s9 + $0xa] sm:$0x3]  ;;  %v11759_v29 = vld [vmem:[%s13551_s9 + $0xe] sm:$0x3] }
 0x1fd   : > { %v13243_v33 = vpop.permute.xlu1 %13242  ;;  %v12783_v43 = vpack.c.bf16 %v2232_v36, %v2230_v35  ;;  %v3031_v24 = vrot.slane %v11753_v23, %v13876_v6  ;;  %v3035_v25 = vrot.slane %v11753_v23, %v13874_v5  ;;  %v3143_v27 = vrot.slane %v11756_v26, %v13876_v6 }
 0x1fe   : > { %v13245_v39 = vunpack.i.h.bf16 %v13243_v33  ;;  %v13244_v42 = vunpack.i.l.bf16 %v13243_v33  ;;  %v3259_v31 = vrot.slane %v11759_v29, %v13874_v5 }
 0x200   : > { %v2231_v44 = vsel %vm2228_vm15, %v13245_v39, %v13239_v28  ;;  %v2229_v45 = vsel %vm2228_vm15, %v13244_v42, %v13234_v30  ;;  %v3147_v28 = vrot.slane %v11756_v26, %v13874_v5  ;;  %v3255_v30 = vrot.slane %v11759_v29, %v13876_v6  ;;  %v11762_v42 = vld [vmem:[%s13551_s9 + $0x10] sm:$0x3] }
 0x201   : > { %v12785_v50 = vpack.c.bf16 %v2231_v44, %v2229_v45 }
 0x202   : > { %11730 = vmatmul.mubr.msk.f32.vlgmr.msra.gmra.mrb[0].mxu0 %vm1313_vm2, %v11729_v34 }
 0x203   : > { %12782 = vmatpush1.bf16.msra.mxu0 %v12781_v38  ;;  %2173 = vmatprep.mubr.f32.mxu0 %v13487_v1 }
 0x204   : > { %12784 = vmatprep.subr.bf16.mxu0 %v12783_v43 }
 0x20a   : > { %11733 = vmatmul.mubr.msk.f32.vlgmr.msra.gmra.mrb[0].mxu0 %vm1313_vm2, %v11732_v49 }
 0x20b   : > { %12786 = vmatpush1.bf16.msra.mxu0 %v12785_v50  ;;  %2304 = vmatprep.mubr.f32.mxu0 %v13487_v1 }
 0x212   : > { %11736 = vmatmul.mubr.msk.f32.vlgmr.msra.gmra.mrb[0].mxu0 %vm1313_vm2, %v11735_v51  ;;  %v3367_v51 = vrot.slane %v11762_v42, %v13876_v6 }
 0x213   : > { %2435 = vmatprep.mubr.f32.mxu0 %v13487_v1 }
 0x249   : > { %v13248_v52 = vpop.permute.xlu0 %13247  ;;  %v13253_v53 = vpop.permute.xlu1 %13252 }
 0x24a   : > { %v13250_v54 = vunpack.i.h.bf16 %v13248_v52  ;;  %v13249_v55 = vunpack.i.l.bf16 %v13248_v52  ;;  %v13255_v56 = vunpack.i.h.bf16 %v13253_v53  ;;  %v13254_v57 = vunpack.i.l.bf16 %v13253_v53 }
 0x24c   : > { %v2361_v58 = vsel %vm2359_vm14, %v13249_v55, %v13250_v54  ;;  %v2363_v59 = vsel %vm2359_vm14, %v13254_v57, %v13255_v56  ;;  %v3371_v54 = vrot.slane %v11762_v42, %v13874_v5 }
 0x24d   : > { %v13258_v60 = vpop.permute.xlu0 %13257  ;;  %v12787_v61 = vpack.c.bf16 %v2363_v59, %v2361_v58 }
 0x24e   : > { %v13260_v47 = vunpack.i.h.bf16 %v13258_v60  ;;  %v13259_v62 = vunpack.i.l.bf16 %v13258_v60 }
 0x24f   : > { %12788 = vmatprep.subr.bf16.mxu0 %v12787_v61 }
 0x250   : > { %v2360_v48 = vsel %vm2359_vm14, %v13259_v62, %v13249_v55  ;;  %v2362_v37 = vsel %vm2359_vm14, %v13260_v47, %v13254_v57 }
 0x251   : > { %v12789_v40 = vpack.c.bf16 %v2362_v37, %v2360_v48 }
 0x253   : > { %12790 = vmatpush1.bf16.msra.mxu0 %v12789_v40 }
 0x254   : > { %12311 = vmatprep.subr.mxu0 %v13487_v1 }
 0x256   : > { %11739 = vmatmul.mubr.msk.f32.vlgmr.msra.gmra.mrb[0].mxu0 %vm1313_vm2, %v11738_v41 }
 0x25b   : > { %v2448_v46 = vpop.permute.xlu1 %2447 }
 0x329   : > { %v2437_v63 = vpop.f32.mrb[0].mxu0 }
 0x32a   : > { %v2450_v0 = vadd.f32 %v2448_v46, %v2437_v63  ;;  %v2439_v2 = vpop.f32.mrb[1].mxu0 }
 0x32b   : > { %v2451_v3 = vadd.f32 %v2448_v46, %v2439_v2 }
 0x32c   : > { %v2452_v7 = vmax.f32 %v2450_v0, 0.0 }
 0x32d   : > { %v2453_v8 = vmax.f32 %v2451_v3, 0.0 }
 0x32e   : > { %2456 = vrot.lane.b32.xlu0 %v2452_v7, %s15198_s10 }
 0x32f   : > { %2458 = vrot.lane.b32.xlu1 %v2453_v8, %s15198_s10 }
 0x332   : > { %2502 = vrot.lane.b32.xlu0 %v2497_v9, %s13489_s22 }
 0x333   : > { %2504 = vrot.lane.b32.xlu1 %v2501_v10, %s13489_s22  ;;  %s15265_s22 = smov 113  }
 0x336   : > { %2480 = vrot.lane.b32.xlu0 %v2475_v12, %s13490_s17 }
 0x337   : > { %2482 = vrot.lane.b32.xlu1 %v2479_v13, %s13490_s17  ;;  %s15266_s17 = smov 111  }
 0x33a   : > { %2700 = vrot.lane.b32.xlu0 %v2695_v15, %s13491_s18 }
 0x33b   : > { %2702 = vrot.lane.b32.xlu1 %v2699_v16, %s13491_s18  ;;  %s15267_s18 = smov 97  }
 0x33e   : > { %2812 = vrot.lane.b32.xlu0 %v2807_v18, %s15193_s2 }
 0x33f   : > { %2814 = vrot.lane.b32.xlu1 %v2811_v19, %s15193_s2 }
 0x342   : > { %2924 = vrot.lane.b32.xlu0 %v2919_v21, %s15198_s10 }
 0x343   : > { %2926 = vrot.lane.b32.xlu1 %v2923_v22, %s15198_s10 }
 0x346   : > { %3036 = vrot.lane.b32.xlu0 %v3031_v24, %s15190_s7 }
 0x347   : > { %3038 = vrot.lane.b32.xlu1 %v3035_v25, %s15190_s7 }
 0x34a   : > { %3148 = vrot.lane.b32.xlu0 %v3143_v27, %s13494_s11 }
 0x34b   : > { %3150 = vrot.lane.b32.xlu1 %v3147_v28, %s13494_s11  ;;  %s15268_s11 = smov 96  }
 0x34e   : > { %3260 = vrot.lane.b32.xlu0 %v3255_v30, %s13495_s1 }
 0x34f   : > { %3262 = vrot.lane.b32.xlu1 %v3259_v31, %s13495_s1  ;;  %s15269_s1 = smov 95   ;;  %v11741_v31 = vld [vmem:[%s15250_s3 + $0x8] sm:$0xff] }
 0x3a0   : > { %v2457_v32 = vpop.permute.xlu0 %2456 }
 0x3a1   : > { %2464 = vst.msk [vmem:[#allocation2] sm:$0xff] %vm1259_vm0, %v2457_v32  ;;  %v2459_v33 = vpop.permute.xlu1 %2458 }
 0x3a2   : > { %2466 = vst.msk [vmem:[#allocation2 + $0x10] sm:$0xff] %vm1250_vm1, %v2459_v33  ;;  %v14151_v45 = vsel %vm1250_vm1, %v2457_v32, %v2459_v33 }
 0x3a4   : > { %v2503_v34 = vpop.permute.xlu0 %2502 }
 0x3a5   : > { %v2505_v35 = vpop.permute.xlu1 %2504 }
 0x3a6   : > { %v2506_v43 = vsel %vm1313_vm2, %v2503_v34, %v2505_v35 }
 0x3a7   : > { %v2511_v52 = vmul.f32 %v2506_v43, %v14151_v45  ;;  %v3474_v43 = vld [vmem:[%s15271_s8] sm:$0xff]  ;;  %s15294_s8 = smov 35  }
 0x3a8   : > { %v14141_v36 = vld [vmem:[#allocation2] sm:$0xff]  ;;  %v2481_v49 = vpop.permute.xlu0 %2480 }
 0x3a9   : > { %v2510_v38 = vmul.f32 %v2503_v34, %v14141_v36  ;;  %v14144_v39 = vld [vmem:[#allocation2 + $0x10] sm:$0xff]  ;;  %v2483_v50 = vpop.permute.xlu1 %2482  ;;  %v2488_v58 = vmul.f32 %v2481_v49, %v14141_v36 }
 0x3aa   : > { %v2512_v44 = vmul.f32 %v2505_v35, %v14144_v39  ;;  %v2484_v53 = vsel %vm1286_vm3, %v2481_v49, %v2483_v50  ;;  %v2490_v6 = vmul.f32 %v2483_v50, %v14144_v39  ;;  %vm2528_vm3 = vcmask 64512   ;;  %v2491_v50 = vld [vmem:[%s15250_s3] sm:$0xff] }
 0x3ab   : > { %2518 = vrot.lane.b32.xlu0 %v2510_v38, %s13496_s23  ;;  %v2489_v57 = vmul.f32 %v2484_v53, %v14151_v45 }
 0x3ac   : > { %2522 = vrot.lane.b32.xlu1 %v2512_v44, %s13496_s23  ;;  %v2701_v55 = vpop.permute.xlu0 %2700 }
 0x3ad   : > { %v2703_v56 = vpop.permute.xlu1 %2702  ;;  %v2708_v48 = vmul.f32 %v2701_v55, %v14141_v36 }
 0x3ae   : > { %v2704_v59 = vsel %vm1543_vm4, %v2701_v55, %v2703_v56  ;;  %v2710_v47 = vmul.f32 %v2703_v56, %v14144_v39  ;;  %v11745_v56 = vld [vmem:[%s15250_s3 + $0x10] sm:$0xff]  ;;  %vm15272_vm4 = vcmask 785408  }
 0x3af   : > { %2520 = vrot.lane.b32.xlu0 %v2511_v52, %s13496_s23  ;;  %v2709_v61 = vmul.f32 %v2704_v59, %v14151_v45  ;;  %s15270_s23 = smov 80  }
 0x3b0   : > { %3372 = vrot.lane.b32.xlu1 %v3367_v51, %s13497_s26  ;;  %v2813_v60 = vpop.permute.xlu0 %2812 }
 0x3b1   : > { %v2815_v5 = vpop.permute.xlu1 %2814  ;;  %v2820_v63 = vmul.f32 %v2813_v60, %v14141_v36 }
 0x3b2   : > { %v2816_v62 = vsel %vm1674_vm5, %v2813_v60, %v2815_v5  ;;  %v2822_v46 = vmul.f32 %v2815_v5, %v14144_v39  ;;  %vm15273_vm5 = vmmov %vm15272_vm4 }
 0x3b3   : > { %3374 = vrot.lane.b32.xlu0 %v3371_v54, %s13497_s26  ;;  %v2821_v41 = vmul.f32 %v2816_v62, %v14151_v45  ;;  %s13508_s26 = smov 24  }
 0x3b4   : > { %2608 = vrot.lane.b32.xlu1 %v2489_v57, %s15265_s22  ;;  %v2925_v37 = vpop.permute.xlu0 %2924 }
 0x3b5   : > { %v2927_v40 = vpop.permute.xlu1 %2926  ;;  %v2932_v9 = vmul.f32 %v2925_v37, %v14141_v36 }
 0x3b6   : > { %v2928_v0 = vsel %vm1250_vm1, %v2925_v37, %v2927_v40  ;;  %v2934_v7 = vmul.f32 %v2927_v40, %v14144_v39 }
 0x3b7   : > { %2610 = vrot.lane.b32.xlu0 %v2490_v6, %s15265_s22  ;;  %v2933_v4 = vmul.f32 %v2928_v0, %v14151_v45 }
 0x3b8   : > { %2606 = vrot.lane.b32.xlu1 %v2488_v58, %s15265_s22  ;;  %v3037_v2 = vpop.permute.xlu0 %3036  ;;  %s13510_s22 = smov 39  }
 0x3b9   : > { %v3039_v3 = vpop.permute.xlu1 %3038  ;;  %v3044_v14 = vmul.f32 %v3037_v2, %v14141_v36 }
 0x3ba   : > { %v3040_v8 = vsel %vm1935_vm6, %v3037_v2, %v3039_v3  ;;  %v3046_v13 = vmul.f32 %v3039_v3, %v14144_v39  ;;  %vm15274_vm6 = vcmask 777216  }
 0x3bb   : > { %2718 = vrot.lane.b32.xlu0 %v2709_v61, %s15266_s17  ;;  %v3045_v12 = vmul.f32 %v3040_v8, %v14151_v45  ;;  %v11748_v61 = vld [vmem:[%s15250_s3 + $0x18] sm:$0xff]  ;;  %v11754_v8 = vld [vmem:[%s15250_s3 + $0x28] sm:$0xff] }
 0x3bc   : > { %2720 = vrot.lane.b32.xlu1 %v2710_v47, %s15266_s17  ;;  %v3149_v10 = vpop.permute.xlu0 %3148 }
 0x3bd   : > { %v3151_v11 = vpop.permute.xlu1 %3150  ;;  %v3156_v21 = vmul.f32 %v3149_v10, %v14141_v36 }
 0x3be   : > { %v3152_v15 = vsel %vm2066_vm7, %v3149_v10, %v3151_v11  ;;  %v3158_v19 = vmul.f32 %v3151_v11, %v14144_v39  ;;  %vm15275_vm7 = vmmov %vm15274_vm6 }
 0x3bf   : > { %2716 = vrot.lane.b32.xlu0 %v2708_v48, %s15266_s17  ;;  %v3157_v18 = vmul.f32 %v3152_v15, %v14151_v45  ;;  %s13511_s17 = smov 41  }
 0x3c0   : > { %2830 = vrot.lane.b32.xlu1 %v2821_v41, %s15267_s18  ;;  %v3261_v16 = vpop.permute.xlu0 %3260 }
 0x3c1   : > { %v3263_v17 = vpop.permute.xlu1 %3262  ;;  %v3268_v24 = vmul.f32 %v3261_v16, %v14141_v36 }
 0x3c2   : > { %v3264_v20 = vsel %vm2197_vm8, %v3261_v16, %v3263_v17  ;;  %v3270_v23 = vmul.f32 %v3263_v17, %v14144_v39  ;;  %vm15276_vm8 = vcmask 662528   ;;  %v11760_v16 = vld [vmem:[%s15250_s3 + $0x38] sm:$0xff] }
 0x3c3   : > { %2832 = vrot.lane.b32.xlu0 %v2822_v46, %s15267_s18  ;;  %v3269_v22 = vmul.f32 %v3264_v20, %v14151_v45 }
 0x3c4   : > { %2828 = vrot.lane.b32.xlu1 %v2820_v63, %s15267_s18  ;;  %v11751_v63 = vld [vmem:[%s15250_s3 + $0x20] sm:$0xff] }
 0x3c7   : > { %2942 = vrot.lane.b32.xlu0 %v2933_v4, %s15268_s11 }
 0x3c8   : > { %2944 = vrot.lane.b32.xlu1 %v2934_v7, %s15268_s11 }
 0x3cb   : > { %2940 = vrot.lane.b32.xlu0 %v2932_v9, %s15268_s11 }
 0x3cc   : > { %3054 = vrot.lane.b32.xlu1 %v3045_v12, %s15269_s1 }
 0x3cf   : > { %3056 = vrot.lane.b32.xlu0 %v3046_v13, %s15269_s1 }
 0x3d0   : > { %3052 = vrot.lane.b32.xlu1 %v3044_v14, %s15269_s1  ;;  %v11757_v14 = vld [vmem:[%s15250_s3 + $0x30] sm:$0xff] }
 0x3d3   : > { %3166 = vrot.lane.b32.xlu0 %v3157_v18, %s13503_s0 }
 0x3d4   : > { %3168 = vrot.lane.b32.xlu1 %v3158_v19, %s13503_s0 }
 0x3d7   : > { %3164 = vrot.lane.b32.xlu0 %v3156_v21, %s13503_s0  ;;  %v11763_v21 = vld [vmem:[%s15250_s3 + $0x40] sm:$0xff]  ;;  %s15188_s0 = smov 127   ;;  %s15218_s3 = smov 93  }
 0x3d8   : > { %3278 = vrot.lane.b32.xlu1 %v3269_v22, %s15270_s23 }
 0x3db   : > { %3280 = vrot.lane.b32.xlu0 %v3270_v23, %s15270_s23 }
 0x3dc   : > { %3276 = vrot.lane.b32.xlu1 %v3268_v24, %s15270_s23 }
 0x41d   : > { %v2519_v25 = vpop.permute.xlu0 %2518 }
 0x41e   : > { %v2523_v26 = vpop.permute.xlu1 %2522 }
 0x421   : > { %v2521_v27 = vpop.permute.xlu0 %2520 }
 0x422   : > { %v3373_v28 = vpop.permute.xlu1 %3372  ;;  %v2525_v29 = vsel %vm1344_vm9, %v2521_v27, %v2523_v26  ;;  %v2524_v30 = vsel %vm1344_vm9, %v2519_v25, %v2521_v27  ;;  %vm15277_vm9 = vmmov %vm15276_vm8 }
 0x423   : > { %2532 = vmatprep.subr.mxu1 %v2525_v29  ;;  %v3380_v51 = vmul.f32 %v3373_v28, %v14141_v36 }
 0x424   : > { %2533 = vmatpush1.msra.mxu1 %v2524_v30 }
 0x425   : > { %v3375_v32 = vpop.permute.xlu0 %3374  ;;  %11742 = vmatmul.mubr.msk.f32.vlgmr.msra.gmra.mrb[0].mxu1 %vm2528_vm3, %v11741_v31 }
 0x426   : > { %v3376_v33 = vsel %vm2328_vm10, %v3373_v28, %v3375_v32  ;;  %v3382_v34 = vmul.f32 %v3375_v32, %v14144_v39  ;;  %v2609_v35 = vpop.permute.xlu1 %2608  ;;  %2683 = vmatprep.mubr.f32.mxu1 %v13487_v1 }
 0x427   : > { %v3381_v38 = vmul.f32 %v3376_v33, %v14151_v45  ;;  %v3561_v33 = vld [vmem:[%s15249_s4 + $0x80] sm:$0xff] }
 0x428   : > { %3392 = vrot.lane.b32.xlu1 %v3382_v34, %s13505_s28  ;;  %v3562_v34 = vld [vmem:[%s15249_s4 + $0x88] sm:$0xff] }
 0x429   : > { %v2611_v42 = vpop.permute.xlu0 %2610  ;;  %3390 = vrot.lane.b32.xlu0 %v3381_v38, %s13505_s28  ;;  %v12791_v38 = vpack.c.bf16 %v3562_v34, %v3561_v33  ;;  %v14323_v34 = vld [vmem:[#allocation3 + $0x1] ss:$0 sm:$0xff] }
 0x42a   : > { %v2607_v44 = vpop.permute.xlu1 %2606  ;;  %v2613_v49 = vsel %vm1445_vm11, %v2609_v35, %v2611_v42  ;;  %v3546_v42 = vld [vmem:[%s15249_s4 + $0x8] sm:$0xff] }
 0x42b   : > { %v2612_v39 = vsel %vm1445_vm11, %v2607_v44, %v2609_v35  ;;  %2619 = vmatprep.subr.mxu1 %v2613_v49  ;;  %v3545_v35 = vld [vmem:[%s15249_s4] sm:$0xff]  ;;  %v3564_v44 = vld [vmem:[%s15249_s4 + $0x98] sm:$0xff]  ;;  %vm3651_vm11 = vcmask 785664  }
 0x42c   : > { %3477 = vperm.xlu1 %13261, %v3474_v43   ;;  %2620 = vmatpush1.msra.mxu1 %v2612_v39  ;;  %v3563_v43 = vld [vmem:[%s15249_s4 + $0x90] sm:$0xff] }
 0x42d   : > { %v2719_v52 = vpop.permute.xlu0 %2718  ;;  %3388 = vrot.lane.b32.xlu0 %v3380_v51, %s13505_s28  ;;  %11743 = vmatmul.mubr.msk.f32.vlgmr.msra.gmra.mrb[0].mxu1 %vm2528_vm3, %v2491_v50  ;;  %v12793_v50 = vpack.c.bf16 %v3546_v42, %v3545_v35  ;;  %v12795_v51 = vpack.c.bf16 %v3564_v44, %v3563_v43  ;;  %v3547_v39 = vld [vmem:[%s15249_s4 + $0x10] sm:$0xff]  ;;  %s13509_s28 = smov 25  }
 0x42e   : > { %v2721_v45 = vpop.permute.xlu1 %2720  ;;  %2793 = vmatprep.mubr.f32.mxu1 %v13487_v1  ;;  %v14328_v35 = vld [vmem:[#allocation3 + $0x2] ss:$0 sm:$0xff] }
 0x42f   : > { %v2723_v53 = vsel %vm1574_vm12, %v2719_v52, %v2721_v45 }
 0x430   : > { %2729 = vmatprep.subr.mxu1 %v2723_v53  ;;  %v3565_v53 = vld [vmem:[%s15249_s4 + $0xa0] sm:$0xff] }
 0x431   : > { %v2717_v54 = vpop.permute.xlu0 %2716 }
 0x432   : > { %v2722_v36 = vsel %vm1574_vm12, %v2717_v54, %v2719_v52  ;;  %v2831_v55 = vpop.permute.xlu1 %2830  ;;  %v3548_v52 = vld [vmem:[%s15249_s4 + $0x18] sm:$0xff]  ;;  %v3566_v54 = vld [vmem:[%s15249_s4 + $0xa8] sm:$0xff]  ;;  %vm13514_vm12 = vmmov 0  }
 0x433   : > { %2730 = vmatpush1.msra.mxu1 %v2722_v36  ;;  %12313 = vmatprep.mubr.msk.f32.mxu0 %vm13514_vm12, %v13487_v1 }
 0x435   : > { %v2833_v57 = vpop.permute.xlu0 %2832  ;;  %11746 = vmatmul.mubr.msk.f32.vlgmr.msra.gmra.mrb[0].mxu1 %vm2528_vm3, %v11745_v56  ;;  %v12799_v56 = vpack.c.bf16 %v3566_v54, %v3565_v53 }
 0x436   : > { %v2829_v6 = vpop.permute.xlu1 %2828  ;;  %v2835_v58 = vsel %vm1705_vm13, %v2831_v55, %v2833_v57  ;;  %2905 = vmatprep.mubr.f32.mxu1 %v13487_v1  ;;  %v3549_v57 = vld [vmem:[%s15249_s4 + $0x20] sm:$0xff] }
 0x437   : > { %v2834_v59 = vsel %vm1705_vm13, %v2829_v6, %v2831_v55  ;;  %2841 = vmatprep.subr.mxu1 %v2835_v58  ;;  %v12797_v55 = vpack.c.bf16 %v3548_v52, %v3547_v39  ;;  %v3550_v6 = vld [vmem:[%s15249_s4 + $0x28] sm:$0xff]  ;;  %v3567_v58 = vld [vmem:[%s15249_s4 + $0xb0] sm:$0xff]  ;;  %vm4481_vm13 = vcmask 781568  }
 0x438   : > { %2842 = vmatpush1.msra.mxu1 %v2834_v59  ;;  %v3568_v59 = vld [vmem:[%s15249_s4 + $0xb8] sm:$0xff] }
 0x439   : > { %v2943_v60 = vpop.permute.xlu0 %2942 }
 0x43a   : > { %v2945_v5 = vpop.permute.xlu1 %2944 }
 0x43b   : > { %v2947_v47 = vsel %vm15272_vm4, %v2943_v60, %v2945_v5  ;;  %v12803_v5 = vpack.c.bf16 %v3568_v59, %v3567_v58  ;;  %v11781_v58 = vld [vmem:[#allocation3 + $0x8] ss:$0 sm:$0xff]  ;;  %vm5338_vm4 = vcmask 523264  }
 0x43c   : > { %2953 = vmatprep.subr.mxu1 %v2947_v47  ;;  %v3552_v47 = vld [vmem:[%s15249_s4 + $0x38] sm:$0xff] }
 0x43d   : > { %v2941_v62 = vpop.permute.xlu0 %2940  ;;  %11749 = vmatmul.mubr.msk.f32.vlgmr.msra.gmra.mrb[0].mxu1 %vm2528_vm3, %v11748_v61  ;;  %v3551_v61 = vld [vmem:[%s15249_s4 + $0x30] sm:$0xff] }
 0x43e   : > { %v2946_v48 = vsel %vm15273_vm5, %v2941_v62, %v2943_v60  ;;  %v3055_v37 = vpop.permute.xlu1 %3054  ;;  %3017 = vmatprep.mubr.f32.mxu1 %v13487_v1  ;;  %v12801_v60 = vpack.c.bf16 %v3550_v6, %v3549_v57  ;;  %v3569_v62 = vld [vmem:[%s15249_s4 + $0xc0] sm:$0xff]  ;;  %v14338_v57 = vld [vmem:[#allocation3 + $0x4] ss:$0 sm:$0xff]  ;;  %v14342_v6 = vld [vmem:[#allocation3 + $0x6] ss:$0 sm:$0xff]  ;;  %vm5416_vm5 = vcmask 388352  }
 0x43f   : > { %2954 = vmatpush1.msra.mxu1 %v2946_v48  ;;  %v3570_v48 = vld [vmem:[%s15249_s4 + $0xc8] sm:$0xff] }
 0x441   : > { %v3057_v40 = vpop.permute.xlu0 %3056 }
 0x442   : > { %v3053_v41 = vpop.permute.xlu1 %3052  ;;  %v3059_v46 = vsel %vm15274_vm6, %v3055_v37, %v3057_v40  ;;  %v12807_v40 = vpack.c.bf16 %v3570_v48, %v3569_v62  ;;  %v14356_v62 = vld [vmem:[#allocation3 + $0x5] ss:$0 sm:$0xff]  ;;  %v14360_v48 = vld [vmem:[#allocation3 + $0x7] ss:$0 sm:$0xff] }
 0x443   : > { %v3058_v0 = vsel %vm15275_vm7, %v3053_v41, %v3055_v37  ;;  %3065 = vmatprep.subr.mxu1 %v3059_v46  ;;  %v12805_v37 = vpack.c.bf16 %v3552_v47, %v3551_v61  ;;  %v3553_v41 = vld [vmem:[%s15249_s4 + $0x40] sm:$0xff]  ;;  %v3554_v46 = vld [vmem:[%s15249_s4 + $0x48] sm:$0xff]  ;;  %v14348_v61 = vld [vmem:[#allocation3] ss:$0 sm:$0xff]  ;;  %vm6288_vm7 = vcmask 1041408  }
 0x444   : > { %v14352_v47 = vld [vmem:[#allocation3 + $0x3] ss:$0 sm:$0xff] }
 0x445   : > { %v3167_v2 = vpop.permute.xlu0 %3166  ;;  %11752 = vmatmul.mubr.msk.f32.vlgmr.msra.gmra.mrb[0].mxu1 %vm2528_vm3, %v11751_v63  ;;  %v3571_v63 = vld [vmem:[%s15249_s4 + $0xd0] sm:$0xff] }
 0x446   : > { %3066 = vmatpush1.msra.mxu1 %v3058_v0  ;;  %v3169_v3 = vpop.permute.xlu1 %3168  ;;  %3129 = vmatprep.mubr.f32.mxu1 %v13487_v1  ;;  %v3572_v0 = vld [vmem:[%s15249_s4 + $0xd8] sm:$0xff] }
 0x447   : > { %v3171_v4 = vsel %vm15276_vm8, %v3167_v2, %v3169_v3  ;;  %v12811_v3 = vpack.c.bf16 %v3572_v0, %v3571_v63  ;;  %vm6284_vm8 = vcmask 15360  }
 0x448   : > { %3177 = vmatprep.subr.mxu1 %v3171_v4  ;;  %v3555_v4 = vld [vmem:[%s15249_s4 + $0x50] sm:$0xff] }
 0x449   : > { %v3165_v7 = vpop.permute.xlu0 %3164 }
 0x44a   : > { %v3279_v9 = vpop.permute.xlu1 %3278  ;;  %v3170_v10 = vsel %vm15277_vm9, %v3165_v7, %v3167_v2  ;;  %v12809_v2 = vpack.c.bf16 %v3554_v46, %v3553_v41  ;;  %v3556_v7 = vld [vmem:[%s15249_s4 + $0x58] sm:$0xff]  ;;  %vm7183_vm9 = vcmask 288000  }
 0x44d   : > { %v3281_v11 = vpop.permute.xlu0 %3280  ;;  %11755 = vmatmul.mubr.msk.f32.vlgmr.msra.gmra.mrb[0].mxu1 %vm2528_vm3, %v11754_v8  ;;  %v12813_v8 = vpack.c.bf16 %v3556_v7, %v3555_v4 }
 0x44e   : > { %3178 = vmatpush1.msra.mxu1 %v3170_v10  ;;  %v3283_v12 = vsel %vm2228_vm15, %v3279_v9, %v3281_v11  ;;  %3241 = vmatprep.mubr.f32.mxu1 %v13487_v1  ;;  %v3277_v13 = vpop.permute.xlu1 %3276  ;;  %v3574_v10 = vld [vmem:[%s15249_s4 + $0xe8] sm:$0xff] }
 0x44f   : > { %3289 = vmatprep.subr.mxu1 %v3283_v12  ;;  %v3282_v15 = vsel %vm2228_vm15, %v3277_v13, %v3279_v9  ;;  %v3573_v9 = vld [vmem:[%s15249_s4 + $0xe0] sm:$0xff]  ;;  %v3558_v13 = vld [vmem:[%s15249_s4 + $0x68] sm:$0xff] }
 0x450   : > { %v12815_v11 = vpack.c.bf16 %v3574_v10, %v3573_v9  ;;  %v3557_v12 = vld [vmem:[%s15249_s4 + $0x60] sm:$0xff] }
 0x455   : > { %11758 = vmatmul.mubr.msk.f32.vlgmr.msra.gmra.mrb[0].mxu1 %vm2528_vm3, %v11757_v14  ;;  %v12817_v14 = vpack.c.bf16 %v3558_v13, %v3557_v12 }
 0x456   : > { %3290 = vmatpush1.msra.mxu1 %v3282_v15  ;;  %3353 = vmatprep.mubr.f32.mxu1 %v13487_v1  ;;  %v3575_v15 = vld [vmem:[%s15249_s4 + $0xf0] sm:$0xff] }
 0x45d   : > { %11761 = vmatmul.mubr.msk.f32.vlgmr.msra.gmra.mrb[0].mxu1 %vm2528_vm3, %v11760_v16  ;;  %v3576_v16 = vld [vmem:[%s15249_s4 + $0xf8] sm:$0xff] }
 0x45e   : > { %3465 = vmatprep.mubr.f32.mxu1 %v13487_v1 }
 0x49a   : > { %v3393_v17 = vpop.permute.xlu1 %3392 }
 0x49b   : > { %v3391_v18 = vpop.permute.xlu0 %3390 }
 0x49c   : > { %v3395_v19 = vsel %vm2359_vm14, %v3391_v18, %v3393_v17  ;;  %v12819_v17 = vpack.c.bf16 %v3576_v16, %v3575_v15 }
 0x49d   : > { %3401 = vmatprep.subr.mxu1 %v3395_v19  ;;  %v3560_v19 = vld [vmem:[%s15249_s4 + $0x78] sm:$0xff] }
 0x49f   : > { %v3389_v20 = vpop.permute.xlu0 %3388 }
 0x4a0   : > { %v3394_v22 = vsel %vm2359_vm14, %v3389_v20, %v3391_v18  ;;  %v3559_v18 = vld [vmem:[%s15249_s4 + $0x70] sm:$0xff]  ;;  %vm4514_vm14 = vcmask 1043456   ;;  %s15292_s4 = smov 28  }
 0x4a1   : > { %3402 = vmatpush1.msra.mxu1 %v3394_v22  ;;  %v12821_v20 = vpack.c.bf16 %v3560_v19, %v3559_v18  ;;  %v3677_v19 = vld [vmem:[#allocation8 + $0x4] sm:$0xf] }
 0x4a2   : > { %11764 = vmatmul.mubr.msk.f32.vlgmr.msra.gmra.mrb[0].mxu1 %vm2528_vm3, %v11763_v21  ;;  %12792 = vmatprep.subr.bf16.mxu1 %v12791_v38 }
 0x4a3   : > { %12794 = vmatpush3.bf16.msra.mxu1 %v12793_v50 }
 0x4a4   : > { %12796 = vmatprep.subr.bf16.mxu1 %v12795_v51 }
 0x4a7   : > { %12798 = vmatpush3.bf16.msra.mxu1 %v12797_v55 }
 0x4a8   : > { %12800 = vmatprep.subr.bf16.mxu1 %v12799_v56 }
 0x4ab   : > { %v3478_v23 = vpop.permute.xlu1 %3477  ;;  %12802 = vmatpush3.bf16.msra.mxu1 %v12801_v60 }
 0x4ac   : > { %12804 = vmatprep.subr.bf16.mxu1 %v12803_v5 }
 0x4af   : > { %12806 = vmatpush3.bf16.msra.mxu1 %v12805_v37 }
 0x4b0   : > { %12808 = vmatprep.subr.bf16.mxu1 %v12807_v40 }
 0x4b3   : > { %12810 = vmatpush3.bf16.msra.mxu1 %v12809_v2 }
 0x4b4   : > { %12812 = vmatprep.subr.bf16.mxu1 %v12811_v3 }
 0x4b7   : > { %12814 = vmatpush3.bf16.msra.mxu1 %v12813_v8 }
 0x4b8   : > { %12816 = vmatprep.subr.bf16.mxu1 %v12815_v11 }
 0x4bb   : > { %12818 = vmatpush3.bf16.msra.mxu1 %v12817_v14 }
 0x4bc   : > { %12820 = vmatprep.subr.bf16.mxu1 %v12819_v17  ;;  %v4469_v17 = vld [vmem:[%s13596_s19] sm:$0xf] }
 0x4bf   : > { %12822 = vmatpush3.bf16.msra.mxu1 %v12821_v20 }
 0x4c0   : > { %12351 = vmatprep.subr.mxu1 %v13487_v1 }
 0x575   : > { %v3467_v24 = vpop.f32.mrb[0].mxu1 }
 0x576   : > { %v3480_v25 = vadd.f32 %v3478_v23, %v3467_v24  ;;  %v3469_v26 = vpop.f32.mrb[1].mxu1 }
 0x577   : > { %v3481_v27 = vadd.f32 %v3478_v23, %v3469_v26 }
 0x578   : > { %v14261_v28 = vmax.f32 %v3480_v25, 0.0 }
 0x579   : > { %v14263_v29 = vmax.f32 %v3481_v27, 0.0 }
 0x57a   : > { %3486 = vrot.lane.b32.xlu0 %v14261_v28, %s15198_s10 }
 0x57b   : > { %3488 = vrot.lane.b32.xlu1 %v14263_v29, %s15198_s10 }
 0x5ec   : > { %v3487_v30 = vpop.permute.xlu0 %3486 }
 0x5ed   : > { %3494 = vst.msk [vmem:[#allocation2] sm:$0xff] %vm1259_vm0, %v3487_v30  ;;  %v3489_v31 = vpop.permute.xlu1 %3488  ;;  %vm3521_vm0 = vcmask 1039360  }
 0x5ee   : > { %v14271_v32 = vsel %vm1250_vm1, %v3487_v30, %v3489_v31  ;;  %3496 = vst.msk [vmem:[#allocation2 + $0x10] sm:$0xff] %vm1250_vm1, %v3489_v31  ;;  %vm15278_vm1 = vmmov %vm15274_vm6  ;;  %vm6255_vm6 = vcmask 386304  }
 0x5ef   : > { %vm15279_vm10 = vmmov %vm15278_vm1 }
 0x5f4   : > { %v14280_v49 = vld [vmem:[#allocation2] sm:$0xff] }
 0x5f5   : > { %3515 = vrot.lane.b32.xlu1 %v14280_v49, %s15188_s0  ;;  %v14286_v45 = vld [vmem:[#allocation2 + $0x10] sm:$0xff] }
 0x5f6   : > { %v13262_v36 = vpack.i.bf16 %v14286_v45, %v14271_v32 }
 0x5f8   : > { %13263 = vrot.lane.b32.xlu0 %v13262_v36, %s15188_s0  ;;  %s15192_s0 = smov 40  }
 0x5f9   : > { %3503 = vrot.lane.b32.xlu1 %v14280_v49, %s15269_s1 }
 0x5fc   : > { %13268 = vrot.lane.b32.xlu0 %v13262_v36, %s15269_s1 }
 0x667   : > { %v3516_v24 = vpop.permute.xlu1 %3515 }
 0x66a   : > { %v13264_v21 = vpop.permute.xlu0 %13263 }
 0x66b   : > { %v13266_v22 = vunpack.i.h.bf16 %v13264_v21  ;;  %v13265_v23 = vunpack.i.l.bf16 %v13264_v21  ;;  %v3504_v43 = vpop.permute.xlu1 %3503 }
 0x66d   : > { %v3529_v25 = vmax.f32 %v14286_v45, %v13266_v22  ;;  %v3522_v26 = vsel %vm3521_vm0, %v3516_v24, %v13265_v23  ;;  %v3523_v27 = vsel %vm3521_vm0, %v13265_v23, %v13266_v22  ;;  %v3664_v22 = vld [vmem:[#allocation8] sm:$0xf]  ;;  %v3844_v24 = vld [vmem:[#allocation8 + $0x8] sm:$0xf] }
 0x66e   : > { %v3528_v30 = vmax.f32 %v14271_v32, %v3523_v27  ;;  %v3527_v31 = vmax.f32 %v14280_v49, %v3522_v26  ;;  %v13269_v32 = vpop.permute.xlu0 %13268  ;;  %v3935_v27 = vld [vmem:[#allocation8 + $0xc] sm:$0xf] }
 0x66f   : > { %v13271_v38 = vunpack.i.h.bf16 %v13269_v32  ;;  %v13270_v42 = vunpack.i.l.bf16 %v13269_v32  ;;  %v4117_v32 = vld [vmem:[#allocation8 + $0x14] sm:$0xf] }
 0x670   : > { %3533 = vrot.lane.b32.xlu1 %v3527_v31, %s15270_s23  ;;  %v13272_v33 = vpack.i.bf16 %v3529_v25, %v3528_v30  ;;  %v4026_v31 = vld [vmem:[#allocation8 + $0x10] sm:$0xf] }
 0x671   : > { %v3509_v44 = vsel %vm15278_vm1, %v3504_v43, %v13270_v42  ;;  %v3510_v49 = vsel %vm15279_vm10, %v13270_v42, %v13271_v38  ;;  %v4208_v38 = vld [vmem:[#allocation8 + $0x18] sm:$0xf]  ;;  %v4299_v43 = vld [vmem:[#allocation8 + $0x1c] sm:$0xf] }
 0x672   : > { %13273 = vrot.lane.b32.xlu0 %v13272_v33, %s15270_s23  ;;  %v3513_v52 = vmax.f32 %v14261_v28, %v3509_v44  ;;  %v3514_v53 = vmax.f32 %v14263_v29, %v3510_v49  ;;  %s13512_s23 = smov 23   ;;  %v4390_v33 = vld [vmem:[#allocation8 + $0x20] sm:$0xf] }
 0x674   : > { %3672 = vrot.lane.b32.xlu1 %v14323_v34, %s13508_s26 }
 0x678   : > { %3839 = vrot.lane.b32.xlu1 %v14328_v35, %s13509_s28 }
 0x67c   : > { %4021 = vrot.lane.b32.xlu1 %v14338_v57, %s15198_s10 }
 0x680   : > { %4203 = vrot.lane.b32.xlu1 %v14342_v6, %s13510_s22 }
 0x684   : > { %4385 = vrot.lane.b32.xlu1 %v11781_v58, %s13511_s17 }
 0x6e2   : > { %v3534_v45 = vpop.permute.xlu1 %3533 }
 0x6e4   : > { %v13274_v50 = vpop.permute.xlu0 %13273 }
 0x6e5   : > { %v13276_v51 = vunpack.i.h.bf16 %v13274_v50  ;;  %v13275_v39 = vunpack.i.l.bf16 %v13274_v50 }
 0x6e6   : > { %v3673_v37 = vpop.permute.xlu1 %3672 }
 0x6e7   : > { %v3539_v54 = vsel %vm2228_vm15, %v3534_v45, %v13275_v39  ;;  %v3540_v36 = vsel %vm2228_vm15, %v13275_v39, %v13276_v51  ;;  %vm4510_vm15 = vcmask 31744  }
 0x6e8   : > { %v3544_v55 = vmax.f32 %v3514_v53, %v3540_v36  ;;  %v3543_v56 = vmax.f32 %v3513_v52, %v3539_v54 }
 0x6ea   : > { %3641 = vmatprep.mubr.f32.mxu1 %v3544_v55  ;;  %v3840_v46 = vpop.permute.xlu1 %3839 }
 0x6eb   : > { %3642 = vmatmul.mubr.f32.vlgmr.msra.gmra.mrb[2].mxu1 %v3543_v56 }
 0x6ec   : > { %12353 = vmatprep.mubr.msk.f32.mxu1 %vm13514_vm12, %v13487_v1 }
 0x6ee   : > { %v4022_v4 = vpop.permute.xlu1 %4021 }
 0x6f2   : > { %v4204_v10 = vpop.permute.xlu1 %4203 }
 0x6f6   : > { %v4386_v16 = vpop.permute.xlu1 %4385 }
 0x7be   : > { %v12128_v59 = vpop.f32.mrb[2].mxu1 }
 0x7bf   : > { %v12129_v60 = vpop.f32.mrb[3].mxu1 }
 0x7c0   : > { %v12130_v5 = vadd.f32 %v12129_v60, %v12128_v59 }
 0x7c2   : > { %3648 = vrot.lane.b32.xlu0 %v12130_v5, %s15198_s10 }
 0x7c6   : > { %3660 = vrot.lane.b32.xlu0 %v14348_v61, %s13512_s23 }
 0x7ca   : > { %3930 = vrot.lane.b32.xlu0 %v14352_v47, %s15193_s2  ;;  %s15197_s2 = smov 103  }
 0x7ce   : > { %4112 = vrot.lane.b32.xlu0 %v14356_v62, %s15190_s7  ;;  %s15196_s7 = smov 105  }
 0x7d2   : > { %4294 = vrot.lane.b32.xlu0 %v14360_v48, %s15192_s0  ;;  %s15195_s0 = smov 104  }
 0x834   : > { %v3649_v40 = vpop.permute.xlu0 %3648 }
 0x835   : > { %3652 = vst.msk [vmem:[#allocation2] sm:$0xff] %vm3651_vm11, %v3649_v40 }
 0x838   : > { %v3661_v41 = vpop.permute.xlu0 %3660 }
 0x83c   : > { %v3653_v63 = vld [vmem:[#allocation2] sm:$0xff]  ;;  %v3931_v0 = vpop.permute.xlu0 %3930 }
 0x83d   : > { %v3663_v2 = vmul.f32 %v3661_v41, %v3653_v63  ;;  %v3675_v3 = vmul.f32 %v3673_v37, %v3653_v63  ;;  %v3933_v8 = vmul.f32 %v3931_v0, %v3653_v63  ;;  %v3842_v9 = vmul.f32 %v3840_v46, %v3653_v63 }
 0x83e   : > { %v4024_v12 = vmul.f32 %v4022_v4, %v3653_v63  ;;  %v4206_v15 = vmul.f32 %v4204_v10, %v3653_v63  ;;  %v4388_v18 = vmul.f32 %v4386_v16, %v3653_v63 }
 0x83f   : > { %3756 = vrot.lane.b32.xlu1 %v3663_v2, %s15196_s7  ;;  %3679 = vrot.lane.b32.xlu0 %v3675_v3, %s15195_s0  ;;  %s13518_s0 = smov 88   ;;  %s13519_s7 = smov 89  }
 0x840   : > { %v4113_v7 = vpop.permute.xlu0 %4112 }
 0x841   : > { %v4115_v11 = vmul.f32 %v4113_v7, %v3653_v63 }
 0x843   : > { %3937 = vrot.lane.b32.xlu1 %v3933_v8, %s15267_s18  ;;  %3846 = vrot.lane.b32.xlu0 %v3842_v9, %s15197_s2  ;;  %s13520_s2 = smov 87  }
 0x844   : > { %v4295_v13 = vpop.permute.xlu0 %4294 }
 0x845   : > { %v4297_v14 = vmul.f32 %v4295_v13, %v3653_v63 }
 0x847   : > { %4119 = vrot.lane.b32.xlu1 %v4115_v11, %s15269_s1  ;;  %4028 = vrot.lane.b32.xlu0 %v4024_v12, %s15268_s11 }
 0x84b   : > { %4301 = vrot.lane.b32.xlu1 %v4297_v14, %s13518_s0  ;;  %4210 = vrot.lane.b32.xlu0 %v4206_v15, %s13519_s7 }
 0x84f   : > { %4472 = vperm.xlu1 %13261, %v4469_v17   ;;  %4392 = vrot.lane.b32.xlu0 %v4388_v18, %s13520_s2 }
 0x853   : > { %4501 = vrot.lane.b32.xlu1 %v14323_v34, %s13508_s26  ;;  %s15280_s26 = smov 31  }
 0x857   : > { %4671 = vrot.lane.b32.xlu1 %v14328_v35, %s13509_s28  ;;  %s15281_s28 = smov 33  }
 0x85b   : > { %4853 = vrot.lane.b32.xlu1 %v14338_v57, %s15198_s10 }
 0x85f   : > { %5035 = vrot.lane.b32.xlu1 %v14342_v6, %s13510_s22  ;;  %s15282_s22 = smov 40  }
 0x863   : > { %5217 = vrot.lane.b32.xlu1 %v11781_v58, %s13511_s17  ;;  %s15283_s17 = smov 105  }
 0x8b1   : > { %v3680_v20 = vpop.permute.xlu0 %3679  ;;  %v3757_v21 = vpop.permute.xlu1 %3756 }
 0x8b2   : > { %12312 = vmatpush3.msra.mxu0 %v3680_v20 }
 0x8b3   : > { %12314 = vmatmul.mubr.msk.f32.vlgmr.msra.gmra.mrb[2].mxu0 %vm2528_vm3, %v3677_v19  ;;  %12316 = vmatprep.subr.mxu0 %v13487_v1 }
 0x8b4   : > { %12317 = vmatpush3.msra.mxu0 %v3757_v21  ;;  %12318 = vmatprep.mubr.msk.f32.mxu0 %vm13514_vm12, %v13487_v1 }
 0x8b5   : > { %v3847_v23 = vpop.permute.xlu0 %3846  ;;  %12321 = vmatprep.subr.mxu0 %v13487_v1  ;;  %v3938_v26 = vpop.permute.xlu1 %3937 }
 0x8b7   : > { %12319 = vmatmul.mubr.msk.f32.vlgmr.msra.gmra.mrb[4].mxu0 %vm2528_vm3, %v3664_v22 }
 0x8b8   : > { %12322 = vmatpush3.msra.mxu0 %v3847_v23  ;;  %12323 = vmatprep.mubr.msk.f32.mxu0 %vm13514_vm12, %v13487_v1 }
 0x8b9   : > { %v4029_v25 = vpop.permute.xlu0 %4028  ;;  %12326 = vmatprep.subr.mxu0 %v13487_v1  ;;  %v4120_v35 = vpop.permute.xlu1 %4119 }
 0x8bb   : > { %12324 = vmatmul.mubr.msk.f32.vlgmr.msra.gmra.mrb[6].mxu0 %vm2528_vm3, %v3844_v24  ;;  %v5302_v24 = vld [vmem:[%s13606_s30] sm:$0xf] }
 0x8bc   : > { %12327 = vmatpush3.msra.mxu0 %v3938_v26  ;;  %12328 = vmatprep.mubr.msk.f32.mxu0 %vm13514_vm12, %v13487_v1 }
 0x8bd   : > { %v4211_v30 = vpop.permute.xlu0 %4210  ;;  %12331 = vmatprep.subr.mxu0 %v13487_v1  ;;  %v4302_v42 = vpop.permute.xlu1 %4301 }
 0x8bf   : > { %12329 = vmatmul.mubr.msk.f32.vlgmr.msra.gmra.mrb[8].mxu0 %vm2528_vm3, %v3935_v27 }
 0x8c0   : > { %12332 = vmatpush3.msra.mxu0 %v4029_v25  ;;  %12333 = vmatprep.mubr.msk.f32.mxu0 %vm13514_vm12, %v13487_v1 }
 0x8c1   : > { %v4393_v34 = vpop.permute.xlu0 %4392  ;;  %12336 = vmatprep.subr.mxu0 %v13487_v1 }
 0x8c2   : > { %12352 = vmatpush3.msra.mxu1 %v4393_v34 }
 0x8c3   : > { %12334 = vmatmul.mubr.msk.f32.vlgmr.msra.gmra.mrb[10].mxu0 %vm2528_vm3, %v4026_v31  ;;  %12354 = vmatmul.mubr.msk.f32.vlgmr.msra.gmra.mrb[4].mxu1 %vm2528_vm3, %v4390_v33 }
 0x8c4   : > { %12337 = vmatpush3.msra.mxu0 %v4120_v35  ;;  %12338 = vmatprep.mubr.msk.f32.mxu0 %vm13514_vm12, %v13487_v1 }
 0x8c5   : > { %12341 = vmatprep.subr.mxu0 %v13487_v1  ;;  %12361 = vmatprep.subr.mxu1 %v13487_v1 }
 0x8c6   : > { %12363 = vmatprep.mubr.msk.f32.mxu1 %vm13514_vm12, %v13487_v1 }
 0x8c7   : > { %12339 = vmatmul.mubr.msk.f32.vlgmr.msra.gmra.mrb[12].mxu0 %vm2528_vm3, %v4117_v32 }
 0x8c8   : > { %12342 = vmatpush3.msra.mxu0 %v4211_v30  ;;  %12343 = vmatprep.mubr.msk.f32.mxu0 %vm13514_vm12, %v13487_v1 }
 0x8c9   : > { %12346 = vmatprep.subr.mxu0 %v13487_v1 }
 0x8cb   : > { %12344 = vmatmul.mubr.msk.f32.vlgmr.msra.gmra.mrb[14].mxu0 %vm2528_vm3, %v4208_v38 }
 0x8cc   : > { %12347 = vmatpush3.msra.mxu0 %v4302_v42  ;;  %12348 = vmatprep.mubr.msk.f32.mxu0 %vm13514_vm12, %v13487_v1 }
 0x8cd   : > { %12356 = vmatprep.subr.mxu0 %v13487_v1 }
 0x8ce   : > { %v4473_v4 = vpop.permute.xlu1 %4472 }
 0x8cf   : > { %12349 = vmatmul.mubr.msk.f32.vlgmr.msra.gmra.mrb[16].mxu0 %vm2528_vm3, %v4299_v43 }
 0x8d0   : > { %12358 = vmatprep.mubr.msk.f32.mxu0 %vm13514_vm12, %v13487_v1 }
 0x8d2   : > { %v4502_v9 = vpop.permute.xlu1 %4501 }
 0x8d6   : > { %v4672_v12 = vpop.permute.xlu1 %4671 }
 0x8da   : > { %v4854_v16 = vpop.permute.xlu1 %4853 }
 0x8de   : > { %v5036_v17 = vpop.permute.xlu1 %5035 }
 0x8e2   : > { %v5218_v23 = vpop.permute.xlu1 %5217 }
 0x986   : > { %v3751_v44 = vpop.f32.mrb[2].mxu0 }
 0x987   : > { %v12315_v49 = vpop.f32.mrb[3].mxu0 }
 0x98a   : > { %v3828_v50 = vpop.f32.mrb[4].mxu0 }
 0x98b   : > { %v3829_v51 = vadd.f32 %v3828_v50, %v3751_v44  ;;  %v12320_v39 = vpop.f32.mrb[5].mxu0 }
 0x98e   : > { %v3918_v52 = vpop.f32.mrb[6].mxu0 }
 0x98f   : > { %v3922_v45 = vadd.f32 %v3918_v52, %v3829_v51  ;;  %v12325_v53 = vpop.f32.mrb[7].mxu0 }
 0x992   : > { %v4009_v54 = vpop.f32.mrb[8].mxu0 }
 0x993   : > { %v4013_v36 = vadd.f32 %v4009_v54, %v3922_v45  ;;  %v12330_v55 = vpop.f32.mrb[9].mxu0 }
 0x996   : > { %v4100_v56 = vpop.f32.mrb[10].mxu0  ;;  %v4464_v57 = vpop.f32.mrb[4].mxu1 }
 0x997   : > { %v4104_v6 = vadd.f32 %v4100_v56, %v4013_v36  ;;  %v12335_v58 = vpop.f32.mrb[11].mxu0  ;;  %v12355_v59 = vpop.f32.mrb[5].mxu1 }
 0x99a   : > { %v4191_v60 = vpop.f32.mrb[12].mxu0 }
 0x99b   : > { %v4195_v5 = vadd.f32 %v4191_v60, %v4104_v6  ;;  %v12340_v37 = vpop.f32.mrb[13].mxu0 }
 0x99e   : > { %v4282_v40 = vpop.f32.mrb[14].mxu0 }
 0x99f   : > { %v4286_v41 = vadd.f32 %v4282_v40, %v4195_v5  ;;  %v12345_v46 = vpop.f32.mrb[15].mxu0 }
 0x9a2   : > { %v4373_v63 = vpop.f32.mrb[16].mxu0 }
 0x9a3   : > { %v4377_v0 = vadd.f32 %v4373_v63, %v4286_v41  ;;  %v12350_v2 = vpop.f32.mrb[17].mxu0 }
 0x9a5   : > { %v4468_v3 = vadd.f32 %v4464_v57, %v4377_v0 }
 0x9a7   : > { %v4475_v7 = vadd.f32 %v4473_v4, %v4468_v3 }
 0x9a9   : > { %v4476_v8 = vmax.f32 %v4475_v7, 0.0 }
 0x9ab   : > { %4478 = vrot.lane.b32.xlu0 %v4476_v8, %s15198_s10  ;;  %s15286_s10 = sld [smem:[#allocation18_spill]] }
 0x9af   : > { %4490 = vrot.lane.b32.xlu0 %v14348_v61, %s13512_s23  ;;  %s15284_s23 = smov 104  }
 0x9b1   : > { %v4494_v26 = vld [vmem:[%s15286_s10] sm:$0xf]  ;;  %v11785_v30 = vld [vmem:[%s15286_s10 + $0x4] sm:$0xf]  ;;  %v11795_v33 = vld [vmem:[%s15286_s10 + $0xc] sm:$0xf] }
 0x9b2   : > { %v11791_v35 = vld [vmem:[%s15286_s10 + $0x8] sm:$0xf]  ;;  %v11803_v38 = vld [vmem:[%s15286_s10 + $0x14] sm:$0xf]  ;;  %v11799_v43 = vld [vmem:[%s15286_s10 + $0x10] sm:$0xf] }
 0x9b3   : > { %4762 = vrot.lane.b32.xlu0 %v14352_v47, %s15280_s26  ;;  %v11811_v49 = vld [vmem:[%s15286_s10 + $0x1c] sm:$0xf]  ;;  %v11807_v51 = vld [vmem:[%s15286_s10 + $0x18] sm:$0xf]  ;;  %v11815_v52 = vld [vmem:[%s15286_s10 + $0x20] sm:$0xf] }
 0x9b7   : > { %4944 = vrot.lane.b32.xlu0 %v14356_v62, %s15281_s28 }
 0x9bb   : > { %5126 = vrot.lane.b32.xlu0 %v14360_v48, %s15282_s22  ;;  %s15285_s22 = smov 103  }
 0xa1d   : > { %v4479_v10 = vpop.permute.xlu0 %4478 }
 0xa1e   : > { %4482 = vst.msk [vmem:[#allocation2] sm:$0xf] %vm4481_vm13, %v4479_v10 }
 0xa21   : > { %v4491_v11 = vpop.permute.xlu0 %4490 }
 0xa25   : > { %v4483_v13 = vld [vmem:[#allocation2] sm:$0xf]  ;;  %v4763_v14 = vpop.permute.xlu0 %4762 }
 0xa26   : > { %v4493_v15 = vmul.f32 %v4491_v11, %v4483_v13  ;;  %v4504_v61 = vmul.f32 %v4502_v9, %v4483_v13  ;;  %v4765_v62 = vmul.f32 %v4763_v14, %v4483_v13  ;;  %v4674_v48 = vmul.f32 %v4672_v12, %v4483_v13 }
 0xa27   : > { %v4856_v19 = vmul.f32 %v4854_v16, %v4483_v13  ;;  %v5038_v22 = vmul.f32 %v5036_v17, %v4483_v13  ;;  %v5220_v25 = vmul.f32 %v5218_v23, %v4483_v13 }
 0xa28   : > { %4588 = vrot.lane.b32.xlu1 %v4493_v15, %s15283_s17  ;;  %4508 = vrot.lane.b32.xlu0 %v4504_v61, %s15284_s23  ;;  %s15289_s17 = smov 127   ;;  %s15202_s23 = smov 28  }
 0xa29   : > { %v4945_v47 = vpop.permute.xlu0 %4944 }
 0xa2a   : > { %v4947_v18 = vmul.f32 %v4945_v47, %v4483_v13 }
 0xa2c   : > { %4769 = vrot.lane.b32.xlu1 %v4765_v62, %s15267_s18  ;;  %4678 = vrot.lane.b32.xlu0 %v4674_v48, %s15285_s22  ;;  %v13521_v62 = vmov 0.0|0.0   ;;  %s15200_s22 = smov 29  }
 0xa2d   : > { %v5127_v20 = vpop.permute.xlu0 %5126 }
 0xa2e   : > { %v5129_v21 = vmul.f32 %v5127_v20, %v4483_v13 }
 0xa30   : > { %4951 = vrot.lane.b32.xlu1 %v4947_v18, %s15269_s1  ;;  %4860 = vrot.lane.b32.xlu0 %v4856_v19, %s15268_s11 }
 0xa34   : > { %5133 = vrot.lane.b32.xlu1 %v5129_v21, %s13518_s0  ;;  %5042 = vrot.lane.b32.xlu0 %v5038_v22, %s13519_s7  ;;  %s15288_s7 = smov 32  }
 0xa38   : > { %5305 = vperm.xlu1 %13261, %v5302_v24   ;;  %5224 = vrot.lane.b32.xlu0 %v5220_v25, %s13520_s2  ;;  %s15287_s2 = sld [smem:[#allocation28_spill]] }
 0xa3e   : > { %v5330_v61 = vld [vmem:[%s15287_s2] sm:$0xff]  ;;  %v5331_v16 = vld [vmem:[%s15287_s2 + $0x8] sm:$0xff]  ;;  %v5332_v47 = vld [vmem:[%s15287_s2 + $0x10] sm:$0xff] }
 0xa3f   : > { %v12824_v48 = vpack.c.bf16 %v5331_v16, %v5330_v61  ;;  %v5333_v17 = vld [vmem:[%s15287_s2 + $0x18] sm:$0xff]  ;;  %v5334_v20 = vld [vmem:[%s15287_s2 + $0x20] sm:$0xff]  ;;  %v5335_v21 = vld [vmem:[%s15287_s2 + $0x28] sm:$0xff] }
 0xa40   : > { %v12827_v19 = vpack.c.bf16 %v5333_v17, %v5332_v47  ;;  %v12830_v22 = vpack.c.bf16 %v5335_v21, %v5334_v20  ;;  %v5336_v23 = vld [vmem:[%s15287_s2 + $0x30] sm:$0xff]  ;;  %v5337_v24 = vld [vmem:[%s15287_s2 + $0x38] sm:$0xff]  ;;  %s15212_s2 = smov 99  }
 0xa9a   : > { %v4589_v27 = vpop.permute.xlu1 %4588  ;;  %v4509_v31 = vpop.permute.xlu0 %4508 }
 0xa9b   : > { %12362 = vmatpush3.msk.msra.mxu1 %vm4514_vm14, %v4589_v27  ;;  %12357 = vmatpush3.msk.msra.mxu0 %vm4514_vm14, %v4509_v31  ;;  %v14517_v31 = vld [vmem:[#allocation5 + $0x1] ss:$0 sm:$0xff] }
 0xa9c   : > { %12364 = vmatmul.mubr.msk.f32.vlgmr.msra.gmra.mrb[6].mxu1 %vm4510_vm15, %v4494_v26  ;;  %12359 = vmatmul.mubr.msk.f32.vlgmr.msra.gmra.mrb[18].mxu0 %vm4510_vm15, %v11785_v30  ;;  %v12833_v26 = vpack.c.bf16 %v5337_v24, %v5336_v23 }
 0xa9d   : > { %12366 = vmatprep.subr.mxu0 %v13487_v1  ;;  %12371 = vmatprep.subr.mxu1 %v13487_v1 }
 0xa9e   : > { %v4770_v34 = vpop.permute.xlu1 %4769  ;;  %12368 = vmatprep.mubr.msk.f32.mxu0 %vm13514_vm12, %v13487_v1  ;;  %v4679_v32 = vpop.permute.xlu0 %4678  ;;  %12373 = vmatprep.mubr.msk.f32.mxu1 %vm13514_vm12, %v13487_v1 }
 0xa9f   : > { %12372 = vmatpush3.msk.msra.mxu1 %vm4514_vm14, %v4770_v34  ;;  %12367 = vmatpush3.msk.msra.mxu0 %vm4514_vm14, %v4679_v32 }
 0xaa0   : > { %12374 = vmatmul.mubr.msk.f32.vlgmr.msra.gmra.mrb[8].mxu1 %vm4510_vm15, %v11795_v33  ;;  %12369 = vmatmul.mubr.msk.f32.vlgmr.msra.gmra.mrb[20].mxu0 %vm4510_vm15, %v11791_v35  ;;  %v14521_v33 = vld [vmem:[#allocation5 + $0x2] ss:$0 sm:$0xff] }
 0xaa1   : > { %12376 = vmatprep.subr.mxu0 %v13487_v1  ;;  %12381 = vmatprep.subr.mxu1 %v13487_v1 }
 0xaa2   : > { %v4952_v42 = vpop.permute.xlu1 %4951  ;;  %12378 = vmatprep.mubr.msk.f32.mxu0 %vm13514_vm12, %v13487_v1  ;;  %v4861_v44 = vpop.permute.xlu0 %4860  ;;  %12383 = vmatprep.mubr.msk.f32.mxu1 %vm13514_vm12, %v13487_v1 }
 0xaa3   : > { %12382 = vmatpush3.msk.msra.mxu1 %vm4514_vm14, %v4952_v42  ;;  %12377 = vmatpush3.msk.msra.mxu0 %vm4514_vm14, %v4861_v44  ;;  %v11834_v42 = vld [vmem:[#allocation5 + $0x4] ss:$0 sm:$0xff]  ;;  %v11850_v44 = vld [vmem:[#allocation5 + $0x8] ss:$0 sm:$0xff] }
 0xaa4   : > { %12384 = vmatmul.mubr.msk.f32.vlgmr.msra.gmra.mrb[10].mxu1 %vm4510_vm15, %v11803_v38  ;;  %12379 = vmatmul.mubr.msk.f32.vlgmr.msra.gmra.mrb[22].mxu0 %vm4510_vm15, %v11799_v43  ;;  %v11842_v43 = vld [vmem:[#allocation5 + $0x6] ss:$0 sm:$0xff] }
 0xaa5   : > { %12386 = vmatprep.subr.mxu0 %v13487_v1  ;;  %12391 = vmatprep.subr.mxu1 %v13487_v1 }
 0xaa6   : > { %v5134_v50 = vpop.permute.xlu1 %5133  ;;  %12388 = vmatprep.mubr.msk.f32.mxu0 %vm13514_vm12, %v13487_v1  ;;  %v5043_v39 = vpop.permute.xlu0 %5042  ;;  %12393 = vmatprep.mubr.msk.f32.mxu1 %vm13514_vm12, %v13487_v1 }
 0xaa7   : > { %12392 = vmatpush3.msk.msra.mxu1 %vm4514_vm14, %v5134_v50  ;;  %12387 = vmatpush3.msk.msra.mxu0 %vm4514_vm14, %v5043_v39  ;;  %v14537_v39 = vld [vmem:[#allocation5 + $0x3] ss:$0 sm:$0xff] }
 0xaa8   : > { %12394 = vmatmul.mubr.msk.f32.vlgmr.msra.gmra.mrb[12].mxu1 %vm4510_vm15, %v11811_v49  ;;  %12389 = vmatmul.mubr.msk.f32.vlgmr.msra.gmra.mrb[24].mxu0 %vm4510_vm15, %v11807_v51  ;;  %v14533_v51 = vld [vmem:[#allocation5] ss:$0 sm:$0xff] }
 0xaa9   : > { %12396 = vmatprep.subr.mxu0 %v13487_v1  ;;  %12398 = vmatprep.mubr.msk.f32.mxu0 %vm13514_vm12, %v13487_v1 }
 0xaaa   : > { %12417 = vmatprep.mubr.msk.f32.mxu1 %vm13514_vm12, %v13487_v1  ;;  %v5225_v45 = vpop.permute.xlu0 %5224  ;;  %12823 = vmatprep.subr.bf16.mxu1 %v13521_v62 }
 0xaab   : > { %12397 = vmatpush3.msk.msra.mxu0 %vm4514_vm14, %v5225_v45  ;;  %12825 = vmatpush3.bf16.msra.mxu1 %v12824_v48  ;;  %v14545_v45 = vld [vmem:[#allocation5 + $0x7] ss:$0 sm:$0xff] }
 0xaac   : > { %12399 = vmatmul.mubr.msk.f32.vlgmr.msra.gmra.mrb[26].mxu0 %vm4510_vm15, %v11815_v52  ;;  %12420 = vmatprep.subr.mxu0 %v13487_v1  ;;  %v14541_v52 = vld [vmem:[#allocation5 + $0x5] ss:$0 sm:$0xff] }
 0xaad   : > { %12422 = vmatprep.mubr.msk.f32.mxu0 %vm13514_vm12, %v13487_v1  ;;  %12826 = vmatprep.subr.bf16.mxu1 %v13521_v62 }
 0xaaf   : > { %12828 = vmatpush3.bf16.msra.mxu1 %v12827_v19 }
 0xab0   : > { %12829 = vmatprep.subr.bf16.mxu1 %v13521_v62 }
 0xab3   : > { %12831 = vmatpush3.bf16.msra.mxu1 %v12830_v22 }
 0xab4   : > { %12832 = vmatprep.subr.bf16.mxu1 %v13521_v62 }
 0xab7   : > { %v5306_v13 = vpop.permute.xlu1 %5305  ;;  %12834 = vmatpush3.bf16.msra.mxu1 %v12833_v26 }
 0xab8   : > { %12440 = vmatprep.subr.mxu1 %v13487_v1 }
 0xb6f   : > { %v4661_v53 = vpop.f32.mrb[6].mxu1  ;;  %v4583_v54 = vpop.f32.mrb[18].mxu0 }
 0xb70   : > { %v12365_v36 = vpop.f32.mrb[7].mxu1  ;;  %v4662_v55 = vadd.f32 %v4661_v53, %v4583_v54  ;;  %v12360_v56 = vpop.f32.mrb[19].mxu0 }
 0xb73   : > { %v4842_v57 = vpop.f32.mrb[8].mxu1  ;;  %v4751_v6 = vpop.f32.mrb[20].mxu0 }
 0xb74   : > { %v12375_v58 = vpop.f32.mrb[9].mxu1  ;;  %v4755_v59 = vadd.f32 %v4751_v6, %v4662_v55  ;;  %v12370_v60 = vpop.f32.mrb[21].mxu0 }
 0xb76   : > { %v4846_v5 = vadd.f32 %v4842_v57, %v4755_v59 }
 0xb77   : > { %v5024_v37 = vpop.f32.mrb[10].mxu1  ;;  %v4933_v40 = vpop.f32.mrb[22].mxu0 }
 0xb78   : > { %v12385_v41 = vpop.f32.mrb[11].mxu1  ;;  %v4937_v46 = vadd.f32 %v4933_v40, %v4846_v5  ;;  %v12380_v63 = vpop.f32.mrb[23].mxu0 }
 0xb7a   : > { %v5028_v0 = vadd.f32 %v5024_v37, %v4937_v46 }
 0xb7b   : > { %v5206_v2 = vpop.f32.mrb[12].mxu1  ;;  %v5115_v3 = vpop.f32.mrb[24].mxu0 }
 0xb7c   : > { %v12395_v4 = vpop.f32.mrb[13].mxu1  ;;  %v5119_v7 = vadd.f32 %v5115_v3, %v5028_v0  ;;  %v12390_v8 = vpop.f32.mrb[25].mxu0 }
 0xb7e   : > { %v5210_v9 = vadd.f32 %v5206_v2, %v5119_v7 }
 0xb7f   : > { %v5297_v10 = vpop.f32.mrb[26].mxu0 }
 0xb80   : > { %v5301_v11 = vadd.f32 %v5297_v10, %v5210_v9  ;;  %v12400_v12 = vpop.f32.mrb[27].mxu0 }
 0xb82   : > { %v5308_v14 = vadd.f32 %v5306_v13, %v5301_v11 }
 0xb84   : > { %v14496_v15 = vmax.f32 %v5308_v14, 0.0 }
 0xb86   : > { %5311 = vrot.lane.b32.xlu0 %v14496_v15, %s15288_s7 }
 0xbf8   : > { %v5312_v18 = vpop.permute.xlu0 %5311 }
 0xbf9   : > { %5314 = vst.msk [vmem:[#allocation2] sm:$0xf] %vm4481_vm13, %v5312_v18 }
 0xc00   : > { %v5315_v25 = vld [vmem:[#allocation2] sm:$0xf] }
 0xc01   : > { %5317 = vrot.lane.b32.xlu0 %v5315_v25, %s15269_s1  ;;  %5321 = vrot.lane.b32.xlu1 %v5315_v25, %s15289_s17 }
 0xc73   : > { %v5322_v27 = vpop.permute.xlu1 %5321  ;;  %v5318_v34 = vpop.permute.xlu0 %5317 }
 0xc74   : > { %v5324_v30 = vmax.f32 %v5315_v25, %v5322_v27  ;;  %v5320_v35 = vmax.f32 %v14496_v15, %v5318_v34 }
 0xc76   : > { %5326 = vrot.lane.b32.xlu1 %v5324_v30, %s13518_s0  ;;  %s15205_s0 = smov 35  }
 0xc7a   : > { %5437 = vrot.lane.b32.xlu1 %v14517_v31, %s15202_s23  ;;  %s15204_s23 = smov 27  }
 0xc7e   : > { %5606 = vrot.lane.b32.xlu1 %v14521_v33, %s15200_s22  ;;  %s15203_s22 = smov 37  }
 0xc82   : > { %5790 = vrot.lane.b32.xlu1 %v11834_v42, %s15288_s7 }
 0xc86   : > { %5974 = vrot.lane.b32.xlu1 %v11842_v43, %s15205_s0  ;;  %s15209_s0 = smov 100  }
 0xc8a   : > { %6158 = vrot.lane.b32.xlu1 %v11850_v44, %s15203_s22  ;;  %s15207_s22 = smov 36  }
 0xce8   : > { %v5327_v32 = vpop.permute.xlu1 %5326 }
 0xce9   : > { %v5329_v38 = vmax.f32 %v5320_v35, %v5327_v32 }
 0xceb   : > { %12418 = vmatmul.mubr.msk.f32.vlgmr.msra.gmra.mrb[14].mxu1 %vm5338_vm4, %v5329_v38 }
 0xcec   : > { %12442 = vmatprep.mubr.msk.f32.mxu1 %vm13514_vm12, %v13487_v1  ;;  %v5438_v53 = vpop.permute.xlu1 %5437 }
 0xcf0   : > { %v5607_v55 = vpop.permute.xlu1 %5606 }
 0xcf4   : > { %v5791_v59 = vpop.permute.xlu1 %5790 }
 0xcf8   : > { %v5975_v40 = vpop.permute.xlu1 %5974 }
 0xcfc   : > { %v6159_v3 = vpop.permute.xlu1 %6158 }
 0xdbe   : > { %v5408_v49 = vpop.f32.mrb[14].mxu1 }
 0xdbf   : > { %5413 = vrot.lane.b32.xlu0 %v5408_v49, %s15288_s7  ;;  %v12419_v50 = vpop.f32.mrb[15].mxu1 }
 0xdc3   : > { %5425 = vrot.lane.b32.xlu0 %v14533_v51, %s15204_s23  ;;  %s15210_s23 = smov 101  }
 0xdc7   : > { %5698 = vrot.lane.b32.xlu0 %v14537_v39, %s15280_s26 }
 0xdcb   : > { %5882 = vrot.lane.b32.xlu0 %v14541_v52, %s15281_s28 }
 0xdcf   : > { %6066 = vrot.lane.b32.xlu0 %v14545_v45, %s15207_s22  ;;  %s15290_s22 = sld [smem:[#allocation20_spill]] }
 0xdd5   : > { %v6243_v4 = vld [vmem:[%s15290_s22] sm:$0x3]  ;;  %s15298_s22 = smov 101  }
 0xe31   : > { %v5414_v54 = vpop.permute.xlu0 %5413 }
 0xe32   : > { %5417 = vst.msk [vmem:[#allocation2] sm:$0xf] %vm5416_vm5, %v5414_v54 }
 0xe35   : > { %v5426_v36 = vpop.permute.xlu0 %5425 }
 0xe39   : > { %v5418_v56 = vld [vmem:[#allocation2] sm:$0xf]  ;;  %v5699_v57 = vpop.permute.xlu0 %5698 }
 0xe3a   : > { %v5428_v6 = vmul.f32 %v5426_v36, %v5418_v56  ;;  %v5440_v58 = vmul.f32 %v5438_v53, %v5418_v56  ;;  %v5701_v5 = vmul.f32 %v5699_v57, %v5418_v56  ;;  %v5609_v37 = vmul.f32 %v5607_v55, %v5418_v56 }
 0xe3b   : > { %v5793_v46 = vmul.f32 %v5791_v59, %v5418_v56  ;;  %v5977_v2 = vmul.f32 %v5975_v40, %v5418_v56  ;;  %v6161_v7 = vmul.f32 %v6159_v3, %v5418_v56 }
 0xe3c   : > { %5522 = vrot.lane.b32.xlu1 %v5428_v6, %s15210_s23  ;;  %5444 = vrot.lane.b32.xlu0 %v5440_v58, %s15209_s0  ;;  %s15291_s0 = sld [smem:[#allocation19_spill]]  ;;  %s15215_s23 = smov 92  }
 0xe3d   : > { %v5883_v60 = vpop.permute.xlu0 %5882 }
 0xe3e   : > { %v5885_v41 = vmul.f32 %v5883_v60, %v5418_v56 }
 0xe40   : > { %5705 = vrot.lane.b32.xlu1 %v5701_v5, %s15267_s18  ;;  %5613 = vrot.lane.b32.xlu0 %v5609_v37, %s15212_s2  ;;  %s15217_s2 = smov 91  }
 0xe41   : > { %v6067_v63 = vpop.permute.xlu0 %6066 }
 0xe42   : > { %v6069_v0 = vmul.f32 %v6067_v63, %v5418_v56  ;;  %v11821_v8 = vld [vmem:[%s15291_s0 + $0x2] sm:$0x3]  ;;  %v5429_v11 = vld [vmem:[%s15291_s0] sm:$0x3]  ;;  %v11827_v14 = vld [vmem:[%s15291_s0 + $0x4] sm:$0x3] }
 0xe43   : > { %v11835_v16 = vld [vmem:[%s15291_s0 + $0x8] sm:$0x3]  ;;  %v11831_v47 = vld [vmem:[%s15291_s0 + $0x6] sm:$0x3]  ;;  %v11843_v18 = vld [vmem:[%s15291_s0 + $0xc] sm:$0x3] }
 0xe44   : > { %5889 = vrot.lane.b32.xlu1 %v5885_v41, %s15269_s1  ;;  %5797 = vrot.lane.b32.xlu0 %v5793_v46, %s15268_s11  ;;  %v11839_v19 = vld [vmem:[%s15291_s0 + $0xa] sm:$0x3]  ;;  %v11851_v21 = vld [vmem:[%s15291_s0 + $0x10] sm:$0x3] }
 0xe45   : > { %v11847_v23 = vld [vmem:[%s15291_s0 + $0xe] sm:$0x3]  ;;  %s15305_s0 = smov 91  }
 0xe48   : > { %6073 = vrot.lane.b32.xlu1 %v6069_v0, %s15215_s23  ;;  %5981 = vrot.lane.b32.xlu0 %v5977_v2, %s15218_s3  ;;  %s15295_s23 = smov 37   ;;  %s15302_s3 = sld [smem:[#allocation21_spill]] }
 0xe4c   : > { %6246 = vperm.xlu1 %13261, %v6243_v4   ;;  %6165 = vrot.lane.b32.xlu0 %v6161_v7, %s15217_s2  ;;  %s15300_s2 = sld [smem:[#allocation22_spill]] }
 0xe50   : > { %6275 = vrot.lane.b32.xlu1 %v14517_v31, %s15292_s4  ;;  %s15296_s4 = smov 27  }
 0xe54   : > { %6445 = vrot.lane.b32.xlu1 %v14521_v33, %s15293_s5 }
 0xe58   : > { %6627 = vrot.lane.b32.xlu1 %v11834_v42, %s15288_s7 }
 0xe5c   : > { %6809 = vrot.lane.b32.xlu1 %v11842_v43, %s15294_s8 }
 0xe60   : > { %6991 = vrot.lane.b32.xlu1 %v11850_v44, %s15295_s23  ;;  %s15297_s23 = smov 36  }
 0xeae   : > { %v5445_v9 = vpop.permute.xlu0 %5444  ;;  %v5523_v10 = vpop.permute.xlu1 %5522 }
 0xeaf   : > { %12421 = vmatpush3.msk.msra.mxu0 %vm4514_vm14, %v5445_v9 }
 0xeb0   : > { %12423 = vmatmul.mubr.msk.f32.vlgmr.msra.gmra.mrb[28].mxu0 %vm4510_vm15, %v11821_v8  ;;  %12425 = vmatprep.subr.mxu0 %v13487_v1 }
 0xeb1   : > { %12426 = vmatpush3.msk.msra.mxu0 %vm4514_vm14, %v5523_v10  ;;  %12427 = vmatprep.mubr.msk.f32.mxu0 %vm13514_vm12, %v13487_v1 }
 0xeb2   : > { %v5614_v12 = vpop.permute.xlu0 %5613  ;;  %12430 = vmatprep.subr.mxu0 %v13487_v1  ;;  %v5706_v13 = vpop.permute.xlu1 %5705 }
 0xeb4   : > { %12428 = vmatmul.mubr.msk.f32.vlgmr.msra.gmra.mrb[30].mxu0 %vm4510_vm15, %v5429_v11 }
 0xeb5   : > { %12431 = vmatpush3.msk.msra.mxu0 %vm4514_vm14, %v5614_v12  ;;  %12432 = vmatprep.mubr.msk.f32.mxu0 %vm13514_vm12, %v13487_v1 }
 0xeb6   : > { %v5798_v61 = vpop.permute.xlu0 %5797  ;;  %12435 = vmatprep.subr.mxu0 %v13487_v1  ;;  %v5890_v48 = vpop.permute.xlu1 %5889 }
 0xeb7   : > { %12441 = vmatpush3.msk.msra.mxu1 %vm4514_vm14, %v5798_v61  ;;  %v7076_v61 = vld [vmem:[%s15300_s2] sm:$0x3]  ;;  %s13534_s2 = smov 30  }
 0xeb8   : > { %12433 = vmatmul.mubr.msk.f32.vlgmr.msra.gmra.mrb[32].mxu0 %vm4510_vm15, %v11827_v14  ;;  %12450 = vmatprep.subr.mxu1 %v13487_v1 }
 0xeb9   : > { %12436 = vmatpush3.msk.msra.mxu0 %vm4514_vm14, %v5706_v13  ;;  %12437 = vmatprep.mubr.msk.f32.mxu0 %vm13514_vm12, %v13487_v1 }
 0xeba   : > { %v5982_v17 = vpop.permute.xlu0 %5981  ;;  %12443 = vmatmul.mubr.msk.f32.vlgmr.msra.gmra.mrb[16].mxu1 %vm4510_vm15, %v11835_v16  ;;  %12445 = vmatprep.subr.mxu0 %v13487_v1  ;;  %v6074_v22 = vpop.permute.xlu1 %6073 }
 0xebb   : > { %12451 = vmatpush3.msk.msra.mxu1 %vm4514_vm14, %v5982_v17  ;;  %12452 = vmatprep.mubr.msk.f32.mxu1 %vm13514_vm12, %v13487_v1  ;;  %v11856_v17 = vld [vmem:[%s15302_s3 + $0x2] sm:$0x3] }
 0xebc   : > { %12438 = vmatmul.mubr.msk.f32.vlgmr.msra.gmra.mrb[34].mxu0 %vm4510_vm15, %v11831_v47  ;;  %12460 = vmatprep.subr.mxu1 %v13487_v1  ;;  %v6268_v47 = vld [vmem:[%s15302_s3] sm:$0x3] }
 0xebd   : > { %12446 = vmatpush3.msk.msra.mxu0 %vm4514_vm14, %v5890_v48  ;;  %12447 = vmatprep.mubr.msk.f32.mxu0 %vm13514_vm12, %v13487_v1 }
 0xebe   : > { %v6166_v20 = vpop.permute.xlu0 %6165  ;;  %12453 = vmatmul.mubr.msk.f32.vlgmr.msra.gmra.mrb[18].mxu1 %vm4510_vm15, %v11843_v18  ;;  %12455 = vmatprep.subr.mxu0 %v13487_v1 }
 0xebf   : > { %12461 = vmatpush3.msk.msra.mxu1 %vm4514_vm14, %v6166_v20  ;;  %12462 = vmatprep.mubr.msk.f32.mxu1 %vm13514_vm12, %v13487_v1 }
 0xec0   : > { %12448 = vmatmul.mubr.msk.f32.vlgmr.msra.gmra.mrb[36].mxu0 %vm4510_vm15, %v11839_v19  ;;  %12470 = vmatprep.subr.mxu1 %v13487_v1  ;;  %v11866_v19 = vld [vmem:[%s15302_s3 + $0x6] sm:$0x3] }
 0xec1   : > { %12456 = vmatpush3.msk.msra.mxu0 %vm4514_vm14, %v6074_v22  ;;  %12457 = vmatprep.mubr.msk.f32.mxu0 %vm13514_vm12, %v13487_v1 }
 0xec2   : > { %12463 = vmatmul.mubr.msk.f32.vlgmr.msra.gmra.mrb[20].mxu1 %vm4510_vm15, %v11851_v21  ;;  %12465 = vmatprep.subr.mxu0 %v13487_v1  ;;  %v11862_v21 = vld [vmem:[%s15302_s3 + $0x4] sm:$0x3] }
 0xec3   : > { %12472 = vmatprep.mubr.msk.f32.mxu1 %vm13514_vm12, %v13487_v1 }
 0xec4   : > { %12458 = vmatmul.mubr.msk.f32.vlgmr.msra.gmra.mrb[38].mxu0 %vm4510_vm15, %v11847_v23  ;;  %v11874_v23 = vld [vmem:[%s15302_s3 + $0xa] sm:$0x3] }
 0xec5   : > { %12467 = vmatprep.mubr.msk.f32.mxu0 %vm13514_vm12, %v13487_v1 }
 0xecb   : > { %v6247_v5 = vpop.permute.xlu1 %6246 }
 0xecf   : > { %v6276_v41 = vpop.permute.xlu1 %6275 }
 0xed3   : > { %v6446_v0 = vpop.permute.xlu1 %6445 }
 0xed7   : > { %v6628_v7 = vpop.permute.xlu1 %6627 }
 0xedb   : > { %v6810_v8 = vpop.permute.xlu1 %6809 }
 0xedf   : > { %v6992_v14 = vpop.permute.xlu1 %6991 }
 0xf83   : > { %v5517_v24 = vpop.f32.mrb[28].mxu0 }
 0xf84   : > { %v12424_v25 = vpop.f32.mrb[29].mxu0 }
 0xf85   : > { %v11870_v25 = vld [vmem:[%s15302_s3 + $0x8] sm:$0x3] }
 0xf87   : > { %v5595_v26 = vpop.f32.mrb[30].mxu0 }
 0xf88   : > { %v5596_v27 = vadd.f32 %v5595_v26, %v5517_v24  ;;  %v12429_v30 = vpop.f32.mrb[31].mxu0 }
 0xf8b   : > { %v5686_v31 = vpop.f32.mrb[32].mxu0 }
 0xf8c   : > { %v5690_v33 = vadd.f32 %v5686_v31, %v5596_v27  ;;  %v12434_v34 = vpop.f32.mrb[33].mxu0  ;;  %v11882_v27 = vld [vmem:[%s15302_s3 + $0xe] sm:$0x3]  ;;  %v11878_v31 = vld [vmem:[%s15302_s3 + $0xc] sm:$0x3] }
 0xf8d   : > { %v5870_v35 = vpop.f32.mrb[16].mxu1  ;;  %v11886_v34 = vld [vmem:[%s15302_s3 + $0x10] sm:$0x3] }
 0xf8e   : > { %v12444_v32 = vpop.f32.mrb[17].mxu1 }
 0xf8f   : > { %v5778_v38 = vpop.f32.mrb[34].mxu0 }
 0xf90   : > { %v5782_v42 = vadd.f32 %v5778_v38, %v5690_v33  ;;  %v12439_v43 = vpop.f32.mrb[35].mxu0 }
 0xf91   : > { %v6054_v44 = vpop.f32.mrb[18].mxu1 }
 0xf92   : > { %v5874_v49 = vadd.f32 %v5870_v35, %v5782_v42  ;;  %v12454_v50 = vpop.f32.mrb[19].mxu1 }
 0xf93   : > { %v5962_v53 = vpop.f32.mrb[36].mxu0 }
 0xf94   : > { %v5966_v54 = vadd.f32 %v5962_v53, %v5874_v49  ;;  %v12449_v36 = vpop.f32.mrb[37].mxu0 }
 0xf95   : > { %v6238_v55 = vpop.f32.mrb[20].mxu1 }
 0xf96   : > { %v6058_v56 = vadd.f32 %v6054_v44, %v5966_v54  ;;  %v12464_v57 = vpop.f32.mrb[21].mxu1 }
 0xf97   : > { %v6146_v6 = vpop.f32.mrb[38].mxu0 }
 0xf98   : > { %v6150_v58 = vadd.f32 %v6146_v6, %v6058_v56  ;;  %v12459_v59 = vpop.f32.mrb[39].mxu0 }
 0xf9a   : > { %v6242_v60 = vadd.f32 %v6238_v55, %v6150_v58 }
 0xf9c   : > { %v6249_v37 = vadd.f32 %v6247_v5, %v6242_v60 }
 0xf9e   : > { %v6250_v40 = vmax.f32 %v6249_v37, 0.0 }
 0xfa0   : > { %6252 = vrot.lane.b32.xlu0 %v6250_v40, %s15288_s7 }
 0xfa4   : > { %6264 = vrot.lane.b32.xlu0 %v14533_v51, %s15296_s4  ;;  %s15299_s4 = smov 100  }
 0xfa8   : > { %6536 = vrot.lane.b32.xlu0 %v14537_v39, %s15280_s26 }
 0xfac   : > { %6718 = vrot.lane.b32.xlu0 %v14541_v52, %s15281_s28 }
 0xfb0   : > { %6900 = vrot.lane.b32.xlu0 %v14545_v45, %s15297_s23  ;;  %s15301_s23 = smov 99  }
0x1012   : > { %v6253_v46 = vpop.permute.xlu0 %6252 }
0x1013   : > { %6256 = vst.msk [vmem:[#allocation2] sm:$0x3] %vm6255_vm6, %v6253_v46 }
0x1016   : > { %v6265_v63 = vpop.permute.xlu0 %6264 }
0x101a   : > { %v6257_v2 = vld [vmem:[#allocation2] sm:$0x3]  ;;  %v6537_v3 = vpop.permute.xlu0 %6536 }
0x101b   : > { %v6267_v4 = vmul.f32 %v6265_v63, %v6257_v2  ;;  %v6278_v51 = vmul.f32 %v6276_v41, %v6257_v2  ;;  %v6539_v52 = vmul.f32 %v6537_v3, %v6257_v2  ;;  %v6448_v45 = vmul.f32 %v6446_v0, %v6257_v2 }
0x101c   : > { %v6630_v10 = vmul.f32 %v6628_v7, %v6257_v2  ;;  %v6812_v13 = vmul.f32 %v6810_v8, %v6257_v2  ;;  %v6994_v16 = vmul.f32 %v6992_v14, %v6257_v2 }
0x101d   : > { %6362 = vrot.lane.b32.xlu1 %v6267_v4, %s15298_s22  ;;  %6282 = vrot.lane.b32.xlu0 %v6278_v51, %s15299_s4  ;;  %s15303_s22 = smov 92   ;;  %s15304_s4 = smov 93  }
0x101e   : > { %v6719_v39 = vpop.permute.xlu0 %6718 }
0x101f   : > { %v6721_v9 = vmul.f32 %v6719_v39, %v6257_v2  ;;  %v7104_v39 = vld [vmem:[#allocation10] sm:$0xff] }
0x1021   : > { %6543 = vrot.lane.b32.xlu1 %v6539_v52, %s15267_s18  ;;  %6452 = vrot.lane.b32.xlu0 %v6448_v45, %s15301_s23  ;;  %v7105_v52 = vld [vmem:[#allocation10 + $0x8] sm:$0xff] }
0x1022   : > { %v6901_v11 = vpop.permute.xlu0 %6900  ;;  %v12836_v45 = vpack.c.bf16 %v7105_v52, %v7104_v39 }
0x1023   : > { %v6903_v12 = vmul.f32 %v6901_v11, %v6257_v2 }
0x1025   : > { %6725 = vrot.lane.b32.xlu1 %v6721_v9, %s15269_s1  ;;  %6634 = vrot.lane.b32.xlu0 %v6630_v10, %s15268_s11 }
0x1029   : > { %6907 = vrot.lane.b32.xlu1 %v6903_v12, %s15303_s22  ;;  %6816 = vrot.lane.b32.xlu0 %v6812_v13, %s15304_s4  ;;  %v14703_v12 = vld [vmem:[#allocation7 + $0x1] ss:$0 sm:$0xff]  ;;  %v11897_v13 = vld [vmem:[#allocation7 + $0x2] ss:$0 sm:$0xff] }
0x102d   : > { %7079 = vperm.xlu1 %13261, %v7076_v61   ;;  %6998 = vrot.lane.b32.xlu0 %v6994_v16, %s15305_s0  ;;  %s15222_s0 = smov 98  }
0x108f   : > { %v6363_v48 = vpop.permute.xlu1 %6362  ;;  %v6283_v18 = vpop.permute.xlu0 %6282 }
0x1090   : > { %12471 = vmatpush3.msk.msra.mxu1 %vm6288_vm7, %v6363_v48  ;;  %12466 = vmatpush3.msk.msra.mxu0 %vm6288_vm7, %v6283_v18  ;;  %v11905_v48 = vld [vmem:[#allocation7 + $0x4] ss:$0 sm:$0xff]  ;;  %v11921_v18 = vld [vmem:[#allocation7 + $0x8] ss:$0 sm:$0xff] }
0x1091   : > { %12473 = vmatmul.mubr.msk.f32.vlgmr.msra.gmra.mrb[22].mxu1 %vm6284_vm8, %v6268_v47  ;;  %12468 = vmatmul.mubr.msk.f32.vlgmr.msra.gmra.mrb[40].mxu0 %vm6284_vm8, %v11856_v17  ;;  %v11913_v17 = vld [vmem:[#allocation7 + $0x6] ss:$0 sm:$0xff] }
0x1092   : > { %12475 = vmatprep.subr.mxu0 %v13487_v1  ;;  %12480 = vmatprep.subr.mxu1 %v13487_v1 }
0x1093   : > { %v6544_v20 = vpop.permute.xlu1 %6543  ;;  %12477 = vmatprep.mubr.msk.f32.mxu0 %vm13514_vm12, %v13487_v1  ;;  %v6453_v22 = vpop.permute.xlu0 %6452  ;;  %12482 = vmatprep.mubr.msk.f32.mxu1 %vm13514_vm12, %v13487_v1 }
0x1094   : > { %12481 = vmatpush3.msk.msra.mxu1 %vm6288_vm7, %v6544_v20  ;;  %12476 = vmatpush3.msk.msra.mxu0 %vm6288_vm7, %v6453_v22  ;;  %v14720_v22 = vld [vmem:[#allocation7 + $0x3] ss:$0 sm:$0xff] }
0x1095   : > { %12483 = vmatmul.mubr.msk.f32.vlgmr.msra.gmra.mrb[24].mxu1 %vm6284_vm8, %v11866_v19  ;;  %12478 = vmatmul.mubr.msk.f32.vlgmr.msra.gmra.mrb[42].mxu0 %vm6284_vm8, %v11862_v21  ;;  %v14716_v21 = vld [vmem:[#allocation7] ss:$0 sm:$0xff] }
0x1096   : > { %12485 = vmatprep.subr.mxu0 %v13487_v1  ;;  %12490 = vmatprep.subr.mxu1 %v13487_v1 }
0x1097   : > { %v6726_v24 = vpop.permute.xlu1 %6725  ;;  %12487 = vmatprep.mubr.msk.f32.mxu0 %vm13514_vm12, %v13487_v1  ;;  %v6635_v26 = vpop.permute.xlu0 %6634  ;;  %12492 = vmatprep.mubr.msk.f32.mxu1 %vm13514_vm12, %v13487_v1 }
0x1098   : > { %12491 = vmatpush3.msk.msra.mxu1 %vm6288_vm7, %v6726_v24  ;;  %12486 = vmatpush3.msk.msra.mxu0 %vm6288_vm7, %v6635_v26  ;;  %v14728_v24 = vld [vmem:[#allocation7 + $0x7] ss:$0 sm:$0xff] }
0x1099   : > { %12493 = vmatmul.mubr.msk.f32.vlgmr.msra.gmra.mrb[26].mxu1 %vm6284_vm8, %v11874_v23  ;;  %12488 = vmatmul.mubr.msk.f32.vlgmr.msra.gmra.mrb[44].mxu0 %vm6284_vm8, %v11870_v25  ;;  %v14724_v23 = vld [vmem:[#allocation7 + $0x5] ss:$0 sm:$0xff] }
0x109a   : > { %12495 = vmatprep.subr.mxu0 %v13487_v1  ;;  %12500 = vmatprep.subr.mxu1 %v13487_v1 }
0x109b   : > { %v6908_v30 = vpop.permute.xlu1 %6907  ;;  %12497 = vmatprep.mubr.msk.f32.mxu0 %vm13514_vm12, %v13487_v1  ;;  %v6817_v33 = vpop.permute.xlu0 %6816  ;;  %12502 = vmatprep.mubr.msk.f32.mxu1 %vm13514_vm12, %v13487_v1 }
0x109c   : > { %12501 = vmatpush3.msk.msra.mxu1 %vm6288_vm7, %v6908_v30  ;;  %12496 = vmatpush3.msk.msra.mxu0 %vm6288_vm7, %v6817_v33 }
0x109d   : > { %12503 = vmatmul.mubr.msk.f32.vlgmr.msra.gmra.mrb[28].mxu1 %vm6284_vm8, %v11882_v27  ;;  %12498 = vmatmul.mubr.msk.f32.vlgmr.msra.gmra.mrb[46].mxu0 %vm6284_vm8, %v11878_v31 }
0x109e   : > { %12505 = vmatprep.subr.mxu0 %v13487_v1  ;;  %12507 = vmatprep.mubr.msk.f32.mxu0 %vm13514_vm12, %v13487_v1 }
0x109f   : > { %12835 = vmatprep.subr.bf16.mxu1 %v13521_v62  ;;  %v6999_v35 = vpop.permute.xlu0 %6998  ;;  %12514 = vmatprep.mubr.msk.f32.mxu1 %vm13514_vm12, %v13487_v1 }
0x10a0   : > { %12506 = vmatpush3.msk.msra.mxu0 %vm6288_vm7, %v6999_v35  ;;  %12837 = vmatpush3.bf16.msra.mxu1 %v12836_v45 }
0x10a1   : > { %12508 = vmatmul.mubr.msk.f32.vlgmr.msra.gmra.mrb[48].mxu0 %vm6284_vm8, %v11886_v34  ;;  %12517 = vmatprep.subr.mxu0 %v13487_v1 }
0x10a2   : > { %12519 = vmatprep.mubr.msk.f32.mxu0 %vm13514_vm12, %v13487_v1  ;;  %12522 = vmatprep.subr.mxu1 %v13487_v1 }
0x10ac   : > { %v7080_v4 = vpop.permute.xlu1 %7079 }
0x1164   : > { %v6435_v32 = vpop.f32.mrb[22].mxu1  ;;  %v6357_v38 = vpop.f32.mrb[40].mxu0 }
0x1165   : > { %v12474_v42 = vpop.f32.mrb[23].mxu1  ;;  %v6436_v43 = vadd.f32 %v6435_v32, %v6357_v38  ;;  %v12469_v44 = vpop.f32.mrb[41].mxu0 }
0x1168   : > { %v6616_v49 = vpop.f32.mrb[24].mxu1  ;;  %v6525_v50 = vpop.f32.mrb[42].mxu0 }
0x1169   : > { %v12484_v53 = vpop.f32.mrb[25].mxu1  ;;  %v6529_v54 = vadd.f32 %v6525_v50, %v6436_v43  ;;  %v12479_v36 = vpop.f32.mrb[43].mxu0 }
0x116b   : > { %v6620_v55 = vadd.f32 %v6616_v49, %v6529_v54 }
0x116c   : > { %v6798_v56 = vpop.f32.mrb[26].mxu1  ;;  %v6707_v57 = vpop.f32.mrb[44].mxu0 }
0x116d   : > { %v12494_v6 = vpop.f32.mrb[27].mxu1  ;;  %v6711_v58 = vadd.f32 %v6707_v57, %v6620_v55  ;;  %v12489_v59 = vpop.f32.mrb[45].mxu0 }
0x116f   : > { %v6802_v60 = vadd.f32 %v6798_v56, %v6711_v58 }
0x1170   : > { %v6980_v5 = vpop.f32.mrb[28].mxu1  ;;  %v6889_v37 = vpop.f32.mrb[46].mxu0 }
0x1171   : > { %v12504_v40 = vpop.f32.mrb[29].mxu1  ;;  %v6893_v41 = vadd.f32 %v6889_v37, %v6802_v60  ;;  %v12499_v46 = vpop.f32.mrb[47].mxu0 }
0x1173   : > { %v6984_v63 = vadd.f32 %v6980_v5, %v6893_v41 }
0x1174   : > { %v7071_v0 = vpop.f32.mrb[48].mxu0 }
0x1175   : > { %v7075_v2 = vadd.f32 %v7071_v0, %v6984_v63  ;;  %v12509_v3 = vpop.f32.mrb[49].mxu0 }
0x1177   : > { %v7082_v51 = vadd.f32 %v7080_v4, %v7075_v2 }
0x1179   : > { %v14694_v7 = vmax.f32 %v7082_v51, 0.0 }
0x117b   : > { %7085 = vrot.lane.b32.xlu0 %v14694_v7, %s15288_s7 }
0x11ed   : > { %v7086_v8 = vpop.permute.xlu0 %7085 }
0x11ee   : > { %7088 = vst.msk [vmem:[#allocation2] sm:$0x3] %vm6255_vm6, %v7086_v8 }
0x11f5   : > { %v7089_v9 = vld [vmem:[#allocation2] sm:$0x3] }
0x11f6   : > { %7091 = vrot.lane.b32.xlu0 %v7089_v9, %s15269_s1  ;;  %7095 = vrot.lane.b32.xlu1 %v7089_v9, %s15289_s17  ;;  %s15221_s17 = smov 34  }
0x1268   : > { %v7096_v10 = vpop.permute.xlu1 %7095  ;;  %v7092_v14 = vpop.permute.xlu0 %7091 }
0x1269   : > { %v7098_v11 = vmax.f32 %v7089_v9, %v7096_v10  ;;  %v7094_v61 = vmax.f32 %v14694_v7, %v7092_v14 }
0x126b   : > { %7100 = vrot.lane.b32.xlu1 %v7098_v11, %s15303_s22  ;;  %s15306_s22 = sld [smem:[#allocation24_spill]] }
0x126f   : > { %7204 = vrot.lane.b32.xlu1 %v14703_v12, %s13534_s2 }
0x1271   : > { %v8010_v56 = vld [vmem:[%s15306_s22] sm:$0x3]  ;;  %s15320_s22 = sld [smem:[#allocation37_spill]] }
0x1273   : > { %7373 = vrot.lane.b32.xlu1 %v11897_v13, %s15280_s26 }
0x1277   : > { %7557 = vrot.lane.b32.xlu1 %v11905_v48, %s15288_s7 }
0x127b   : > { %7741 = vrot.lane.b32.xlu1 %v11913_v17, %s15281_s28 }
0x127f   : > { %7925 = vrot.lane.b32.xlu1 %v11921_v18, %s15294_s8 }
0x12dd   : > { %v7101_v16 = vpop.permute.xlu1 %7100 }
0x12de   : > { %v7103_v47 = vmax.f32 %v7094_v61, %v7101_v16 }
0x12e0   : > { %12515 = vmatmul.mubr.msk.f32.vlgmr.msra.gmra.mrb[30].mxu1 %vm1313_vm2, %v7103_v47 }
0x12e1   : > { %12524 = vmatprep.mubr.msk.f32.mxu1 %vm13514_vm12, %v13487_v1  ;;  %v7205_v25 = vpop.permute.xlu1 %7204 }
0x12e5   : > { %v7374_v30 = vpop.permute.xlu1 %7373 }
0x12e9   : > { %v7558_v32 = vpop.permute.xlu1 %7557 }
0x12ed   : > { %v7742_v44 = vpop.permute.xlu1 %7741 }
0x12f1   : > { %v7926_v55 = vpop.permute.xlu1 %7925 }
0x13b3   : > { %v7175_v19 = vpop.f32.mrb[30].mxu1 }
0x13b4   : > { %7180 = vrot.lane.b32.xlu0 %v7175_v19, %s15288_s7  ;;  %v12516_v20 = vpop.f32.mrb[31].mxu1 }
0x13b8   : > { %7192 = vrot.lane.b32.xlu0 %v14716_v21, %s15293_s5 }
0x13bc   : > { %7465 = vrot.lane.b32.xlu0 %v14720_v22, %s15280_s26 }
0x13c0   : > { %7649 = vrot.lane.b32.xlu0 %v14724_v23, %s15281_s28 }
0x13c4   : > { %7833 = vrot.lane.b32.xlu0 %v14728_v24, %s15221_s17  ;;  %s15307_s17 = sld [smem:[#allocation23_spill]] }
0x13ca   : > { %v7196_v6 = vld [vmem:[%s15307_s17] sm:$0x3]  ;;  %v11892_v59 = vld [vmem:[%s15307_s17 + $0x2] sm:$0x3]  ;;  %v11902_v5 = vld [vmem:[%s15307_s17 + $0x6] sm:$0x3] }
0x13cb   : > { %v11898_v40 = vld [vmem:[%s15307_s17 + $0x4] sm:$0x3]  ;;  %v11910_v46 = vld [vmem:[%s15307_s17 + $0xa] sm:$0x3]  ;;  %v11906_v0 = vld [vmem:[%s15307_s17 + $0x8] sm:$0x3] }
0x13cc   : > { %v11918_v3 = vld [vmem:[%s15307_s17 + $0xe] sm:$0x3]  ;;  %v11914_v51 = vld [vmem:[%s15307_s17 + $0xc] sm:$0x3]  ;;  %v11922_v52 = vld [vmem:[%s15307_s17 + $0x10] sm:$0x3] }
0x1426   : > { %v7181_v26 = vpop.permute.xlu0 %7180 }
0x1427   : > { %7184 = vst.msk [vmem:[#allocation2] sm:$0x3] %vm7183_vm9, %v7181_v26 }
0x142a   : > { %v7193_v27 = vpop.permute.xlu0 %7192 }
0x142e   : > { %v7185_v31 = vld [vmem:[#allocation2] sm:$0x3]  ;;  %v7466_v33 = vpop.permute.xlu0 %7465 }
0x142f   : > { %v7195_v34 = vmul.f32 %v7193_v27, %v7185_v31  ;;  %v7207_v35 = vmul.f32 %v7205_v25, %v7185_v31  ;;  %v7468_v42 = vmul.f32 %v7466_v33, %v7185_v31  ;;  %v7376_v43 = vmul.f32 %v7374_v30, %v7185_v31 }
0x1430   : > { %v7560_v50 = vmul.f32 %v7558_v32, %v7185_v31  ;;  %v7744_v36 = vmul.f32 %v7742_v44, %v7185_v31  ;;  %v7928_v57 = vmul.f32 %v7926_v55, %v7185_v31 }
0x1431   : > { %7289 = vrot.lane.b32.xlu1 %v7195_v34, %s15301_s23  ;;  %7211 = vrot.lane.b32.xlu0 %v7207_v35, %s15222_s0  ;;  %s13537_s0 = smov 94  }
0x1432   : > { %v7650_v38 = vpop.permute.xlu0 %7649 }
0x1433   : > { %v7652_v49 = vmul.f32 %v7650_v38, %v7185_v31 }
0x1435   : > { %7472 = vrot.lane.b32.xlu1 %v7468_v42, %s15267_s18  ;;  %7380 = vrot.lane.b32.xlu0 %v7376_v43, %s15267_s18 }
0x1436   : > { %v7834_v53 = vpop.permute.xlu0 %7833 }
0x1437   : > { %v7836_v54 = vmul.f32 %v7834_v53, %v7185_v31 }
0x1439   : > { %7656 = vrot.lane.b32.xlu1 %v7652_v49, %s15269_s1  ;;  %7564 = vrot.lane.b32.xlu0 %v7560_v50, %s15268_s11 }
0x143d   : > { %7840 = vrot.lane.b32.xlu1 %v7836_v54, %s13537_s0  ;;  %7748 = vrot.lane.b32.xlu0 %v7744_v36, %s15269_s1 }
0x1441   : > { %8013 = vperm.xlu1 %13261, %v8010_v56   ;;  %7932 = vrot.lane.b32.xlu0 %v7928_v57, %s15304_s4 }
0x1445   : > { %8041 = vrot.lane.b32.xlu1 %v14703_v12, %s13534_s2  ;;  %s15318_s2 = sld [smem:[#allocation35_spill]] }
0x1449   : > { %8209 = vrot.lane.b32.xlu1 %v11897_v13, %s15280_s26 }
0x144d   : > { %8391 = vrot.lane.b32.xlu1 %v11905_v48, %s15288_s7 }
0x1451   : > { %8573 = vrot.lane.b32.xlu1 %v11913_v17, %s15281_s28 }
0x1455   : > { %8755 = vrot.lane.b32.xlu1 %v11921_v18, %s15294_s8  ;;  %s15308_s8 = smov 34  }
0x14a3   : > { %v7290_v58 = vpop.permute.xlu1 %7289  ;;  %v7212_v60 = vpop.permute.xlu0 %7211 }
0x14a4   : > { %12523 = vmatpush3.msk.msra.mxu1 %vm6288_vm7, %v7290_v58  ;;  %12518 = vmatpush3.msk.msra.mxu0 %vm6288_vm7, %v7212_v60 }
0x14a5   : > { %12525 = vmatmul.mubr.msk.f32.vlgmr.msra.gmra.mrb[32].mxu1 %vm6284_vm8, %v7196_v6  ;;  %12520 = vmatmul.mubr.msk.f32.vlgmr.msra.gmra.mrb[50].mxu0 %vm6284_vm8, %v11892_v59 }
0x14a6   : > { %12527 = vmatprep.subr.mxu0 %v13487_v1  ;;  %12532 = vmatprep.subr.mxu1 %v13487_v1 }
0x14a7   : > { %v7473_v37 = vpop.permute.xlu1 %7472  ;;  %12529 = vmatprep.mubr.msk.f32.mxu0 %vm13514_vm12, %v13487_v1  ;;  %v7381_v41 = vpop.permute.xlu0 %7380  ;;  %12534 = vmatprep.mubr.msk.f32.mxu1 %vm13514_vm12, %v13487_v1 }
0x14a8   : > { %12533 = vmatpush3.msk.msra.mxu1 %vm6288_vm7, %v7473_v37  ;;  %12528 = vmatpush3.msk.msra.mxu0 %vm6288_vm7, %v7381_v41 }
0x14a9   : > { %12535 = vmatmul.mubr.msk.f32.vlgmr.msra.gmra.mrb[34].mxu1 %vm6284_vm8, %v11902_v5  ;;  %12530 = vmatmul.mubr.msk.f32.vlgmr.msra.gmra.mrb[52].mxu0 %vm6284_vm8, %v11898_v40 }
0x14aa   : > { %12537 = vmatprep.subr.mxu0 %v13487_v1  ;;  %12542 = vmatprep.subr.mxu1 %v13487_v1 }
0x14ab   : > { %v7657_v63 = vpop.permute.xlu1 %7656  ;;  %12539 = vmatprep.mubr.msk.f32.mxu0 %vm13514_vm12, %v13487_v1  ;;  %v7565_v2 = vpop.permute.xlu0 %7564  ;;  %12544 = vmatprep.mubr.msk.f32.mxu1 %vm13514_vm12, %v13487_v1 }
0x14ac   : > { %12543 = vmatpush3.msk.msra.mxu1 %vm6288_vm7, %v7657_v63  ;;  %12538 = vmatpush3.msk.msra.mxu0 %vm6288_vm7, %v7565_v2 }
0x14ad   : > { %12545 = vmatmul.mubr.msk.f32.vlgmr.msra.gmra.mrb[36].mxu1 %vm6284_vm8, %v11910_v46  ;;  %12540 = vmatmul.mubr.msk.f32.vlgmr.msra.gmra.mrb[54].mxu0 %vm6284_vm8, %v11906_v0 }
0x14ae   : > { %12547 = vmatprep.subr.mxu0 %v13487_v1  ;;  %12552 = vmatprep.subr.mxu1 %v13487_v1 }
0x14af   : > { %v7841_v4 = vpop.permute.xlu1 %7840  ;;  %12549 = vmatprep.mubr.msk.f32.mxu0 %vm13514_vm12, %v13487_v1  ;;  %v7749_v39 = vpop.permute.xlu0 %7748  ;;  %12554 = vmatprep.mubr.msk.f32.mxu1 %vm13514_vm12, %v13487_v1 }
0x14b0   : > { %12553 = vmatpush3.msk.msra.mxu1 %vm6288_vm7, %v7841_v4  ;;  %12548 = vmatpush3.msk.msra.mxu0 %vm6288_vm7, %v7749_v39 }
0x14b1   : > { %12555 = vmatmul.mubr.msk.f32.vlgmr.msra.gmra.mrb[38].mxu1 %vm6284_vm8, %v11918_v3  ;;  %12550 = vmatmul.mubr.msk.f32.vlgmr.msra.gmra.mrb[56].mxu0 %vm6284_vm8, %v11914_v51  ;;  %v11534_v3 = vld [vmem:[%s13731_s12 + $0x8] sm:$0xff] }
0x14b2   : > { %12557 = vmatprep.subr.mxu0 %v13487_v1  ;;  %12559 = vmatprep.mubr.msk.f32.mxu0 %vm13514_vm12, %v13487_v1 }
0x14b3   : > { %12562 = vmatprep.subr.mxu1 %v13487_v1  ;;  %v7933_v45 = vpop.permute.xlu0 %7932  ;;  %12564 = vmatprep.mubr.msk.f32.mxu1 %vm13514_vm12, %v13487_v1 }
0x14b4   : > { %12558 = vmatpush3.msk.msra.mxu0 %vm6288_vm7, %v7933_v45 }
0x14b5   : > { %12560 = vmatmul.mubr.msk.f32.vlgmr.msra.gmra.mrb[58].mxu0 %vm6284_vm8, %v11922_v52  ;;  %12567 = vmatprep.subr.mxu0 %v13487_v1 }
0x14b6   : > { %12569 = vmatprep.mubr.msk.f32.mxu0 %vm13514_vm12, %v13487_v1 }
0x14c0   : > { %v8014_v43 = vpop.permute.xlu1 %8013 }
0x14c4   : > { %v8042_v50 = vpop.permute.xlu1 %8041 }
0x14c8   : > { %v8210_v36 = vpop.permute.xlu1 %8209 }
0x1578   : > { %v7362_v8 = vpop.f32.mrb[32].mxu1  ;;  %v7284_v9 = vpop.f32.mrb[50].mxu0 }
0x1579   : > { %v12526_v10 = vpop.f32.mrb[33].mxu1  ;;  %v7363_v11 = vadd.f32 %v7362_v8, %v7284_v9  ;;  %v12521_v12 = vpop.f32.mrb[51].mxu0 }
0x157c   : > { %v7545_v13 = vpop.f32.mrb[34].mxu1  ;;  %v7453_v14 = vpop.f32.mrb[52].mxu0 }
0x157d   : > { %v12536_v61 = vpop.f32.mrb[35].mxu1  ;;  %v7457_v16 = vadd.f32 %v7453_v14, %v7363_v11  ;;  %v12531_v47 = vpop.f32.mrb[53].mxu0 }
0x157f   : > { %v7549_v48 = vadd.f32 %v7545_v13, %v7457_v16 }
0x1580   : > { %v7729_v17 = vpop.f32.mrb[36].mxu1  ;;  %v7637_v18 = vpop.f32.mrb[54].mxu0 }
0x1581   : > { %v12546_v19 = vpop.f32.mrb[37].mxu1  ;;  %v7641_v20 = vadd.f32 %v7637_v18, %v7549_v48  ;;  %v12541_v25 = vpop.f32.mrb[55].mxu0 }
0x1583   : > { %v7733_v26 = vadd.f32 %v7729_v17, %v7641_v20 }
0x1584   : > { %v7913_v27 = vpop.f32.mrb[38].mxu1  ;;  %v7821_v30 = vpop.f32.mrb[56].mxu0 }
0x1585   : > { %v12556_v31 = vpop.f32.mrb[39].mxu1  ;;  %v7825_v33 = vadd.f32 %v7821_v30, %v7733_v26  ;;  %v12551_v34 = vpop.f32.mrb[57].mxu0 }
0x1587   : > { %v7917_v35 = vadd.f32 %v7913_v27, %v7825_v33 }
0x1588   : > { %v8005_v32 = vpop.f32.mrb[58].mxu0 }
0x1589   : > { %v8009_v38 = vadd.f32 %v8005_v32, %v7917_v35  ;;  %v12561_v42 = vpop.f32.mrb[59].mxu0 }
0x158b   : > { %v8016_v44 = vadd.f32 %v8014_v43, %v8009_v38 }
0x158d   : > { %v8017_v49 = vmax.f32 %v8016_v44, 0.0 }
0x158f   : > { %8019 = vrot.lane.b32.xlu0 %v8017_v49, %s15288_s7  ;;  %s15312_s7 = sld [smem:[#allocation38_spill]] }
0x1593   : > { %8030 = vrot.lane.b32.xlu0 %v14716_v21, %s15293_s5  ;;  %v8392_v21 = vpop.permute.xlu1 %8391  ;;  %s15309_s5 = smov 98  }
0x1595   : > { %v11355_v2 = vld [vmem:[%s15312_s7] sm:$0xff] }
0x1597   : > { %8300 = vrot.lane.b32.xlu0 %v14720_v22, %s15280_s26  ;;  %s15310_s26 = sld [smem:[#allocation26_spill]] }
0x159b   : > { %8482 = vrot.lane.b32.xlu0 %v14724_v23, %s15281_s28  ;;  %s15311_s28 = sld [smem:[#allocation34_spill]] }
0x159d   : > { %v8840_v46 = vld [vmem:[%s15310_s26] sm:$0x3]  ;;  %s15323_s26 = sshll.u32 %s15325_s16, 5 }
0x159f   : > { %8664 = vrot.lane.b32.xlu0 %v14728_v24, %s15308_s8  ;;  %v8574_v24 = vpop.permute.xlu1 %8573  ;;  %s15321_s8 = sld [smem:[#allocation39_spill]] }
0x15a1   : > { %v10378_v0 = vld [vmem:[%s15311_s28] sm:$0xf]  ;;  %s1227_s28 = scalar_lea.vmem %s13736_s6, %s15323_s26 }
0x15a3   : > { %v8756_v41 = vpop.permute.xlu1 %8755 }
0x1601   : > { %v8020_v53 = vpop.permute.xlu0 %8019 }
0x1602   : > { %8022 = vst.msk [vmem:[#allocation2] sm:$0x3] %vm7183_vm9, %v8020_v53 }
0x1605   : > { %v8031_v54 = vpop.permute.xlu0 %8030 }
0x1609   : > { %v8023_v55 = vld [vmem:[#allocation2] sm:$0x3]  ;;  %v8301_v56 = vpop.permute.xlu0 %8300 }
0x160a   : > { %v8033_v57 = vmul.f32 %v8031_v54, %v8023_v55  ;;  %v8044_v6 = vmul.f32 %v8042_v50, %v8023_v55  ;;  %v8303_v23 = vmul.f32 %v8301_v56, %v8023_v55  ;;  %v8212_v58 = vmul.f32 %v8210_v36, %v8023_v55 }
0x160b   : > { %v8394_v60 = vmul.f32 %v8392_v21, %v8023_v55  ;;  %v8576_v40 = vmul.f32 %v8574_v24, %v8023_v55  ;;  %v8758_v63 = vmul.f32 %v8756_v41, %v8023_v55 }
0x160c   : > { %8126 = vrot.lane.b32.xlu1 %v8033_v57, %s15301_s23  ;;  %8048 = vrot.lane.b32.xlu0 %v8044_v6, %s15309_s5  ;;  %s15313_s23 = sld [smem:[#allocation25_spill]]  ;;  %s15322_s5 = sld [smem:[#allocation36_spill]] }
0x160d   : > { %v8483_v22 = vpop.permute.xlu0 %8482 }
0x160e   : > { %v8485_v59 = vmul.f32 %v8483_v22, %v8023_v55 }
0x1610   : > { %8307 = vrot.lane.b32.xlu1 %v8303_v23, %s15267_s18  ;;  %8216 = vrot.lane.b32.xlu0 %v8212_v58, %s15267_s18  ;;  %s15314_s18 = sld [smem:[#allocation29_spill]] }
0x1611   : > { %v8665_v5 = vpop.permute.xlu0 %8664 }
0x1612   : > { %v8667_v37 = vmul.f32 %v8665_v5, %v8023_v55  ;;  %v8034_v4 = vld [vmem:[%s15313_s23] sm:$0x3]  ;;  %v11927_v39 = vld [vmem:[%s15313_s23 + $0x2] sm:$0x3]  ;;  %v11937_v45 = vld [vmem:[%s15313_s23 + $0x6] sm:$0x3] }
0x1613   : > { %v11933_v9 = vld [vmem:[%s15313_s23 + $0x4] sm:$0x3]  ;;  %v11945_v11 = vld [vmem:[%s15313_s23 + $0xa] sm:$0x3]  ;;  %v11941_v13 = vld [vmem:[%s15313_s23 + $0x8] sm:$0x3] }
0x1614   : > { %8489 = vrot.lane.b32.xlu1 %v8485_v59, %s15269_s1  ;;  %8398 = vrot.lane.b32.xlu0 %v8394_v60, %s15268_s11  ;;  %v11953_v61 = vld [vmem:[%s15313_s23 + $0xe] sm:$0x3]  ;;  %v11949_v47 = vld [vmem:[%s15313_s23 + $0xc] sm:$0x3]  ;;  %s15315_s11 = sld [smem:[#allocation31_spill]] }
0x1615   : > { %v11957_v17 = vld [vmem:[%s15313_s23 + $0x10] sm:$0x3] }
0x1616   : > { %v8848_v59 = vld [vmem:[%s15314_s18] sm:$0x3]  ;;  %v11962_v60 = vld [vmem:[%s15314_s18 + $0x2] sm:$0x3] }
0x1618   : > { %8671 = vrot.lane.b32.xlu1 %v8667_v37, %s13537_s0  ;;  %8580 = vrot.lane.b32.xlu0 %v8576_v40, %s15269_s1  ;;  %s15316_s1 = sld [smem:[#allocation30_spill]]  ;;  %s15319_s0 = sld [smem:[#allocation32_spill]] }
0x161a   : > { %v11965_v5 = vld [vmem:[%s15315_s11 + $0x4] sm:$0xf]  ;;  %v8925_v37 = vld [vmem:[%s15315_s11] sm:$0xf] }
0x161c   : > { %8843 = vperm.xlu1 %13261, %v8840_v46   ;;  %8762 = vrot.lane.b32.xlu0 %v8758_v63, %s15304_s4  ;;  %s15317_s4 = sld [smem:[#allocation33_spill]] }
0x1620   : > { %10381 = vperm.xlu1 %13261, %v10378_v0   ;;  %v11970_v0 = vld [vmem:[%s15314_s18 + $0x4] sm:$0x3] }
0x1624   : > { %11358 = vperm.xlu1 %13261, %v11355_v2   ;;  %v11976_v2 = vld [vmem:[%s15314_s18 + $0x6] sm:$0x3] }
0x1628   : > { %11542 = vperm.xlu1 %13261, %v11534_v3   ;;  %v11973_v3 = vld [vmem:[%s15315_s11 + $0x8] sm:$0xf] }
0x167e   : > { %v8127_v51 = vpop.permute.xlu1 %8126  ;;  %v8049_v52 = vpop.permute.xlu0 %8048 }
0x167f   : > { %12568 = vmatpush3.msk.msra.mxu0 %vm6288_vm7, %v8127_v51  ;;  %12563 = vmatpush3.msk.msra.mxu1 %vm6288_vm7, %v8049_v52  ;;  %v11533_v51 = vld [vmem:[%s13731_s12] sm:$0xff] }
0x1680   : > { %12570 = vmatmul.mubr.msk.f32.vlgmr.msra.gmra.mrb[60].mxu0 %vm6284_vm8, %v8034_v4  ;;  %12565 = vmatmul.mubr.msk.f32.vlgmr.msra.gmra.mrb[40].mxu1 %vm6284_vm8, %v11927_v39  ;;  %v9463_v4 = vld [vmem:[%s15316_s1] sm:$0x3] }
0x1681   : > { %12572 = vmatprep.subr.mxu1 %v13487_v1  ;;  %12577 = vmatprep.subr.mxu0 %v13487_v1 }
0x1682   : > { %v8308_v8 = vpop.permute.xlu1 %8307  ;;  %12574 = vmatprep.mubr.msk.f32.mxu1 %vm13514_vm12, %v13487_v1  ;;  %v8217_v10 = vpop.permute.xlu0 %8216  ;;  %12579 = vmatprep.mubr.msk.f32.mxu0 %vm13514_vm12, %v13487_v1 }
0x1683   : > { %12578 = vmatpush3.msk.msra.mxu0 %vm6288_vm7, %v8308_v8  ;;  %12573 = vmatpush3.msk.msra.mxu1 %vm6288_vm7, %v8217_v10  ;;  %v11979_v10 = vld [vmem:[%s15315_s11 + $0xc] sm:$0xf] }
0x1684   : > { %12580 = vmatmul.mubr.msk.f32.vlgmr.msra.gmra.mrb[62].mxu0 %vm6284_vm8, %v11937_v45  ;;  %12575 = vmatmul.mubr.msk.f32.vlgmr.msra.gmra.mrb[42].mxu1 %vm6284_vm8, %v11933_v9 }
0x1685   : > { %12582 = vmatprep.subr.mxu1 %v13487_v1  ;;  %12587 = vmatprep.subr.mxu0 %v13487_v1 }
0x1686   : > { %v8490_v12 = vpop.permute.xlu1 %8489  ;;  %12584 = vmatprep.mubr.msk.f32.mxu1 %vm13514_vm12, %v13487_v1  ;;  %v8399_v14 = vpop.permute.xlu0 %8398  ;;  %12589 = vmatprep.mubr.msk.f32.mxu0 %vm13514_vm12, %v13487_v1 }
0x1687   : > { %12588 = vmatpush3.msk.msra.mxu0 %vm6288_vm7, %v8490_v12  ;;  %12583 = vmatpush3.msk.msra.mxu1 %vm6288_vm7, %v8399_v14 }
0x1688   : > { %12590 = vmatmul.mubr.msk.f32.vlgmr.msra.gmra.mrb[64].mxu0 %vm6284_vm8, %v11945_v11  ;;  %12585 = vmatmul.mubr.msk.f32.vlgmr.msra.gmra.mrb[44].mxu1 %vm6284_vm8, %v11941_v13 }
0x1689   : > { %12592 = vmatprep.subr.mxu1 %v13487_v1  ;;  %12597 = vmatprep.subr.mxu0 %v13487_v1 }
0x168a   : > { %v8672_v16 = vpop.permute.xlu1 %8671  ;;  %12594 = vmatprep.mubr.msk.f32.mxu1 %vm13514_vm12, %v13487_v1  ;;  %v8581_v48 = vpop.permute.xlu0 %8580  ;;  %12599 = vmatprep.mubr.msk.f32.mxu0 %vm13514_vm12, %v13487_v1 }
0x168b   : > { %12598 = vmatpush3.msk.msra.mxu0 %vm6288_vm7, %v8672_v16  ;;  %12593 = vmatpush3.msk.msra.mxu1 %vm6288_vm7, %v8581_v48  ;;  %v11987_v16 = vld [vmem:[%s15317_s4 + $0x4] sm:$0xf] }
0x168c   : > { %12600 = vmatmul.mubr.msk.f32.vlgmr.msra.gmra.mrb[66].mxu0 %vm6284_vm8, %v11953_v61  ;;  %12595 = vmatmul.mubr.msk.f32.vlgmr.msra.gmra.mrb[46].mxu1 %vm6284_vm8, %v11949_v47  ;;  %v9471_v61 = vld [vmem:[%s15317_s4] sm:$0xf] }
0x168d   : > { %12602 = vmatprep.subr.mxu1 %v13487_v1  ;;  %12604 = vmatprep.mubr.msk.f32.mxu1 %vm13514_vm12, %v13487_v1 }
0x168e   : > { %12607 = vmatprep.subr.mxu0 %v13487_v1  ;;  %v8763_v18 = vpop.permute.xlu0 %8762  ;;  %12609 = vmatprep.mubr.msk.f32.mxu0 %vm13514_vm12, %v13487_v1 }
0x168f   : > { %12603 = vmatpush3.msk.msra.mxu1 %vm6288_vm7, %v8763_v18  ;;  %9466 = vperm.xlu0 %13277, %v9463_v4  }
0x1690   : > { %12605 = vmatmul.mubr.msk.f32.vlgmr.msra.gmra.mrb[48].mxu1 %vm6284_vm8, %v11957_v17  ;;  %12612 = vmatprep.subr.mxu1 %v13487_v1 }
0x1691   : > { %12614 = vmatprep.mubr.msk.f32.mxu1 %vm13514_vm12, %v13487_v1 }
0x1693   : > { %11537 = vperm.xlu0 %13277, %v11533_v51   ;;  %v12024_v51 = vld [vmem:[%s15321_s8 + $0x80] sm:$0xff] }
0x169b   : > { %v8844_v23 = vpop.permute.xlu1 %8843 }
0x1753   : > { %v8199_v19 = vpop.f32.mrb[60].mxu0  ;;  %v8121_v20 = vpop.f32.mrb[40].mxu1 }
0x1754   : > { %v12571_v25 = vpop.f32.mrb[61].mxu0  ;;  %v8200_v26 = vadd.f32 %v8199_v19, %v8121_v20  ;;  %v12566_v27 = vpop.f32.mrb[41].mxu1  ;;  %v11992_v19 = vld [vmem:[%s15318_s2 + $0x10] sm:$0xff] }
0x1755   : > { %v9623_v27 = vld [vmem:[%s15318_s2] sm:$0xff] }
0x1757   : > { %v8380_v30 = vpop.f32.mrb[62].mxu0  ;;  %v8289_v31 = vpop.f32.mrb[42].mxu1 }
0x1758   : > { %v12581_v33 = vpop.f32.mrb[63].mxu0  ;;  %v8293_v34 = vadd.f32 %v8289_v31, %v8200_v26  ;;  %v12576_v35 = vpop.f32.mrb[43].mxu1  ;;  %v11993_v26 = vld [vmem:[%s15318_s2 + $0x18] sm:$0xff] }
0x1759   : > { %v9467_v31 = vpop.permute.xlu0 %9466  ;;  %v11986_v35 = vld [vmem:[%s15319_s0 + $0x4] sm:$0xf] }
0x175a   : > { %v8384_v32 = vadd.f32 %v8380_v30, %v8293_v34  ;;  %v9624_v30 = vld [vmem:[%s15318_s2 + $0x8] sm:$0xff]  ;;  %v9470_v34 = vld [vmem:[%s15319_s0] sm:$0xf] }
0x175b   : > { %v8562_v38 = vpop.f32.mrb[64].mxu0  ;;  %v8471_v42 = vpop.f32.mrb[44].mxu1 }
0x175c   : > { %v12591_v43 = vpop.f32.mrb[65].mxu0  ;;  %v8475_v44 = vadd.f32 %v8471_v42, %v8384_v32  ;;  %v12586_v49 = vpop.f32.mrb[45].mxu1  ;;  %v12839_v32 = vpack.c.bf16 %v11993_v26, %v11992_v19  ;;  %v12034_v26 = vld [vmem:[%s15321_s8 + $0xd0] sm:$0xff] }
0x175e   : > { %v8566_v50 = vadd.f32 %v8562_v38, %v8475_v44  ;;  %v12842_v38 = vpack.c.bf16 %v9624_v30, %v9623_v27  ;;  %v12037_v27 = vld [vmem:[%s15321_s8 + $0xe8] sm:$0xff]  ;;  %v12039_v30 = vld [vmem:[%s15321_s8 + $0xf8] sm:$0xff] }
0x175f   : > { %v8744_v53 = vpop.f32.mrb[66].mxu0  ;;  %v8653_v54 = vpop.f32.mrb[46].mxu1 }
0x1760   : > { %v12601_v36 = vpop.f32.mrb[67].mxu0  ;;  %v8657_v55 = vadd.f32 %v8653_v54, %v8566_v50  ;;  %v12596_v56 = vpop.f32.mrb[47].mxu1  ;;  %v11997_v50 = vld [vmem:[%s15317_s4 + $0x8] sm:$0xf]  ;;  %v12002_v54 = vld [vmem:[%s15318_s2 + $0x20] sm:$0xff] }
0x1761   : > { %v12003_v36 = vld [vmem:[%s15318_s2 + $0x28] sm:$0xff] }
0x1762   : > { %v8748_v57 = vadd.f32 %v8744_v53, %v8657_v55  ;;  %v11996_v53 = vld [vmem:[%s15319_s0 + $0x8] sm:$0xf]  ;;  %v12845_v55 = vpack.c.bf16 %v12003_v36, %v12002_v54 }
0x1763   : > { %v8835_v6 = vpop.f32.mrb[48].mxu1 }
0x1764   : > { %v8839_v21 = vadd.f32 %v8835_v6, %v8748_v57  ;;  %v12606_v22 = vpop.f32.mrb[49].mxu1 }
0x1766   : > { %v8846_v58 = vadd.f32 %v8844_v23, %v8839_v21 }
0x1768   : > { %v8847_v24 = vmax.f32 %v8846_v58, 0.0  ;;  %v12006_v58 = vld [vmem:[%s15317_s4 + $0xc] sm:$0xf] }
0x176a   : > { %12608 = vmatpush3.msk.msra.mxu0 %vm6288_vm7, %v8847_v24  ;;  %12613 = vmatpush3.msk.msra.mxu1 %vm6288_vm7, %v8847_v24 }
0x176b   : > { %12610 = vmatmul.mubr.msk.f32.vlgmr.msra.gmra.mrb[68].mxu0 %vm6284_vm8, %v8848_v59  ;;  %12615 = vmatmul.mubr.msk.f32.vlgmr.msra.gmra.mrb[50].mxu1 %vm6284_vm8, %v11962_v60  ;;  %v12012_v59 = vld [vmem:[%s15318_s2 + $0x38] sm:$0xff] }
0x176c   : > { %12617 = vmatprep.subr.mxu0 %v13487_v1  ;;  %12622 = vmatprep.subr.mxu1 %v13487_v1 }
0x176d   : > { %12618 = vmatpush3.msk.msra.mxu0 %vm4514_vm14, %v11965_v5  ;;  %12619 = vmatprep.mubr.msk.f32.mxu0 %vm13514_vm12, %v13487_v1  ;;  %v12019_v5 = vld [vmem:[%s15320_s22 + $0x8] sm:$0xff] }
0x176e   : > { %12624 = vmatprep.mubr.msk.f32.mxu1 %vm13514_vm12, %v13487_v1  ;;  %12627 = vmatprep.subr.mxu0 %v13487_v1 }
0x176f   : > { %12623 = vmatpush3.msk.msra.mxu1 %vm4514_vm14, %v8925_v37 }
0x1770   : > { %12632 = vmatprep.subr.mxu1 %v13487_v1 }
0x183e   : > { %v8921_v40 = vpop.f32.mrb[68].mxu0  ;;  %v8997_v41 = vpop.f32.mrb[50].mxu1 }
0x183f   : > { %v12616_v46 = vpop.f32.mrb[51].mxu1  ;;  %12620 = vmatmul.mubr.msk.f32.vlgmr.msra.gmra.mrb[70].mxu0 %vm4510_vm15, %v8997_v41  ;;  %12625 = vmatmul.mubr.msk.f32.vlgmr.msra.gmra.mrb[52].mxu1 %vm4510_vm15, %v8921_v40  ;;  %v12611_v63 = vpop.f32.mrb[69].mxu0 }
0x1840   : > { %12628 = vmatpush3.msk.msra.mxu0 %vm6288_vm7, %v8847_v24  ;;  %12629 = vmatprep.mubr.msk.f32.mxu0 %vm13514_vm12, %v13487_v1 }
0x1841   : > { %12637 = vmatprep.subr.mxu0 %v13487_v1  ;;  %12634 = vmatprep.mubr.msk.f32.mxu1 %vm13514_vm12, %v13487_v1 }
0x1842   : > { %12633 = vmatpush3.msk.msra.mxu1 %vm4514_vm14, %v11973_v3  ;;  %v12027_v3 = vld [vmem:[%s15321_s8 + $0x98] sm:$0xff] }
0x1843   : > { %12630 = vmatmul.mubr.msk.f32.vlgmr.msra.gmra.mrb[72].mxu0 %vm6284_vm8, %v11970_v0  ;;  %12642 = vmatprep.subr.mxu1 %v13487_v1  ;;  %v10386_v0 = vld [vmem:[%s15320_s22] sm:$0xff] }
0x1844   : > { %12638 = vmatpush3.msk.msra.mxu0 %vm6288_vm7, %v8847_v24  ;;  %12639 = vmatprep.mubr.msk.f32.mxu0 %vm13514_vm12, %v13487_v1  ;;  %v12005_v24 = vld [vmem:[%s15319_s0 + $0xc] sm:$0xf] }
0x1845   : > { %12647 = vmatprep.subr.mxu0 %v13487_v1 }
0x1847   : > { %12640 = vmatmul.mubr.msk.f32.vlgmr.msra.gmra.mrb[74].mxu0 %vm6284_vm8, %v11976_v2  ;;  %v12025_v2 = vld [vmem:[%s15321_s8 + $0x88] sm:$0xff] }
0x1848   : > { %12648 = vmatpush3.msk.msra.mxu0 %vm6288_vm7, %v14694_v7  ;;  %12649 = vmatprep.mubr.msk.f32.mxu0 %vm13514_vm12, %v13487_v1 }
0x1849   : > { %12652 = vmatprep.subr.mxu0 %v13487_v1 }
0x184b   : > { %12650 = vmatmul.mubr.msk.f32.vlgmr.msra.gmra.mrb[76].mxu0 %vm6284_vm8, %v9471_v61  ;;  %v10385_v61 = vld [vmem:[%s15322_s5] sm:$0xff] }
0x184c   : > { %12654 = vmatprep.mubr.msk.f32.mxu0 %vm13514_vm12, %v13487_v1 }
0x1912   : > { %v9075_v39 = vpop.f32.mrb[70].mxu0  ;;  %v9151_v52 = vpop.f32.mrb[52].mxu1 }
0x1913   : > { %v9152_v45 = vadd.f32 %v9151_v52, %v9075_v39  ;;  %v12621_v8 = vpop.f32.mrb[71].mxu0  ;;  %v12626_v9 = vpop.f32.mrb[53].mxu1  ;;  %v12026_v39 = vld [vmem:[%s15321_s8 + $0x90] sm:$0xff] }
0x1914   : > { %v12029_v8 = vld [vmem:[%s15321_s8 + $0xa8] sm:$0xff]  ;;  %v12031_v9 = vld [vmem:[%s15321_s8 + $0xb8] sm:$0xff] }
0x1916   : > { %v9226_v11 = vpop.f32.mrb[72].mxu0 }
0x1917   : > { %v12631_v12 = vpop.f32.mrb[73].mxu0  ;;  %12635 = vmatmul.mubr.msk.f32.vlgmr.msra.gmra.mrb[54].mxu1 %vm4510_vm15, %v9226_v11  ;;  %v12850_v11 = vpack.c.bf16 %v12027_v3, %v12025_v2 }
0x1918   : > { %12643 = vmatpush3.msk.msra.mxu1 %vm4514_vm14, %v11979_v10  ;;  %12644 = vmatprep.mubr.msk.f32.mxu1 %vm13514_vm12, %v13487_v1  ;;  %v10382_v10 = vpop.permute.xlu1 %10381 }
0x1919   : > { %12657 = vmatprep.subr.mxu1 %v13487_v1 }
0x191a   : > { %v9380_v13 = vpop.f32.mrb[74].mxu0 }
0x191b   : > { %v12641_v14 = vpop.f32.mrb[75].mxu0  ;;  %12645 = vmatmul.mubr.msk.f32.vlgmr.msra.gmra.mrb[56].mxu1 %vm4510_vm15, %v9380_v13  ;;  %v12018_v13 = vld [vmem:[%s15322_s5 + $0x8] sm:$0xff] }
0x191c   : > { %12658 = vmatpush3.msk.msra.mxu1 %vm6288_vm7, %v14694_v7  ;;  %12659 = vmatprep.mubr.msk.f32.mxu1 %vm13514_vm12, %v13487_v1  ;;  %v12852_v14 = vpack.c.bf16 %v12026_v39, %v12024_v51  ;;  %v12043_v39 = vld [vmem:[%s15320_s22 + $0x10] sm:$0xff] }
0x191d   : > { %12662 = vmatprep.subr.mxu1 %v13487_v1 }
0x191f   : > { %12660 = vmatmul.mubr.msk.f32.vlgmr.msra.gmra.mrb[58].mxu1 %vm6284_vm8, %v11987_v16  ;;  %v12854_v16 = vpack.c.bf16 %v12031_v9, %v12029_v8  ;;  %v12066_v8 = vld [vmem:[%s15320_s22 + $0x18] sm:$0xff]  ;;  %v12053_v9 = vld [vmem:[%s15321_s8 + $0x128] sm:$0xff] }
0x1920   : > { %12664 = vmatprep.mubr.msk.f32.mxu1 %vm13514_vm12, %v13487_v1 }
0x19ea   : > { %v9304_v47 = vpop.f32.mrb[54].mxu1 }
0x19eb   : > { %v9308_v48 = vadd.f32 %v9304_v47, %v9152_v45  ;;  %v12636_v17 = vpop.f32.mrb[55].mxu1  ;;  %v12028_v47 = vld [vmem:[%s15321_s8 + $0xa0] sm:$0xff] }
0x19ec   : > { %v12033_v17 = vld [vmem:[%s15321_s8 + $0xc8] sm:$0xff] }
0x19ee   : > { %v9458_v18 = vpop.f32.mrb[56].mxu1 }
0x19ef   : > { %v9462_v20 = vadd.f32 %v9458_v18, %v9308_v48  ;;  %v12646_v25 = vpop.f32.mrb[57].mxu1  ;;  %v12030_v48 = vld [vmem:[%s15321_s8 + $0xb0] sm:$0xff]  ;;  %v12035_v18 = vld [vmem:[%s15321_s8 + $0xd8] sm:$0xff] }
0x19f0   : > { %v12856_v19 = vpack.c.bf16 %v12030_v48, %v12028_v47  ;;  %v12032_v25 = vld [vmem:[%s15321_s8 + $0xc0] sm:$0xff]  ;;  %v12061_v48 = vld [vmem:[%s15321_s8 + $0x168] sm:$0xff] }
0x19f1   : > { %v9469_v33 = vadd.f32 %v9467_v31, %v9462_v20  ;;  %v12858_v20 = vpack.c.bf16 %v12035_v18, %v12033_v17  ;;  %v12860_v31 = vpack.c.bf16 %v12034_v26, %v12032_v25  ;;  %v12063_v17 = vld [vmem:[%s15321_s8 + $0x178] sm:$0xff]  ;;  %v12062_v25 = vld [vmem:[%s15321_s8 + $0x170] sm:$0xff] }
0x19f3   : > { %12653 = vmatpush3.msk.msra.mxu0 %vm6288_vm7, %v9469_v33  ;;  %12663 = vmatpush3.msk.msra.mxu1 %vm6288_vm7, %v9469_v33 }
0x19f4   : > { %12655 = vmatmul.mubr.msk.f32.vlgmr.msra.gmra.mrb[76].mxu0 %vm6284_vm8, %v9470_v34  ;;  %12665 = vmatmul.mubr.msk.f32.vlgmr.msra.gmra.mrb[58].mxu1 %vm6284_vm8, %v11986_v35  ;;  %v12036_v34 = vld [vmem:[%s15321_s8 + $0xe0] sm:$0xff]  ;;  %v12038_v35 = vld [vmem:[%s15321_s8 + $0xf0] sm:$0xff] }
0x19f5   : > { %12838 = vmatprep.subr.bf16.mxu0 %v13521_v62  ;;  %12841 = vmatprep.subr.bf16.mxu1 %v13521_v62 }
0x19f6   : > { %12840 = vmatpush3.bf16.msra.mxu0 %v12839_v32  ;;  %12843 = vmatpush3.bf16.msra.mxu1 %v12842_v38  ;;  %v12864_v32 = vpack.c.bf16 %v12038_v35, %v12036_v34  ;;  %v10539_v38 = vld [vmem:[%s15321_s8 + $0x8] sm:$0xff]  ;;  %v12071_v35 = vld [vmem:[%s15321_s8 + $0x180] sm:$0xff] }
0x19f7   : > { %12671 = vmatprep.mubr.msk.f32.mxu0 %vm13514_vm12, %v13487_v1  ;;  %12678 = vmatprep.mubr.msk.f32.mxu1 %vm13514_vm12, %v13487_v1 }
0x19f8   : > { %12681 = vmatprep.subr.mxu0 %v13487_v1  ;;  %12844 = vmatprep.subr.bf16.mxu1 %v13521_v62 }
0x1ac7   : > { %v9619_v42 = vpop.f32.mrb[76].mxu0  ;;  %v9771_v43 = vpop.f32.mrb[58].mxu1 }
0x1ac8   : > { %v12666_v44 = vpop.f32.mrb[59].mxu1  ;;  %12672 = vmatmul.mubr.msk.f32.vlgmr.msra.gmra.mrb[78].mxu0 %vm1313_vm2, %v9771_v43  ;;  %12679 = vmatmul.mubr.msk.f32.vlgmr.msra.gmra.mrb[60].mxu1 %vm1313_vm2, %v9619_v42  ;;  %v12656_v49 = vpop.f32.mrb[77].mxu0  ;;  %v10541_v42 = vld [vmem:[%s15321_s8 + $0x18] sm:$0xff]  ;;  %v10538_v43 = vld [vmem:[%s15321_s8] sm:$0xff] }
0x1ac9   : > { %12682 = vmatpush3.msk.msra.mxu0 %vm6288_vm7, %v14694_v7  ;;  %12683 = vmatprep.mubr.msk.f32.mxu0 %vm13514_vm12, %v13487_v1  ;;  %v12866_v44 = vpack.c.bf16 %v10541_v42, %v10539_v38  ;;  %v10540_v49 = vld [vmem:[%s15321_s8 + $0x10] sm:$0xff]  ;;  %v12076_v38 = vld [vmem:[%s15321_s8 + $0x1a8] sm:$0xff]  ;;  %v12078_v42 = vld [vmem:[%s15321_s8 + $0x1b8] sm:$0xff] }
0x1aca   : > { %12686 = vmatprep.subr.mxu0 %v13487_v1  ;;  %12695 = vmatprep.mubr.msk.f32.mxu1 %vm13514_vm12, %v13487_v1  ;;  %v12868_v54 = vpack.c.bf16 %v10540_v49, %v10538_v43  ;;  %v12075_v49 = vld [vmem:[%s15321_s8 + $0x1a0] sm:$0xff] }
0x1acb   : > { %12846 = vmatpush3.bf16.msra.mxu1 %v12845_v55  ;;  %v10542_v55 = vld [vmem:[%s15321_s8 + $0x20] sm:$0xff] }
0x1acc   : > { %12684 = vmatmul.mubr.msk.f32.vlgmr.msra.gmra.mrb[80].mxu0 %vm6284_vm8, %v11997_v50  ;;  %12698 = vmatprep.subr.mxu1 %v13487_v1  ;;  %v10543_v50 = vld [vmem:[%s15321_s8 + $0x28] sm:$0xff] }
0x1acd   : > { %12687 = vmatpush3.msk.msra.mxu0 %vm6288_vm7, %v9469_v33  ;;  %12688 = vmatprep.mubr.msk.f32.mxu0 %vm13514_vm12, %v13487_v1 }
0x1ace   : > { %12847 = vmatprep.subr.bf16.mxu0 %v13521_v62 }
0x1ad4   : > { %12689 = vmatmul.mubr.msk.f32.vlgmr.msra.gmra.mrb[80].mxu0 %vm6284_vm8, %v11996_v53  ;;  %v10545_v53 = vld [vmem:[%s15321_s8 + $0x38] sm:$0xff] }
0x1ad5   : > { %12712 = vmatprep.mubr.msk.f32.mxu0 %vm13514_vm12, %v13487_v1  ;;  %v12870_v36 = vpack.c.bf16 %v10545_v53, %v10543_v50  ;;  %v12077_v50 = vld [vmem:[%s15321_s8 + $0x1b0] sm:$0xff] }
0x1b9b   : > { %v9847_v56 = vpop.f32.mrb[78].mxu0  ;;  %v9920_v57 = vpop.f32.mrb[60].mxu1 }
0x1b9c   : > { %v9921_v6 = vadd.f32 %v9920_v57, %v9847_v56  ;;  %v12673_v21 = vpop.f32.mrb[79].mxu0  ;;  %v12680_v22 = vpop.f32.mrb[61].mxu1  ;;  %v10544_v56 = vld [vmem:[%s15321_s8 + $0x30] sm:$0xff]  ;;  %v10547_v57 = vld [vmem:[%s15321_s8 + $0x48] sm:$0xff] }
0x1b9d   : > { %v12872_v21 = vpack.c.bf16 %v10544_v56, %v10542_v55  ;;  %v12904_v56 = vpack.c.bf16 %v12077_v50, %v12075_v49 }
0x1ba7   : > { %v10070_v62 = vpop.f32.mrb[80].mxu0 }
0x1ba8   : > { %v12690_v23 = vpop.f32.mrb[81].mxu0  ;;  %12696 = vmatmul.mubr.msk.f32.vlgmr.msra.gmra.mrb[62].mxu1 %vm1313_vm2, %v10070_v62  ;;  %v10546_v62 = vld [vmem:[%s15321_s8 + $0x40] sm:$0xff] }
0x1ba9   : > { %12699 = vmatpush3.msk.msra.mxu1 %vm6288_vm7, %v14694_v7  ;;  %12700 = vmatprep.mubr.msk.f32.mxu1 %vm13514_vm12, %v13487_v1  ;;  %v12011_v7 = vld [vmem:[%s15318_s2 + $0x30] sm:$0xff] }
0x1baa   : > { %12703 = vmatprep.subr.mxu1 %v13487_v1  ;;  %v12848_v60 = vpack.c.bf16 %v12012_v59, %v12011_v7  ;;  %v10548_v23 = vld [vmem:[%s15321_s8 + $0x50] sm:$0xff] }
0x1bab   : > { %v12876_v7 = vpack.c.bf16 %v10548_v23, %v10546_v62  ;;  %v12086_v62 = vld [vmem:[%s15321_s8 + $0x1f8] sm:$0xff] }
0x1bac   : > { %12701 = vmatmul.mubr.msk.f32.vlgmr.msra.gmra.mrb[64].mxu1 %vm6284_vm8, %v12006_v58  ;;  %12849 = vmatpush3.bf16.msra.mxu0 %v12848_v60  ;;  %v10551_v58 = vld [vmem:[%s15321_s8 + $0x68] sm:$0xff]  ;;  %v10550_v60 = vld [vmem:[%s15321_s8 + $0x60] sm:$0xff] }
0x1bad   : > { %12704 = vmatpush3.msk.msra.mxu1 %vm6288_vm7, %v9469_v33  ;;  %12705 = vmatprep.mubr.msk.f32.mxu1 %vm13514_vm12, %v13487_v1  ;;  %v12862_v33 = vpack.c.bf16 %v12039_v30, %v12037_v27  ;;  %v12072_v27 = vld [vmem:[%s15321_s8 + $0x188] sm:$0xff]  ;;  %v12074_v30 = vld [vmem:[%s15321_s8 + $0x198] sm:$0xff] }
0x1bae   : > { %12725 = vmatprep.subr.mxu1 %v13487_v1  ;;  %12715 = vmatprep.subr.mxu0 %v13487_v1 }
0x1bb4   : > { %12706 = vmatmul.mubr.msk.f32.vlgmr.msra.gmra.mrb[64].mxu1 %vm6284_vm8, %v12005_v24  ;;  %v10553_v24 = vld [vmem:[%s15321_s8 + $0x78] sm:$0xff] }
0x1bb5   : > { %12726 = vmatpush3.msk.msra.mxu1 %vm4514_vm14, %v14496_v15  ;;  %12727 = vmatprep.mubr.msk.f32.mxu1 %vm13514_vm12, %v13487_v1  ;;  %v12878_v59 = vpack.c.bf16 %v10553_v24, %v10551_v58  ;;  %v12083_v24 = vld [vmem:[%s15321_s8 + $0x1e0] sm:$0xff] }
0x1bb6   : > { %12730 = vmatprep.subr.mxu1 %v13487_v1 }
0x1bb8   : > { %12728 = vmatmul.mubr.msk.f32.vlgmr.msra.gmra.mrb[66].mxu1 %vm4510_vm15, %v12019_v5  ;;  %v10552_v5 = vld [vmem:[%s15321_s8 + $0x70] sm:$0xff] }
0x1bb9   : > { %12732 = vmatprep.mubr.msk.f32.mxu1 %vm13514_vm12, %v13487_v1 }
0x1c7b   : > { %v10146_v37 = vpop.f32.mrb[62].mxu1 }
0x1c7c   : > { %v10150_v40 = vadd.f32 %v10146_v37, %v9921_v6  ;;  %v12697_v41 = vpop.f32.mrb[63].mxu1  ;;  %v10549_v6 = vld [vmem:[%s15321_s8 + $0x58] sm:$0xff]  ;;  %v12049_v37 = vld [vmem:[%s15321_s8 + $0x108] sm:$0xff] }
0x1c7d   : > { %v12874_v22 = vpack.c.bf16 %v10549_v6, %v10547_v57  ;;  %v12880_v41 = vpack.c.bf16 %v10552_v5, %v10550_v60  ;;  %v12079_v6 = vld [vmem:[%s15321_s8 + $0x1c0] sm:$0xff] }
0x1c87   : > { %v10297_v46 = vpop.f32.mrb[64].mxu1 }
0x1c88   : > { %v12707_v63 = vpop.f32.mrb[65].mxu1  ;;  %12713 = vmatmul.mubr.msk.f32.vlgmr.msra.gmra.mrb[82].mxu0 %vm1313_vm2, %v10297_v46 }
0x1c89   : > { %12716 = vmatpush3.msk.msra.mxu0 %vm4514_vm14, %v14496_v15  ;;  %12717 = vmatprep.mubr.msk.f32.mxu0 %vm13514_vm12, %v13487_v1  ;;  %v12048_v63 = vld [vmem:[%s15321_s8 + $0x100] sm:$0xff] }
0x1c8a   : > { %12720 = vmatprep.subr.mxu0 %v13487_v1 }
0x1c8c   : > { %12718 = vmatmul.mubr.msk.f32.vlgmr.msra.gmra.mrb[84].mxu0 %vm4510_vm15, %v10386_v0  ;;  %v12050_v0 = vld [vmem:[%s15321_s8 + $0x110] sm:$0xff] }
0x1c8d   : > { %12722 = vmatprep.mubr.msk.f32.mxu0 %vm13514_vm12, %v13487_v1  ;;  %v12884_v3 = vpack.c.bf16 %v12050_v0, %v12048_v63 }
0x1d5b   : > { %v10373_v4 = vpop.f32.mrb[82].mxu0 }
0x1d5c   : > { %v10377_v52 = vadd.f32 %v10373_v4, %v10150_v40  ;;  %v12714_v45 = vpop.f32.mrb[83].mxu0  ;;  %v12051_v40 = vld [vmem:[%s15321_s8 + $0x118] sm:$0xff] }
0x1d5d   : > { %v12882_v46 = vpack.c.bf16 %v12051_v40, %v12049_v37  ;;  %v12042_v45 = vld [vmem:[%s15322_s5 + $0x10] sm:$0xff]  ;;  %v11365_v37 = vld [vmem:[%s13726_s27] sm:$0xff]  ;;  %v11366_v40 = vld [vmem:[%s13726_s27 + $0x8] sm:$0xff] }
0x1d5e   : > { %v15026_v12 = vadd.f32 %v10382_v10, %v10377_v52  ;;  %v12055_v10 = vld [vmem:[%s15321_s8 + $0x138] sm:$0xff] }
0x1d60   : > { %12721 = vmatpush3.msk.msra.mxu0 %vm4514_vm14, %v15026_v12  ;;  %12731 = vmatpush3.msk.msra.mxu1 %vm4514_vm14, %v15026_v12 }
0x1d61   : > { %12733 = vmatmul.mubr.msk.f32.vlgmr.msra.gmra.mrb[66].mxu1 %vm4510_vm15, %v12018_v13  ;;  %12851 = vmatprep.subr.bf16.mxu1 %v12850_v11  ;;  %v12886_v11 = vpack.c.bf16 %v12055_v10, %v12053_v9  ;;  %v12054_v13 = vld [vmem:[%s15321_s8 + $0x130] sm:$0xff] }
0x1d62   : > { %12853 = vmatpush1.bf16.msra.mxu1 %v12852_v14  ;;  %12723 = vmatmul.mubr.msk.f32.vlgmr.msra.gmra.mrb[84].mxu0 %vm4510_vm15, %v10385_v61  ;;  %v12059_v61 = vld [vmem:[%s15321_s8 + $0x158] sm:$0xff] }
0x1d63   : > { %12855 = vmatprep.subr.bf16.mxu1 %v12854_v16  ;;  %10788 = vmatprep.mubr.f32.mxu1 %v13487_v1  ;;  %v12056_v16 = vld [vmem:[%s15321_s8 + $0x140] sm:$0xff] }
0x1d64   : > { %10862 = vmatprep.mubr.f32.mxu0 %v13487_v1  ;;  %12867 = vmatprep.subr.bf16.mxu0 %v12866_v44  ;;  %v12902_v44 = vpack.c.bf16 %v12078_v42, %v12076_v38 }
0x1d65   : > { %12869 = vmatpush1.bf16.msra.mxu0 %v12868_v54  ;;  %v12080_v54 = vld [vmem:[%s15321_s8 + $0x1c8] sm:$0xff] }
0x1d66   : > { %12857 = vmatpush1.bf16.msra.mxu1 %v12856_v19  ;;  %12871 = vmatprep.subr.bf16.mxu0 %v12870_v36  ;;  %v12894_v19 = vpack.c.bf16 %v12063_v17, %v12061_v48  ;;  %v12082_v36 = vld [vmem:[%s15321_s8 + $0x1d8] sm:$0xff] }
0x1d67   : > { %12859 = vmatprep.subr.bf16.mxu1 %v12858_v20  ;;  %v12060_v20 = vld [vmem:[%s15321_s8 + $0x160] sm:$0xff]  ;;  %v12906_v57 = vpack.c.bf16 %v12082_v36, %v12080_v54 }
0x1d68   : > { %v12896_v26 = vpack.c.bf16 %v12062_v25, %v12060_v20 }
0x1d69   : > { %12873 = vmatpush1.bf16.msra.mxu0 %v12872_v21  ;;  %v12081_v21 = vld [vmem:[%s15321_s8 + $0x1d0] sm:$0xff] }
0x1d6a   : > { %12861 = vmatpush1.bf16.msra.mxu1 %v12860_v31  ;;  %12875 = vmatprep.subr.bf16.mxu0 %v12874_v22  ;;  %v12898_v31 = vpack.c.bf16 %v12074_v30, %v12072_v27  ;;  %v12084_v22 = vld [vmem:[%s15321_s8 + $0x1e8] sm:$0xff]  ;;  %v12908_v23 = vpack.c.bf16 %v12081_v21, %v12079_v6 }
0x1d6b   : > { %12863 = vmatprep.subr.bf16.mxu1 %v12862_v33  ;;  %v12910_v58 = vpack.c.bf16 %v12086_v62, %v12084_v22 }
0x1d6d   : > { %12877 = vmatpush1.bf16.msra.mxu0 %v12876_v7  ;;  %v12085_v7 = vld [vmem:[%s15321_s8 + $0x1f0] sm:$0xff] }
0x1d6e   : > { %12865 = vmatpush1.bf16.msra.mxu1 %v12864_v32  ;;  %12879 = vmatprep.subr.bf16.mxu0 %v12878_v59  ;;  %v12073_v32 = vld [vmem:[%s15321_s8 + $0x190] sm:$0xff]  ;;  %v12912_v59 = vpack.c.bf16 %v12085_v7, %v12083_v24 }
0x1d6f   : > { %12735 = vmatprep.subr.mxu1 %v13487_v1  ;;  %v12900_v43 = vpack.c.bf16 %v12073_v32, %v12071_v35 }
0x1d71   : > { %12881 = vmatpush1.bf16.msra.mxu0 %v12880_v41 }
0x1d72   : > { %12883 = vmatprep.subr.bf16.mxu0 %v12882_v46 }
0x1e34   : > { %v10700_v2 = vpop.f32.mrb[66].mxu1 }
0x1e35   : > { %v12734_v4 = vpop.f32.mrb[67].mxu1  ;;  %12040 = vmatmul.mubr.msk.f32.vlgmr.msra.gmra.mrb[68].mxu1 %vm5338_vm4, %v10700_v2  ;;  %v10534_v51 = vpop.f32.mrb[84].mxu0 }
0x1e36   : > { %12736 = vmatpush3.msk.msra.mxu1 %vm4514_vm14, %v14496_v15  ;;  %12737 = vmatprep.mubr.msk.f32.mxu1 %vm13514_vm12, %v13487_v1  ;;  %v12724_v52 = vpop.f32.mrb[85].mxu0  ;;  %v11359_v2 = vpop.permute.xlu1 %11358 }
0x1e37   : > { %12740 = vmatprep.subr.mxu1 %v13487_v1  ;;  %12041 = vmatmul.mubr.msk.f32.vlgmr.msra.gmra.mrb[86].mxu0 %vm5338_vm4, %v10534_v51  ;;  %v11363_v51 = vld [vmem:[%s13721_s24] sm:$0xff]  ;;  %v11538_v52 = vpop.permute.xlu0 %11537 }
0x1e38   : > { %12885 = vmatpush1.bf16.msra.mxu0 %v12884_v3  ;;  %11103 = vmatprep.mubr.f32.mxu0 %v13487_v1 }
0x1e39   : > { %12738 = vmatmul.mubr.msk.f32.vlgmr.msra.gmra.mrb[70].mxu1 %vm4510_vm15, %v12043_v39  ;;  %12887 = vmatprep.subr.bf16.mxu0 %v12886_v11  ;;  %v11364_v39 = vld [vmem:[%s13721_s24 + $0x8] sm:$0xff] }
0x1e3a   : > { %12741 = vmatpush3.msk.msra.mxu1 %vm4514_vm14, %v15026_v12  ;;  %12742 = vmatprep.mubr.msk.f32.mxu1 %vm13514_vm12, %v13487_v1  ;;  %v11543_v10 = vpop.permute.xlu1 %11542 }
0x1e3b   : > { %12745 = vmatprep.subr.mxu1 %v13487_v1 }
0x1e41   : > { %12743 = vmatmul.mubr.msk.f32.vlgmr.msra.gmra.mrb[70].mxu1 %vm4510_vm15, %v12042_v45 }
0x1e42   : > { %12746 = vmatpush3.msk.msra.mxu1 %vm4514_vm14, %v14496_v15  ;;  %12747 = vmatprep.mubr.msk.f32.mxu1 %vm13514_vm12, %v13487_v1  ;;  %v12065_v15 = vld [vmem:[%s15322_s5 + $0x18] sm:$0xff] }
0x1e43   : > { %12750 = vmatprep.subr.mxu1 %v13487_v1 }
0x1e45   : > { %12748 = vmatmul.mubr.msk.f32.vlgmr.msra.gmra.mrb[72].mxu1 %vm4510_vm15, %v12066_v8 }
0x1e46   : > { %12751 = vmatpush3.msk.msra.mxu1 %vm4514_vm14, %v15026_v12  ;;  %12752 = vmatprep.mubr.msk.f32.mxu1 %vm13514_vm12, %v13487_v1  ;;  %v12052_v12 = vld [vmem:[%s15321_s8 + $0x120] sm:$0xff] }
0x1e47   : > { %11373 = vmatprep.subr.mxu1 %v14263_v29  ;;  %v12888_v14 = vpack.c.bf16 %v12054_v13, %v12052_v12  ;;  %v12057_v29 = vld [vmem:[%s15321_s8 + $0x148] sm:$0xff] }
0x1e48   : > { %v12890_v47 = vpack.c.bf16 %v12059_v61, %v12057_v29 }
0x1e49   : > { %12889 = vmatpush1.bf16.msra.mxu0 %v12888_v14 }
0x1e4a   : > { %12891 = vmatprep.subr.bf16.mxu0 %v12890_v47 }
0x1e4d   : > { %12753 = vmatmul.mubr.msk.f32.vlgmr.msra.gmra.mrb[72].mxu1 %vm4510_vm15, %v12065_v15 }
0x1e4e   : > { %11374 = vmatpush1.msra.mxu1 %v14261_v28  ;;  %11437 = vmatprep.mubr.f32.mxu1 %v13487_v1  ;;  %v12058_v28 = vld [vmem:[%s15321_s8 + $0x150] sm:$0xff] }
0x1e4f   : > { %v12892_v18 = vpack.c.bf16 %v12058_v28, %v12056_v16 }
0x1e51   : > { %12893 = vmatpush1.bf16.msra.mxu0 %v12892_v18  ;;  %12088 = vmatmul.mubr.msk.f32.vlgmr.msra.gmra.mrb[74].mxu1 %vm2528_vm3, %v11365_v37 }
0x1e52   : > { %12895 = vmatprep.subr.bf16.mxu0 %v12894_v19  ;;  %11443 = vmatprep.mubr.f32.mxu1 %v13487_v1 }
0x1e55   : > { %12897 = vmatpush1.bf16.msra.mxu0 %v12896_v26  ;;  %12089 = vmatmul.mubr.msk.f32.gmra.mrb[76].mxu1 %vm2528_vm3, %v11366_v40 }
0x1e56   : > { %12899 = vmatprep.subr.bf16.mxu0 %v12898_v31  ;;  %11520 = vmatprep.mubr.f32.mxu1 %v13487_v1 }
0x1f08   : > { %v10790_v33 = vpop.f32.mrb[68].mxu1 }
0x1f09   : > { %v10792_v34 = vpop.f32.mrb[69].mxu1 }
0x1f14   : > { %v11015_v53 = vpop.f32.mrb[70].mxu1 }
0x1f15   : > { %v12744_v55 = vpop.f32.mrb[71].mxu1  ;;  %12064 = vmatmul.mubr.msk.f32.vlgmr.msra.gmra.mrb[86].mxu0 %vm5338_vm4, %v11015_v53 }
0x1f16   : > { %12901 = vmatpush1.bf16.msra.mxu0 %v12900_v43  ;;  %11346 = vmatprep.mubr.f32.mxu0 %v13487_v1 }
0x1f17   : > { %12903 = vmatprep.subr.bf16.mxu0 %v12902_v44 }
0x1f1a   : > { %12905 = vmatpush1.bf16.msra.mxu0 %v12904_v56 }
0x1f1b   : > { %12907 = vmatprep.subr.bf16.mxu0 %v12906_v57 }
0x1f1e   : > { %12909 = vmatpush1.bf16.msra.mxu0 %v12908_v23 }
0x1f1f   : > { %12911 = vmatprep.subr.bf16.mxu0 %v12910_v58 }
0x1f20   : > { %v11258_v60 = vpop.f32.mrb[72].mxu1 }
0x1f21   : > { %v12754_v5 = vpop.f32.mrb[73].mxu1 }
0x1f22   : > { %12913 = vmatpush1.bf16.msra.mxu0 %v12912_v59 }
0x1f25   : > { %12087 = vmatmul.mubr.msk.f32.vlgmr.msra.gmra.mrb[86].mxu0 %vm5338_vm4, %v11258_v60 }
0x1ff8   : > { %v11348_v41 = vpop.f32.mrb[86].mxu0 }
0x1ff9   : > { %v12914_v46 = vadd.f32 %v11348_v41, %v10790_v33  ;;  %v11350_v63 = vpop.f32.mrb[87].mxu0 }
0x1ffa   : > { %v12915_v0 = vadd.f32 %v11350_v63, %v10792_v34 }
0x1ffb   : > { %v11361_v4 = vadd.f32 %v12914_v46, %v11359_v2 }
0x1ffc   : > { %v11362_v3 = vadd.f32 %v12915_v0, %v11359_v2 }
0x1ffe   : > { %11456 = vmatprep.subr.mxu1 %v11362_v3 }
0x1fff   : > { %11457 = vmatpush1.msra.mxu1 %v11361_v4 }
0x2000   : > { %12090 = vmatmul.mubr.msk.f32.vlgmr.msra.gmra.mrb[74].mxu1 %vm2528_vm3, %v11363_v51 }
0x2001   : > { %11526 = vmatprep.mubr.f32.mxu1 %v13487_v1 }
0x2004   : > { %12091 = vmatmul.mubr.msk.f32.gmra.mrb[76].mxu1 %vm2528_vm3, %v11364_v39 }
0x20d3   : > { %v11522_v45 = vpop.f32.mrb[74].mxu1 }
0x20d4   : > { %v11545_v8 = vadd.f32 %v11538_v52, %v11522_v45  ;;  %v11524_v15 = vpop.f32.mrb[75].mxu1 }
0x20d5   : > { %v11546_v9 = vadd.f32 %v11538_v52, %v11524_v15 }
0x20d6   : > { %11549 = vst [vmem:[%s1227_s28] sm:$0xff] %v11545_v8 }
0x20d7   : > { %11550 = vst [vmem:[%s1227_s28 + $0x8] sm:$0xff] %v11546_v9  ;;  %v11528_v11 = vpop.f32.mrb[76].mxu1 }
0x20d8   : > { %v11547_v12 = vadd.f32 %v11543_v10, %v11528_v11  ;;  %v11530_v13 = vpop.f32.mrb[77].mxu1 }
0x20d9   : > { %v11548_v14 = vadd.f32 %v11543_v10, %v11530_v13 }
0x20da   : > { %11551 = vst [vmem:[%s1227_s28 + $0x10] sm:$0xff] %v11547_v12 }
0x20db   : > { %11552 = vst [vmem:[%s1227_s28 + $0x18] sm:$0xff] %v11548_v14 }
0x20dc PF: > { %s90_s15 = sadd.s32 1, %s13436_s15  }
0x20dd   : > { %p87_p12 = scmp.ge.s32.totalorder %s90_s15, 4  }
0x20df   :  { %89 = sbr.rel (!%p87_p12) target bundleno = 71 (0x47), region = 381 }
0x20e6   :  { %11574 = vsyncpa [#allocation4], 1 }
0x20e7   :  { %11576 = vsyncpa [#allocation4 + $0x1], 1 }
0x20e8   :  { %11577 = vsyncpa [#allocation6], 1 }
0x20e9   :  { %11578 = vsyncpa [#allocation9], 1 }

</bundles_post_ra>
